<compile_context>
chip_gen: v5e
topology: v5e:2x2
jax: 0.10.0
libtpu: 0.0.40
codegen_flags: <defaults>
</compile_context>

<pallas_src>
import functools

import jax
import jax.numpy as jnp
from jax import lax
from jax.experimental import pallas as pl
from jax.experimental.pallas import tpu as pltpu

EPS = 1e-5  # PyTorch GroupNorm default eps


# ----------------------------- in-kernel helpers ---------------------------- #

def _gn_onehots(C, num_groups, n_pix):
    """One-hot group membership matrices (C,G)/(G,C), built from iota (no HBM input)."""
    cg = C // num_groups
    c_i = lax.broadcasted_iota(jnp.int32, (C, num_groups), 0)
    g_i = lax.broadcasted_iota(jnp.int32, (C, num_groups), 1)
    scatter_cg = ((c_i >= g_i * cg) & (c_i < (g_i + 1) * cg)).astype(jnp.float32)   # (C, G)
    g_j = lax.broadcasted_iota(jnp.int32, (num_groups, C), 0)
    c_j = lax.broadcasted_iota(jnp.int32, (num_groups, C), 1)
    gather_gc = ((c_j >= g_j * cg) & (c_j < (g_j + 1) * cg)).astype(jnp.float32)    # (G, C)
    gather_gc = gather_gc * (1.0 / (n_pix * cg))
    return scatter_cg, gather_gc


def _group_norm_silu(x, gamma, beta, scatter_cg, gather_gc):
    """GroupNorm + SiLU on a flat (n_pix, C) f32 image (group stats via skinny matmuls)."""
    def group_mean(per_channel_sums):            # (1, C) sums -> (1, C) per-group means
        gs = jnp.dot(per_channel_sums, scatter_cg, preferred_element_type=jnp.float32)
        return jnp.dot(gs, gather_gc, preferred_element_type=jnp.float32)

    # NOTE: single f32 accumulation over the image; fine for n <= ~64K pixels (test & typical
    # decoder tiles).  For 512x512 tiles switch to chunked / MXU-ones-vector sums.
    mean = group_mean(jnp.sum(x, axis=0, keepdims=True))
    d = x - mean
    var = group_mean(jnp.sum(d * d, axis=0, keepdims=True))   # biased var (matches PyTorch)
    y = d * lax.rsqrt(var + EPS) * gamma + beta
    return y * lax.logistic(y)                                 # SiLU


def _stage_padded_image(hp_ref, h):
    """Write flat image h (n, C) into the interior of the zero-padded scratch hp_ref."""
    rows, C = hp_ref.shape
    n = h.shape[0]
    pad = (rows - n) // 2
    z = jnp.zeros((pad, C), hp_ref.dtype)
    hp_ref[0:pad, :] = z                       # top zero rows (absorb dy=-1 boundary taps)
    hp_ref[pad + n:rows, :] = z                # bottom zero rows (absorb dy=+1 boundary taps)
    hp_ref[pad:pad + n, :] = h.astype(hp_ref.dtype)


def _conv3x3(hp_ref, w_ref, b_ref, n, W, valid_l, valid_r, conv_dtype, use_im2col):
    """3x3 / padding=1 conv on the zero-padded flat scratch.

    Every tap (dy,dx) is a contiguous window of n rows at static offset dy*W+dx; the zero pad
    rows absorb the y-boundary, the (n,1) valid_l / valid_r masks absorb the x-boundary.
    use_im2col=True : concat 9 taps along K -> one (n,9C)x(9C,Cout) matmul (small C).
    use_im2col=False: 9 tap matmuls accumulated in f32 (no (n,9C) intermediate; MRB-friendly).
    """
    rows, C = hp_ref.shape
    pad = (rows - n) // 2
    taps = []
    for dy in (-1, 0, 1):
        for dx in (-1, 0, 1):
            start = pad + dy * W + dx
            win = hp_ref[start:start + n, :]
            if dx == -1:
                win = jnp.where(valid_l, win, jnp.zeros_like(win))
            elif dx == 1:
                win = jnp.where(valid_r, win, jnp.zeros_like(win))
            taps.append(win.astype(conv_dtype))   # tap order matches (3,3,C,Cout)->(9C,Cout)

    if use_im2col:
        p = jnp.concatenate(taps, axis=-1)                                  # (n, 9*C)
        acc = jnp.dot(p, w_ref[...], preferred_element_type=jnp.float32)
    else:
        acc = None
        for t, win in enumerate(taps):
            w_tap = w_ref[t * C:(t + 1) * C, :]                             # (C, Cout)
            contrib = jnp.dot(win, w_tap, preferred_element_type=jnp.float32)
            acc = contrib if acc is None else acc + contrib
    return acc + b_ref[...]


# --------------------------------- kernel ----------------------------------- #

def _resblock_kernel(*refs, num_groups, conv_dtype, has_proj, im2col_max_channels):
    if has_proj:
        (x_ref, g1_ref, b1_ref, w1_ref, c1_ref,
         g2_ref, b2_ref, w2_ref, c2_ref, wr_ref, br_ref,
         o_ref, hp1_ref, hp2_ref) = refs
    else:
        (x_ref, g1_ref, b1_ref, w1_ref, c1_ref,
         g2_ref, b2_ref, w2_ref, c2_ref,
         o_ref, hp1_ref, hp2_ref) = refs
        wr_ref = br_ref = None

    _, H, W, Cin = x_ref.shape
    Cout = o_ref.shape[-1]
    n = H * W

    x = x_ref[0].reshape(n, Cin).astype(jnp.float32)      # residue, flat row-major

    # Hoisted per-step constants: x-boundary masks (replaces old xcoord input) and the GN
    # one-hot matrices (shared by both GroupNorms).
    xcol = lax.broadcasted_iota(jnp.int32, (n, 1), 0) % W
    valid_l = xcol >= 1                                    # pixel has a dx=-1 neighbor
    valid_r = xcol <= W - 2                                # pixel has a dx=+1 neighbor
    sc1, ga1 = _gn_onehots(Cin, num_groups, n)
    sc2, ga2 = (sc1, ga1) if Cin == Cout else _gn_onehots(Cout, num_groups, n)

    use_im2col_1 = Cin <= im2col_max_channels
    use_im2col_2 = Cout <= im2col_max_channels

    # --- GroupNorm1 + SiLU + conv1 (3x3, pad=1) ---
    h = _group_norm_silu(x, g1_ref[...], b1_ref[...], sc1, ga1)
    _stage_padded_image(hp1_ref, h)
    y = _conv3x3(hp1_ref, w1_ref, c1_ref, n, W, valid_l, valid_r, conv_dtype, use_im2col_1)

    # --- GroupNorm2 + SiLU + conv2 (3x3, pad=1) ---
    h = _group_norm_silu(y, g2_ref[...], b2_ref[...], sc2, ga2)
    _stage_padded_image(hp2_ref, h)
    y = _conv3x3(hp2_ref, w2_ref, c2_ref, n, W, valid_l, valid_r, conv_dtype, use_im2col_2)

    # --- residual (1x1 projection only when in_ch != out_ch, else nn.Identity) ---
    if has_proj:
        y = y + jnp.dot(x.astype(conv_dtype), wr_ref[...],
                        preferred_element_type=jnp.float32) + br_ref[...]
    else:
        y = y + x

    o_ref[0] = y.reshape(H, W, Cout).astype(o_ref.dtype)


# ------------------------------ JAX wrapper --------------------------------- #

def vae_residual_block(x, params, *, num_groups=32, conv_dtype=jnp.bfloat16,
                       im2col_max_channels=96):
    """x: (N, H, W, Cin) NHWC.  Matches VAE_ResidualBlock.forward."""
    N, H, W, Cin = x.shape
    Cout = params["conv1_w"].shape[-1]
    assert W % 8 == 0, "W must be a multiple of 8 for clean (H,W,C)<->(H*W,C) relayout"
    assert Cin % num_groups == 0 and Cout % num_groups == 0
    has_proj = "res_w" in params

    n = H * W
    pad = ((W + 1 + 7) // 8) * 8   # zero rows on each side of the flat image; 8-row aligned

    # pack 3x3 weights for per-tap slicing / im2col: (3,3,C,Cout) -> (9*C, Cout)
    w1 = params["conv1_w"].reshape(9 * Cin, Cout).astype(conv_dtype)
    w2 = params["conv2_w"].reshape(9 * Cout, Cout).astype(conv_dtype)

    def _const_spec(shape):
        zeros = (0,) * len(shape)
        return pl.BlockSpec(shape, lambda i, zeros=zeros: zeros)

    args = [x,
            params["gn1_gamma"], params["gn1_beta"], w1, params["conv1_b"],
            params["gn2_gamma"], params["gn2_beta"], w2, params["conv2_b"]]
    in_specs = [pl.BlockSpec((1, H, W, Cin), lambda i: (i, 0, 0, 0)),
                _const_spec((1, Cin)), _const_spec((1, Cin)),
                _const_spec((9 * Cin, Cout)), _const_spec((1, Cout)),
                _const_spec((1, Cout)), _const_spec((1, Cout)),
                _const_spec((9 * Cout, Cout)), _const_spec((1, Cout))]
    if has_proj:
        args += [params["res_w"].astype(conv_dtype), params["res_b"]]
        in_specs += [_const_spec((Cin, Cout)), _const_spec((1, Cout))]

    # Explicit scoped-VMEM budget (default 16/32 MiB is too small for non-toy shapes):
    # double-buffered x/out blocks + (double-buffered) weights + f32 staging scratches + slack.
    bx = jnp.dtype(x.dtype).itemsize
    bc = jnp.dtype(conv_dtype).itemsize
    est = 2 * n * (Cin + Cout) * bx                                   # pipelined x / out blocks
    est += 2 * ((9 * Cin + 9 * Cout + Cin) * Cout * bc + 8 * (Cin + Cout) * 4)   # weights/scales
    est += (n + 2 * pad) * (Cin + Cout) * 4                           # staging scratches (f32)
    est += 10 * n * max(Cin, Cout) * 4                                # in-flight working set
    vmem_limit = int(min(100 * 2**20, max(32 * 2**20, 2 * est)))

    kernel = functools.partial(_resblock_kernel, num_groups=num_groups,
                               conv_dtype=conv_dtype, has_proj=has_proj,
                               im2col_max_channels=im2col_max_channels)
    return pl.pallas_call(
        kernel,
        out_shape=jax.ShapeDtypeStruct((N, H, W, Cout), x.dtype),
        grid=(N,),
        in_specs=in_specs,
        out_specs=pl.BlockSpec((1, H, W, Cout), lambda i: (i, 0, 0, 0)),
        scratch_shapes=[pltpu.VMEM((n + 2 * pad, Cin), jnp.float32),
                        pltpu.VMEM((n + 2 * pad, Cout), jnp.float32)],
        compiler_params=pltpu.CompilerParams(
            dimension_semantics=("parallel",),
            vmem_limit_bytes=vmem_limit),
    )(*args)


# --------------------------- deterministic params --------------------------- #

def init_params(key, cin, cout):
    ks = jax.random.split(key, 10)
    s = 0.05
    p = {
        "gn1_gamma": 1.0 + 0.1 * jax.random.normal(ks[0], (1, cin), jnp.float32),
        "gn1_beta": 0.1 * jax.random.normal(ks[1], (1, cin), jnp.float32),
        "conv1_w": s * jax.random.normal(ks[2], (3, 3, cin, cout), jnp.float32),
        "conv1_b": s * jax.random.normal(ks[3], (1, cout), jnp.float32),
        "gn2_gamma": 1.0 + 0.1 * jax.random.normal(ks[4], (1, cout), jnp.float32),
        "gn2_beta": 0.1 * jax.random.normal(ks[5], (1, cout), jnp.float32),
        "conv2_w": s * jax.random.normal(ks[6], (3, 3, cout, cout), jnp.float32),
        "conv2_b": s * jax.random.normal(ks[7], (1, cout), jnp.float32),
    }
    if cin != cout:   # nn.Identity otherwise -> no projection params at all
        p["res_w"] = s * jax.random.normal(ks[8], (cin, cout), jnp.float32)
        p["res_b"] = s * jax.random.normal(ks[9], (1, cout), jnp.float32)
    return p


# ------------------------------ pure-JAX reference -------------------------- #

def _groupnorm_ref(x, gamma, beta, num_groups=32):
    N, H, W, C = x.shape
    cg = C // num_groups
    xg = x.reshape(N, H, W, num_groups, cg)
    mean = xg.mean(axis=(1, 2, 4), keepdims=True)
    var = xg.var(axis=(1, 2, 4), keepdims=True)
    xn = ((xg - mean) / jnp.sqrt(var + EPS)).reshape(N, H, W, C)
    return xn * gamma.reshape(1, 1, 1, C) + beta.reshape(1, 1, 1, C)


def forward_ref(x, params, conv_dtype=jnp.float32):
    def conv(h, w, b):
        y = lax.conv_general_dilated(h.astype(conv_dtype), w.astype(conv_dtype),
                                     (1, 1), ((1, 1), (1, 1)),
                                     dimension_numbers=("NHWC", "HWIO", "NHWC"),
                                     preferred_element_type=jnp.float32)
        return y + b.reshape(1, 1, 1, -1)

    h = _groupnorm_ref(x, params["gn1_gamma"], params["gn1_beta"])
    h = h * jax.nn.sigmoid(h)
    h = conv(h, params["conv1_w"], params["conv1_b"])
    h = _groupnorm_ref(h, params["gn2_gamma"], params["gn2_beta"])
    h = h * jax.nn.sigmoid(h)
    h = conv(h, params["conv2_w"], params["conv2_b"])
    if "res_w" in params:
        res = jnp.einsum("nhwc,co->nhwo", x.astype(conv_dtype),
                         params["res_w"].astype(conv_dtype),
                         preferred_element_type=jnp.float32)
        res = res + params["res_b"].reshape(1, 1, 1, -1)
    else:
        res = x
    return h + res


if __name__ == "__main__":
    N, H, W = 2, 16, 16
    key = jax.random.PRNGKey(0)
    # (32 -> 64) exercises the 1x1 residual projection; (32 -> 32) the nn.Identity path.
    # Each is run with both the im2col form (threshold 96, i.e. small-C path) and the
    # tap-accumulation form (threshold 0), at f32 and bf16 MXU precision.
    for cin, cout in [(32, 64), (32, 32)]:
        key, kx, kp = jax.random.split(key, 3)
        x = jax.random.normal(kx, (N, H, W, cin), jnp.float32)
        params = init_params(kp, cin, cout)
        for dt in (jnp.float32, jnp.bfloat16):
            ref = jax.block_until_ready(forward_ref(x, params, conv_dtype=dt))
            for thr in (96, 0):
                out = jax.block_until_ready(
                    vae_residual_block(x, params, conv_dtype=dt, im2col_max_channels=thr))
                assert out.shape == (N, H, W, cout)
                max_err = float(jnp.max(jnp.abs(out - ref)))
                assert bool(jnp.allclose(out, ref, atol=1e-2, rtol=1e-2)), \
                    (cin, cout, str(dt), thr, max_err)
    print("KERNEL_OK")
</pallas_src>

<mosaic_0001>
module attributes {stable_mosaic.version = 11 : i64} {
  func.func @_resblock_kernel(%arg0: i32, %arg1: memref<1x16x16x32xf32, #tpu.memory_space<vmem>>, %arg2: memref<1x32xf32, #tpu.memory_space<vmem>>, %arg3: memref<1x32xf32, #tpu.memory_space<vmem>>, %arg4: memref<288x64xf32, #tpu.memory_space<vmem>>, %arg5: memref<1x64xf32, #tpu.memory_space<vmem>>, %arg6: memref<1x64xf32, #tpu.memory_space<vmem>>, %arg7: memref<1x64xf32, #tpu.memory_space<vmem>>, %arg8: memref<576x64xf32, #tpu.memory_space<vmem>>, %arg9: memref<1x64xf32, #tpu.memory_space<vmem>>, %arg10: memref<32x64xf32, #tpu.memory_space<vmem>>, %arg11: memref<1x64xf32, #tpu.memory_space<vmem>>, %arg12: memref<1x16x16x64xf32, #tpu.memory_space<vmem>>, %arg13: memref<304x32xf32, #tpu.memory_space<vmem>>, %arg14: memref<304x64xf32, #tpu.memory_space<vmem>>) attributes {dimension_semantics = [#tpu.dimension_semantics<parallel>], iteration_bounds = array<i64: 2>, scalar_prefetch = 0 : i64, scratch_operands = 2 : i64, tpu.core_type = #tpu.core_type<tc>, window_params = [{transform_indices = @transform_0, window_bounds = array<i64: 1, 16, 16, 32>}, {pipeline_mode = #tpu.pipeline_mode<synchronous>, transform_indices = @transform_1, window_bounds = array<i64: 1, 32>}, {pipeline_mode = #tpu.pipeline_mode<synchronous>, transform_indices = @transform_2, window_bounds = array<i64: 1, 32>}, {pipeline_mode = #tpu.pipeline_mode<synchronous>, transform_indices = @transform_3, window_bounds = array<i64: 288, 64>}, {pipeline_mode = #tpu.pipeline_mode<synchronous>, transform_indices = @transform_4, window_bounds = array<i64: 1, 64>}, {pipeline_mode = #tpu.pipeline_mode<synchronous>, transform_indices = @transform_5, window_bounds = array<i64: 1, 64>}, {pipeline_mode = #tpu.pipeline_mode<synchronous>, transform_indices = @transform_6, window_bounds = array<i64: 1, 64>}, {pipeline_mode = #tpu.pipeline_mode<synchronous>, transform_indices = @transform_7, window_bounds = array<i64: 576, 64>}, {pipeline_mode = #tpu.pipeline_mode<synchronous>, transform_indices = @transform_8, window_bounds = array<i64: 1, 64>}, {pipeline_mode = #tpu.pipeline_mode<synchronous>, transform_indices = @transform_9, window_bounds = array<i64: 32, 64>}, {pipeline_mode = #tpu.pipeline_mode<synchronous>, transform_indices = @transform_10, window_bounds = array<i64: 1, 64>}, {transform_indices = @transform_11, window_bounds = array<i64: 1, 16, 16, 64>}]} {
    %c0 = arith.constant 0 : index
    %c0_0 = arith.constant 0 : index
    %c0_1 = arith.constant 0 : index
    %c0_2 = arith.constant 0 : index
    %0 = vector.load %arg1[%c0, %c0_0, %c0_1, %c0_2] : memref<1x16x16x32xf32, #tpu.memory_space<vmem>>, vector<1x16x16x32xf32>
    %1 = vector.shape_cast %0 : vector<1x16x16x32xf32> to vector<16x16x32xf32>
    %2 = vector.shape_cast %1 : vector<16x16x32xf32> to vector<256x32xf32>
    %3 = tpu.iota {dimensions = array<i32: 0>} : vector<256x1xi32>
    %c16_i32 = arith.constant 16 : i32
    %c0_i32 = arith.constant 0 : i32
    %4 = arith.cmpi eq, %c16_i32, %c0_i32 : i32
    %c1_i32 = arith.constant 1 : i32
    %5 = arith.select %4, %c1_i32, %c16_i32 : i32
    %6 = vector.broadcast %5 : i32 to vector<256x1xi32>
    %7 = arith.remsi %3, %6 : vector<256x1xi32>
    %c0_i32_3 = arith.constant 0 : i32
    %8 = vector.broadcast %c0_i32_3 : i32 to vector<256x1xi32>
    %9 = arith.cmpi ne, %7, %8 : vector<256x1xi32>
    %c0_i32_4 = arith.constant 0 : i32
    %10 = vector.broadcast %c0_i32_4 : i32 to vector<256x1xi32>
    %11 = arith.cmpi slt, %7, %10 : vector<256x1xi32>
    %c0_i32_5 = arith.constant 0 : i32
    %12 = arith.cmpi slt, %5, %c0_i32_5 : i32
    %13 = vector.broadcast %12 : i1 to vector<256x1xi1>
    %14 = vector.broadcast %13 : vector<256x1xi1> to vector<256x1xi1>
    %15 = arith.xori %11, %14 : vector<256x1xi1>
    %16 = arith.andi %15, %9 : vector<256x1xi1>
    %17 = vector.broadcast %5 : i32 to vector<256x1xi32>
    %18 = arith.addi %7, %17 : vector<256x1xi32>
    %19 = arith.select %16, %18, %7 : vector<256x1xi1>, vector<256x1xi32>
    %c1_i32_6 = arith.constant 1 : i32
    %20 = vector.broadcast %c1_i32_6 : i32 to vector<256x1xi32>
    %21 = arith.cmpi sge, %19, %20 : vector<256x1xi32>
    %c14_i32 = arith.constant 14 : i32
    %22 = vector.broadcast %c14_i32 : i32 to vector<256x1xi32>
    %23 = arith.cmpi sle, %19, %22 : vector<256x1xi32>
    %24 = tpu.iota {dimensions = array<i32: 0>} : vector<32x32xi32>
    %25 = tpu.iota {dimensions = array<i32: 1>} : vector<32x32xi32>
    %c1_i32_7 = arith.constant 1 : i32
    %26 = vector.broadcast %c1_i32_7 : i32 to vector<32x32xi32>
    %27 = arith.muli %25, %26 : vector<32x32xi32>
    %28 = arith.cmpi sge, %24, %27 : vector<32x32xi32>
    %c1_i32_8 = arith.constant 1 : i32
    %29 = vector.broadcast %c1_i32_8 : i32 to vector<32x32xi32>
    %30 = arith.addi %25, %29 : vector<32x32xi32>
    %c1_i32_9 = arith.constant 1 : i32
    %31 = vector.broadcast %c1_i32_9 : i32 to vector<32x32xi32>
    %32 = arith.muli %30, %31 : vector<32x32xi32>
    %33 = arith.cmpi slt, %24, %32 : vector<32x32xi32>
    %34 = arith.andi %28, %33 : vector<32x32xi1>
    %35 = arith.extui %34 : vector<32x32xi1> to vector<32x32xi32>
    %36 = arith.sitofp %35 : vector<32x32xi32> to vector<32x32xf32>
    %37 = tpu.iota {dimensions = array<i32: 0>} : vector<32x32xi32>
    %38 = tpu.iota {dimensions = array<i32: 1>} : vector<32x32xi32>
    %c1_i32_10 = arith.constant 1 : i32
    %39 = vector.broadcast %c1_i32_10 : i32 to vector<32x32xi32>
    %40 = arith.muli %37, %39 : vector<32x32xi32>
    %41 = arith.cmpi sge, %38, %40 : vector<32x32xi32>
    %c1_i32_11 = arith.constant 1 : i32
    %42 = vector.broadcast %c1_i32_11 : i32 to vector<32x32xi32>
    %43 = arith.addi %37, %42 : vector<32x32xi32>
    %c1_i32_12 = arith.constant 1 : i32
    %44 = vector.broadcast %c1_i32_12 : i32 to vector<32x32xi32>
    %45 = arith.muli %43, %44 : vector<32x32xi32>
    %46 = arith.cmpi slt, %38, %45 : vector<32x32xi32>
    %47 = arith.andi %41, %46 : vector<32x32xi1>
    %48 = arith.extui %47 : vector<32x32xi1> to vector<32x32xi32>
    %49 = arith.sitofp %48 : vector<32x32xi32> to vector<32x32xf32>
    %cst = arith.constant 3.906250e-03 : f32
    %50 = vector.broadcast %cst : f32 to vector<32x32xf32>
    %51 = arith.mulf %49, %50 : vector<32x32xf32>
    %52 = tpu.iota {dimensions = array<i32: 0>} : vector<64x32xi32>
    %53 = tpu.iota {dimensions = array<i32: 1>} : vector<64x32xi32>
    %c2_i32 = arith.constant 2 : i32
    %54 = vector.broadcast %c2_i32 : i32 to vector<64x32xi32>
    %55 = arith.muli %53, %54 : vector<64x32xi32>
    %56 = arith.cmpi sge, %52, %55 : vector<64x32xi32>
    %c1_i32_13 = arith.constant 1 : i32
    %57 = vector.broadcast %c1_i32_13 : i32 to vector<64x32xi32>
    %58 = arith.addi %53, %57 : vector<64x32xi32>
    %c2_i32_14 = arith.constant 2 : i32
    %59 = vector.broadcast %c2_i32_14 : i32 to vector<64x32xi32>
    %60 = arith.muli %58, %59 : vector<64x32xi32>
    %61 = arith.cmpi slt, %52, %60 : vector<64x32xi32>
    %62 = arith.andi %56, %61 : vector<64x32xi1>
    %63 = arith.extui %62 : vector<64x32xi1> to vector<64x32xi32>
    %64 = arith.sitofp %63 : vector<64x32xi32> to vector<64x32xf32>
    %65 = tpu.iota {dimensions = array<i32: 0>} : vector<32x64xi32>
    %66 = tpu.iota {dimensions = array<i32: 1>} : vector<32x64xi32>
    %c2_i32_15 = arith.constant 2 : i32
    %67 = vector.broadcast %c2_i32_15 : i32 to vector<32x64xi32>
    %68 = arith.muli %65, %67 : vector<32x64xi32>
    %69 = arith.cmpi sge, %66, %68 : vector<32x64xi32>
    %c1_i32_16 = arith.constant 1 : i32
    %70 = vector.broadcast %c1_i32_16 : i32 to vector<32x64xi32>
    %71 = arith.addi %65, %70 : vector<32x64xi32>
    %c2_i32_17 = arith.constant 2 : i32
    %72 = vector.broadcast %c2_i32_17 : i32 to vector<32x64xi32>
    %73 = arith.muli %71, %72 : vector<32x64xi32>
    %74 = arith.cmpi slt, %66, %73 : vector<32x64xi32>
    %75 = arith.andi %69, %74 : vector<32x64xi1>
    %76 = arith.extui %75 : vector<32x64xi1> to vector<32x64xi32>
    %77 = arith.sitofp %76 : vector<32x64xi32> to vector<32x64xf32>
    %cst_18 = arith.constant 0.001953125 : f32
    %78 = vector.broadcast %cst_18 : f32 to vector<32x64xf32>
    %79 = arith.mulf %77, %78 : vector<32x64xf32>
    %c0_19 = arith.constant 0 : index
    %c0_20 = arith.constant 0 : index
    %80 = vector.load %arg2[%c0_19, %c0_20] : memref<1x32xf32, #tpu.memory_space<vmem>>, vector<1x32xf32>
    %c0_21 = arith.constant 0 : index
    %c0_22 = arith.constant 0 : index
    %81 = vector.load %arg3[%c0_21, %c0_22] : memref<1x32xf32, #tpu.memory_space<vmem>>, vector<1x32xf32>
    %cst_23 = arith.constant dense<0.000000e+00> : vector<32xf32>
    %82 = vector.multi_reduction <add>, %2, %cst_23 [0] : vector<256x32xf32> to vector<32xf32>
    %83 = vector.shape_cast %82 : vector<32xf32> to vector<1x32xf32>
    %cst_24 = arith.constant dense<0.000000e+00> : vector<1x32xf32>
    %84 = tpu.matmul %83, %36, %cst_24 {dimension_numbers = #tpu.dot_dimension_numbers<[1], [0], [0], [1], [0, 0, 1, 1], [], []>} : vector<1x32xf32>, vector<32x32xf32>, vector<1x32xf32> -> vector<1x32xf32>
    %cst_25 = arith.constant dense<0.000000e+00> : vector<1x32xf32>
    %85 = tpu.matmul %84, %51, %cst_25 {dimension_numbers = #tpu.dot_dimension_numbers<[1], [0], [0], [1], [0, 0, 1, 1], [], []>} : vector<1x32xf32>, vector<32x32xf32>, vector<1x32xf32> -> vector<1x32xf32>
    %86 = vector.broadcast %85 : vector<1x32xf32> to vector<256x32xf32>
    %87 = arith.subf %2, %86 : vector<256x32xf32>
    %88 = arith.mulf %87, %87 : vector<256x32xf32>
    %cst_26 = arith.constant dense<0.000000e+00> : vector<32xf32>
    %89 = vector.multi_reduction <add>, %88, %cst_26 [0] : vector<256x32xf32> to vector<32xf32>
    %90 = vector.shape_cast %89 : vector<32xf32> to vector<1x32xf32>
    %cst_27 = arith.constant dense<0.000000e+00> : vector<1x32xf32>
    %91 = tpu.matmul %90, %36, %cst_27 {dimension_numbers = #tpu.dot_dimension_numbers<[1], [0], [0], [1], [0, 0, 1, 1], [], []>} : vector<1x32xf32>, vector<32x32xf32>, vector<1x32xf32> -> vector<1x32xf32>
    %cst_28 = arith.constant dense<0.000000e+00> : vector<1x32xf32>
    %92 = tpu.matmul %91, %51, %cst_28 {dimension_numbers = #tpu.dot_dimension_numbers<[1], [0], [0], [1], [0, 0, 1, 1], [], []>} : vector<1x32xf32>, vector<32x32xf32>, vector<1x32xf32> -> vector<1x32xf32>
    %cst_29 = arith.constant 9.99999974E-6 : f32
    %93 = vector.broadcast %cst_29 : f32 to vector<1x32xf32>
    %94 = arith.addf %92, %93 : vector<1x32xf32>
    %95 = math.rsqrt %94 : vector<1x32xf32>
    %96 = vector.broadcast %95 : vector<1x32xf32> to vector<256x32xf32>
    %97 = arith.mulf %87, %96 : vector<256x32xf32>
    %98 = vector.broadcast %80 : vector<1x32xf32> to vector<256x32xf32>
    %99 = arith.mulf %97, %98 : vector<256x32xf32>
    %100 = vector.broadcast %81 : vector<1x32xf32> to vector<256x32xf32>
    %101 = arith.addf %99, %100 : vector<256x32xf32>
    %102 = arith.negf %101 : vector<256x32xf32>
    %103 = math.exp %102 : vector<256x32xf32>
    %cst_30 = arith.constant 1.000000e+00 : f32
    %104 = vector.broadcast %cst_30 : f32 to vector<256x32xf32>
    %105 = arith.addf %104, %103 : vector<256x32xf32>
    %106 = arith.divf %104, %105 : vector<256x32xf32>
    %107 = arith.mulf %101, %106 : vector<256x32xf32>
    %cst_31 = arith.constant 0.000000e+00 : f32
    %108 = vector.broadcast %cst_31 : f32 to vector<24x32xf32>
    %c0_32 = arith.constant 0 : index
    %c0_33 = arith.constant 0 : index
    %109 = vector.load %arg13[%c0_32, %c0_33] : memref<304x32xf32, #tpu.memory_space<vmem>>, vector<24x32xf32>
    tpu.vector_store %arg13[%c0_32, %c0_33], %108 {strides = array<i32>} : memref<304x32xf32, #tpu.memory_space<vmem>>, vector<24x32xf32>,
    %c280 = arith.constant 280 : index
    %c0_34 = arith.constant 0 : index
    %110 = vector.load %arg13[%c280, %c0_34] : memref<304x32xf32, #tpu.memory_space<vmem>>, vector<24x32xf32>
    tpu.vector_store %arg13[%c280, %c0_34], %108 {strides = array<i32>} : memref<304x32xf32, #tpu.memory_space<vmem>>, vector<24x32xf32>,
    %c24 = arith.constant 24 : index
    %c0_35 = arith.constant 0 : index
    %111 = vector.load %arg13[%c24, %c0_35] : memref<304x32xf32, #tpu.memory_space<vmem>>, vector<256x32xf32>
    tpu.vector_store %arg13[%c24, %c0_35], %107 {strides = array<i32>} : memref<304x32xf32, #tpu.memory_space<vmem>>, vector<256x32xf32>,
    %c7 = arith.constant 7 : index
    %c0_36 = arith.constant 0 : index
    %112 = vector.load %arg13[%c7, %c0_36] : memref<304x32xf32, #tpu.memory_space<vmem>>, vector<256x32xf32>
    %cst_37 = arith.constant 0.000000e+00 : f32
    %113 = vector.broadcast %cst_37 : f32 to vector<256x32xf32>
    %114 = vector.shape_cast %21 : vector<256x1xi1> to vector<256x1xi1>
    %115 = vector.broadcast %114 : vector<256x1xi1> to vector<256x32xi1>
    %116 = arith.select %115, %112, %113 : vector<256x32xi1>, vector<256x32xf32>
    %c8 = arith.constant 8 : index
    %c0_38 = arith.constant 0 : index
    %117 = vector.load %arg13[%c8, %c0_38] : memref<304x32xf32, #tpu.memory_space<vmem>>, vector<256x32xf32>
    %c9 = arith.constant 9 : index
    %c0_39 = arith.constant 0 : index
    %118 = vector.load %arg13[%c9, %c0_39] : memref<304x32xf32, #tpu.memory_space<vmem>>, vector<256x32xf32>
    %cst_40 = arith.constant 0.000000e+00 : f32
    %119 = vector.broadcast %cst_40 : f32 to vector<256x32xf32>
    %120 = vector.shape_cast %23 : vector<256x1xi1> to vector<256x1xi1>
    %121 = vector.broadcast %120 : vector<256x1xi1> to vector<256x32xi1>
    %122 = arith.select %121, %118, %119 : vector<256x32xi1>, vector<256x32xf32>
    %c23 = arith.constant 23 : index
    %c0_41 = arith.constant 0 : index
    %123 = vector.load %arg13[%c23, %c0_41] : memref<304x32xf32, #tpu.memory_space<vmem>>, vector<256x32xf32>
    %cst_42 = arith.constant 0.000000e+00 : f32
    %124 = vector.broadcast %cst_42 : f32 to vector<256x32xf32>
    %125 = vector.shape_cast %21 : vector<256x1xi1> to vector<256x1xi1>
    %126 = vector.broadcast %125 : vector<256x1xi1> to vector<256x32xi1>
    %127 = arith.select %126, %123, %124 : vector<256x32xi1>, vector<256x32xf32>
    %c24_43 = arith.constant 24 : index
    %c0_44 = arith.constant 0 : index
    %128 = vector.load %arg13[%c24_43, %c0_44] : memref<304x32xf32, #tpu.memory_space<vmem>>, vector<256x32xf32>
    %c25 = arith.constant 25 : index
    %c0_45 = arith.constant 0 : index
    %129 = vector.load %arg13[%c25, %c0_45] : memref<304x32xf32, #tpu.memory_space<vmem>>, vector<256x32xf32>
    %cst_46 = arith.constant 0.000000e+00 : f32
    %130 = vector.broadcast %cst_46 : f32 to vector<256x32xf32>
    %131 = vector.shape_cast %23 : vector<256x1xi1> to vector<256x1xi1>
    %132 = vector.broadcast %131 : vector<256x1xi1> to vector<256x32xi1>
    %133 = arith.select %132, %129, %130 : vector<256x32xi1>, vector<256x32xf32>
    %c39 = arith.constant 39 : index
    %c0_47 = arith.constant 0 : index
    %134 = vector.load %arg13[%c39, %c0_47] : memref<304x32xf32, #tpu.memory_space<vmem>>, vector<256x32xf32>
    %cst_48 = arith.constant 0.000000e+00 : f32
    %135 = vector.broadcast %cst_48 : f32 to vector<256x32xf32>
    %136 = vector.shape_cast %21 : vector<256x1xi1> to vector<256x1xi1>
    %137 = vector.broadcast %136 : vector<256x1xi1> to vector<256x32xi1>
    %138 = arith.select %137, %134, %135 : vector<256x32xi1>, vector<256x32xf32>
    %c40 = arith.constant 40 : index
    %c0_49 = arith.constant 0 : index
    %139 = vector.load %arg13[%c40, %c0_49] : memref<304x32xf32, #tpu.memory_space<vmem>>, vector<256x32xf32>
    %c41 = arith.constant 41 : index
    %c0_50 = arith.constant 0 : index
    %140 = vector.load %arg13[%c41, %c0_50] : memref<304x32xf32, #tpu.memory_space<vmem>>, vector<256x32xf32>
    %cst_51 = arith.constant 0.000000e+00 : f32
    %141 = vector.broadcast %cst_51 : f32 to vector<256x32xf32>
    %142 = vector.shape_cast %23 : vector<256x1xi1> to vector<256x1xi1>
    %143 = vector.broadcast %142 : vector<256x1xi1> to vector<256x32xi1>
    %144 = arith.select %143, %140, %141 : vector<256x32xi1>, vector<256x32xf32>
    %145 = tpu.concatenate %116, %117, %122, %127, %128, %133, %138, %139, %144 in 1 : vector<256x32xf32>, vector<256x32xf32>, vector<256x32xf32>, vector<256x32xf32>, vector<256x32xf32>, vector<256x32xf32>, vector<256x32xf32>, vector<256x32xf32>, vector<256x32xf32> -> vector<256x288xf32>
    %c0_52 = arith.constant 0 : index
    %c0_53 = arith.constant 0 : index
    %146 = vector.load %arg4[%c0_52, %c0_53] : memref<288x64xf32, #tpu.memory_space<vmem>>, vector<288x64xf32>
    %cst_54 = arith.constant dense<0.000000e+00> : vector<256x64xf32>
    %147 = tpu.matmul %145, %146, %cst_54 {dimension_numbers = #tpu.dot_dimension_numbers<[1], [0], [0], [1], [0, 0, 1, 1], [], []>} : vector<256x288xf32>, vector<288x64xf32>, vector<256x64xf32> -> vector<256x64xf32>
    %c0_55 = arith.constant 0 : index
    %c0_56 = arith.constant 0 : index
    %148 = vector.load %arg5[%c0_55, %c0_56] : memref<1x64xf32, #tpu.memory_space<vmem>>, vector<1x64xf32>
    %149 = vector.broadcast %148 : vector<1x64xf32> to vector<256x64xf32>
    %150 = arith.addf %147, %149 : vector<256x64xf32>
    %c0_57 = arith.constant 0 : index
    %c0_58 = arith.constant 0 : index
    %151 = vector.load %arg6[%c0_57, %c0_58] : memref<1x64xf32, #tpu.memory_space<vmem>>, vector<1x64xf32>
    %c0_59 = arith.constant 0 : index
    %c0_60 = arith.constant 0 : index
    %152 = vector.load %arg7[%c0_59, %c0_60] : memref<1x64xf32, #tpu.memory_space<vmem>>, vector<1x64xf32>
    %cst_61 = arith.constant dense<0.000000e+00> : vector<64xf32>
    %153 = vector.multi_reduction <add>, %150, %cst_61 [0] : vector<256x64xf32> to vector<64xf32>
    %154 = vector.shape_cast %153 : vector<64xf32> to vector<1x64xf32>
    %cst_62 = arith.constant dense<0.000000e+00> : vector<1x32xf32>
    %155 = tpu.matmul %154, %64, %cst_62 {dimension_numbers = #tpu.dot_dimension_numbers<[1], [0], [0], [1], [0, 0, 1, 1], [], []>} : vector<1x64xf32>, vector<64x32xf32>, vector<1x32xf32> -> vector<1x32xf32>
    %cst_63 = arith.constant dense<0.000000e+00> : vector<1x64xf32>
    %156 = tpu.matmul %155, %79, %cst_63 {dimension_numbers = #tpu.dot_dimension_numbers<[1], [0], [0], [1], [0, 0, 1, 1], [], []>} : vector<1x32xf32>, vector<32x64xf32>, vector<1x64xf32> -> vector<1x64xf32>
    %157 = vector.broadcast %156 : vector<1x64xf32> to vector<256x64xf32>
    %158 = arith.subf %150, %157 : vector<256x64xf32>
    %159 = arith.mulf %158, %158 : vector<256x64xf32>
    %cst_64 = arith.constant dense<0.000000e+00> : vector<64xf32>
    %160 = vector.multi_reduction <add>, %159, %cst_64 [0] : vector<256x64xf32> to vector<64xf32>
    %161 = vector.shape_cast %160 : vector<64xf32> to vector<1x64xf32>
    %cst_65 = arith.constant dense<0.000000e+00> : vector<1x32xf32>
    %162 = tpu.matmul %161, %64, %cst_65 {dimension_numbers = #tpu.dot_dimension_numbers<[1], [0], [0], [1], [0, 0, 1, 1], [], []>} : vector<1x64xf32>, vector<64x32xf32>, vector<1x32xf32> -> vector<1x32xf32>
    %cst_66 = arith.constant dense<0.000000e+00> : vector<1x64xf32>
    %163 = tpu.matmul %162, %79, %cst_66 {dimension_numbers = #tpu.dot_dimension_numbers<[1], [0], [0], [1], [0, 0, 1, 1], [], []>} : vector<1x32xf32>, vector<32x64xf32>, vector<1x64xf32> -> vector<1x64xf32>
    %cst_67 = arith.constant 9.99999974E-6 : f32
    %164 = vector.broadcast %cst_67 : f32 to vector<1x64xf32>
    %165 = arith.addf %163, %164 : vector<1x64xf32>
    %166 = math.rsqrt %165 : vector<1x64xf32>
    %167 = vector.broadcast %166 : vector<1x64xf32> to vector<256x64xf32>
    %168 = arith.mulf %158, %167 : vector<256x64xf32>
    %169 = vector.broadcast %151 : vector<1x64xf32> to vector<256x64xf32>
    %170 = arith.mulf %168, %169 : vector<256x64xf32>
    %171 = vector.broadcast %152 : vector<1x64xf32> to vector<256x64xf32>
    %172 = arith.addf %170, %171 : vector<256x64xf32>
    %173 = arith.negf %172 : vector<256x64xf32>
    %174 = math.exp %173 : vector<256x64xf32>
    %cst_68 = arith.constant 1.000000e+00 : f32
    %175 = vector.broadcast %cst_68 : f32 to vector<256x64xf32>
    %176 = arith.addf %175, %174 : vector<256x64xf32>
    %177 = arith.divf %175, %176 : vector<256x64xf32>
    %178 = arith.mulf %172, %177 : vector<256x64xf32>
    %cst_69 = arith.constant 0.000000e+00 : f32
    %179 = vector.broadcast %cst_69 : f32 to vector<24x64xf32>
    %c0_70 = arith.constant 0 : index
    %c0_71 = arith.constant 0 : index
    %180 = vector.load %arg14[%c0_70, %c0_71] : memref<304x64xf32, #tpu.memory_space<vmem>>, vector<24x64xf32>
    tpu.vector_store %arg14[%c0_70, %c0_71], %179 {strides = array<i32>} : memref<304x64xf32, #tpu.memory_space<vmem>>, vector<24x64xf32>,
    %c280_72 = arith.constant 280 : index
    %c0_73 = arith.constant 0 : index
    %181 = vector.load %arg14[%c280_72, %c0_73] : memref<304x64xf32, #tpu.memory_space<vmem>>, vector<24x64xf32>
    tpu.vector_store %arg14[%c280_72, %c0_73], %179 {strides = array<i32>} : memref<304x64xf32, #tpu.memory_space<vmem>>, vector<24x64xf32>,
    %c24_74 = arith.constant 24 : index
    %c0_75 = arith.constant 0 : index
    %182 = vector.load %arg14[%c24_74, %c0_75] : memref<304x64xf32, #tpu.memory_space<vmem>>, vector<256x64xf32>
    tpu.vector_store %arg14[%c24_74, %c0_75], %178 {strides = array<i32>} : memref<304x64xf32, #tpu.memory_space<vmem>>, vector<256x64xf32>,
    %c7_76 = arith.constant 7 : index
    %c0_77 = arith.constant 0 : index
    %183 = vector.load %arg14[%c7_76, %c0_77] : memref<304x64xf32, #tpu.memory_space<vmem>>, vector<256x64xf32>
    %cst_78 = arith.constant 0.000000e+00 : f32
    %184 = vector.broadcast %cst_78 : f32 to vector<256x64xf32>
    %185 = vector.shape_cast %21 : vector<256x1xi1> to vector<256x1xi1>
    %186 = vector.broadcast %185 : vector<256x1xi1> to vector<256x64xi1>
    %187 = arith.select %186, %183, %184 : vector<256x64xi1>, vector<256x64xf32>
    %c8_79 = arith.constant 8 : index
    %c0_80 = arith.constant 0 : index
    %188 = vector.load %arg14[%c8_79, %c0_80] : memref<304x64xf32, #tpu.memory_space<vmem>>, vector<256x64xf32>
    %c9_81 = arith.constant 9 : index
    %c0_82 = arith.constant 0 : index
    %189 = vector.load %arg14[%c9_81, %c0_82] : memref<304x64xf32, #tpu.memory_space<vmem>>, vector<256x64xf32>
    %cst_83 = arith.constant 0.000000e+00 : f32
    %190 = vector.broadcast %cst_83 : f32 to vector<256x64xf32>
    %191 = vector.shape_cast %23 : vector<256x1xi1> to vector<256x1xi1>
    %192 = vector.broadcast %191 : vector<256x1xi1> to vector<256x64xi1>
    %193 = arith.select %192, %189, %190 : vector<256x64xi1>, vector<256x64xf32>
    %c23_84 = arith.constant 23 : index
    %c0_85 = arith.constant 0 : index
    %194 = vector.load %arg14[%c23_84, %c0_85] : memref<304x64xf32, #tpu.memory_space<vmem>>, vector<256x64xf32>
    %cst_86 = arith.constant 0.000000e+00 : f32
    %195 = vector.broadcast %cst_86 : f32 to vector<256x64xf32>
    %196 = vector.shape_cast %21 : vector<256x1xi1> to vector<256x1xi1>
    %197 = vector.broadcast %196 : vector<256x1xi1> to vector<256x64xi1>
    %198 = arith.select %197, %194, %195 : vector<256x64xi1>, vector<256x64xf32>
    %c24_87 = arith.constant 24 : index
    %c0_88 = arith.constant 0 : index
    %199 = vector.load %arg14[%c24_87, %c0_88] : memref<304x64xf32, #tpu.memory_space<vmem>>, vector<256x64xf32>
    %c25_89 = arith.constant 25 : index
    %c0_90 = arith.constant 0 : index
    %200 = vector.load %arg14[%c25_89, %c0_90] : memref<304x64xf32, #tpu.memory_space<vmem>>, vector<256x64xf32>
    %cst_91 = arith.constant 0.000000e+00 : f32
    %201 = vector.broadcast %cst_91 : f32 to vector<256x64xf32>
    %202 = vector.shape_cast %23 : vector<256x1xi1> to vector<256x1xi1>
    %203 = vector.broadcast %202 : vector<256x1xi1> to vector<256x64xi1>
    %204 = arith.select %203, %200, %201 : vector<256x64xi1>, vector<256x64xf32>
    %c39_92 = arith.constant 39 : index
    %c0_93 = arith.constant 0 : index
    %205 = vector.load %arg14[%c39_92, %c0_93] : memref<304x64xf32, #tpu.memory_space<vmem>>, vector<256x64xf32>
    %cst_94 = arith.constant 0.000000e+00 : f32
    %206 = vector.broadcast %cst_94 : f32 to vector<256x64xf32>
    %207 = vector.shape_cast %21 : vector<256x1xi1> to vector<256x1xi1>
    %208 = vector.broadcast %207 : vector<256x1xi1> to vector<256x64xi1>
    %209 = arith.select %208, %205, %206 : vector<256x64xi1>, vector<256x64xf32>
    %c40_95 = arith.constant 40 : index
    %c0_96 = arith.constant 0 : index
    %210 = vector.load %arg14[%c40_95, %c0_96] : memref<304x64xf32, #tpu.memory_space<vmem>>, vector<256x64xf32>
    %c41_97 = arith.constant 41 : index
    %c0_98 = arith.constant 0 : index
    %211 = vector.load %arg14[%c41_97, %c0_98] : memref<304x64xf32, #tpu.memory_space<vmem>>, vector<256x64xf32>
    %cst_99 = arith.constant 0.000000e+00 : f32
    %212 = vector.broadcast %cst_99 : f32 to vector<256x64xf32>
    %213 = vector.shape_cast %23 : vector<256x1xi1> to vector<256x1xi1>
    %214 = vector.broadcast %213 : vector<256x1xi1> to vector<256x64xi1>
    %215 = arith.select %214, %211, %212 : vector<256x64xi1>, vector<256x64xf32>
    %216 = tpu.concatenate %187, %188, %193, %198, %199, %204, %209, %210, %215 in 1 : vector<256x64xf32>, vector<256x64xf32>, vector<256x64xf32>, vector<256x64xf32>, vector<256x64xf32>, vector<256x64xf32>, vector<256x64xf32>, vector<256x64xf32>, vector<256x64xf32> -> vector<256x576xf32>
    %c0_100 = arith.constant 0 : index
    %c0_101 = arith.constant 0 : index
    %217 = vector.load %arg8[%c0_100, %c0_101] : memref<576x64xf32, #tpu.memory_space<vmem>>, vector<576x64xf32>
    %cst_102 = arith.constant dense<0.000000e+00> : vector<256x64xf32>
    %218 = tpu.matmul %216, %217, %cst_102 {dimension_numbers = #tpu.dot_dimension_numbers<[1], [0], [0], [1], [0, 0, 1, 1], [], []>} : vector<256x576xf32>, vector<576x64xf32>, vector<256x64xf32> -> vector<256x64xf32>
    %c0_103 = arith.constant 0 : index
    %c0_104 = arith.constant 0 : index
    %219 = vector.load %arg9[%c0_103, %c0_104] : memref<1x64xf32, #tpu.memory_space<vmem>>, vector<1x64xf32>
    %220 = vector.broadcast %219 : vector<1x64xf32> to vector<256x64xf32>
    %221 = arith.addf %218, %220 : vector<256x64xf32>
    %c0_105 = arith.constant 0 : index
    %c0_106 = arith.constant 0 : index
    %222 = vector.load %arg10[%c0_105, %c0_106] : memref<32x64xf32, #tpu.memory_space<vmem>>, vector<32x64xf32>
    %cst_107 = arith.constant dense<0.000000e+00> : vector<256x64xf32>
    %223 = tpu.matmul %2, %222, %cst_107 {dimension_numbers = #tpu.dot_dimension_numbers<[1], [0], [0], [1], [0, 0, 1, 1], [], []>} : vector<256x32xf32>, vector<32x64xf32>, vector<256x64xf32> -> vector<256x64xf32>
    %224 = arith.addf %221, %223 : vector<256x64xf32>
    %c0_108 = arith.constant 0 : index
    %c0_109 = arith.constant 0 : index
    %225 = vector.load %arg11[%c0_108, %c0_109] : memref<1x64xf32, #tpu.memory_space<vmem>>, vector<1x64xf32>
    %226 = vector.broadcast %225 : vector<1x64xf32> to vector<256x64xf32>
    %227 = arith.addf %224, %226 : vector<256x64xf32>
    %228 = vector.shape_cast %227 : vector<256x64xf32> to vector<16x16x64xf32>
    %c0_110 = arith.constant 0 : index
    %c0_111 = arith.constant 0 : index
    %c0_112 = arith.constant 0 : index
    %c0_113 = arith.constant 0 : index
    %229 = vector.load %arg12[%c0_110, %c0_111, %c0_112, %c0_113] : memref<1x16x16x64xf32, #tpu.memory_space<vmem>>, vector<1x16x16x64xf32>
    %230 = vector.shape_cast %229 : vector<1x16x16x64xf32> to vector<16x16x64xf32>
    %231 = vector.shape_cast %228 : vector<16x16x64xf32> to vector<1x16x16x64xf32>
    tpu.vector_store %arg12[%c0_110, %c0_111, %c0_112, %c0_113], %231 {strides = array<i32>} : memref<1x16x16x64xf32, #tpu.memory_space<vmem>>, vector<1x16x16x64xf32>,
    return
  }
  func.func @transform_0(%arg0: i32) -> (i32, i32, i32, i32) {
    %c0_i32 = arith.constant 0 : i32
    %c0_i32_0 = arith.constant 0 : i32
    %c0_i32_1 = arith.constant 0 : i32
    %c0_i32_2 = arith.constant 0 : i32
    return %arg0, %c0_i32, %c0_i32_0, %c0_i32_1 : i32, i32, i32, i32
  }
  func.func @transform_1(%arg0: i32) -> (i32, i32) {
    %c0_i32 = arith.constant 0 : i32
    %c0_i32_0 = arith.constant 0 : i32
    %c0_i32_1 = arith.constant 0 : i32
    return %c0_i32, %c0_i32_0 : i32, i32
  }
  func.func @transform_2(%arg0: i32) -> (i32, i32) {
    %c0_i32 = arith.constant 0 : i32
    %c0_i32_0 = arith.constant 0 : i32
    %c0_i32_1 = arith.constant 0 : i32
    return %c0_i32, %c0_i32_0 : i32, i32
  }
  func.func @transform_3(%arg0: i32) -> (i32, i32) {
    %c0_i32 = arith.constant 0 : i32
    %c0_i32_0 = arith.constant 0 : i32
    %c0_i32_1 = arith.constant 0 : i32
    return %c0_i32, %c0_i32_0 : i32, i32
  }
  func.func @transform_4(%arg0: i32) -> (i32, i32) {
    %c0_i32 = arith.constant 0 : i32
    %c0_i32_0 = arith.constant 0 : i32
    %c0_i32_1 = arith.constant 0 : i32
    return %c0_i32, %c0_i32_0 : i32, i32
  }
  func.func @transform_5(%arg0: i32) -> (i32, i32) {
    %c0_i32 = arith.constant 0 : i32
    %c0_i32_0 = arith.constant 0 : i32
    %c0_i32_1 = arith.constant 0 : i32
    return %c0_i32, %c0_i32_0 : i32, i32
  }
  func.func @transform_6(%arg0: i32) -> (i32, i32) {
    %c0_i32 = arith.constant 0 : i32
    %c0_i32_0 = arith.constant 0 : i32
    %c0_i32_1 = arith.constant 0 : i32
    return %c0_i32, %c0_i32_0 : i32, i32
  }
  func.func @transform_7(%arg0: i32) -> (i32, i32) {
    %c0_i32 = arith.constant 0 : i32
    %c0_i32_0 = arith.constant 0 : i32
    %c0_i32_1 = arith.constant 0 : i32
    return %c0_i32, %c0_i32_0 : i32, i32
  }
  func.func @transform_8(%arg0: i32) -> (i32, i32) {
    %c0_i32 = arith.constant 0 : i32
    %c0_i32_0 = arith.constant 0 : i32
    %c0_i32_1 = arith.constant 0 : i32
    return %c0_i32, %c0_i32_0 : i32, i32
  }
  func.func @transform_9(%arg0: i32) -> (i32, i32) {
    %c0_i32 = arith.constant 0 : i32
    %c0_i32_0 = arith.constant 0 : i32
    %c0_i32_1 = arith.constant 0 : i32
    return %c0_i32, %c0_i32_0 : i32, i32
  }
  func.func @transform_10(%arg0: i32) -> (i32, i32) {
    %c0_i32 = arith.constant 0 : i32
    %c0_i32_0 = arith.constant 0 : i32
    %c0_i32_1 = arith.constant 0 : i32
    return %c0_i32, %c0_i32_0 : i32, i32
  }
  func.func @transform_11(%arg0: i32) -> (i32, i32, i32, i32) {
    %c0_i32 = arith.constant 0 : i32
    %c0_i32_0 = arith.constant 0 : i32
    %c0_i32_1 = arith.constant 0 : i32
    %c0_i32_2 = arith.constant 0 : i32
    return %arg0, %c0_i32, %c0_i32_0, %c0_i32_1 : i32, i32, i32, i32
  }
}

</mosaic_0001>

<bundles_post_ra>
// kernel: tpu_custom_call.1
= control target key start
LH: loop header
LB: loop body
LE: loop exit
PB: predicated region body
PF: predicated region fallthrough
CT: control target
= control target key end

     0   :  { %s15201_s0 = inlined_call_operand.vmem [shape: f32[2,16,16,32], index: 0, kind: input, shape index: {}]   ;;  %s15202_s1 = inlined_call_operand.vmem [shape: f32[1,32], index: 1, kind: input, shape index: {}]   ;;  %s15203_s2 = inlined_call_operand.vmem [shape: f32[1,32], index: 2, kind: input, shape index: {}]   ;;  %s15204_s3 = inlined_call_operand.vmem [shape: f32[288,64], index: 3, kind: input, shape index: {}]   ;;  %s15205_s4 = inlined_call_operand.vmem [shape: f32[1,64], index: 4, kind: input, shape index: {}]   ;;  %s15206_s5 = inlined_call_operand.vmem [shape: f32[1,64], index: 5, kind: input, shape index: {}]   ;;  %s15207_s6 = inlined_call_operand.vmem [shape: f32[1,64], index: 6, kind: input, shape index: {}]   ;;  %s15208_s7 = inlined_call_operand.vmem [shape: f32[576,64], index: 7, kind: input, shape index: {}]   ;;  %s15209_s8 = inlined_call_operand.vmem [shape: f32[1,64], index: 8, kind: input, shape index: {}]   ;;  %s15210_s9 = inlined_call_operand.vmem [shape: f32[32,64], index: 9, kind: input, shape index: {}]   ;;  %s15211_s10 = inlined_call_operand.vmem [shape: f32[1,64], index: 10, kind: input, shape index: {}]   ;;  %s15212_s11 = inlined_call_operand.hbm [shape: f32[2,16,16,64], index: 11, kind: output, shape index: {}]  }
   0x1   :  { %15556 = sst [smem:[#allocation119_spill]] %s15201_s0 }
   0x2   :  { %16 = vsyncpa [#allocation5], 0 }
   0x3   :  { %18 = vsyncpa [#allocation5 + $0x1], 0  ;;  %s8516_s17 = smov 0   ;;  %s8518_s18 = smov 0  }
   0x4   :  { %s8520_s19 = smov 0   ;;  %s8522_s20 = smov 0  }
   0x5 LB: > { %s8537_s21 = sadd.s32 4294967295, %s8447_s20   ;;  %s6993_s22 = sadd.s32 4294967294, %s8447_s20   ;;  %s8447_s20 = sphi %s8522_s20, %s16996_s20   ;;  %s8443_s19 = sphi %s8520_s19, %s16995_s19   ;;  %s8439_s18 = sphi %s8518_s18, %s16994_s18   ;;  %s8435_s17 = sphi %s8516_s17, %s16993_s17  }
   0x6   : > { %s8541_s23 = sadd.s32 1, %s8447_s20   ;;  %s267_s24 = sadd.s32 1, %s8443_s19 }
   0x7   : > { %s264_s25 = ssub.s32 %s8447_s20, %s8541_s23  ;;  %p277_p0 = scmp.ne.s32.totalorder %s8443_s19, %s8439_s18 }
   0x8   : > { %p265_p1 = scmp.eq.s32.totalorder %s264_s25, 0  ;;  %p278_p2 = scmp.eq.s32.totalorder %s8537_s21, 1 }
   0x9   : > { %p283_p3 = scmp.ne.s32.totalorder %s8439_s18, %s8435_s17  ;;  %p284_p4 = scmp.eq.s32.totalorder %s6993_s22, 1 }
   0xa   : > { %s8552_s26 = scalar_select %p265_p1, %s8443_s19, %s267_s24  }
   0xb   : > { %p8554_p5 = por %p278_p2, %p277_p0  ;;  %p8558_p6 = por %p284_p4, %p283_p3 }
   0xc   : > { %p6996_p7 = scmp.ge.s32.totalorder %s8447_s20, 1  ;;  %p340_p8 = scmp.lt.s32.totalorder %s8447_s20, 3 }
   0xe   : > { %p341_p9 = pnand %p6996_p7, %p340_p8 }
  0x10   : > { %344 = sbr.rel (%p341_p9) target bundleno = 2978 (0xba2), region = 64 }
  0x15   : > { %v417_v0 = vlaneseq  ;;  %p380_p10 = scmp.lt.s32.totalorder %s8537_s21, 1  ;;  %s15565_s0 = sld [smem:[#allocation119_spill]]  ;;  %vm15258_vm0 = vcmask 261120   ;;  %v15213_v11 = vmov 1.0  }
  0x16   : > { %s8451_s24 = smov 32   ;;  %s8452_s25 = smov 64  }
  0x17   : > { %v8565_v1 = vshrl.u32 %v417_v0, 7  ;;  %v8567_v2 = vand.u32 127, %v417_v0  ;;  %s381_s29 = scalar_select %p380_p10, %s8537_s21, 1 }
  0x18   : > { %s377_s12 = sand.u32 1, %s8439_s18   ;;  %s8405_s16 = scalar_lea.hbm %s15212_s11, 512 }
  0x19   : > { %15559 = vst [vmem:[#allocation7_spill] sm:$0xff] %v8565_v1  ;;  %v8571_v3 = vadd.s32 24, %v8565_v1  ;;  %v8574_v4 = vadd.s32 1, %v8567_v2  ;;  %v8577_v5 = vadd.s32 16, %v8565_v1  ;;  %v8580_v6 = vadd.s32 8, %v8565_v1  ;;  %s7217_s30 = sshll.u32 %s381_s29, 8 }
  0x1a   : > { %15560 = vst [vmem:[#allocation8_spill] sm:$0xff] %v8567_v2  ;;  %vm900_vm8 = vcmp.ge.s32.totalorder %v8565_v1, %v8567_v2  ;;  %s8453_s29 = smov 96   ;;  %s6997_s13 = sshll.u32 %s377_s12, 8 }
  0x1b   : > { %15561 = vst [vmem:[#allocation9_spill] sm:$0xff] %v8571_v3  ;;  %s8585_s14 = scalar_lea.vmem %s15565_s0, %s7217_s30  ;;  %vm903_vm1 = vcmp.ge.s32.totalorder %v8571_v3, %v8567_v2  ;;  %vm908_vm2 = vcmp.lt.s32.totalorder %v8571_v3, %v8574_v4  ;;  %vm902_vm3 = vcmp.ge.s32.totalorder %v8577_v5, %v8567_v2  ;;  %vm907_vm5 = vcmp.lt.s32.totalorder %v8577_v5, %v8574_v4 }
  0x1c   : > { %15562 = vst [vmem:[#allocation10_spill] sm:$0xff] %v8574_v4  ;;  %v8594_v7 = vld [vmem:[%s8585_s14] sm:$0xff]  ;;  %v8597_v8 = vld [vmem:[%s8585_s14 + $0x8] sm:$0xff]  ;;  %v8600_v9 = vld [vmem:[%s8585_s14 + $0x10] sm:$0xff]  ;;  %vm901_vm6 = vcmp.ge.s32.totalorder %v8580_v6, %v8567_v2  ;;  %vm906_vm7 = vcmp.lt.s32.totalorder %v8580_v6, %v8574_v4  ;;  %vm905_vm10 = vcmp.lt.s32.totalorder %v8565_v1, %v8574_v4  ;;  %vm924_vm13 = vcmp.ge.s32.totalorder %v8567_v2, %v8571_v3 }
  0x1d   : > { %15563 = vst [vmem:[#allocation11_spill] sm:$0xff] %v8577_v5  ;;  %vm912_vm4 = vmand %vm903_vm1, %vm908_vm2  ;;  %v8611_v10 = vld [vmem:[%s8585_s14 + $0x18] sm:$0xff]  ;;  %v1026_v12 = vsel %vm15258_vm0, %v8594_v7, 0.0  ;;  %v1027_v13 = vsel %vm15258_vm0, %v8597_v8, 0.0  ;;  %v1029_v14 = vsel %vm15258_vm0, %v8600_v9, 0.0  ;;  %v8624_v15 = vld [vmem:[%s8585_s14 + $0x20] sm:$0xff]  ;;  %vm923_vm14 = vcmp.ge.s32.totalorder %v8567_v2, %v8577_v5 }
  0x1e   : > { %15564 = vst [vmem:[#allocation12_spill] sm:$0xff] %v8580_v6  ;;  %7020 = vmatpush.msk.msra.mxu0 %vm912_vm4, %v15213_v11  ;;  %vm911_vm9 = vmand %vm902_vm3, %vm907_vm5  ;;  %7026 = vmatpush.msk.msra.mxu2 %vm912_vm4, %v15213_v11  ;;  %v1028_v16 = vadd.f32 %v1027_v13, %v1026_v12  ;;  %v1031_v17 = vsel %vm15258_vm0, %v8611_v10, 0.0  ;;  %v8634_v18 = vld [vmem:[%s8585_s14 + $0x28] sm:$0xff]  ;;  %v1033_v20 = vsel %vm15258_vm0, %v8624_v15, 0.0  ;;  %v8641_v21 = vld [vmem:[%s8585_s14 + $0x30] sm:$0xff]  ;;  %vm922_vm1 = vcmp.ge.s32.totalorder %v8567_v2, %v8580_v6 }
  0x1f   : > { %vm910_vm11 = vmand %vm901_vm6, %vm906_vm7  ;;  %v1035_v23 = vsel %vm15258_vm0, %v8634_v18, 0.0  ;;  %v8648_v24 = vld [vmem:[%s8585_s14 + $0x38] sm:$0xff]  ;;  %v1037_v26 = vsel %vm15258_vm0, %v8641_v21, 0.0  ;;  %v8653_v27 = vld [vmem:[%s8585_s14 + $0x40] sm:$0xff]  ;;  %vm921_vm7 = vcmp.ge.s32.totalorder %v8567_v2, %v8565_v1 }
  0x20   : > { %7021 = vmatpush.msk.msra.mxu0 %vm911_vm9, %v15213_v11  ;;  %7027 = vmatpush.msk.msra.mxu2 %vm911_vm9, %v15213_v11  ;;  %vm909_vm12 = vmand %vm900_vm8, %vm905_vm10  ;;  %v1030_v19 = vadd.f32 %v1029_v14, %v1028_v16  ;;  %v1039_v29 = vsel %vm15258_vm0, %v8648_v24, 0.0  ;;  %v8658_v30 = vld [vmem:[%s8585_s14 + $0x48] sm:$0xff]  ;;  %v1041_v32 = vsel %vm15258_vm0, %v8653_v27, 0.0  ;;  %v8663_v33 = vld [vmem:[%s8585_s14 + $0x50] sm:$0xff] }
  0x21   : > { %v1043_v35 = vsel %vm15258_vm0, %v8658_v30, 0.0  ;;  %v8668_v36 = vld [vmem:[%s8585_s14 + $0x58] sm:$0xff]  ;;  %v1045_v38 = vsel %vm15258_vm0, %v8663_v33, 0.0  ;;  %v8673_v39 = vld [vmem:[%s8585_s14 + $0x60] sm:$0xff]  ;;  %v8678_v42 = vld [vmem:[%s8585_s14 + $0x68] sm:$0xff] }
  0x22   : > { %7022 = vmatpush.msk.msra.mxu0 %vm910_vm11, %v15213_v11  ;;  %7028 = vmatpush.msk.msra.mxu2 %vm910_vm11, %v15213_v11  ;;  %v1032_v22 = vadd.f32 %v1031_v17, %v1030_v19  ;;  %v1047_v41 = vsel %vm15258_vm0, %v8668_v36, 0.0  ;;  %v1049_v44 = vsel %vm15258_vm0, %v8673_v39, 0.0  ;;  %v8683_v45 = vld [vmem:[%s8585_s14 + $0x70] sm:$0xff]  ;;  %v1051_v47 = vsel %vm15258_vm0, %v8678_v42, 0.0  ;;  %v8688_v48 = vld [vmem:[%s8585_s14 + $0x78] sm:$0xff]  ;;  %v8693_v51 = vld [vmem:[%s8585_s14 + $0x80] sm:$0xff] }
  0x23   : > { %v1053_v50 = vsel %vm15258_vm0, %v8683_v45, 0.0  ;;  %v1055_v53 = vsel %vm15258_vm0, %v8688_v48, 0.0  ;;  %v8698_v54 = vld [vmem:[%s8585_s14 + $0x88] sm:$0xff]  ;;  %v1057_v56 = vsel %vm15258_vm0, %v8693_v51, 0.0  ;;  %v8703_v57 = vld [vmem:[%s8585_s14 + $0x90] sm:$0xff]  ;;  %v8708_v60 = vld [vmem:[%s8585_s14 + $0x98] sm:$0xff] }
  0x24   : > { %7023 = vmatpush.msk.msra.mxu0 %vm909_vm12, %v15213_v11  ;;  %7029 = vmatpush.msk.msra.mxu2 %vm909_vm12, %v15213_v11  ;;  %v1034_v25 = vadd.f32 %v1033_v20, %v1032_v22  ;;  %v1059_v59 = vsel %vm15258_vm0, %v8698_v54, 0.0  ;;  %v1061_v62 = vsel %vm15258_vm0, %v8703_v57, 0.0  ;;  %v8713_v63 = vld [vmem:[%s8585_s14 + $0xa0] sm:$0xff]  ;;  %v1063_v12 = vsel %vm15258_vm0, %v8708_v60, 0.0  ;;  %v8718_v13 = vld [vmem:[%s8585_s14 + $0xa8] sm:$0xff]  ;;  %v8723_v17 = vld [vmem:[%s8585_s14 + $0xb0] sm:$0xff] }
  0x25   : > { %v1065_v16 = vsel %vm15258_vm0, %v8713_v63, 0.0  ;;  %v1067_v20 = vsel %vm15258_vm0, %v8718_v13, 0.0  ;;  %v8728_v22 = vld [vmem:[%s8585_s14 + $0xb8] sm:$0xff] }
  0x26   : > { %v1036_v28 = vadd.f32 %v1035_v23, %v1034_v25  ;;  %v1069_v25 = vsel %vm15258_vm0, %v8723_v17, 0.0 }
  0x28   : > { %v1038_v31 = vadd.f32 %v1037_v26, %v1036_v28  ;;  %v8733_v26 = vld [vmem:[%s8585_s14 + $0xc0] sm:$0xff] }
  0x2a   : > { %v1040_v34 = vadd.f32 %v1039_v29, %v1038_v31  ;;  %v1071_v29 = vsel %vm15258_vm0, %v8728_v22, 0.0  ;;  %v8738_v31 = vld [vmem:[%s8585_s14 + $0xc8] sm:$0xff] }
  0x2c   : > { %v1042_v37 = vadd.f32 %v1041_v32, %v1040_v34  ;;  %v8743_v34 = vadd.s32 1, %v8571_v3 }
  0x2e   : > { %v1044_v40 = vadd.f32 %v1043_v35, %v1042_v37  ;;  %15566 = vst [vmem:[#allocation13_spill] sm:$0xff] %v8743_v34  ;;  %v1073_v35 = vsel %vm15258_vm0, %v8733_v26, 0.0  ;;  %v15215_v37 = vmov 0.0   ;;  %vm932_vm15 = vcmp.lt.s32.totalorder %v8567_v2, %v8743_v34 }
  0x2f   : > { %2074 = vst.msk [vmem:[#allocation2] sm:$0xff] %vm15258_vm0, %v15215_v37  ;;  %vm936_vm2 = vmand %vm924_vm13, %vm932_vm15 }
  0x30   : > { %v1046_v43 = vadd.f32 %v1045_v38, %v1044_v40  ;;  %v8752_v38 = vadd.s32 1, %v8577_v5  ;;  %v8755_v40 = vadd.s32 1, %v8580_v6  ;;  %2075 = vst.msk [vmem:[#allocation2 + $0x8] sm:$0xff] %vm15258_vm0, %v15215_v37 }
  0x31   : > { %2076 = vst.msk [vmem:[#allocation2 + $0x10] sm:$0xff] %vm15258_vm0, %v15215_v37 }
  0x32   : > { %v1048_v46 = vadd.f32 %v1047_v41, %v1046_v43  ;;  %15567 = vst [vmem:[#allocation14_spill] sm:$0xff] %v8752_v38  ;;  %v8758_v41 = vld [vmem:[%s8585_s14 + $0xd0] sm:$0xff]  ;;  %vm931_vm3 = vcmp.lt.s32.totalorder %v8567_v2, %v8752_v38  ;;  %vm930_vm4 = vcmp.lt.s32.totalorder %v8567_v2, %v8755_v40 }
  0x33   : > { %15568 = vst [vmem:[#allocation15_spill] sm:$0xff] %v8755_v40  ;;  %vm935_vm5 = vmand %vm923_vm14, %vm931_vm3 }
  0x34   : > { %v1050_v49 = vadd.f32 %v1049_v44, %v1048_v46  ;;  %v1075_v44 = vsel %vm15258_vm0, %v8738_v31, 0.0  ;;  %v8775_v46 = vld [vmem:[%s8585_s14 + $0xd8] sm:$0xff]  ;;  %2077 = vst.msk [vmem:[#allocation2 + $0x118] sm:$0xff] %vm15258_vm0, %v15215_v37  ;;  %vm934_vm6 = vmand %vm922_vm1, %vm930_vm4 }
  0x35   : > { %2078 = vst.msk [vmem:[#allocation2 + $0x120] sm:$0xff] %vm15258_vm0, %v15215_v37 }
  0x36   : > { %v1052_v52 = vadd.f32 %v1051_v47, %v1050_v49  ;;  %v7007_v49 = vsel %vm936_vm2, 1.0, %v15215_v37  ;;  %2079 = vst.msk [vmem:[#allocation2 + $0x128] sm:$0xff] %vm15258_vm0, %v15215_v37 }
  0x38   : > { %v1054_v55 = vadd.f32 %v1053_v50, %v1052_v52  ;;  %v1077_v50 = vsel %vm15258_vm0, %v8758_v41, 0.0  ;;  %v948_v52 = vmul.f32 0.00390625, %v7007_v49 }
  0x3a   : > { %v1056_v58 = vadd.f32 %v1055_v53, %v1054_v55  ;;  %v7006_v53 = vsel %vm935_vm5, 1.0, %v15215_v37  ;;  %v8792_v55 = vld [vmem:[%s8585_s14 + $0xe0] sm:$0xff]  ;;  %1133 = vmatpush.msra.mxu1 %v948_v52  ;;  %1313 = vmatpush.msra.mxu3 %v948_v52 }
  0x3c   : > { %v1058_v61 = vadd.f32 %v1057_v56, %v1056_v58  ;;  %v947_v58 = vmul.f32 0.00390625, %v7006_v53 }
  0x3e   : > { %v1060_v0 = vadd.f32 %v1059_v59, %v1058_v61  ;;  %v7005_v59 = vsel %vm934_vm6, 1.0, %v15215_v37  ;;  %v1079_v61 = vsel %vm15258_vm0, %v8775_v46, 0.0  ;;  %1134 = vmatpush.msra.mxu1 %v947_v58  ;;  %1314 = vmatpush.msra.mxu3 %v947_v58 }
  0x40   : > { %v1062_v14 = vadd.f32 %v1061_v62, %v1060_v0  ;;  %v946_v62 = vmul.f32 0.00390625, %v7005_v59  ;;  %v8800_v0 = vld [vmem:[%s8585_s14 + $0xe8] sm:$0xff] }
  0x42   : > { %v1064_v19 = vadd.f32 %v1063_v12, %v1062_v14  ;;  %v1081_v14 = vsel %vm15258_vm0, %v8792_v55, 0.0  ;;  %1135 = vmatpush.msra.mxu1 %v946_v62  ;;  %1315 = vmatpush.msra.mxu3 %v946_v62 }
  0x44   : > { %v1066_v23 = vadd.f32 %v1065_v16, %v1064_v19  ;;  %v8805_v16 = vld [vmem:[%s8585_s14 + $0xf0] sm:$0xff] }
  0x46   : > { %v1068_v28 = vadd.f32 %v1067_v20, %v1066_v23  ;;  %v1083_v20 = vsel %vm15258_vm0, %v8800_v0, 0.0  ;;  %v8810_v23 = vld [vmem:[%s8585_s14 + $0xf8] sm:$0xff] }
  0x48   : > { %v1070_v32 = vadd.f32 %v1069_v25, %v1068_v28  ;;  %v1085_v28 = vsel %vm15258_vm0, %v8805_v16, 0.0 }
  0x4a   : > { %v1072_v43 = vadd.f32 %v1071_v29, %v1070_v32  ;;  %v1087_v32 = vsel %vm15258_vm0, %v8810_v23, 0.0 }
  0x4c   : > { %v1074_v47 = vadd.f32 %v1073_v35, %v1072_v43 }
  0x4e   : > { %v1076_v56 = vadd.f32 %v1075_v44, %v1074_v47 }
  0x50   : > { %v1078_v12 = vadd.f32 %v1077_v50, %v1076_v56  ;;  %v8818_v56 = vadd.s32 1, %v8565_v1 }
  0x52   : > { %v1080_v19 = vadd.f32 %v1079_v61, %v1078_v12  ;;  %15569 = vst [vmem:[#allocation16_spill] sm:$0xff] %v8818_v56  ;;  %vm929_vm8 = vcmp.lt.s32.totalorder %v8567_v2, %v8818_v56 }
  0x53   : > { %vm933_vm9 = vmand %vm921_vm7, %vm929_vm8 }
  0x54   : > { %v1082_v25 = vadd.f32 %v1081_v14, %v1080_v19  ;;  %v7004_v58 = vsel %vm933_vm9, 1.0, %v15215_v37 }
  0x55   : > { %v945_v59 = vmul.f32 0.00390625, %v7004_v58 }
  0x56   : > { %v1084_v29 = vadd.f32 %v1083_v20, %v1082_v25 }
  0x57   : > { %1136 = vmatpush.msra.mxu1 %v945_v59  ;;  %1316 = vmatpush.msra.mxu3 %v945_v59 }
  0x58   : > { %v1086_v35 = vadd.f32 %v1085_v28, %v1084_v29 }
  0x5a   : > { %v1088_v43 = vadd.f32 %v1087_v32, %v1086_v35 }
  0x5c   : > { %v1089_v44 = vrot.slane %v1088_v43, 4 }
  0x5e   : > { %v1090_v47 = vadd.f32 %v1089_v44, %v1088_v43 }
  0x60   : > { %v1091_v49 = vrot.slane %v1090_v47, 2 }
  0x62   : > { %v1092_v50 = vadd.f32 %v1091_v49, %v1090_v47 }
  0x64   : > { %v1093_v52 = vrot.slane %v1092_v50, 1 }
  0x66   : > { %v1094_v53 = vadd.f32 %v1093_v52, %v1092_v50 }
  0x68   : > { %7024 = vmatmul.msk.f32.vlgmr.msra.gmra.mxu0 %vm15258_vm0, %v1094_v53 }
  0xe5   : > { %v1115_v61 = vpop.f32.mrf.mxu0 }
  0xe6   : > { %7025 = vmatmul.msk.f32.vlgmr.msra.gmra.mxu1 %vm15258_vm0, %v1115_v61 }
 0x163   : > { %v1138_v62 = vpop.f32.mrf.mxu1 }
 0x164   : > { %v8826_v12 = vperm.slane %v1138_v62, 0 }
 0x166   : > { %v8830_v14 = vsub.f32 %v8594_v7, %v8826_v12  ;;  %v8834_v19 = vsub.f32 %v8597_v8, %v8826_v12  ;;  %v8838_v20 = vsub.f32 %v8600_v9, %v8826_v12  ;;  %v8842_v25 = vsub.f32 %v8611_v10, %v8826_v12 }
 0x167   : > { %v8850_v7 = vsub.f32 %v8624_v15, %v8826_v12  ;;  %v8856_v9 = vsub.f32 %v8634_v18, %v8826_v12  ;;  %v8864_v44 = vsub.f32 %v8641_v21, %v8826_v12  ;;  %v8871_v18 = vsub.f32 %v8648_v24, %v8826_v12 }
 0x168   : > { %15570 = vst [vmem:[#allocation17_spill] sm:$0xff] %v8838_v20  ;;  %v1174_v28 = vmul.f32 %v8830_v14, %v8830_v14  ;;  %v1175_v29 = vmul.f32 %v8834_v19, %v8834_v19  ;;  %v1176_v8 = vmul.f32 %v8838_v20, %v8838_v20  ;;  %v1177_v10 = vmul.f32 %v8842_v25, %v8842_v25 }
 0x169   : > { %15571 = vst [vmem:[#allocation18_spill] sm:$0xff] %v8842_v25  ;;  %v1178_v15 = vmul.f32 %v8850_v7, %v8850_v7  ;;  %v1179_v50 = vmul.f32 %v8856_v9, %v8856_v9  ;;  %v8878_v21 = vsub.f32 %v8653_v27, %v8826_v12  ;;  %v1180_v58 = vmul.f32 %v8864_v44, %v8864_v44 }
 0x16a   : > { %15572 = vst [vmem:[#allocation19_spill] sm:$0xff] %v8850_v7  ;;  %v1206_v32 = vsel %vm15258_vm0, %v1174_v28, 0.0  ;;  %v1207_v35 = vsel %vm15258_vm0, %v1175_v29, 0.0  ;;  %v1209_v47 = vsel %vm15258_vm0, %v1176_v8, 0.0  ;;  %v1211_v52 = vsel %vm15258_vm0, %v1177_v10, 0.0  ;;  %v2240_v7 = vld [vmem:[#allocation2 + $0x8] sm:$0xff] }
 0x16b   : > { %15573 = vst [vmem:[#allocation20_spill] sm:$0xff] %v8856_v9  ;;  %v1208_v43 = vadd.f32 %v1207_v35, %v1206_v32  ;;  %v1213_v59 = vsel %vm15258_vm0, %v1178_v15, 0.0  ;;  %v8885_v24 = vsub.f32 %v8658_v30, %v8826_v12  ;;  %v1181_v62 = vmul.f32 %v8871_v18, %v8871_v18 }
 0x16c   : > { %15574 = vst [vmem:[#allocation21_spill] sm:$0xff] %v8864_v44  ;;  %v1215_v28 = vsel %vm15258_vm0, %v1179_v50, 0.0  ;;  %v8892_v27 = vsub.f32 %v8663_v33, %v8826_v12  ;;  %v1182_v8 = vmul.f32 %v8878_v21, %v8878_v21  ;;  %v1217_v10 = vsel %vm15258_vm0, %v1180_v58, 0.0 }
 0x16d   : > { %v1210_v49 = vadd.f32 %v1209_v47, %v1208_v43  ;;  %15575 = vst [vmem:[#allocation22_spill] sm:$0xff] %v8871_v18  ;;  %v8899_v30 = vsub.f32 %v8668_v36, %v8826_v12  ;;  %v1183_v35 = vmul.f32 %v8885_v24, %v8885_v24  ;;  %v1219_v43 = vsel %vm15258_vm0, %v1181_v62, 0.0 }
 0x16e   : > { %15576 = vst [vmem:[#allocation23_spill] sm:$0xff] %v8878_v21  ;;  %v8906_v33 = vsub.f32 %v8673_v39, %v8826_v12  ;;  %v1184_v47 = vmul.f32 %v8892_v27, %v8892_v27  ;;  %v8913_v36 = vsub.f32 %v8678_v42, %v8826_v12  ;;  %v8920_v39 = vsub.f32 %v8683_v45, %v8826_v12 }
 0x16f   : > { %v1212_v53 = vadd.f32 %v1211_v52, %v1210_v49  ;;  %15577 = vst [vmem:[#allocation24_spill] sm:$0xff] %v8885_v24  ;;  %v1221_v49 = vsel %vm15258_vm0, %v1182_v8, 0.0  ;;  %v1185_v52 = vmul.f32 %v8899_v30, %v8899_v30  ;;  %v8927_v42 = vsub.f32 %v8688_v48, %v8826_v12 }
 0x170   : > { %15578 = vst [vmem:[#allocation25_spill] sm:$0xff] %v8892_v27  ;;  %v8934_v45 = vsub.f32 %v8693_v51, %v8826_v12  ;;  %v8941_v48 = vsub.f32 %v8698_v54, %v8826_v12  ;;  %v8948_v51 = vsub.f32 %v8703_v57, %v8826_v12  ;;  %v8955_v54 = vsub.f32 %v8708_v60, %v8826_v12 }
 0x171   : > { %v1214_v61 = vadd.f32 %v1213_v59, %v1212_v53  ;;  %15579 = vst [vmem:[#allocation26_spill] sm:$0xff] %v8899_v30  ;;  %v1223_v53 = vsel %vm15258_vm0, %v1183_v35, 0.0  ;;  %v1186_v59 = vmul.f32 %v8906_v33, %v8906_v33  ;;  %v8962_v57 = vsub.f32 %v8713_v63, %v8826_v12 }
 0x172   : > { %15580 = vst [vmem:[#allocation27_spill] sm:$0xff] %v8906_v33  ;;  %v8969_v60 = vsub.f32 %v8718_v13, %v8826_v12  ;;  %v8976_v63 = vsub.f32 %v8723_v17, %v8826_v12  ;;  %v8983_v13 = vsub.f32 %v8728_v22, %v8826_v12  ;;  %v8990_v17 = vsub.f32 %v8733_v26, %v8826_v12 }
 0x173   : > { %v1216_v29 = vadd.f32 %v1215_v28, %v1214_v61  ;;  %15581 = vst [vmem:[#allocation28_spill] sm:$0xff] %v8913_v36  ;;  %v1225_v61 = vsel %vm15258_vm0, %v1184_v47, 0.0  ;;  %v1187_v28 = vmul.f32 %v8913_v36, %v8913_v36  ;;  %v8997_v22 = vsub.f32 %v8738_v31, %v8826_v12 }
 0x174   : > { %15582 = vst [vmem:[#allocation29_spill] sm:$0xff] %v8920_v39  ;;  %v9004_v26 = vsub.f32 %v8758_v41, %v8826_v12  ;;  %v9011_v31 = vsub.f32 %v8775_v46, %v8826_v12  ;;  %v9018_v41 = vsub.f32 %v8792_v55, %v8826_v12  ;;  %v9025_v46 = vsub.f32 %v8800_v0, %v8826_v12 }
 0x175   : > { %v1218_v32 = vadd.f32 %v1217_v10, %v1216_v29  ;;  %15583 = vst [vmem:[#allocation30_spill] sm:$0xff] %v8927_v42  ;;  %v1227_v29 = vsel %vm15258_vm0, %v1185_v52, 0.0  ;;  %v1188_v10 = vmul.f32 %v8920_v39, %v8920_v39  ;;  %v9032_v55 = vsub.f32 %v8805_v16, %v8826_v12 }
 0x176   : > { %15584 = vst [vmem:[#allocation31_spill] sm:$0xff] %v8934_v45  ;;  %v9039_v0 = vsub.f32 %v8810_v23, %v8826_v12 }
 0x177   : > { %v1220_v15 = vadd.f32 %v1219_v43, %v1218_v32  ;;  %v1229_v32 = vsel %vm15258_vm0, %v1186_v59, 0.0  ;;  %15585 = vst [vmem:[#allocation32_spill] sm:$0xff] %v8941_v48  ;;  %v1189_v43 = vmul.f32 %v8927_v42, %v8927_v42  ;;  %v1204_v16 = vmul.f32 %v9032_v55, %v9032_v55 }
 0x178   : > { %15586 = vst [vmem:[#allocation33_spill] sm:$0xff] %v8948_v51 }
 0x179   : > { %v1222_v50 = vadd.f32 %v1221_v49, %v1220_v15  ;;  %v1231_v15 = vsel %vm15258_vm0, %v1187_v28, 0.0  ;;  %v1190_v49 = vmul.f32 %v8934_v45, %v8934_v45  ;;  %v1265_v23 = vsel %vm15258_vm0, %v1204_v16, 0.0  ;;  %v3507_v16 = vld [vmem:[%s15204_s3 + $0x108] sm:$0xff] }
 0x17b   : > { %v1224_v58 = vadd.f32 %v1223_v53, %v1222_v50  ;;  %v1233_v50 = vsel %vm15258_vm0, %v1188_v10, 0.0  ;;  %v1191_v53 = vmul.f32 %v8941_v48, %v8941_v48 }
 0x17d   : > { %v1226_v62 = vadd.f32 %v1225_v61, %v1224_v58  ;;  %v1235_v58 = vsel %vm15258_vm0, %v1189_v43, 0.0  ;;  %v1192_v61 = vmul.f32 %v8948_v51, %v8948_v51 }
 0x17f   : > { %v1228_v8 = vadd.f32 %v1227_v29, %v1226_v62  ;;  %v1237_v62 = vsel %vm15258_vm0, %v1190_v49, 0.0  ;;  %v1193_v29 = vmul.f32 %v8955_v54, %v8955_v54 }
 0x181   : > { %v1230_v35 = vadd.f32 %v1229_v32, %v1228_v8  ;;  %v1239_v8 = vsel %vm15258_vm0, %v1191_v53, 0.0  ;;  %v1194_v32 = vmul.f32 %v8962_v57, %v8962_v57 }
 0x183   : > { %v1232_v47 = vadd.f32 %v1231_v15, %v1230_v35  ;;  %v1241_v35 = vsel %vm15258_vm0, %v1192_v61, 0.0  ;;  %v1195_v15 = vmul.f32 %v8969_v60, %v8969_v60 }
 0x185   : > { %v1234_v52 = vadd.f32 %v1233_v50, %v1232_v47  ;;  %v1243_v47 = vsel %vm15258_vm0, %v1193_v29, 0.0  ;;  %v1196_v50 = vmul.f32 %v8976_v63, %v8976_v63 }
 0x187   : > { %v1236_v59 = vadd.f32 %v1235_v58, %v1234_v52  ;;  %v1245_v52 = vsel %vm15258_vm0, %v1194_v32, 0.0  ;;  %v1197_v58 = vmul.f32 %v8983_v13, %v8983_v13 }
 0x189   : > { %v1238_v28 = vadd.f32 %v1237_v62, %v1236_v59  ;;  %v1247_v59 = vsel %vm15258_vm0, %v1195_v15, 0.0  ;;  %v1198_v62 = vmul.f32 %v8990_v17, %v8990_v17 }
 0x18b   : > { %v1240_v10 = vadd.f32 %v1239_v8, %v1238_v28  ;;  %v1249_v28 = vsel %vm15258_vm0, %v1196_v50, 0.0  ;;  %v1199_v8 = vmul.f32 %v8997_v22, %v8997_v22 }
 0x18d   : > { %v1242_v43 = vadd.f32 %v1241_v35, %v1240_v10  ;;  %v1251_v10 = vsel %vm15258_vm0, %v1197_v58, 0.0  ;;  %v1200_v35 = vmul.f32 %v9004_v26, %v9004_v26 }
 0x18f   : > { %v1244_v49 = vadd.f32 %v1243_v47, %v1242_v43  ;;  %v1253_v43 = vsel %vm15258_vm0, %v1198_v62, 0.0  ;;  %v1201_v47 = vmul.f32 %v9011_v31, %v9011_v31 }
 0x191   : > { %v1246_v53 = vadd.f32 %v1245_v52, %v1244_v49  ;;  %v1255_v49 = vsel %vm15258_vm0, %v1199_v8, 0.0  ;;  %v1202_v52 = vmul.f32 %v9018_v41, %v9018_v41  ;;  %v1205_v8 = vmul.f32 %v9039_v0, %v9039_v0 }
 0x193   : > { %v1248_v61 = vadd.f32 %v1247_v59, %v1246_v53  ;;  %v1257_v53 = vsel %vm15258_vm0, %v1200_v35, 0.0  ;;  %v1203_v59 = vmul.f32 %v9025_v46, %v9025_v46  ;;  %v1267_v35 = vsel %vm15258_vm0, %v1205_v8, 0.0 }
 0x195   : > { %v1250_v29 = vadd.f32 %v1249_v28, %v1248_v61  ;;  %v1259_v61 = vsel %vm15258_vm0, %v1201_v47, 0.0  ;;  %v1261_v28 = vsel %vm15258_vm0, %v1202_v52, 0.0 }
 0x197   : > { %v1252_v32 = vadd.f32 %v1251_v10, %v1250_v29  ;;  %v1263_v10 = vsel %vm15258_vm0, %v1203_v59, 0.0  ;;  %v3509_v59 = vld [vmem:[%s15204_s3 + $0x118] sm:$0xff] }
 0x198   : > { %7235 = vmatpush.msrb.mxu2 %v3509_v59 }
 0x199   : > { %v1254_v15 = vadd.f32 %v1253_v43, %v1252_v32 }
 0x19b   : > { %v1256_v50 = vadd.f32 %v1255_v49, %v1254_v15 }
 0x19d   : > { %v1258_v58 = vadd.f32 %v1257_v53, %v1256_v50 }
 0x19f   : > { %v1260_v62 = vadd.f32 %v1259_v61, %v1258_v58  ;;  %v3508_v61 = vld [vmem:[%s15204_s3 + $0x110] sm:$0xff] }
 0x1a0   : > { %7236 = vmatpush.msrb.mxu2 %v3508_v61 }
 0x1a1   : > { %v1262_v29 = vadd.f32 %v1261_v28, %v1260_v62 }
 0x1a2   : > { %7237 = vmatpush.msrb.mxu2 %v3507_v16 }
 0x1a3   : > { %v1264_v32 = vadd.f32 %v1263_v10, %v1262_v29  ;;  %v3506_v29 = vld [vmem:[%s15204_s3 + $0x100] sm:$0xff] }
 0x1a4   : > { %7238 = vmatpush.msrb.mxu2 %v3506_v29 }
 0x1a5   : > { %v1266_v12 = vadd.f32 %v1265_v23, %v1264_v32 }
 0x1a7   : > { %v1268_v43 = vadd.f32 %v1267_v35, %v1266_v12 }
 0x1a9   : > { %v1269_v15 = vrot.slane %v1268_v43, 4 }
 0x1ab   : > { %v1270_v47 = vadd.f32 %v1269_v15, %v1268_v43 }
 0x1ad   : > { %v1271_v49 = vrot.slane %v1270_v47, 2 }
 0x1af   : > { %v1272_v50 = vadd.f32 %v1271_v49, %v1270_v47  ;;  %v9071_v47 = vld [vmem:[%s15202_s1] ss:$0 sm:$0xff] }
 0x1b0   : > { %15588 = vst [vmem:[#allocation35_spill] sm:$0xff] %v9071_v47 }
 0x1b1   : > { %v1273_v53 = vrot.slane %v1272_v50, 1 }
 0x1b3   : > { %v1274_v58 = vadd.f32 %v1273_v53, %v1272_v50  ;;  %v9080_v53 = vld [vmem:[%s15203_s2] ss:$0 sm:$0xff] }
 0x1b4   : > { %15589 = vst [vmem:[#allocation36_spill] sm:$0xff] %v9080_v53 }
 0x1b5   : > { %7030 = vmatmul.msk.f32.vlgmr.msra.gmra.mxu2 %vm15258_vm0, %v1274_v58 }
 0x238   : > { %v1295_v52 = vpop.f32.mrf.mxu2 }
 0x239   : > { %7031 = vmatmul.msk.f32.vlgmr.msra.gmra.mxu3 %vm15258_vm0, %v1295_v52 }
 0x2bc   : > { %v1318_v62 = vpop.f32.mrf.mxu3 }
 0x2bd   : > { %v1319_v28 = vadd.f32 1e-05, %v1318_v62 }
 0x2bf   : > { %7928 = vrsqrt.f32 %v1319_v28  ;;  %vm1327_vm11 = vweird.f32 %v1319_v28 }
 0x2c5   : > { %v7929_v8 = vpop.eup %7928 }
 0x2c6   : > { %v1322_v10 = vmul.f32 %v7929_v8, %v1319_v28  ;;  %vm1328_vm10 = vweird.f32 %v7929_v8 }
 0x2c7   : > { %vm1329_vm12 = vmor %vm1327_vm11, %vm1328_vm10 }
 0x2c8   : > { %v1323_v32 = vmul.f32 %v7929_v8, %v1322_v10 }
 0x2ca   : > { %v1324_v23 = vmul.f32 0.5, %v1323_v32 }
 0x2cc   : > { %v1325_v12 = vsub.f32 1.5, %v1324_v23 }
 0x2ce   : > { %v1326_v35 = vmul.f32 %v7929_v8, %v1325_v12 }
 0x2d0   : > { %v1330_v43 = vsel %vm1329_vm12, %v7929_v8, %v1326_v35 }
 0x2d1   : > { %v9066_v15 = vperm.slane %v1330_v43, 0 }
 0x2d3   : > { %15587 = vst [vmem:[#allocation34_spill] sm:$0xff] %v9066_v15  ;;  %v1354_v49 = vmul.f32 %v9066_v15, %v8976_v63  ;;  %v1355_v50 = vmul.f32 %v9066_v15, %v8983_v13  ;;  %v1356_v58 = vmul.f32 %v9066_v15, %v8990_v17  ;;  %v1357_v52 = vmul.f32 %v9066_v15, %v8997_v22 }
 0x2d4   : > { %v1358_v63 = vmul.f32 %v9066_v15, %v9004_v26  ;;  %v1351_v17 = vmul.f32 %v9066_v15, %v8955_v54  ;;  %v1359_v28 = vmul.f32 %v9066_v15, %v9011_v31  ;;  %v1360_v26 = vmul.f32 %v9066_v15, %v9018_v41 }
 0x2d5   : > { %v1389_v59 = vmul.f32 %v9071_v47, %v1354_v49  ;;  %v1390_v61 = vmul.f32 %v9071_v47, %v1355_v50  ;;  %v1391_v13 = vmul.f32 %v9071_v47, %v1356_v58  ;;  %v1392_v22 = vmul.f32 %v9071_v47, %v1357_v52 }
 0x2d6   : > { %v1361_v8 = vmul.f32 %v9066_v15, %v9025_v46  ;;  %v1362_v32 = vmul.f32 %v9066_v15, %v9032_v55  ;;  %v1393_v54 = vmul.f32 %v9071_v47, %v1358_v63  ;;  %v1363_v31 = vmul.f32 %v9066_v15, %v9039_v0 }
 0x2d7   : > { %v9092_v62 = vadd.f32 %v9080_v53, %v1389_v59  ;;  %v9095_v16 = vadd.f32 %v9080_v53, %v1390_v61  ;;  %v9112_v23 = vadd.f32 %v9080_v53, %v1391_v13  ;;  %v9117_v12 = vadd.f32 %v9080_v53, %v1392_v22 }
 0x2d8   : > { %v1386_v41 = vmul.f32 %v9071_v47, %v1351_v17  ;;  %v1394_v46 = vmul.f32 %v9071_v47, %v1359_v28  ;;  %v1352_v55 = vmul.f32 %v9066_v15, %v8962_v57  ;;  %v1353_v35 = vmul.f32 %v9066_v15, %v8969_v60 }
 0x2d9   : > { %v7054_v29 = vmul.f32 -1.442695, %v9092_v62  ;;  %v7055_v10 = vmul.f32 -1.442695, %v9095_v16  ;;  %v1395_v43 = vmul.f32 %v9071_v47, %v1360_v26  ;;  %v1396_v49 = vmul.f32 %v9071_v47, %v1361_v8 }
 0x2da   : > { %v9128_v0 = vadd.f32 %v9080_v53, %v1393_v54  ;;  %v7056_v50 = vmul.f32 -1.442695, %v9112_v23  ;;  %v1397_v58 = vmul.f32 %v9071_v47, %v1362_v32  ;;  %v1398_v52 = vmul.f32 %v9071_v47, %v1363_v31 }
 0x2db   : > { %7930 = vpow2.f32 %v7054_v29  ;;  %v7057_v59 = vmul.f32 -1.442695, %v9117_v12  ;;  %v9135_v57 = vadd.f32 %v9080_v53, %v1386_v41  ;;  %v9138_v60 = vadd.f32 %v9080_v53, %v1394_v46 }
 0x2dc   : > { %7932 = vpow2.f32 %v7055_v10  ;;  %v1332_v63 = vmul.f32 %v9066_v15, %v8830_v14  ;;  %v1387_v17 = vmul.f32 %v9071_v47, %v1352_v55  ;;  %v1388_v22 = vmul.f32 %v9071_v47, %v1353_v35 }
 0x2dd   : > { %15590 = vst [vmem:[#allocation37_spill] sm:$0xff] %v9138_v60  ;;  %v9145_v28 = vadd.f32 %v9080_v53, %v1395_v43  ;;  %v9150_v26 = vadd.f32 %v9080_v53, %v1396_v49  ;;  %v7058_v8 = vmul.f32 -1.442695, %v9128_v0  ;;  %7934 = vpow2.f32 %v7056_v50 }
 0x2de   : > { %v9156_v14 = vadd.f32 %v9080_v53, %v1397_v58  ;;  %v9159_v32 = vadd.f32 %v9080_v53, %v1398_v52  ;;  %7936 = vpow2.f32 %v7057_v59  ;;  %v7051_v54 = vmul.f32 -1.442695, %v9135_v57 }
 0x2df   : > { %15591 = vst [vmem:[#allocation38_spill] sm:$0xff] %v9145_v28  ;;  %v7059_v31 = vmul.f32 -1.442695, %v9138_v60  ;;  %v1367_v41 = vmul.f32 %v9071_v47, %v1332_v63  ;;  %v1333_v46 = vmul.f32 %v9066_v15, %v8834_v19  ;;  %v7060_v55 = vmul.f32 -1.442695, %v9145_v28 }
 0x2e0   : > { %15592 = vst [vmem:[#allocation39_spill] sm:$0xff] %v9150_v26  ;;  %v7061_v35 = vmul.f32 -1.442695, %v9150_v26  ;;  %v7062_v43 = vmul.f32 -1.442695, %v9156_v14  ;;  %v9172_v49 = vadd.f32 %v9080_v53, %v1387_v17  ;;  %v9175_v50 = vadd.f32 %v9080_v53, %v1388_v22 }
 0x2e1   : > { %v7931_v61 = vpop.eup %7930  ;;  %15593 = vst [vmem:[#allocation40_spill] sm:$0xff] %v9156_v14  ;;  %v7063_v52 = vmul.f32 -1.442695, %v9159_v32  ;;  %v9179_v19 = vadd.f32 %v9080_v53, %v1367_v41  ;;  %v1368_v59 = vmul.f32 %v9071_v47, %v1333_v46 }
 0x2e2   : > { %v7933_v13 = vpop.eup %7932  ;;  %v9147_v29 = vadd.f32 1.0, %v7931_v61  ;;  %15594 = vst [vmem:[#allocation41_spill] sm:$0xff] %v9159_v32  ;;  %v7052_v22 = vmul.f32 -1.442695, %v9172_v49 }
 0x2e3   : > { %v9153_v10 = vadd.f32 1.0, %v7933_v13  ;;  %v7935_v58 = vpop.eup %7934  ;;  %v7032_v41 = vmul.f32 -1.442695, %v9179_v19  ;;  %v9190_v46 = vadd.f32 %v9080_v53, %v1368_v59 }
 0x2e4   : > { %7938 = vrcp.f32 %v9147_v29  ;;  %v7937_v61 = vpop.eup %7936  ;;  %vm1897_vm13 = vweird.f32 %v9147_v29  ;;  %v1903_v11 = vand.u32 2147483648, %v9147_v29  ;;  %v9200_v59 = vadd.f32 1.0, %v7935_v58 }
 0x2e5   : > { %7940 = vrcp.f32 %v9153_v10  ;;  %v1916_v56 = vand.u32 2147483647, %v9153_v10  ;;  %vm1912_vm15 = vweird.f32 %v9153_v10  ;;  %v9202_v48 = vadd.f32 1.0, %v7937_v61 }
 0x2e6   : > { %7942 = vpow2.f32 %v7058_v8  ;;  %v9185_v8 = vmul.f32 -1.442695, %v9175_v50  ;;  %v1904_v39 = vor.u32 1.1754944e-38, %v1903_v11 }
 0x2e7   : > { %7944 = vpow2.f32 %v7051_v54  ;;  %vm1917_vm4 = vcmp.eq.f32.partialorder %v1916_v56, 8.507059e+37  ;;  %v1933_v56 = vand.u32 2147483648, %v9200_v59 }
 0x2e8   : > { %7946 = vpow2.f32 %v7059_v31 }
 0x2e9   : > { %7948 = vpow2.f32 %v7060_v55 }
 0x2ea   : > { %v7939_v63 = vpop.eup %7938  ;;  %7950 = vpow2.f32 %v7061_v35 }
 0x2eb   : > { %v7941_v13 = vpop.eup %7940  ;;  %7952 = vpow2.f32 %v7062_v43  ;;  %v1893_v17 = vmul.f32 %v7939_v63, %v9147_v29  ;;  %v1901_v43 = vand.u32 2147483647, %v9147_v29  ;;  %vm1898_vm14 = vweird.f32 %v7939_v63 }
 0x2ec   : > { %v7943_v54 = vpop.eup %7942  ;;  %7954 = vpow2.f32 %v7063_v52  ;;  %v1908_v31 = vmul.f32 %v7941_v13, %v9153_v10  ;;  %v1918_v52 = vand.u32 2147483648, %v9153_v10  ;;  %vm1913_vm1 = vweird.f32 %v7941_v13  ;;  %vm1899_vm3 = vmor %vm1897_vm13, %vm1898_vm14 }
 0x2ed   : > { %v7945_v55 = vpop.eup %7944  ;;  %v1894_v35 = vsub.f32 1.0, %v1893_v17  ;;  %vm1902_vm2 = vcmp.eq.f32.partialorder %v1901_v43, 8.507059e+37  ;;  %vm1914_vm5 = vmor %vm1912_vm15, %vm1913_vm1  ;;  %vm1927_vm13 = vweird.f32 %v9200_v59 }
 0x2ee   : > { %v7947_v37 = vpop.eup %7946  ;;  %v1909_v2 = vsub.f32 1.0, %v1908_v31  ;;  %v9197_v40 = vadd.f32 1.0, %v7945_v55  ;;  %v9205_v55 = vadd.f32 1.0, %v7943_v54  ;;  %v1919_v58 = vor.u32 1.1754944e-38, %v1918_v52 }
 0x2ef   : > { %v7949_v38 = vpop.eup %7948  ;;  %v1895_v34 = vmul.f32 %v7939_v63, %v1894_v35  ;;  %v9209_v33 = vadd.f32 1.0, %v7947_v37 }
 0x2f0   : > { %v7951_v17 = vpop.eup %7950  ;;  %v1910_v4 = vmul.f32 %v7941_v13, %v1909_v2  ;;  %7956 = vrcp.f32 %v9197_v40  ;;  %v9214_v61 = vadd.f32 1.0, %v7949_v38  ;;  %v1856_v43 = vand.u32 2147483647, %v9197_v40 }
 0x2f1   : > { %v7953_v31 = vpop.eup %7952  ;;  %v1896_v42 = vadd.f32 %v7939_v63, %v1895_v34  ;;  %v9216_v34 = vadd.f32 1.0, %v7951_v17  ;;  %7958 = vrcp.f32 %v9200_v59  ;;  %v1963_v52 = vand.u32 2147483648, %v9205_v55 }
 0x2f2   : > { %v7955_v36 = vpop.eup %7954  ;;  %v1911_v35 = vadd.f32 %v7941_v13, %v1910_v4  ;;  %7960 = vrcp.f32 %v9202_v48  ;;  %v9225_v10 = vadd.f32 1.0, %v7953_v31  ;;  %vm1852_vm6 = vweird.f32 %v9197_v40 }
 0x2f3   : > { %v1900_v2 = vsel %vm1899_vm3, %v7939_v63, %v1896_v42  ;;  %7962 = vrcp.f32 %v9205_v55  ;;  %vm9253_vm8 = vcmp.eq.f32.partialorder %v1856_v43, 8.507059e+37  ;;  %vm15637_vm15 = vweird.f32 %v9205_v55 }
 0x2f4   : > { %v1905_v11 = vsel %vm1902_vm2, %v1904_v39, %v1900_v2  ;;  %v1915_v54 = vsel %vm1914_vm5, %v7941_v13, %v1911_v35  ;;  %7964 = vpow2.f32 %v7032_v41  ;;  %v9229_v39 = vadd.f32 1.0, %v7955_v36 }
 0x2f5   : > { %v1920_v4 = vsel %vm1917_vm4, %v1919_v58, %v1915_v54  ;;  %v2064_v37 = vmul.f32 %v1905_v11, %v9092_v62  ;;  %v1948_v62 = vand.u32 2147483648, %v9202_v48  ;;  %7966 = vpow2.f32 %v7052_v22 }
 0x2f6   : > { %v7957_v42 = vpop.eup %7956  ;;  %v2065_v38 = vmul.f32 %v1920_v4, %v9095_v16  ;;  %7968 = vpow2.f32 %v9185_v8  ;;  %v1858_v36 = vand.u32 2147483648, %v9197_v40  ;;  %v1978_v35 = vand.u32 2147483648, %v9209_v33 }
 0x2f7   : > { %2102 = vst.msk [vmem:[#allocation2 + $0xc8] sm:$0xff] %vm15258_vm0, %v2064_v37  ;;  %v1848_v13 = vmul.f32 %v7957_v42, %v9197_v40  ;;  %v9238_v41 = vpop.eup %7958  ;;  %7970 = vrcp.f32 %v9209_v33  ;;  %v1993_v2 = vand.u32 2147483648, %v9214_v61  ;;  %vm1853_vm7 = vweird.f32 %v7957_v42 }
 0x2f8   : > { %2103 = vst.msk [vmem:[#allocation2 + $0xd0] sm:$0xff] %vm15258_vm0, %v2065_v38  ;;  %v9243_v22 = vpop.eup %7960  ;;  %7972 = vrcp.f32 %v9214_v61  ;;  %v2008_v38 = vand.u32 2147483648, %v9216_v34  ;;  %v1859_v31 = vor.u32 1.1754944e-38, %v1858_v36  ;;  %vm1854_vm9 = vmor %vm1852_vm6, %vm1853_vm7  ;;  %v9291_v36 = vor.u32 1.1754944e-38, %v1933_v56 }
 0x2f9   : > { %v1849_v17 = vsub.f32 1.0, %v1848_v13  ;;  %v9249_v8 = vpop.eup %7962  ;;  %7974 = vrcp.f32 %v9216_v34  ;;  %v9295_v43 = vmul.f32 %v9243_v22, %v9202_v48  ;;  %v9297_v4 = vor.u32 1.1754944e-38, %v1948_v62 }
 0x2fa   : > { %v7965_v54 = vpop.eup %7964  ;;  %7976 = vrcp.f32 %v9225_v10  ;;  %v9310_v62 = vmul.f32 %v9249_v8, %v9205_v55  ;;  %vm1928_vm10 = vweird.f32 %v9238_v41  ;;  %v9327_v3 = vor.u32 1.1754944e-38, %v1993_v2 }
 0x2fb   : > { %v1850_v11 = vmul.f32 %v7957_v42, %v1849_v17  ;;  %v7967_v13 = vpop.eup %7966  ;;  %v9261_v40 = vadd.f32 1.0, %v7965_v54  ;;  %7978 = vrcp.f32 %v9229_v39  ;;  %v1939_v26 = vsub.f32 1.0, %v9295_v43 }
 0x2fc   : > { %v7969_v16 = vpop.eup %7968  ;;  %v9266_v37 = vadd.f32 1.0, %v7967_v13  ;;  %vm15636_vm4 = vweird.f32 %v9249_v8 }
 0x2fd   : > { %v1851_v58 = vadd.f32 %v7957_v42, %v1850_v11  ;;  %v9268_v29 = vpop.eup %7970  ;;  %v9273_v17 = vadd.f32 1.0, %v7969_v16  ;;  %7980 = vrcp.f32 %v9261_v40  ;;  %v1573_v63 = vand.u32 2147483648, %v9261_v40 }
 0x2fe   : > { %v9276_v54 = vpop.eup %7972  ;;  %7982 = vrcp.f32 %v9266_v37  ;;  %v1873_v27 = vand.u32 2147483648, %v9266_v37  ;;  %v9319_v51 = vmul.f32 %v9268_v29, %v9209_v33  ;;  %vm1567_vm11 = vweird.f32 %v9261_v40 }
 0x2ff   : > { %v9270_v30 = vld [vmem:[#allocation2 + $0xc9] sm:$0xff]  ;;  %v1855_v11 = vsel %vm1854_vm9, %v7957_v42, %v1851_v58  ;;  %v9286_v42 = vmul.f32 %v9238_v41, %v9200_v59  ;;  %v9288_v16 = vpop.eup %7974  ;;  %7984 = vrcp.f32 %v9273_v17  ;;  %v1888_v56 = vand.u32 2147483648, %v9273_v17 }
 0x300   : > { %15597 = vst [vmem:[#allocation42_spill] sm:$0xff] %v9270_v30  ;;  %7084 = vmatmul.msk.f32.vlgmr.msrb.gmra.mxu2 %vm15258_vm0, %v9270_v30  ;;  %v1860_v13 = vsel %vm9253_vm8, %v1859_v31, %v1855_v11  ;;  %v9299_v31 = vpop.eup %7976  ;;  %v1571_v11 = vand.u32 2147483647, %v9261_v40  ;;  %v9321_v30 = vor.u32 1.1754944e-38, %v1978_v35  ;;  %vm1867_vm12 = vweird.f32 %v9266_v37 }
 0x301   : > { %v2061_v58 = vmul.f32 %v1860_v13, %v9135_v57  ;;  %v1871_v57 = vand.u32 2147483647, %v9266_v37  ;;  %v9312_v13 = vor.u32 1.1754944e-38, %v1963_v52  ;;  %v9314_v45 = vpop.eup %7978  ;;  %v1886_v52 = vand.u32 2147483647, %v9273_v17 }
 0x302   : > { %v9336_v24 = vmul.f32 %v9288_v16, %v9216_v34  ;;  %vm9343_vm14 = vcmp.eq.f32.partialorder %v1571_v11, 8.507059e+37  ;;  %v1574_v18 = vor.u32 1.1754944e-38, %v1573_v63  ;;  %v9347_v53 = vor.u32 1.1754944e-38, %v1873_v27 }
 0x303   : > { %2099 = vst.msk [vmem:[#allocation2 + $0xb0] sm:$0xff] %vm15258_vm0, %v2061_v58  ;;  %v9325_v58 = vmul.f32 %v9276_v54, %v9214_v61  ;;  %v9329_v5 = vpop.eup %7980  ;;  %vm9352_vm1 = vcmp.eq.f32.partialorder %v1871_v57, 8.507059e+37  ;;  %vm1882_vm2 = vweird.f32 %v9273_v17  ;;  %v9357_v47 = vor.u32 1.1754944e-38, %v1888_v56 }
 0x304   : > { %v9338_v35 = vpop.eup %7982  ;;  %v1563_v2 = vmul.f32 %v9329_v5, %v9261_v40  ;;  %v9360_v11 = vor.u32 1.1754944e-38, %v2008_v38  ;;  %v9364_v27 = vmul.f32 %v9299_v31, %v9225_v10  ;;  %vm1568_vm5 = vweird.f32 %v9329_v5 }
 0x305   : > { %v1863_v44 = vmul.f32 %v9338_v35, %v9266_v37  ;;  %v9366_v63 = vpop.eup %7984  ;;  %vm1868_vm6 = vweird.f32 %v9338_v35  ;;  %v9374_v38 = vmul.f32 %v9314_v45, %v9229_v39  ;;  %vm9379_vm9 = vcmp.eq.f32.partialorder %v1886_v52, 8.507059e+37  ;;  %vm1569_vm7 = vmor %vm1567_vm11, %vm1568_vm5 }
 0x306   : > { %v1564_v57 = vsub.f32 1.0, %v1563_v2  ;;  %v1878_v25 = vmul.f32 %v9366_v63, %v9273_v17  ;;  %v1924_v20 = vsub.f32 1.0, %v9286_v42  ;;  %vm1883_vm8 = vweird.f32 %v9366_v63  ;;  %vm1869_vm3 = vmor %vm1867_vm12, %vm1868_vm6 }
 0x307   : > { %v1864_v56 = vsub.f32 1.0, %v1863_v44  ;;  %v15604_v44 = vand.u32 2147483647, %v9200_v59  ;;  %v1954_v2 = vsub.f32 1.0, %v9310_v62  ;;  %v1969_v60 = vsub.f32 1.0, %v9319_v51 }
 0x308   : > { %v1565_v14 = vmul.f32 %v9329_v5, %v1564_v57  ;;  %v1879_v57 = vsub.f32 1.0, %v1878_v25  ;;  %v1984_v43 = vsub.f32 1.0, %v9325_v58  ;;  %v1999_v62 = vsub.f32 1.0, %v9336_v24 }
 0x309   : > { %vm9391_vm0 = vcmp.eq.f32.partialorder %v15604_v44, 8.507059e+37  ;;  %v1865_v28 = vmul.f32 %v9338_v35, %v1864_v56  ;;  %v1925_v24 = vmul.f32 %v9238_v41, %v1924_v20  ;;  %v2029_v40 = vsub.f32 1.0, %v9374_v38 }
 0x30a   : > { %v2261_v32 = vld [vmem:[#allocation2 + $0xb0] sm:$0xff]  ;;  %v1566_v44 = vadd.f32 %v9329_v5, %v1565_v14  ;;  %v1880_v51 = vmul.f32 %v9366_v63, %v1879_v57  ;;  %v9417_v14 = vadd.s32 168, %v8565_v1  ;;  %v1955_v58 = vmul.f32 %v9249_v8, %v1954_v2 }
 0x30b   : > { %v7301_v42 = vpack.i.bf16 %v2261_v32, %v2240_v7  ;;  %v2014_v7 = vsub.f32 1.0, %v9364_v27  ;;  %v1866_v25 = vadd.f32 %v9338_v35, %v1865_v28  ;;  %v1940_v28 = vmul.f32 %v9243_v22, %v1939_v26 }
 0x30c   : > { %v1570_v32 = vsel %vm1569_vm7, %v9329_v5, %v1566_v44  ;;  %v15607_v27 = vand.u32 15, %v8580_v6  ;;  %v15608_v56 = vmov 0  ;;  %v1881_v37 = vadd.f32 %v9366_v63, %v1880_v51 }
 0x30d   : > { %7302 = vrot.lane.b32.xlu0 %v7301_v42, %s8451_s24  ;;  %v1575_v5 = vsel %vm9343_vm14, %v1574_v18, %v1570_v32  ;;  %v1870_v20 = vsel %vm1869_vm3, %v9338_v35, %v1866_v25  ;;  %v15611_v42 = vand.u32 2147483647, %v9202_v48  ;;  %v15614_v26 = vand.u32 2147483647, %v9205_v55  ;;  %vm9455_vm14 = vmor %vm1927_vm13, %vm1928_vm10 }
 0x30e   : > { %vm9431_vm11 = vcmp.le.s32.totalorder %v15607_v27, 14  ;;  %v1970_v21 = vmul.f32 %v9268_v29, %v1969_v60  ;;  %v1875_v35 = vsel %vm9352_vm1, %v9347_v53, %v1870_v20  ;;  %vm1884_vm3 = vmor %vm1882_vm2, %vm1883_vm8  ;;  %v2042_v57 = vmul.f32 %v1575_v5, %v9179_v19 }
 0x30f   : > { %v15609_v56 = vsel %vm9431_vm11, 4294967295, %v15608_v56  ;;  %vm9441_vm12 = vcmp.eq.f32.partialorder %v15611_v42, 8.507059e+37  ;;  %vm9447_vm5 = vcmp.eq.f32.partialorder %v15614_v26, 8.507059e+37  ;;  %v15619_v44 = vand.u32 2147483647, %v9209_v33 }
 0x310   : > { %15610 = vst [vmem:[#allocation43_spill] sm:$0xff] %v15609_v56  ;;  %v15622_v25 = vand.u32 2147483647, %v9214_v61  ;;  %v1926_v9 = vadd.f32 %v9238_v41, %v1925_v24  ;;  %v1985_v53 = vmul.f32 %v9276_v54, %v1984_v43  ;;  %v1885_v17 = vsel %vm1884_vm3, %v9366_v63, %v1881_v37 }
 0x311   : > { %vm9470_vm6 = vcmp.eq.f32.partialorder %v15619_v44, 8.507059e+37  ;;  %v2062_v19 = vmul.f32 %v1875_v35, %v9172_v49  ;;  %v15625_v51 = vand.u32 2147483647, %v9216_v34  ;;  %v15626_v32 = vmov 0 }
 0x312   : > { %vm9476_vm10 = vcmp.eq.f32.partialorder %v15622_v25, 8.507059e+37  ;;  %v15628_v27 = vand.u32 2147483647, %v9225_v10  ;;  %v15629_v5 = vmov 0  ;;  %vm15631_vm2 = vweird.f32 %v9243_v22 }
 0x313   : > { %vm9486_vm13 = vcmp.eq.f32.partialorder %v15625_v51, 8.507059e+37  ;;  %vm15632_vm7 = vweird.f32 %v9202_v48  ;;  %v601_v49 = vand.u32 15, %v9417_v14  ;;  %v2000_v43 = vmul.f32 %v9288_v16, %v1999_v62  ;;  %v2272_v51 = vld [vmem:[#allocation2 + $0x9] sm:$0xff] }
 0x314   : > { %v15627_v32 = vsel %vm9486_vm13, 4294967295, %v15626_v32  ;;  %vm9492_vm1 = vcmp.eq.f32.partialorder %v15628_v27, 8.507059e+37  ;;  %vm9500_vm8 = vmor %vm15632_vm7, %vm15631_vm2  ;;  %v1890_v24 = vsel %vm9379_vm9, %v9357_v47, %v1885_v17  ;;  %vm15635_vm3 = vcmask 261120  }
 0x315   : > { %v15630_v5 = vsel %vm9492_vm1, 4294967295, %v15629_v5  ;;  %2080 = vst.msk [vmem:[#allocation2 + $0x18] sm:$0xff] %vm15635_vm3, %v2042_v57  ;;  %vm9514_vm1 = vmor %vm15637_vm15, %vm15636_vm4  ;;  %v1930_v14 = vsel %vm9455_vm14, %v9238_v41, %v1926_v9  ;;  %v2015_v62 = vmul.f32 %v9299_v31, %v2014_v7  ;;  %v2030_v20 = vmul.f32 %v9314_v45, %v2029_v40 }
 0x316   : > { %v2063_v15 = vmul.f32 %v1890_v24, %v9175_v50  ;;  %vm15640_vm9 = vmmov %vm15635_vm3  ;;  %vm15641_vm2 = vweird.f32 %v9268_v29  ;;  %vm15642_vm7 = vweird.f32 %v9209_v33  ;;  %v1935_v55 = vsel %vm9391_vm0, %v9291_v36, %v1930_v14  ;;  %v15675_v24 = vld [vmem:[#allocation37_spill] sm:$0xff]  ;;  %v15676_v14 = vld [vmem:[#allocation38_spill] sm:$0xff] }
 0x317   : > { %2100 = vst.msk [vmem:[#allocation2 + $0xb8] sm:$0xff] %vm15640_vm9, %v2062_v19  ;;  %vm9529_vm15 = vmor %vm15642_vm7, %vm15641_vm2  ;;  %v1941_v41 = vadd.f32 %v9243_v22, %v1940_v28  ;;  %v1956_v7 = vadd.f32 %v9249_v8, %v1955_v58  ;;  %vm15645_vm4 = vweird.f32 %v9276_v54  ;;  %vm15646_vm14 = vweird.f32 %v9214_v61 }
 0x318   : > { %vm9542_vm3 = vmor %vm15646_vm14, %vm15645_vm4  ;;  %v2066_v33 = vmul.f32 %v1935_v55, %v9112_v23  ;;  %v1971_v40 = vadd.f32 %v9268_v29, %v1970_v21  ;;  %v1986_v37 = vadd.f32 %v9276_v54, %v1985_v53  ;;  %v2001_v36 = vadd.f32 %v9288_v16, %v2000_v43  ;;  %v15679_v55 = vld [vmem:[#allocation40_spill] sm:$0xff] }
 0x319   : > { %vm15649_vm0 = vmmov %vm15640_vm9  ;;  %v15650_v52 = vand.u32 2147483648, %v9225_v10  ;;  %vm15651_vm9 = vweird.f32 %v9288_v16  ;;  %vm15652_vm2 = vweird.f32 %v9216_v34  ;;  %v2016_v23 = vadd.f32 %v9299_v31, %v2015_v62 }
 0x31a   : > { %2101 = vst.msk [vmem:[#allocation2 + $0xc0] sm:$0xff] %vm15649_vm0, %v2063_v15  ;;  %vm9557_vm7 = vmor %vm15652_vm2, %vm15651_vm9  ;;  %v2031_v58 = vadd.f32 %v9314_v45, %v2030_v20  ;;  %v7033_v42 = vmul.f32 -1.442695, %v9190_v46  ;;  %vm15655_vm4 = vweird.f32 %v9299_v31  ;;  %vm15656_vm14 = vweird.f32 %v9225_v10  ;;  %v15678_v15 = vld [vmem:[#allocation39_spill] sm:$0xff] }
 0x31b   : > { %v2024_v28 = vor.u32 1.1754944e-38, %v15650_v52  ;;  %vm9568_vm0 = vmor %vm15656_vm14, %vm15655_vm4  ;;  %vm15659_vm13 = vcmask 261120   ;;  %v1945_v34 = vsel %vm9500_vm8, %v9243_v22, %v1941_v41  ;;  %v1960_v18 = vsel %vm9514_vm1, %v9249_v8, %v1956_v7  ;;  %v15680_v7 = vld [vmem:[#allocation41_spill] sm:$0xff] }
 0x31c   : > { %2104 = vst.msk [vmem:[#allocation2 + $0xd8] sm:$0xff] %vm15659_vm13, %v2066_v33  ;;  %v1975_v21 = vsel %vm9529_vm15, %v9268_v29, %v1971_v40  ;;  %v1990_v10 = vsel %vm9542_vm3, %v9276_v54, %v1986_v37  ;;  %v15660_v35 = vand.u32 15, %v8565_v1  ;;  %v15661_v57 = vmov 0  ;;  %v2273_v9 = vld [vmem:[#allocation2 + $0x11] sm:$0xff] }
 0x31d   : > { %vm15664_vm13 = vweird.f32 %v9314_v45  ;;  %vm15665_vm8 = vweird.f32 %v9229_v39  ;;  %7986 = vpow2.f32 %v7033_v42  ;;  %v2005_v29 = vsel %vm9557_vm7, %v9288_v16, %v2001_v36  ;;  %v2114_v19 = vld [vmem:[#allocation2 + $0x17] sm:$0xff] }
 0x31e   : > { %vm9587_vm9 = vcmp.ge.s32.totalorder %v15660_v35, 1  ;;  %vm9595_vm2 = vmor %vm15665_vm8, %vm15664_vm13  ;;  %v2020_v8 = vsel %vm9568_vm0, %v9299_v31, %v2016_v23  ;;  %vm9605_vm1 = vcmp.le.s32.totalorder %v601_v49, 14  ;;  %v15668_v54 = vmov 0  ;;  %v2293_v2 = vld [vmem:[#allocation2 + $0xb1] sm:$0xff]  ;;  %v15691_v35 = vld [vmem:[#allocation20_spill] sm:$0xff] }
 0x31f   : > { %v15662_v57 = vsel %vm9587_vm9, 4294967295, %v15661_v57  ;;  %v15669_v54 = vsel %vm9605_vm1, 4294967295, %v15668_v54  ;;  %v2035_v44 = vsel %vm9595_vm2, %v9314_v45, %v2031_v58  ;;  %v1950_v25 = vsel %vm9441_vm12, %v9297_v4, %v1945_v34  ;;  %v15683_v33 = vld [vmem:[#allocation17_spill] sm:$0xff]  ;;  %v15684_v40 = vld [vmem:[#allocation34_spill] sm:$0xff]  ;;  %v15690_v34 = vld [vmem:[#allocation35_spill] sm:$0xff] }
 0x320   : > { %15663 = vst [vmem:[#allocation44_spill] sm:$0xff] %v15662_v57  ;;  %v1965_v16 = vsel %vm9447_vm5, %v9312_v13, %v1960_v18  ;;  %v15671_v53 = vand.u32 2147483647, %v9229_v39  ;;  %v15672_v31 = vand.u32 2147483648, %v9229_v39  ;;  %v1980_v45 = vsel %vm9470_vm6, %v9321_v30, %v1975_v21  ;;  %v15685_v36 = vld [vmem:[#allocation18_spill] sm:$0xff]  ;;  %v2241_v23 = vld [vmem:[#allocation2 + $0x10] sm:$0xff] }
 0x321   : > { %15670 = vst [vmem:[#allocation45_spill] sm:$0xff] %v15669_v54  ;;  %v1995_v4 = vsel %vm9476_vm10, %v9327_v3, %v1990_v10  ;;  %v2369_v13 = vsel %vm9431_vm11, %v2273_v9, 0.0  ;;  %v2402_v38 = vsel %vm9587_vm9, %v2114_v19, 0.0  ;;  %vm15673_vm12 = vnez %v15627_v32  ;;  %v2294_v63 = vld [vmem:[#allocation2 + $0xb9] sm:$0xff] }
 0x322   : > { %vm2037_vm15 = vcmp.eq.f32.partialorder %v15671_v53, 8.507059e+37  ;;  %v2039_v17 = vor.u32 1.1754944e-38, %v15672_v31  ;;  %v2010_v39 = vsel %vm15673_vm12, %v9360_v11, %v2005_v29  ;;  %vm15674_vm5 = vnez %v15630_v5  ;;  %v2135_v49 = vld [vmem:[#allocation2 + $0xbf] sm:$0xff]  ;;  %v15693_v29 = vld [vmem:[#allocation21_spill] sm:$0xff] }
 0x323   : > { %v2025_v27 = vsel %vm15674_vm5, %v2024_v28, %v2020_v8  ;;  %v2389_v30 = vsel %vm9605_vm1, %v2293_v2, 0.0  ;;  %v2067_v3 = vmul.f32 %v1950_v25, %v9117_v12  ;;  %v2068_v60 = vmul.f32 %v1965_v16, %v9128_v0  ;;  %v7987_v32 = vpop.eup %7986  ;;  %v9643_v5 = vld [vmem:[#allocation2 + $0xd1] sm:$0xff]  ;;  %v15686_v28 = vld [vmem:[#allocation19_spill] sm:$0xff] }
 0x324   : > { %v2040_v59 = vsel %vm2037_vm15, %v2039_v17, %v2035_v44  ;;  %v7306_v43 = vpack.i.bf16 %v2389_v30, %v2272_v51  ;;  %v2069_v48 = vmul.f32 %v1980_v45, %v15675_v24  ;;  %v2070_v62 = vmul.f32 %v1995_v4, %v15676_v14  ;;  %v2262_v58 = vld [vmem:[#allocation2 + $0xb8] sm:$0xff]  ;;  %v2263_v26 = vld [vmem:[#allocation2 + $0xc0] sm:$0xff]  ;;  %v15695_v44 = vld [vmem:[#allocation36_spill] sm:$0xff] }
 0x325   : > { %v7371_v11 = vpack.i.bf16 %v2294_v63, %v2369_v13  ;;  %v7311_v20 = vpack.i.bf16 %v2135_v49, %v2402_v38  ;;  %vm15677_vm6 = vcmask 261120   ;;  %v2071_v47 = vmul.f32 %v2010_v39, %v15678_v15  ;;  %v2242_v42 = vld [vmem:[#allocation2 + $0x18] sm:$0xff] }
 0x326   : > { %2105 = vst.msk [vmem:[#allocation2 + $0xe0] sm:$0xff] %vm15677_vm6, %v2067_v3  ;;  %v2529_v12 = vsel %vm9605_vm1, %v9643_v5, 0.0  ;;  %7307 = vrot.lane.b32.xlu0 %v7306_v43, %s8452_s25  ;;  %v9651_v0 = vadd.f32 1.0, %v7987_v32  ;;  %v2072_v41 = vmul.f32 %v2025_v27, %v15679_v55  ;;  %v2073_v50 = vmul.f32 %v2040_v59, %v15680_v7  ;;  %vm15681_vm10 = vmmov %vm15677_vm6 }
 0x327   : > { %2106 = vst.msk [vmem:[#allocation2 + $0xe8] sm:$0xff] %vm15681_vm10, %v2068_v60  ;;  %7372 = vrot.lane.b32.xlu2 %v7371_v11, %s8452_s25  ;;  %7312 = vrot.lane.b32.xlu1 %v7311_v20, %s8453_s29  ;;  %vm15682_vm3 = vmmov %vm15677_vm6  ;;  %v1334_v37 = vmul.f32 %v15684_v40, %v15683_v33  ;;  %v1335_v52 = vmul.f32 %v15684_v40, %v15685_v36  ;;  %v441_v30 = vadd.s32 184, %v8565_v1  ;;  %v440_v59 = vadd.s32 176, %v8565_v1 }
 0x328   : > { %2107 = vst.msk [vmem:[#allocation2 + $0xf0] sm:$0xff] %vm15682_vm3, %v2069_v48  ;;  %v1336_v61 = vmul.f32 %v15684_v40, %v15686_v28  ;;  %vm15687_vm7 = vmmov %vm15682_vm3  ;;  %7988 = vrcp.f32 %v9651_v0  ;;  %v1337_v22 = vmul.f32 %v15684_v40, %v15691_v35  ;;  %v1338_v8 = vmul.f32 %v15684_v40, %v15693_v29  ;;  %v15697_v48 = vld [vmem:[#allocation22_spill] sm:$0xff] }
 0x329   : > { %7085 = vmatmul.msk.f32.gmra.mxu2 %vm15687_vm7, %v2529_v12  ;;  %vm15688_vm4 = vmmov %vm15682_vm3  ;;  %v1369_v18 = vmul.f32 %v15690_v34, %v1334_v37  ;;  %v1370_v21 = vmul.f32 %v15690_v34, %v1335_v52  ;;  %v7316_v31 = vpack.i.bf16 %v2262_v58, %v2241_v23  ;;  %v7321_v17 = vpack.i.bf16 %v2263_v26, %v2242_v42  ;;  %v15703_v23 = vld [vmem:[#allocation24_spill] sm:$0xff] }
 0x32a   : > { %2108 = vst.msk [vmem:[#allocation2 + $0xf8] sm:$0xff] %vm15688_vm4, %v2070_v62  ;;  %vm15689_vm14 = vmmov %vm15682_vm3  ;;  %v1371_v10 = vmul.f32 %v15690_v34, %v1336_v61  ;;  %v1372_v53 = vmul.f32 %v15690_v34, %v1337_v22  ;;  %v1373_v19 = vmul.f32 %v15690_v34, %v1338_v8  ;;  %v1586_v3 = vand.u32 2147483647, %v9651_v0  ;;  %v15707_v22 = vld [vmem:[#allocation11_spill] sm:$0xff] }
 0x32b   : > { %2109 = vst.msk [vmem:[#allocation2 + $0x100] sm:$0xff] %vm15689_vm14, %v2071_v47  ;;  %vm15692_vm0 = vmmov %vm15682_vm3  ;;  %v9679_v25 = vadd.f32 %v15695_v44, %v1369_v18  ;;  %v9682_v16 = vadd.f32 %v15695_v44, %v1370_v21  ;;  %v1588_v49 = vand.u32 2147483648, %v9651_v0  ;;  %v615_v43 = vand.u32 15, %v441_v30  ;;  %v2136_v18 = vld [vmem:[#allocation2 + $0xc7] sm:$0xff] }
 0x32c   : > { %2110 = vst.msk [vmem:[#allocation2 + $0x108] sm:$0xff] %vm15692_vm0, %v2072_v41  ;;  %vm15694_vm13 = vmmov %vm15692_vm0  ;;  %v9685_v9 = vadd.f32 %v15695_v44, %v1371_v10  ;;  %v9693_v13 = vadd.f32 %v15695_v44, %v1372_v53  ;;  %v9697_v2 = vadd.f32 %v15695_v44, %v1373_v19  ;;  %v1339_v14 = vmul.f32 %v15684_v40, %v15697_v48  ;;  %v2295_v8 = vld [vmem:[#allocation2 + $0xc1] sm:$0xff] }
 0x32d   : > { %2111 = vst.msk [vmem:[#allocation2 + $0x110] sm:$0xff] %vm15694_vm13, %v2073_v50  ;;  %v7034_v51 = vmul.f32 -1.442695, %v9679_v25  ;;  %v7035_v45 = vmul.f32 -1.442695, %v9682_v16  ;;  %v9701_v27 = vld [vmem:[#allocation2 + $0xd9] sm:$0xff]  ;;  %vm15696_vm8 = vmmov %vm15692_vm0  ;;  %vm1582_vm12 = vweird.f32 %v9651_v0  ;;  %v1341_v58 = vmul.f32 %v15684_v40, %v15703_v23 }
 0x32e   : > { %v7036_v4 = vmul.f32 -1.442695, %v9685_v9  ;;  %v7989_v38 = vpop.eup %7988  ;;  %7322 = vrot.lane.b32.xlu0 %v7321_v17, %s8451_s24  ;;  %v7037_v60 = vmul.f32 -1.442695, %v9693_v13  ;;  %v7038_v24 = vmul.f32 -1.442695, %v9697_v2  ;;  %v1374_v7 = vmul.f32 %v15690_v34, %v1339_v14  ;;  %vm15702_vm10 = vmmov %vm15692_vm0 }
 0x32f   : > { %v1578_v39 = vmul.f32 %v7989_v38, %v9651_v0  ;;  %7317 = vrot.lane.b32.xlu1 %v7316_v31, %s8451_s24  ;;  %7990 = vpow2.f32 %v7034_v51  ;;  %vm1583_vm2 = vweird.f32 %v7989_v38  ;;  %v608_v32 = vand.u32 15, %v440_v59  ;;  %v9717_v20 = vld [vmem:[#allocation2 + $0xe1] sm:$0xff]  ;;  %vm15708_vm7 = vmmov %vm15692_vm0 }
 0x330   : > { %7992 = vpow2.f32 %v7035_v45  ;;  %vm9713_vm15 = vcmp.le.s32.totalorder %v615_v43, 14  ;;  %v15698_v11 = vmov 0  ;;  %vm1587_vm5 = vcmp.eq.f32.partialorder %v1586_v3, 8.507059e+37  ;;  %vm1584_vm6 = vmor %vm1582_vm12, %vm1583_vm2  ;;  %v15701_v50 = vld [vmem:[#allocation23_spill] sm:$0xff] }
 0x331   : > { %7086 = vmatmul.msk.f32.gmra.mxu2 %vm15696_vm8, %v9701_v27  ;;  %v1579_v63 = vsub.f32 1.0, %v1578_v39  ;;  %7994 = vpow2.f32 %v7036_v4  ;;  %v15699_v11 = vsel %vm9713_vm15, 4294967295, %v15698_v11  ;;  %v1589_v12 = vor.u32 1.1754944e-38, %v1588_v49  ;;  %v15709_v4 = vld [vmem:[#allocation9_spill] sm:$0xff]  ;;  %vm15715_vm8 = vmmov %vm15708_vm7 }
 0x332   : > { %15700 = vst [vmem:[#allocation37_spill] sm:$0xff] %v15699_v11  ;;  %7996 = vpow2.f32 %v7037_v60  ;;  %v1340_v33 = vmul.f32 %v15684_v40, %v15701_v50  ;;  %v2531_v52 = vsel %vm9713_vm15, %v9717_v20, 0.0  ;;  %v443_v0 = vadd.s32 200, %v8565_v1 }
 0x333   : > { %v1580_v62 = vmul.f32 %v7989_v38, %v1579_v63  ;;  %7998 = vpow2.f32 %v7038_v24  ;;  %vm9735_vm3 = vcmp.ge.s32.totalorder %v608_v32, 1  ;;  %v15704_v42 = vmov 0  ;;  %v9775_v24 = vld [vmem:[#allocation2 + $0xe9] sm:$0xff] }
 0x334   : > { %v15705_v42 = vsel %vm9735_vm3, 4294967295, %v15704_v42  ;;  %v9744_v35 = vadd.f32 %v15695_v44, %v1374_v7  ;;  %v468_v29 = vand.u32 15, %v15707_v22  ;;  %v629_v53 = vand.u32 15, %v443_v0  ;;  %v2264_v32 = vld [vmem:[#allocation2 + $0xc8] sm:$0xff] }
 0x335   : > { %v7991_v15 = vpop.eup %7990  ;;  %v1581_v47 = vadd.f32 %v7989_v38, %v1580_v62  ;;  %15706 = vst [vmem:[#allocation38_spill] sm:$0xff] %v15705_v42  ;;  %v1375_v31 = vmul.f32 %v15690_v34, %v1340_v33  ;;  %v9754_v51 = vmul.f32 %v15690_v34, %v1341_v58  ;;  %v9757_v45 = vadd.s32 192, %v8565_v1 }
 0x336   : > { %v7993_v55 = vpop.eup %7992  ;;  %v9720_v41 = vadd.f32 1.0, %v7991_v15  ;;  %v9761_v39 = vadd.s32 208, %v8565_v1  ;;  %v2391_v60 = vsel %vm9713_vm15, %v2295_v8, 0.0  ;;  %v9771_v34 = vmul.f32 -1.442695, %v9744_v35 }
 0x337   : > { %v7995_v37 = vpop.eup %7994  ;;  %v1585_v36 = vsel %vm1584_vm6, %v7989_v38, %v1581_v47  ;;  %v9728_v28 = vadd.f32 1.0, %v7993_v55  ;;  %v475_v38 = vand.u32 15, %v15709_v4  ;;  %vm9777_vm14 = vcmp.le.s32.totalorder %v629_v53, 14  ;;  %v9792_v47 = vld [vmem:[#allocation2 + $0xf1] sm:$0xff] }
 0x338   : > { %v1590_v61 = vsel %vm1587_vm5, %v1589_v12, %v1585_v36  ;;  %8000 = vrcp.f32 %v9720_v41  ;;  %v7997_v21 = vpop.eup %7996  ;;  %v9741_v10 = vadd.f32 1.0, %v7995_v37  ;;  %v1601_v19 = vand.u32 2147483647, %v9720_v41 }
 0x339   : > { %7087 = vmatmul.msk.f32.gmra.mxu2 %vm15702_vm10, %v2531_v52  ;;  %v2043_v26 = vmul.f32 %v1590_v61, %v9190_v46  ;;  %8002 = vrcp.f32 %v9728_v28  ;;  %v7999_v17 = vpop.eup %7998  ;;  %v2424_v46 = vsel %vm9735_vm3, %v2136_v18, 0.0  ;;  %v9763_v30 = vadd.f32 1.0, %v7997_v21 }
 0x33a   : > { %8004 = vrcp.f32 %v9741_v10  ;;  %v1603_v3 = vand.u32 2147483648, %v9720_v41  ;;  %v9768_v63 = vadd.f32 1.0, %v7999_v17  ;;  %vm1597_vm4 = vweird.f32 %v9720_v41 }
 0x33b   : > { %2081 = vst.msk [vmem:[#allocation2 + $0x20] sm:$0xff] %vm15708_vm7, %v2043_v26  ;;  %v15710_v48 = vmov 0  ;;  %v9782_v14 = vadd.f32 %v15695_v44, %v1375_v31  ;;  %vm9784_vm0 = vcmp.eq.f32.partialorder %v1601_v19, 8.507059e+37  ;;  %vm1612_vm13 = vweird.f32 %v9728_v28 }
 0x33c   : > { %v15711_v48 = vsel %vm9777_vm14, 4294967295, %v15710_v48  ;;  %8006 = vrcp.f32 %v9763_v30  ;;  %v1616_v44 = vand.u32 2147483647, %v9728_v28  ;;  %v1618_v55 = vand.u32 2147483648, %v9728_v28 }
 0x33d   : > { %15712 = vst [vmem:[#allocation39_spill] sm:$0xff] %v15711_v48  ;;  %v1631_v7 = vand.u32 2147483647, %v9741_v10  ;;  %v1604_v37 = vor.u32 1.1754944e-38, %v1603_v3  ;;  %v1633_v61 = vand.u32 2147483648, %v9741_v10  ;;  %8008 = vrcp.f32 %v9768_v63 }
 0x33e   : > { %v8001_v59 = vpop.eup %8000  ;;  %vm9806_vm5 = vcmp.eq.f32.partialorder %v1616_v44, 8.507059e+37  ;;  %v1619_v17 = vor.u32 1.1754944e-38, %v1618_v55  ;;  %vm1627_vm10 = vweird.f32 %v9741_v10  ;;  %v15720_v55 = vmov 0 }
 0x33f   : > { %v8003_v49 = vpop.eup %8002  ;;  %v1593_v43 = vmul.f32 %v8001_v59, %v9720_v41  ;;  %vm1598_vm2 = vweird.f32 %v8001_v59  ;;  %v1634_v41 = vor.u32 1.1754944e-38, %v1633_v61  ;;  %v1648_v62 = vand.u32 2147483648, %v9763_v30 }
 0x340   : > { %v1608_v15 = vmul.f32 %v8003_v49, %v9728_v28  ;;  %v8005_v50 = vpop.eup %8004  ;;  %vm1613_vm12 = vweird.f32 %v8003_v49  ;;  %vm1599_vm6 = vmor %vm1597_vm4, %vm1598_vm2  ;;  %vm9830_vm4 = vcmp.ge.s32.totalorder %v468_v29, 1  ;;  %vm15723_vm2 = vcmask 261120  }
 0x341   : > { %7088 = vmatmul.msk.f32.gmra.mxu2 %vm15715_vm8, %v9775_v24  ;;  %v1594_v12 = vsub.f32 1.0, %v1593_v43  ;;  %v1623_v8 = vmul.f32 %v8005_v50, %v9741_v10  ;;  %v9818_v43 = vadd.s32 216, %v8565_v1  ;;  %vm1614_vm7 = vmor %vm1612_vm13, %vm1613_vm12  ;;  %vm9823_vm8 = vcmp.eq.f32.partialorder %v1631_v7, 8.507059e+37 }
 0x342   : > { %v2115_v33 = vld [vmem:[#allocation2 + $0x1f] sm:$0xff]  ;;  %v1609_v0 = vsub.f32 1.0, %v1608_v15  ;;  %v8007_v19 = vpop.eup %8006  ;;  %v15721_v55 = vsel %vm9830_vm4, 4294967295, %v15720_v55  ;;  %vm1628_vm13 = vweird.f32 %v8005_v50  ;;  %vm1642_vm12 = vweird.f32 %v9763_v30 }
 0x343   : > { %v9798_v36 = vld [vmem:[#allocation2 + $0x19] sm:$0xff]  ;;  %v7376_v23 = vpack.i.bf16 %v2424_v46, %v2115_v33  ;;  %v1595_v58 = vmul.f32 %v8001_v59, %v1594_v12  ;;  %v2533_v46 = vsel %vm9777_vm14, %v9792_v47, 0.0  ;;  %v1638_v12 = vmul.f32 %v8007_v19, %v9763_v30  ;;  %v8009_v44 = vpop.eup %8008  ;;  %15722 = vst [vmem:[#allocation40_spill] sm:$0xff] %v15721_v55 }
 0x344   : > { %v2243_v52 = vld [vmem:[#allocation2 + $0x20] sm:$0xff]  ;;  %v7381_v26 = vpack.i.bf16 %v2391_v60, %v9798_v36  ;;  %v1610_v21 = vmul.f32 %v8003_v49, %v1609_v0  ;;  %v1624_v60 = vsub.f32 1.0, %v1623_v8  ;;  %v1653_v61 = vmul.f32 %v8009_v44, %v9768_v63 }
 0x345   : > { %v7326_v18 = vpack.i.bf16 %v2264_v32, %v2243_v52  ;;  %7377 = vrot.lane.b32.xlu2 %v7376_v23, %s8453_s29  ;;  %v1596_v53 = vadd.f32 %v8001_v59, %v1595_v58  ;;  %v1639_v0 = vsub.f32 1.0, %v1638_v12  ;;  %8010 = vpow2.f32 %v9771_v34 }
 0x346   : > { %7382 = vrot.lane.b32.xlu1 %v7381_v26, %s8452_s25  ;;  %v1611_v3 = vadd.f32 %v8003_v49, %v1610_v21  ;;  %v1625_v28 = vmul.f32 %v8005_v50, %v1624_v60  ;;  %v1663_v26 = vand.u32 2147483648, %v9768_v63  ;;  %v15726_v8 = vmov 0  ;;  %v2137_v60 = vld [vmem:[#allocation2 + $0xcf] sm:$0xff] }
 0x347   : > { %7327 = vrot.lane.b32.xlu0 %v7326_v18, %s8451_s24  ;;  %v1600_v32 = vsel %vm1599_vm6, %v8001_v59, %v1596_v53  ;;  %vm1629_vm6 = vmor %vm1627_vm10, %vm1628_vm13  ;;  %vm1658_vm10 = vweird.f32 %v8009_v44  ;;  %vm9856_vm13 = vcmp.le.s32.totalorder %v475_v38, 14  ;;  %v1649_v53 = vor.u32 1.1754944e-38, %v1648_v62  ;;  %v9907_v62 = vld [vmem:[#allocation2 + $0x101] sm:$0xff] }
 0x348   : > { %v1605_v59 = vsel %vm9784_vm0, %v1604_v37, %v1600_v32  ;;  %v1615_v33 = vsel %vm1614_vm7, %v8003_v49, %v1611_v3  ;;  %v1626_v23 = vadd.f32 %v8005_v50, %v1625_v28  ;;  %vm15724_vm0 = vmmov %vm15723_vm2  ;;  %v1640_v49 = vmul.f32 %v8007_v19, %v1639_v0  ;;  %v2265_v3 = vld [vmem:[#allocation2 + $0xd0] sm:$0xff] }
 0x349   : > { %7089 = vmatmul.msk.f32.gmra.mxu2 %vm15723_vm2, %v2533_v46  ;;  %v2044_v7 = vmul.f32 %v1605_v59, %v9679_v25  ;;  %v1620_v52 = vsel %vm9806_vm5, %v1619_v17, %v1615_v33  ;;  %vm1643_vm7 = vweird.f32 %v8007_v19  ;;  %v1646_v25 = vand.u32 2147483647, %v9763_v30  ;;  %vm15725_vm5 = vmmov %vm15724_vm0  ;;  %v9864_v17 = vld [vmem:[#allocation2 + $0xf9] sm:$0xff] }
 0x34a   : > { %v2045_v29 = vmul.f32 %v1620_v52, %v9682_v16  ;;  %v1654_v37 = vsub.f32 1.0, %v1653_v61  ;;  %v1630_v58 = vsel %vm1629_vm6, %v8005_v50, %v1626_v23  ;;  %v1661_v16 = vand.u32 2147483647, %v9768_v63  ;;  %vm1644_vm2 = vmor %vm1642_vm12, %vm1643_vm7 }
 0x34b   : > { %2082 = vst.msk [vmem:[#allocation2 + $0x28] sm:$0xff] %vm15724_vm0, %v2044_v7  ;;  %v1635_v18 = vsel %vm9823_vm8, %v1634_v41, %v1630_v58  ;;  %v1641_v21 = vadd.f32 %v8007_v19, %v1640_v49  ;;  %v15727_v8 = vsel %vm9856_vm13, 4294967295, %v15726_v8  ;;  %v7040_v34 = vmul.f32 -1.442695, %v9782_v14  ;;  %vm15729_vm6 = vmmov %vm15725_vm5  ;;  %v8011_v41 = vpop.eup %8010  ;;  %v9912_v49 = vld [vmem:[%s15203_s2] ss:$0 sm:$0xff] }
 0x34c   : > { %2083 = vst.msk [vmem:[#allocation2 + $0x30] sm:$0xff] %vm15725_vm5, %v2045_v29  ;;  %v1655_v10 = vmul.f32 %v8009_v44, %v1654_v37  ;;  %v2046_v50 = vmul.f32 %v1635_v18, %v9685_v9  ;;  %vm1647_vm0 = vcmp.eq.f32.partialorder %v1646_v25, 8.507059e+37  ;;  %vm1657_vm8 = vweird.f32 %v9768_v63  ;;  %v15739_v37 = vld [vmem:[#allocation33_spill] sm:$0xff] }
 0x34d   : > { %15728 = vst [vmem:[#allocation41_spill] sm:$0xff] %v15727_v8  ;;  %v1645_v31 = vsel %vm1644_vm2, %v8007_v19, %v1641_v21  ;;  %vm9871_vm15 = vmor %vm1657_vm8, %vm1658_vm10  ;;  %v1664_v30 = vor.u32 1.1754944e-38, %v1663_v26  ;;  %v643_v19 = vand.u32 15, %v9818_v43  ;;  %8012 = vpow2.f32 %v7040_v34  ;;  %v2138_v18 = vld [vmem:[#allocation2 + $0xd7] sm:$0xff]  ;;  %v15747_v34 = vld [vmem:[#allocation31_spill] sm:$0xff] }
 0x34e   : > { %v1656_v46 = vadd.f32 %v8009_v44, %v1655_v10  ;;  %2084 = vst.msk [vmem:[#allocation2 + $0x38] sm:$0xff] %vm15729_vm6, %v2046_v50  ;;  %v1650_v38 = vsel %vm1647_vm0, %v1649_v53, %v1645_v31  ;;  %v9877_v32 = vadd.s32 32, %v8565_v1  ;;  %vm1662_vm12 = vcmp.eq.f32.partialorder %v1661_v16, 8.507059e+37  ;;  %vm15740_vm10 = vmmov %vm15725_vm5  ;;  %v9935_v10 = vld [vmem:[#allocation2 + $0xe7] sm:$0xff] }
 0x34f   : > { %v2047_v63 = vmul.f32 %v1650_v38, %v9693_v13  ;;  %v622_v59 = vand.u32 15, %v9757_v45  ;;  %v636_v43 = vand.u32 15, %v9761_v39  ;;  %v9891_v7 = vadd.s32 40, %v8565_v1  ;;  %v15735_v39 = vld [vmem:[#allocation42_spill] sm:$0xff]  ;;  %vm15748_vm8 = vmmov %vm15725_vm5 }
 0x350   : > { %15732 = vst [vmem:[#allocation17_spill] sm:$0xff] %v9877_v32  ;;  %v1660_v15 = vsel %vm9871_vm15, %v8009_v44, %v1656_v46  ;;  %vm15734_vm15 = vmmov %vm15725_vm5  ;;  %vm9903_vm7 = vcmp.le.s32.totalorder %v643_v19, 14  ;;  %v15736_v23 = vmov 0  ;;  %v9916_v25 = vadd.f32 %v9912_v49, %v9754_v51 }
 0x351   : > { %7090 = vmatmul.msk.f32.gmra.mxu2 %vm15725_vm5, %v9864_v17  ;;  %15733 = vst [vmem:[#allocation34_spill] sm:$0xff] %v9891_v7  ;;  %v1665_v52 = vsel %vm1662_vm12, %v1664_v30, %v1660_v15  ;;  %v15737_v23 = vsel %vm9903_vm7, 4294967295, %v15736_v23  ;;  %v9922_v58 = vadd.f32 1.0, %v8011_v41  ;;  %vm9925_vm2 = vcmp.ge.s32.totalorder %v622_v59, 1  ;;  %v9955_v30 = vld [vmem:[%s15202_s1] ss:$0 sm:$0xff] }
 0x352   : > { %v9882_v12 = vld [vmem:[#allocation2 + $0x27] sm:$0xff]  ;;  %2085 = vst.msk [vmem:[#allocation2 + $0x40] sm:$0xff] %vm15734_vm15, %v2047_v63  ;;  %v2048_v0 = vmul.f32 %v1665_v52, %v9697_v2  ;;  %v1350_v2 = vmul.f32 %v15684_v40, %v15739_v37  ;;  %v15741_v26 = vmov 0  ;;  %v482_v51 = vand.u32 15, %v9877_v32  ;;  %vm15760_vm15 = vmmov %vm15748_vm8 }
 0x353   : > { %v9885_v33 = vld [vmem:[#allocation2 + $0x21] sm:$0xff]  ;;  %v2404_v13 = vsel %vm9830_vm4, %v9882_v12, 0.0  ;;  %15738 = vst [vmem:[#allocation18_spill] sm:$0xff] %v15737_v23  ;;  %v8013_v16 = vpop.eup %8012  ;;  %v15742_v26 = vsel %vm9925_vm2, 4294967295, %v15741_v26  ;;  %vm9931_vm0 = vcmp.ge.s32.totalorder %v636_v43, 1  ;;  %v15744_v21 = vmov 0 }
 0x354   : > { %v9887_v28 = vld [vmem:[#allocation2 + $0x28] sm:$0xff]  ;;  %v2371_v44 = vsel %vm9856_vm13, %v9885_v33, 0.0  ;;  %v7386_v61 = vpack.i.bf16 %v2137_v60, %v2404_v13  ;;  %2086 = vst.msk [vmem:[#allocation2 + $0x48] sm:$0xff] %vm15740_vm10, %v2048_v0  ;;  %v15745_v21 = vsel %vm9931_vm0, 4294967295, %v15744_v21  ;;  %v489_v50 = vand.u32 15, %v9891_v7  ;;  %v9946_v46 = vld [vmem:[#allocation2 + $0x30] sm:$0xff] }
 0x355   : > { %v7331_v45 = vpack.i.bf16 %v2265_v3, %v9887_v28  ;;  %v7391_v29 = vpack.i.bf16 %v15735_v39, %v2371_v44  ;;  %15743 = vst [vmem:[#allocation19_spill] sm:$0xff] %v15742_v26  ;;  %v2535_v53 = vsel %vm9903_vm7, %v9907_v62, 0.0  ;;  %8014 = vrcp.f32 %v9922_v58  ;;  %v2266_v3 = vld [vmem:[#allocation2 + $0xd8] sm:$0xff]  ;;  %v9960_v60 = vld [vmem:[#allocation2 + $0x2f] sm:$0xff] }
 0x356   : > { %7387 = vrot.lane.b32.xlu2 %v7386_v61, %s8453_s29  ;;  %15746 = vst [vmem:[#allocation35_spill] sm:$0xff] %v15745_v21  ;;  %v9944_v31 = vmul.f32 %v15684_v40, %v15747_v34  ;;  %v9949_v38 = vadd.f32 1.0, %v8013_v16  ;;  %v7041_v9 = vmul.f32 -1.442695, %v9916_v25  ;;  %v9958_v19 = vmul.f32 %v9955_v30, %v1350_v2  ;;  %v9964_v15 = vld [vmem:[#allocation2 + $0x29] sm:$0xff]  ;;  %v9976_v52 = vld [vmem:[#allocation2 + $0x37] sm:$0xff] }
 0x357   : > { %7332 = vrot.lane.b32.xlu0 %v7331_v45, %s8451_s24  ;;  %7392 = vrot.lane.b32.xlu1 %v7391_v29, %s8452_s25  ;;  %v2426_v63 = vsel %vm9925_vm2, %v2138_v18, 0.0  ;;  %v2393_v41 = vsel %vm9777_vm14, %v9643_v5, 0.0  ;;  %v9970_v59 = vadd.s32 48, %v8565_v1  ;;  %vm9972_vm6 = vcmp.ge.s32.totalorder %v482_v51, 1  ;;  %v9990_v0 = vld [vmem:[#allocation2 + $0x31] sm:$0xff] }
 0x358   : > { %v15750_v43 = vmov 0  ;;  %v9982_v44 = vadd.s32 224, %v8565_v1  ;;  %8016 = vrcp.f32 %v9949_v38  ;;  %v7336_v5 = vpack.i.bf16 %v2266_v3, %v9946_v46  ;;  %v15756_v39 = vld [vmem:[#allocation25_spill] sm:$0xff]  ;;  %v15757_v16 = vld [vmem:[#allocation26_spill] sm:$0xff]  ;;  %v2267_v3 = vld [vmem:[#allocation2 + $0xe0] sm:$0xff] }
 0x359   : > { %7091 = vmatmul.msk.f32.gmra.mxu2 %vm15748_vm8, %v2535_v53  ;;  %15749 = vst [vmem:[#allocation20_spill] sm:$0xff] %v9970_v59  ;;  %v15751_v43 = vsel %vm9972_vm6, 4294967295, %v15750_v43  ;;  %vm9986_vm5 = vcmp.le.s32.totalorder %v489_v50, 14  ;;  %v15753_v45 = vmov 0  ;;  %v447_v61 = vadd.s32 232, %v8565_v1  ;;  %v2139_v50 = vld [vmem:[#allocation2 + $0xdf] sm:$0xff] }
 0x35a   : > { %15752 = vst [vmem:[#allocation21_spill] sm:$0xff] %v15751_v43  ;;  %v15754_v45 = vsel %vm9986_vm5, 4294967295, %v15753_v45  ;;  %v1342_v29 = vmul.f32 %v15684_v40, %v15756_v39  ;;  %v7396_v37 = vpack.i.bf16 %v2426_v63, %v9960_v60  ;;  %v7401_v2 = vpack.i.bf16 %v2393_v41, %v9964_v15  ;;  %v10003_v34 = vld [vmem:[#allocation2 + $0x38] sm:$0xff]  ;;  %v15758_v41 = vld [vmem:[#allocation27_spill] sm:$0xff] }
 0x35b   : > { %15755 = vst [vmem:[#allocation36_spill] sm:$0xff] %v15754_v45  ;;  %8018 = vpow2.f32 %v7041_v9  ;;  %v1343_v18 = vmul.f32 %v15684_v40, %v15757_v16  ;;  %v8015_v51 = vpop.eup %8014  ;;  %v2406_v53 = vsel %vm9972_vm6, %v9976_v52, 0.0  ;;  %v1678_v63 = vand.u32 2147483648, %v9922_v58  ;;  %v3499_v45 = vld [vmem:[%s15204_s3 + $0xc8] sm:$0xff] }
 0x35c   : > { %v1344_v9 = vmul.f32 %v15684_v40, %v15758_v41  ;;  %v2373_v16 = vsel %vm9986_vm5, %v9990_v0, 0.0  ;;  %v1668_v13 = vmul.f32 %v8015_v51, %v9922_v58  ;;  %v10017_v6 = vadd.s32 56, %v8565_v1  ;;  %v2436_v41 = vld [vmem:[#allocation2 + $0x109] sm:$0xff] }
 0x35d   : > { %vm1672_vm12 = vweird.f32 %v9922_v58  ;;  %v1676_v39 = vand.u32 2147483647, %v9922_v58  ;;  %v657_v22 = vand.u32 15, %v447_v61  ;;  %v7406_v4 = vpack.i.bf16 %v2139_v50, %v2406_v53 }
 0x35e   : > { %7397 = vrot.lane.b32.xlu2 %v7396_v37, %s8453_s29  ;;  %15759 = vst [vmem:[#allocation22_spill] sm:$0xff] %v10017_v6  ;;  %v1377_v37 = vmul.f32 %v9955_v30, %v1342_v29  ;;  %v7341_v32 = vpack.i.bf16 %v2267_v3, %v10003_v34  ;;  %v1669_v7 = vsub.f32 1.0, %v1668_v13  ;;  %v7411_v48 = vpack.i.bf16 %v9701_v27, %v2373_v16 }
 0x35f   : > { %7337 = vrot.lane.b32.xlu0 %v7336_v5, %s8451_s24  ;;  %7402 = vrot.lane.b32.xlu1 %v7401_v2, %s8452_s25  ;;  %v8017_v2 = vpop.eup %8016  ;;  %v1378_v5 = vmul.f32 %v9955_v30, %v1343_v18  ;;  %v1679_v11 = vor.u32 1.1754944e-38, %v1678_v63  ;;  %v1379_v26 = vmul.f32 %v9955_v30, %v1344_v9  ;;  %vm1673_vm10 = vweird.f32 %v8015_v51 }
 0x360   : > { %v1683_v54 = vmul.f32 %v8017_v2, %v9949_v38  ;;  %v1670_v61 = vmul.f32 %v8015_v51, %v1669_v7  ;;  %v10029_v29 = vadd.f32 %v9912_v49, %v1377_v37  ;;  %v1691_v53 = vand.u32 2147483647, %v9949_v38  ;;  %v2437_v7 = vld [vmem:[#allocation2 + $0x111] sm:$0xff]  ;;  %v10068_v37 = vld [vmem:[#allocation2 + $0x39] sm:$0xff] }
 0x361   : > { %7092 = vmatmul.msk.f32.gmra.mxu2 %vm15760_vm15, %v2436_v41  ;;  %v8019_v42 = vpop.eup %8018  ;;  %v10032_v50 = vadd.f32 %v9912_v49, %v1378_v5  ;;  %v1693_v18 = vand.u32 2147483648, %v9949_v38  ;;  %vm10038_vm8 = vcmp.le.s32.totalorder %v657_v22, 14  ;;  %v15761_v63 = vmov 0  ;;  %vm1674_vm15 = vmor %vm1672_vm12, %vm1673_vm10  ;;  %v10059_v41 = vld [vmem:[#allocation2 + $0x40] sm:$0xff] }
 0x362   : > { %v1684_v13 = vsub.f32 1.0, %v1683_v54  ;;  %v10036_v27 = vadd.f32 1.0, %v8019_v42  ;;  %v1671_v3 = vadd.f32 %v8015_v51, %v1670_v61  ;;  %v15762_v63 = vsel %vm10038_vm8, 4294967295, %v15761_v63  ;;  %15764 = vst [vmem:[#allocation24_spill] sm:$0xff] %v10059_v41 }
 0x363   : > { %15763 = vst [vmem:[#allocation23_spill] sm:$0xff] %v15762_v63  ;;  %v7042_v9 = vmul.f32 -1.442695, %v10029_v29  ;;  %v7043_v16 = vmul.f32 -1.442695, %v10032_v50  ;;  %vm1688_vm14 = vweird.f32 %v8017_v2  ;;  %v10049_v42 = vadd.f32 %v9912_v49, %v1379_v26 }
 0x364   : > { %v1685_v54 = vmul.f32 %v8017_v2, %v1684_v13  ;;  %8020 = vrcp.f32 %v10036_v27  ;;  %v1675_v22 = vsel %vm1674_vm15, %v8015_v51, %v1671_v3  ;;  %vm1677_vm1 = vcmp.eq.f32.partialorder %v1676_v39, 8.507059e+37  ;;  %v10066_v39 = vld [vmem:[#allocation2 + $0x3f] sm:$0xff] }
 0x365   : > { %vm1687_vm2 = vweird.f32 %v9949_v38  ;;  %8022 = vpow2.f32 %v7042_v9  ;;  %v2537_v58 = vsel %vm10038_vm8, %v2437_v7, 0.0  ;;  %v2395_v26 = vsel %vm9903_vm7, %v9717_v20, 0.0  ;;  %v15772_v9 = vld [vmem:[#allocation29_spill] sm:$0xff] }
 0x366   : > { %7407 = vrot.lane.b32.xlu2 %v7406_v4, %s8453_s29  ;;  %v1686_v5 = vadd.f32 %v8017_v2, %v1685_v54  ;;  %8024 = vpow2.f32 %v7043_v16  ;;  %v2268_v4 = vld [vmem:[#allocation2 + $0xe8] sm:$0xff]  ;;  %vm1689_vm12 = vmor %vm1687_vm2, %vm1688_vm14  ;;  %v1694_v51 = vor.u32 1.1754944e-38, %v1693_v18  ;;  %vm15765_vm10 = vcmask 261120  }
 0x367   : > { %7342 = vrot.lane.b32.xlu0 %v7341_v32, %s8451_s24  ;;  %7412 = vrot.lane.b32.xlu1 %v7411_v48, %s8452_s25  ;;  %v1680_v32 = vsel %vm1677_vm1, %v1679_v11, %v1675_v22  ;;  %v15766_v11 = vld [vmem:[#allocation28_spill] sm:$0xff]  ;;  %v10071_v61 = vadd.s32 64, %v8565_v1  ;;  %vm1692_vm1 = vcmp.eq.f32.partialorder %v1691_v53, 8.507059e+37  ;;  %v7044_v13 = vmul.f32 -1.442695, %v10049_v42  ;;  %vm15771_vm2 = vmmov %vm15765_vm10 }
 0x368   : > { %v2049_v48 = vmul.f32 %v1680_v32, %v9744_v35  ;;  %v1345_v38 = vmul.f32 %v15684_v40, %v15766_v11  ;;  %v1690_v20 = vsel %vm1689_vm12, %v8017_v2, %v1686_v5  ;;  %v15767_v35 = vand.u32 15, %v9970_v59  ;;  %vm15779_vm12 = vmmov %vm15771_vm2 }
 0x369   : > { %7093 = vmatmul.msk.f32.gmra.mxu2 %vm15765_vm10, %v2537_v58  ;;  %v15768_v18 = vmov 0  ;;  %v503_v3 = vand.u32 15, %v10017_v6  ;;  %v1695_v7 = vsel %vm1692_vm1, %v1694_v51, %v1690_v20  ;;  %v1346_v16 = vmul.f32 %v15684_v40, %v15772_v9  ;;  %v10097_v51 = vld [vmem:[#allocation2 + $0x47] sm:$0xff]  ;;  %v2269_v9 = vld [vmem:[#allocation2 + $0xf0] sm:$0xff] }
 0x36a   : > { %vm10076_vm14 = vcmp.ge.s32.totalorder %v15767_v35, 1  ;;  %2087 = vst.msk [vmem:[#allocation2 + $0x50] sm:$0xff] %vm15771_vm2, %v2049_v48  ;;  %v8021_v54 = vpop.eup %8020  ;;  %v7346_v2 = vpack.i.bf16 %v2268_v4, %v10059_v41  ;;  %v15773_v53 = vand.u32 15, %v9982_v44  ;;  %v15774_v22 = vmov 0 }
 0x36b   : > { %v15769_v18 = vsel %vm10076_vm14, 4294967295, %v15768_v18  ;;  %v2050_v32 = vmul.f32 %v1695_v7, %v9782_v14  ;;  %8026 = vpow2.f32 %v7044_v13  ;;  %v8023_v5 = vpop.eup %8022  ;;  %v15777_v58 = vsel %vm9931_vm0, %v9935_v10, 0.0  ;;  %15778 = vst [vmem:[#allocation31_spill] sm:$0xff] %v10097_v51  ;;  %v10103_v14 = vld [vmem:[#allocation2 + $0xf7] sm:$0xff] }
 0x36c   : > { %15770 = vst [vmem:[#allocation42_spill] sm:$0xff] %v15769_v18  ;;  %vm10087_vm15 = vcmp.ge.s32.totalorder %v15773_v53, 1  ;;  %v7416_v48 = vpack.i.bf16 %v15777_v58, %v10066_v39  ;;  %v7421_v4 = vpack.i.bf16 %v2395_v26, %v10068_v37  ;;  %v1698_v44 = vmul.f32 %v8021_v54, %v10036_v27  ;;  %v8025_v20 = vpop.eup %8024 }
 0x36d   : > { %v15775_v22 = vsel %vm10087_vm15, 4294967295, %v15774_v22  ;;  %v1380_v11 = vmul.f32 %v9955_v30, %v1345_v38  ;;  %v510_v13 = vand.u32 15, %v10071_v61  ;;  %2088 = vst.msk [vmem:[#allocation2 + $0x58] sm:$0xff] %vm15779_vm12, %v2050_v32  ;;  %v10108_v10 = vadd.s32 240, %v8565_v1  ;;  %v10119_v38 = vld [vmem:[#allocation2 + $0x41] sm:$0xff] }
 0x36e   : > { %15776 = vst [vmem:[#allocation33_spill] sm:$0xff] %v15775_v22  ;;  %v427_v35 = vadd.s32 72, %v8565_v1  ;;  %v10111_v7 = vadd.f32 1.0, %v8023_v5  ;;  %7417 = vrot.lane.b32.xlu2 %v7416_v48, %s8453_s29  ;;  %vm10115_vm10 = vcmp.le.s32.totalorder %v503_v3, 14  ;;  %v15780_v26 = vmov 0  ;;  %v10121_v61 = vld [vmem:[#allocation2 + $0x48] sm:$0xff] }
 0x36f   : > { %7347 = vrot.lane.b32.xlu0 %v7346_v2, %s8451_s24  ;;  %7422 = vrot.lane.b32.xlu1 %v7421_v4, %s8452_s25  ;;  %v15781_v26 = vsel %vm10115_vm10, 4294967295, %v15780_v26  ;;  %15783 = vst [vmem:[#allocation26_spill] sm:$0xff] %v10121_v61  ;;  %v1699_v2 = vsub.f32 1.0, %v1698_v44  ;;  %v10123_v53 = vadd.f32 1.0, %v8025_v20  ;;  %v1381_v32 = vmul.f32 %v9955_v30, %v1346_v16  ;;  %v2141_v48 = vld [vmem:[#allocation2 + $0xef] sm:$0xff] }
 0x370   : > { %15782 = vst [vmem:[#allocation25_spill] sm:$0xff] %v15781_v26  ;;  %v2408_v5 = vsel %vm10076_vm14, %v10097_v51, 0.0  ;;  %v1706_v58 = vand.u32 2147483647, %v10036_v27  ;;  %v1708_v3 = vand.u32 2147483648, %v10036_v27  ;;  %8028 = vrcp.f32 %v10111_v7 }
 0x371   : > { %v1700_v4 = vmul.f32 %v8021_v54, %v1699_v2  ;;  %vm1703_vm1 = vweird.f32 %v8021_v54  ;;  %8030 = vrcp.f32 %v10123_v53  ;;  %v10134_v44 = vadd.f32 %v9912_v49, %v1380_v11  ;;  %v8027_v20 = vpop.eup %8026  ;;  %v15784_v11 = vld [vmem:[#allocation30_spill] sm:$0xff] }
 0x372   : > { %v2430_v16 = vsel %vm10087_vm15, %v10103_v14, 0.0  ;;  %v2375_v59 = vsel %vm10115_vm10, %v10119_v38, 0.0  ;;  %v7351_v6 = vpack.i.bf16 %v2269_v9, %v10121_v61  ;;  %v517_v23 = vand.u32 15, %v427_v35 }
 0x373   : > { %v1701_v21 = vadd.f32 %v8021_v54, %v1700_v4  ;;  %vm1702_vm2 = vweird.f32 %v10036_v27  ;;  %v10145_v2 = vadd.f32 %v9912_v49, %v1381_v32  ;;  %v1347_v18 = vmul.f32 %v15684_v40, %v15784_v11  ;;  %v10195_v11 = vld [vmem:[#allocation2 + $0x4f] sm:$0xff] }
 0x374   : > { %v7426_v41 = vpack.i.bf16 %v2141_v48, %v2408_v5  ;;  %vm1704_vm12 = vmor %vm1702_vm2, %vm1703_vm1  ;;  %v1709_v22 = vor.u32 1.1754944e-38, %v1708_v3  ;;  %v10150_v14 = vadd.s32 248, %v8565_v1  ;;  %v10152_v26 = vadd.f32 1.0, %v8027_v20  ;;  %15793 = vst [vmem:[#allocation30_spill] sm:$0xff] %v10195_v11 }
 0x375   : > { %v7431_v9 = vpack.i.bf16 %v9775_v24, %v2375_v59  ;;  %v1705_v35 = vsel %vm1704_vm12, %v8021_v54, %v1701_v21  ;;  %vm1707_vm7 = vcmp.eq.f32.partialorder %v1706_v58, 8.507059e+37  ;;  %v7045_v27 = vmul.f32 -1.442695, %v10134_v44 }
 0x376   : > { %v10156_v4 = vpop.eup %8028  ;;  %vm10159_vm15 = vcmp.ge.s32.totalorder %v510_v13, 1  ;;  %v15785_v32 = vmov 0  ;;  %v2397_v5 = vsel %vm10038_vm8, %v9792_v47, 0.0  ;;  %v1710_v48 = vsel %vm1707_vm7, %v1709_v22, %v1705_v35  ;;  %7427 = vrot.lane.b32.xlu2 %v7426_v41, %s8453_s29  ;;  %v2270_v22 = vld [vmem:[#allocation2 + $0xf8] sm:$0xff] }
 0x377   : > { %7352 = vrot.lane.b32.xlu0 %v7351_v6, %s8451_s24  ;;  %v15786_v32 = vsel %vm10159_vm15, 4294967295, %v15785_v32  ;;  %v10168_v24 = vadd.s32 80, %v8565_v1  ;;  %v10170_v21 = vpop.eup %8030  ;;  %7432 = vrot.lane.b32.xlu1 %v7431_v9, %s8452_s25  ;;  %v2051_v6 = vmul.f32 %v1710_v48, %v9916_v25  ;;  %vm10175_vm1 = vcmp.le.s32.totalorder %v517_v23, 14  ;;  %v10187_v25 = vld [vmem:[#allocation2 + $0x50] sm:$0xff] }
 0x378   : > { %15787 = vst [vmem:[#allocation27_spill] sm:$0xff] %v15786_v32  ;;  %v15788_v59 = vmov 0  ;;  %v7046_v47 = vmul.f32 -1.442695, %v10145_v2  ;;  %v1382_v54 = vmul.f32 %v9955_v30, %v1347_v18  ;;  %v1713_v13 = vmul.f32 %v10156_v4, %v10111_v7  ;;  %v10197_v9 = vld [vmem:[#allocation2 + $0x49] sm:$0xff] }
 0x379   : > { %v15789_v59 = vsel %vm10175_vm1, 4294967295, %v15788_v59  ;;  %v1728_v41 = vmul.f32 %v10170_v21, %v10123_v53  ;;  %8032 = vrcp.f32 %v10152_v26  ;;  %15791 = vst [vmem:[#allocation29_spill] sm:$0xff] %v10187_v25  ;;  %vm15792_vm7 = vcmask 261120  }
 0x37a   : > { %15790 = vst [vmem:[#allocation28_spill] sm:$0xff] %v15789_v59  ;;  %v1721_v23 = vand.u32 2147483647, %v10111_v7  ;;  %v1723_v20 = vand.u32 2147483648, %v10111_v7  ;;  %v10193_v18 = vadd.s32 88, %v8565_v1  ;;  %8034 = vpow2.f32 %v7045_v27 }
 0x37b   : > { %2089 = vst.msk [vmem:[#allocation2 + $0x60] sm:$0xff] %vm15792_vm7, %v2051_v6  ;;  %v1714_v35 = vsub.f32 1.0, %v1713_v13  ;;  %v1729_v48 = vsub.f32 1.0, %v1728_v41  ;;  %v1736_v58 = vand.u32 2147483647, %v10123_v53  ;;  %vm1718_vm12 = vweird.f32 %v10156_v4 }
 0x37c   : > { %15794 = vst [vmem:[#allocation46_spill] sm:$0xff] %v10197_v9  ;;  %v1738_v6 = vand.u32 2147483648, %v10123_v53  ;;  %8036 = vpow2.f32 %v7046_v47  ;;  %v10204_v3 = vadd.f32 %v9912_v49, %v1382_v54  ;;  %v7356_v27 = vpack.i.bf16 %v2270_v22, %v10187_v25  ;;  %v10216_v54 = vld [vmem:[#allocation2 + $0x57] sm:$0xff]  ;;  %v2271_v25 = vld [vmem:[#allocation2 + $0x100] sm:$0xff] }
 0x37d   : > { %v1715_v63 = vmul.f32 %v10156_v4, %v1714_v35  ;;  %v1730_v61 = vmul.f32 %v10170_v21, %v1729_v48  ;;  %v7436_v13 = vpack.i.bf16 %v2430_v16, %v10195_v11  ;;  %v7441_v41 = vpack.i.bf16 %v2397_v5, %v10197_v9  ;;  %v10219_v22 = vld [vmem:[#allocation2 + $0x51] sm:$0xff] }
 0x37e   : > { %vm1732_vm2 = vweird.f32 %v10123_v53  ;;  %v7047_v43 = vmul.f32 -1.442695, %v10204_v3  ;;  %vm15795_vm7 = vweird.f32 %v10111_v7  ;;  %vm10230_vm0 = vcmp.eq.f32.partialorder %v1721_v23, 8.507059e+37 }
 0x37f   : > { %v10214_v47 = vpop.eup %8032  ;;  %7357 = vrot.lane.b32.xlu0 %v7356_v27, %s8451_s24  ;;  %v1716_v35 = vadd.f32 %v10156_v4, %v1715_v63  ;;  %vm10226_vm8 = vmor %vm15795_vm7, %vm1718_vm12  ;;  %v1724_v5 = vor.u32 1.1754944e-38, %v1723_v20  ;;  %v1731_v48 = vadd.f32 %v10170_v21, %v1730_v61  ;;  %7437 = vrot.lane.b32.xlu2 %v7436_v13, %s8453_s29  ;;  %vm15800_vm14 = vweird.f32 %v10170_v21  ;;  %v3489_v61 = vld [vmem:[%s15204_s3 + $0x78] sm:$0xff] }
 0x380   : > { %v8035_v27 = vpop.eup %8034  ;;  %7442 = vrot.lane.b32.xlu1 %v7441_v41, %s8452_s25  ;;  %vm10239_vm10 = vmor %vm1732_vm2, %vm15800_vm14  ;;  %vm10243_vm12 = vcmp.eq.f32.partialorder %v1736_v58, 8.507059e+37  ;;  %v1739_v23 = vor.u32 1.1754944e-38, %v1738_v6  ;;  %v1743_v20 = vmul.f32 %v10214_v47, %v10152_v26  ;;  %v10254_v13 = vadd.f32 %v9912_v49, %v9958_v19  ;;  %v10256_v41 = vld [vmem:[#allocation2 + $0x58] sm:$0xff]  ;;  %3610 = vmatpush.msrb.mxu0 %v3489_v61 }
 0x381   : > { %v1720_v58 = vsel %vm10226_vm8, %v10156_v4, %v1716_v35  ;;  %v1735_v6 = vsel %vm10239_vm10, %v10170_v21, %v1731_v48  ;;  %7219 = vmatpush.msrb.mxu1 %v3489_v61  ;;  %v10264_v11 = vadd.f32 1.0, %v8035_v27  ;;  %8038 = vpow2.f32 %v7047_v43  ;;  %v2143_v35 = vld [vmem:[#allocation2 + $0xff] sm:$0xff] }
 0x382   : > { %v8037_v9 = vpop.eup %8036  ;;  %v2410_v19 = vsel %vm10159_vm15, %v10216_v54, 0.0  ;;  %v2377_v51 = vsel %vm10175_vm1, %v10219_v22, 0.0  ;;  %v1725_v4 = vsel %vm10230_vm0, %v1724_v5, %v1720_v58  ;;  %v1383_v21 = vmul.f32 %v9955_v30, %v9944_v31 }
 0x383   : > { %v2052_v16 = vmul.f32 %v1725_v4, %v10029_v29  ;;  %v1740_v43 = vsel %vm10243_vm12, %v1739_v23, %v1735_v6  ;;  %v1744_v48 = vsub.f32 1.0, %v1743_v20  ;;  %8040 = vrcp.f32 %v10264_v11  ;;  %v2400_v6 = vld [vmem:[#allocation2 + $0x107] sm:$0xff] }
 0x384   : > { %v7361_v27 = vpack.i.bf16 %v2271_v25, %v10256_v41  ;;  %v2053_v63 = vmul.f32 %v1740_v43, %v10032_v50  ;;  %v1753_v61 = vand.u32 2147483648, %v10152_v26  ;;  %v7050_v53 = vmul.f32 -1.442695, %v10254_v13 }
 0x385   : > { %vm15805_vm0 = vcmask 261120   ;;  %v1745_v31 = vmul.f32 %v10214_v47, %v1744_v48  ;;  %vm1748_vm8 = vweird.f32 %v10214_v47  ;;  %v1751_v29 = vand.u32 2147483647, %v10152_v26  ;;  %v10330_v48 = vld [vmem:[#allocation2 + $0x60] sm:$0xff] }
 0x386   : > { %2090 = vst.msk [vmem:[#allocation2 + $0x68] sm:$0xff] %vm15805_vm0, %v2052_v16  ;;  %v10288_v5 = vadd.f32 1.0, %v8037_v9  ;;  %v7446_v7 = vpack.i.bf16 %v2143_v35, %v2410_v19  ;;  %v15806_v23 = vand.u32 15, %v10108_v10  ;;  %v15807_v25 = vmov 0  ;;  %vm15810_vm10 = vmmov %vm15805_vm0  ;;  %v15815_v16 = vld [vmem:[#allocation32_spill] sm:$0xff] }
 0x387   : > { %v7451_v50 = vpack.i.bf16 %v9864_v17, %v2377_v51  ;;  %2091 = vst.msk [vmem:[#allocation2 + $0x70] sm:$0xff] %vm15810_vm10, %v2053_v63  ;;  %v10299_v20 = vadd.f32 %v9912_v49, %v1383_v21  ;;  %v8039_v58 = vpop.eup %8038  ;;  %7362 = vrot.lane.b32.xlu0 %v7361_v27, %s8451_s24  ;;  %v524_v9 = vand.u32 15, %v10168_v24  ;;  %v1746_v19 = vadd.f32 %v10214_v47, %v1745_v31  ;;  %v3487_v24 = vld [vmem:[%s15204_s3 + $0x68] sm:$0xff]  ;;  %v3486_v63 = vld [vmem:[%s15204_s3 + $0x60] sm:$0xff] }
 0x388   : > { %vm10292_vm14 = vcmp.ge.s32.totalorder %v15806_v23, 1  ;;  %vm1747_vm2 = vweird.f32 %v10152_v26  ;;  %8042 = vrcp.f32 %v10288_v5  ;;  %7447 = vrot.lane.b32.xlu2 %v7446_v7, %s8453_s29  ;;  %v15811_v17 = vand.u32 15, %v10150_v14  ;;  %v3488_v26 = vld [vmem:[%s15204_s3 + $0x70] sm:$0xff]  ;;  %v10342_v31 = vld [vmem:[#allocation2 + $0x59] sm:$0xff] }
 0x389   : > { %v15808_v25 = vsel %vm10292_vm14, 4294967295, %v15807_v25  ;;  %7452 = vrot.lane.b32.xlu1 %v7451_v50, %s8452_s25  ;;  %v15812_v51 = vmov 0  ;;  %vm1749_vm12 = vmor %vm1747_vm2, %vm1748_vm8  ;;  %v1754_v10 = vor.u32 1.1754944e-38, %v1753_v61  ;;  %v10322_v4 = vadd.f32 1.0, %v8039_v58  ;;  %v10324_v14 = vpop.eup %8040  ;;  %3611 = vmatpush.msrb.mxu0 %v3488_v26  ;;  %v3485_v23 = vld [vmem:[%s15204_s3 + $0x58] sm:$0xff] }
 0x38a   : > { %15809 = vst [vmem:[#allocation47_spill] sm:$0xff] %v15808_v25  ;;  %vm10310_vm7 = vcmp.le.s32.totalorder %v15811_v17, 14  ;;  %8044 = vpow2.f32 %v7050_v53  ;;  %v531_v21 = vand.u32 15, %v10193_v18  ;;  %v1750_v35 = vsel %vm1749_vm12, %v10214_v47, %v1746_v19  ;;  %7220 = vmatpush.msrb.mxu1 %v3488_v26  ;;  %v10338_v53 = vld [vmem:[#allocation2 + $0x5f] sm:$0xff] }
 0x38b   : > { %v15813_v51 = vsel %vm10310_vm7, 4294967295, %v15812_v51  ;;  %vm1752_vm0 = vcmp.eq.f32.partialorder %v1751_v29, 8.507059e+37  ;;  %v1349_v43 = vmul.f32 %v15684_v40, %v15815_v16  ;;  %v1758_v61 = vmul.f32 %v10324_v14, %v10264_v11  ;;  %3612 = vmatpush.msrb.mxu0 %v3487_v24 }
 0x38c   : > { %15814 = vst [vmem:[#allocation48_spill] sm:$0xff] %v15813_v51  ;;  %v1755_v27 = vsel %vm1752_vm0, %v1754_v10, %v1750_v35  ;;  %v7048_v18 = vmul.f32 -1.442695, %v10299_v20  ;;  %v2432_v47 = vsel %vm10292_vm14, %v2400_v6, 0.0  ;;  %v2399_v40 = vsel %vm10310_vm7, %v9907_v62, 0.0  ;;  %7221 = vmatpush.msrb.mxu1 %v3487_v24 }
 0x38d   : > { %v2054_v29 = vmul.f32 %v1755_v27, %v10049_v42  ;;  %8046 = vrcp.f32 %v10322_v4  ;;  %vm10349_vm8 = vcmp.ge.s32.totalorder %v524_v9, 1  ;;  %v15816_v7 = vmov 0  ;;  %3613 = vmatpush.msrb.mxu0 %v3486_v63  ;;  %v3481_v27 = vld [vmem:[%s15204_s3 + $0x38] sm:$0xff] }
 0x38e   : > { %v15817_v7 = vsel %vm10349_vm8, 4294967295, %v15816_v7  ;;  %v1759_v50 = vsub.f32 1.0, %v1758_v61  ;;  %v1766_v58 = vand.u32 2147483647, %v10264_v11  ;;  %v1768_v6 = vand.u32 2147483648, %v10264_v11  ;;  %v10358_v62 = vpop.eup %8042  ;;  %7222 = vmatpush.msrb.mxu1 %v3486_v63  ;;  %v3484_v61 = vld [vmem:[%s15204_s3 + $0x50] sm:$0xff] }
 0x38f   : > { %15818 = vst [vmem:[#allocation32_spill] sm:$0xff] %v15817_v7  ;;  %v7366_v42 = vpack.i.bf16 %v9798_v36, %v10330_v48  ;;  %vm10362_vm10 = vcmp.le.s32.totalorder %v531_v21, 14  ;;  %v15819_v19 = vmov 0  ;;  %v2472_v9 = vsel %vm9587_vm9, %v9882_v12, 0.0  ;;  %v10378_v21 = vld [vmem:[#allocation2 + $0x67] sm:$0xff]  ;;  %3614 = vmatpush.msrb.mxu0 %v3485_v23 }
 0x390   : > { %v15820_v19 = vsel %vm10362_vm10, 4294967295, %v15819_v19  ;;  %v10370_v17 = vadd.s32 96, %v8565_v1  ;;  %vm15822_vm2 = vcmask 261120   ;;  %v8045_v10 = vpop.eup %8044  ;;  %v7456_v26 = vpack.i.bf16 %v2432_v47, %v10338_v53  ;;  %7223 = vmatpush.msrb.mxu1 %v3485_v23 }
 0x391   : > { %15821 = vst [vmem:[#allocation49_spill] sm:$0xff] %v15820_v19  ;;  %v7461_v36 = vpack.i.bf16 %v2399_v40, %v10342_v31  ;;  %v2439_v24 = vsel %vm9431_vm11, %v9885_v33, 0.0  ;;  %8048 = vpow2.f32 %v7048_v18  ;;  %7367 = vrot.lane.b32.xlu0 %v7366_v42, %s8451_s24  ;;  %v1760_v12 = vmul.f32 %v10324_v14, %v1759_v50  ;;  %v10390_v33 = vld [vmem:[#allocation2 + $0x61] sm:$0xff]  ;;  %3615 = vmatpush.msrb.mxu0 %v3484_v61 }
 0x392   : > { %2092 = vst.msk [vmem:[#allocation2 + $0x78] sm:$0xff] %vm15822_vm2, %v2054_v29  ;;  %vm1763_vm12 = vweird.f32 %v10324_v14  ;;  %v10384_v35 = vadd.s32 104, %v8565_v1  ;;  %v1773_v16 = vmul.f32 %v10358_v62, %v10288_v5  ;;  %7457 = vrot.lane.b32.xlu2 %v7456_v26, %s8453_s29  ;;  %vm10393_vm2 = vcmp.eq.f32.partialorder %v1766_v58, 8.507059e+37  ;;  %v2401_v58 = vld [vmem:[#allocation2 + $0x10f] sm:$0xff]  ;;  %7224 = vmatpush.msrb.mxu1 %v3484_v61 }
 0x393   : > { %7462 = vrot.lane.b32.xlu1 %v7461_v36, %s8452_s25  ;;  %v1769_v63 = vor.u32 1.1754944e-38, %v1768_v6  ;;  %v1384_v18 = vmul.f32 %v9955_v30, %v1349_v43  ;;  %v10401_v47 = vpop.eup %8046  ;;  %v1761_v40 = vadd.f32 %v10324_v14, %v1760_v12  ;;  %vm1777_vm0 = vweird.f32 %v10288_v5  ;;  %v10410_v42 = vld [vmem:[#allocation2 + $0x68] sm:$0xff] }
 0x394   : > { %v1774_v29 = vsub.f32 1.0, %v1773_v16  ;;  %v10405_v50 = vadd.f32 1.0, %v8045_v10  ;;  %v2412_v6 = vsel %vm10349_vm8, %v10378_v21, 0.0  ;;  %vm15825_vm11 = vweird.f32 %v10264_v11  ;;  %v3483_v36 = vld [vmem:[%s15204_s3 + $0x48] sm:$0xff]  ;;  %v3482_v11 = vld [vmem:[%s15204_s3 + $0x40] sm:$0xff] }
 0x395   : > { %vm1764_vm7 = vmor %vm15825_vm11, %vm1763_vm12  ;;  %v1781_v30 = vand.u32 2147483647, %v10288_v5  ;;  %v1783_v43 = vand.u32 2147483648, %v10288_v5  ;;  %v1788_v23 = vmul.f32 %v10401_v47, %v10322_v4  ;;  %v2379_v10 = vsel %vm10362_vm10, %v10390_v33, 0.0  ;;  %3616 = vmatpush.msrb.mxu0 %v3483_v36  ;;  %7225 = vmatpush.msrb.mxu1 %v3483_v36  ;;  %v3480_v5 = vld [vmem:[%s15204_s3 + $0x30] sm:$0xff]  ;;  %v3479_v36 = vld [vmem:[%s15204_s3 + $0x28] sm:$0xff] }
 0x396   : > { %v1765_v26 = vsel %vm1764_vm7, %v10324_v14, %v1761_v40  ;;  %v1775_v12 = vmul.f32 %v10358_v62, %v1774_v29  ;;  %8050 = vrcp.f32 %v10405_v50  ;;  %vm1778_vm11 = vweird.f32 %v10358_v62 }
 0x397   : > { %v8049_v16 = vpop.eup %8048  ;;  %v1770_v56 = vsel %vm10393_vm2, %v1769_v63, %v1765_v26  ;;  %v1789_v14 = vsub.f32 1.0, %v1788_v23  ;;  %v1796_v61 = vand.u32 2147483647, %v10322_v4  ;;  %v7466_v40 = vpack.i.bf16 %v2401_v58, %v2412_v6  ;;  %3617 = vmatpush.msrb.mxu0 %v3482_v11  ;;  %7226 = vmatpush.msrb.mxu1 %v3482_v11  ;;  %vm10452_vm2 = vmor %vm1777_vm0, %vm1778_vm11  ;;  %v10478_v6 = vld [vmem:[#allocation2 + $0x6f] sm:$0xff] }
 0x398   : > { %v7486_v51 = vpack.i.bf16 %v2439_v24, %v10410_v42  ;;  %v2055_v25 = vmul.f32 %v1770_v56, %v10134_v44  ;;  %v1798_v29 = vand.u32 2147483648, %v10322_v4  ;;  %v7476_v7 = vpack.i.bf16 %v2472_v9, %v2379_v10 }
 0x399   : > { %v1776_v63 = vadd.f32 %v10358_v62, %v1775_v12  ;;  %v1790_v23 = vmul.f32 %v10401_v47, %v1789_v14  ;;  %vm1793_vm7 = vweird.f32 %v10401_v47  ;;  %v538_v24 = vand.u32 15, %v10370_v17  ;;  %3618 = vmatpush.msrb.mxu0 %v3481_v27  ;;  %7227 = vmatpush.msrb.mxu1 %v3481_v27  ;;  %v10488_v26 = vpop.permute.xlu1 %7312  ;;  %v3478_v12 = vld [vmem:[%s15204_s3 + $0x20] sm:$0xff] }
 0x39a   : > { %7487 = vrot.lane.b32.xlu0 %v7486_v51, %s8451_s24  ;;  %vm15826_vm12 = vcmask 261120   ;;  %v1784_v44 = vor.u32 1.1754944e-38, %v1783_v43  ;;  %v10456_v9 = vadd.f32 1.0, %v8049_v16  ;;  %v10459_v58 = vadd.f32 %v9912_v49, %v1384_v18  ;;  %7467 = vrot.lane.b32.xlu2 %v7466_v40, %s8453_s29  ;;  %v10469_v51 = vpop.permute.xlu0 %7302 }
 0x39b   : > { %2093 = vst.msk [vmem:[#allocation2 + $0x80] sm:$0xff] %vm15826_vm12, %v2055_v25  ;;  %7477 = vrot.lane.b32.xlu1 %v7476_v7, %s8452_s25  ;;  %v1780_v25 = vsel %vm10452_vm2, %v10358_v62, %v1776_v63  ;;  %vm1782_vm12 = vcmp.eq.f32.partialorder %v1781_v30, 8.507059e+37  ;;  %v1791_v17 = vadd.f32 %v10401_v47, %v1790_v23  ;;  %vm1792_vm0 = vweird.f32 %v10322_v4  ;;  %v10480_v30 = vld [vmem:[#allocation2 + $0x70] sm:$0xff]  ;;  %3619 = vmatpush.msrb.mxu0 %v3480_v5  ;;  %v10513_v63 = vpop.permute.xlu2 %7372 }
 0x39c   : > { %v10473_v49 = vpop.eup %8050  ;;  %v545_v18 = vand.u32 15, %v10384_v35  ;;  %v1785_v7 = vsel %vm1782_vm12, %v1784_v44, %v1780_v25  ;;  %vm1794_vm11 = vmor %vm1792_vm0, %vm1793_vm7  ;;  %v1799_v62 = vor.u32 1.1754944e-38, %v1798_v29  ;;  %vm1797_vm2 = vcmp.eq.f32.partialorder %v1796_v61, 8.507059e+37  ;;  %v10486_v35 = vld [vmem:[#allocation2 + $0x69] sm:$0xff]  ;;  %7228 = vmatpush.msrb.mxu1 %v3480_v5  ;;  %v10515_v23 = vld [vmem:[#allocation2 + $0x77] sm:$0xff] }
 0x39d   : > { %v2056_v43 = vmul.f32 %v1785_v7, %v10145_v2  ;;  %v1795_v10 = vsel %vm1794_vm11, %v10401_v47, %v1791_v17  ;;  %v1833_v4 = vmul.f32 %v10473_v49, %v10405_v50  ;;  %8052 = vrcp.f32 %v10456_v9  ;;  %3620 = vmatpush.msrb.mxu0 %v3479_v36  ;;  %v3476_v44 = vld [vmem:[%s15204_s3 + $0x10] sm:$0xff]  ;;  %v10549_v7 = vld [vmem:[#allocation2 + $0x78] sm:$0xff] }
 0x39e   : > { %v1800_v11 = vsel %vm1797_vm2, %v1799_v62, %v1795_v10  ;;  %v7049_v2 = vmul.f32 -1.442695, %v10459_v58  ;;  %vm10495_vm7 = vcmp.ge.s32.totalorder %v538_v24, 1  ;;  %v15829_v47 = vmov 0  ;;  %7229 = vmatpush.msrb.mxu1 %v3479_v36  ;;  %v10519_v24 = vld [vmem:[#allocation2 + $0x71] sm:$0xff] }
 0x39f   : > { %v15830_v47 = vsel %vm10495_vm7, 4294967295, %v15829_v47  ;;  %vm15832_vm12 = vcmask 261120   ;;  %v2057_v16 = vmul.f32 %v1800_v11, %v10204_v3  ;;  %v1834_v14 = vsub.f32 1.0, %v1833_v4  ;;  %3621 = vmatpush.msrb.mxu0 %v3478_v12 }
 0x3a0   : > { %15831 = vst [vmem:[#allocation50_spill] sm:$0xff] %v15830_v47  ;;  %v7471_v61 = vpack.i.bf16 %v9887_v28, %v10478_v6  ;;  %v7491_v40 = vpack.i.bf16 %v9964_v15, %v10480_v30  ;;  %vm10508_vm0 = vcmp.le.s32.totalorder %v545_v18, 14  ;;  %v15833_v29 = vmov 0  ;;  %v3477_v28 = vld [vmem:[%s15204_s3 + $0x18] sm:$0xff]  ;;  %vm15836_vm11 = vmmov %vm15832_vm12  ;;  %7230 = vmatpush.msrb.mxu1 %v3478_v12 }
 0x3a1   : > { %2094 = vst.msk [vmem:[#allocation2 + $0x88] sm:$0xff] %vm15832_vm12, %v2056_v43  ;;  %v15834_v29 = vsel %vm10508_vm0, 4294967295, %v15833_v29  ;;  %v1843_v27 = vand.u32 2147483648, %v10405_v50  ;;  %v7481_v3 = vpack.i.bf16 %v9960_v60, %v10486_v35  ;;  %v1835_v15 = vmul.f32 %v10473_v49, %v1834_v14  ;;  %3622 = vmatpush.msrb.mxu0 %v3477_v28 }
 0x3a2   : > { %15835 = vst [vmem:[#allocation51_spill] sm:$0xff] %v15834_v29  ;;  %vm1838_vm2 = vweird.f32 %v10473_v49  ;;  %v1841_v56 = vand.u32 2147483647, %v10405_v50  ;;  %7492 = vrot.lane.b32.xlu0 %v7491_v40, %s8451_s24  ;;  %8054 = vpow2.f32 %v7049_v2  ;;  %7472 = vrot.lane.b32.xlu2 %v7471_v61, %s8453_s29  ;;  %v2474_v60 = vsel %vm9830_vm4, %v9976_v52, 0.0  ;;  %v10537_v25 = vpop.permute.xlu0 %7307 }
 0x3a3   : > { %2095 = vst.msk [vmem:[#allocation2 + $0x90] sm:$0xff] %vm15836_vm11, %v2057_v16  ;;  %7482 = vrot.lane.b32.xlu1 %v7481_v3, %s8452_s25  ;;  %v1836_v5 = vadd.f32 %v10473_v49, %v1835_v15  ;;  %vm1837_vm12 = vweird.f32 %v10405_v50  ;;  %v10541_v17 = vpop.eup %8052  ;;  %v2414_v18 = vsel %vm10495_vm7, %v10515_v23, 0.0  ;;  %v2381_v52 = vsel %vm10508_vm0, %v10519_v24, 0.0  ;;  %7231 = vmatpush.msrb.mxu1 %v3477_v28  ;;  %v2112_v16 = vld [vmem:[#allocation2 + $0x7] sm:$0xff] }
 0x3a4   : > { %v2441_v62 = vsel %vm9856_vm13, %v9990_v0, 0.0  ;;  %vm1839_vm11 = vmor %vm1837_vm12, %vm1838_vm2  ;;  %v1844_v50 = vor.u32 1.1754944e-38, %v1843_v27  ;;  %v7304_v43 = vunpack.i.l.bf16 %v10469_v51  ;;  %vm1842_vm14 = vcmp.eq.f32.partialorder %v1841_v56, 8.507059e+37  ;;  %3623 = vmatpush.msrb.mxu0 %v3476_v44  ;;  %v3475_v0 = vld [vmem:[%s15204_s3 + $0x8] sm:$0xff]  ;;  %v10571_v27 = vpop.permute.xlu1 %7317  ;;  %v3474_v15 = vld [vmem:[%s15204_s3] sm:$0xff] }
 0x3a5   : > { %v1840_v10 = vsel %vm1839_vm11, %v10473_v49, %v1836_v5  ;;  %v1803_v4 = vmul.f32 %v10541_v17, %v10456_v9  ;;  %v7309_v36 = vunpack.i.l.bf16 %v10537_v25  ;;  %vm15341_vm13 = vcmask 523264   ;;  %7232 = vmatpush.msrb.mxu1 %v3476_v44 }
 0x3a6   : > { %v1845_v11 = vsel %vm1842_vm14, %v1844_v50, %v1840_v10  ;;  %v7496_v2 = vpack.i.bf16 %v9946_v46, %v2414_v18  ;;  %v7516_v12 = vpack.i.bf16 %v2441_v62, %v10549_v7  ;;  %v10567_v49 = vadd.s32 112, %v8565_v1  ;;  %3624 = vmatpush.msrb.mxu0 %v3475_v0  ;;  %v10594_v62 = vpop.permute.xlu2 %7377 }
 0x3a7   : > { %v15837_v14 = vmov 0.0   ;;  %v7506_v40 = vpack.i.bf16 %v2474_v60, %v2381_v52  ;;  %v2208_v3 = vsel %vm9587_vm9, %v2112_v16, 0.0  ;;  %vm15340_vm14 = vcmask 785408   ;;  %7233 = vmatpush.msrb.mxu1 %v3475_v0  ;;  %v10610_v0 = vld [vmem:[#allocation2 + $0x80] sm:$0xff] }
 0x3a8   : > { %4999 = vst.msk [vmem:[#allocation3] sm:$0xff] %vm15341_vm13, %v15837_v14  ;;  %v8055_v61 = vpop.eup %8054  ;;  %v1804_v46 = vsub.f32 1.0, %v1803_v4  ;;  %v7314_v28 = vunpack.i.l.bf16 %v10488_v26  ;;  %vm15838_vm2 = vcmask 261120   ;;  %v2060_v60 = vmul.f32 %v1845_v11, %v10254_v13  ;;  %3625 = vmatpush.msrb.mxu0 %v3474_v15 }
 0x3a9   : > { %5000 = vst.msk [vmem:[#allocation3 + $0x8] sm:$0xff] %vm15341_vm13, %v15837_v14  ;;  %v3280_v56 = vsel %vm15838_vm2, %v2208_v3, %v7304_v43  ;;  %v1813_v44 = vand.u32 2147483648, %v10456_v9  ;;  %vm1808_vm12 = vweird.f32 %v10541_v17  ;;  %v1811_v52 = vand.u32 2147483647, %v10456_v9  ;;  %7234 = vmatpush.msrb.mxu1 %v3474_v15 }
 0x3aa   : > { %5001 = vst.msk [vmem:[#allocation3 + $0x10] sm:$0xff] %vm15341_vm13, %v15837_v14  ;;  %7517 = vrot.lane.b32.xlu0 %v7516_v12, %s8451_s24  ;;  %v3313_v5 = vsel %vm15341_vm13, %v3280_v56, %v7309_v36  ;;  %v1805_v18 = vmul.f32 %v10541_v17, %v1804_v46  ;;  %7497 = vrot.lane.b32.xlu2 %v7496_v2, %s8453_s29  ;;  %v433_v13 = vadd.s32 120, %v8565_v1  ;;  %v7319_v50 = vunpack.i.l.bf16 %v10571_v27  ;;  %v10608_v36 = vld [vmem:[#allocation2 + $0x7f] sm:$0xff] }
 0x3ab   : > { %5002 = vst.msk [vmem:[#allocation3 + $0x118] sm:$0xff] %vm15341_vm13, %v15837_v14  ;;  %7507 = vrot.lane.b32.xlu1 %v7506_v40, %s8452_s25  ;;  %v3346_v43 = vsel %vm15340_vm14, %v3313_v5, %v7314_v28  ;;  %v10602_v10 = vadd.f32 1.0, %v8055_v61  ;;  %vm1807_vm11 = vweird.f32 %v10456_v9  ;;  %v1814_v11 = vor.u32 1.1754944e-38, %v1813_v44  ;;  %v10617_v12 = vld [vmem:[#allocation2 + $0x79] sm:$0xff]  ;;  %v2113_v40 = vld [vmem:[#allocation2 + $0xf] sm:$0xff] }
 0x3ac   : > { %5003 = vst.msk [vmem:[#allocation3 + $0x120] sm:$0xff] %vm15341_vm13, %v15837_v14  ;;  %v1806_v4 = vadd.f32 %v10541_v17, %v1805_v18  ;;  %3626 = vmatmul.f32.vlgmr.msrb.gmra.mxu0 %v3346_v43  ;;  %vm1809_vm14 = vmor %vm1807_vm11, %vm1808_vm12  ;;  %v552_v2 = vand.u32 15, %v10567_v49  ;;  %v8190_v9 = vld [vmem:[%s15204_s3 + $0x118] sm:$0xff]  ;;  %v7374_v3 = vunpack.i.l.bf16 %v10513_v63  ;;  %v559_v46 = vand.u32 15, %v433_v13  ;;  %v10661_v13 = vld [vmem:[#allocation2 + $0x81] sm:$0xff] }
 0x3ad   : > { %5004 = vst.msk [vmem:[#allocation3 + $0x128] sm:$0xff] %vm15341_vm13, %v15837_v14  ;;  %8056 = vrcp.f32 %v10602_v10  ;;  %3848 = vmatpush.msra.mxu0 %v8190_v9  ;;  %vm1812_vm13 = vcmp.eq.f32.partialorder %v1811_v52, 8.507059e+37  ;;  %v3505_v61 = vld [vmem:[%s15204_s3 + $0xf8] sm:$0xff]  ;;  %vm15839_vm12 = vmmov %vm15838_vm2  ;;  %v7521_v15 = vpack.i.bf16 %v10068_v37, %v10610_v0  ;;  %v7511_v44 = vpack.i.bf16 %v10066_v39, %v10617_v12 }
 0x3ae   : > { %2098 = vst.msk [vmem:[#allocation2 + $0xa8] sm:$0xff] %vm15838_vm2, %v2060_v60  ;;  %v1810_v16 = vsel %vm1809_vm14, %v10541_v17, %v1806_v4  ;;  %3723 = vmatpush.msra.mxu1 %v3505_v61  ;;  %v3281_v49 = vsel %vm15839_vm12, %v2113_v40, %v7319_v50  ;;  %v8191_v17 = vld [vmem:[%s15204_s3 + $0x110] sm:$0xff]  ;;  %v7501_v60 = vpack.i.bf16 %v10003_v34, %v10608_v36  ;;  %v7305_v5 = vunpack.i.h.bf16 %v10469_v51  ;;  %vm15841_vm14 = vmmov %vm15838_vm2  ;;  %v10654_v51 = vld [vmem:[#allocation2 + $0x87] sm:$0xff] }
 0x3af   : > { %v1815_v28 = vsel %vm1812_vm13, %v1814_v11, %v1810_v16  ;;  %3849 = vmatpush.msra.mxu0 %v8191_v17  ;;  %vm15840_vm13 = vcmask 523264   ;;  %v7379_v52 = vunpack.i.l.bf16 %v10594_v62  ;;  %v7310_v37 = vunpack.i.h.bf16 %v10537_v25  ;;  %v3504_v50 = vld [vmem:[%s15204_s3 + $0xf0] sm:$0xff]  ;;  %v10668_v4 = vld [vmem:[#allocation2 + $0x88] sm:$0xff]  ;;  %v8193_v61 = vld [vmem:[%s15204_s3 + $0x100] sm:$0xff] }
 0x3b0   : > { %v2058_v56 = vmul.f32 %v1815_v28, %v10299_v20  ;;  %v3314_v18 = vsel %vm15840_vm13, %v3281_v49, %v7374_v3  ;;  %v8192_v20 = vld [vmem:[%s15204_s3 + $0x108] sm:$0xff]  ;;  %vm10650_vm11 = vcmp.ge.s32.totalorder %v552_v2, 1  ;;  %v15842_v39 = vmov 0  ;;  %v10674_v9 = vld [vmem:[#allocation2 + $0xb7] sm:$0xff]  ;;  %3724 = vmatpush.msra.mxu1 %v3504_v50  ;;  %v10681_v40 = vpop.permute.xlu2 %7387  ;;  %vm15851_vm13 = vmmov %vm15841_vm14 }
 0x3b1   : > { %3850 = vmatpush.msra.mxu0 %v8192_v20  ;;  %v15843_v39 = vsel %vm10650_vm11, 4294967295, %v15842_v39  ;;  %vm10657_vm2 = vcmp.le.s32.totalorder %v559_v46, 14  ;;  %v15845_v25 = vmov 0  ;;  %v2443_v11 = vsel %vm9986_vm5, %v10119_v38, 0.0  ;;  %v15849_v46 = vld [vmem:[#allocation31_spill] sm:$0xff] }
 0x3b2   : > { %7522 = vrot.lane.b32.xlu0 %v7521_v15, %s8451_s24  ;;  %2096 = vst.msk [vmem:[#allocation2 + $0x98] sm:$0xff] %vm15841_vm14, %v2058_v56  ;;  %7502 = vrot.lane.b32.xlu2 %v7501_v60, %s8453_s29  ;;  %v15846_v25 = vsel %vm10657_vm2, 4294967295, %v15845_v25  ;;  %vm15848_vm12 = vcmask 785408   ;;  %v7315_v3 = vunpack.i.h.bf16 %v10488_v26  ;;  %v2476_v38 = vsel %vm9972_vm6, %v15849_v46, 0.0  ;;  %v10690_v56 = vpop.permute.xlu0 %7322 }
 0x3b3   : > { %v10647_v34 = vpop.eup %8056  ;;  %15844 = vst [vmem:[#allocation52_spill] sm:$0xff] %v15843_v39  ;;  %7512 = vrot.lane.b32.xlu1 %v7511_v44, %s8452_s25  ;;  %v3347_v2 = vsel %vm15848_vm12, %v3314_v18, %v7379_v52  ;;  %3851 = vmatpush.msra.mxu0 %v8193_v61  ;;  %v7320_v49 = vunpack.i.h.bf16 %v10571_v27  ;;  %v2416_v17 = vsel %vm10650_vm11, %v10654_v51, 0.0  ;;  %v2383_v26 = vsel %vm10657_vm2, %v10661_v13, 0.0  ;;  %v3503_v27 = vld [vmem:[%s15204_s3 + $0xe8] sm:$0xff] }
 0x3b4   : > { %15847 = vst [vmem:[#allocation53_spill] sm:$0xff] %v15846_v25  ;;  %v1818_v16 = vmul.f32 %v10647_v34, %v10602_v10  ;;  %3629 = vmatmul.f32.gmra.mxu0 %v3347_v2  ;;  %vm15852_vm14 = vcmask 523264   ;;  %v7546_v18 = vpack.i.bf16 %v2443_v11, %v10668_v4  ;;  %v2230_v20 = vsel %vm9735_vm3, %v10674_v9, 0.0  ;;  %3725 = vmatpush.msra.mxu1 %v3503_v27  ;;  %v15854_v61 = vld [vmem:[#allocation24_spill] sm:$0xff]  ;;  %v8194_v27 = vld [vmem:[#allocation2 + $0x17] sm:$0xff] }
 0x3b5   : > { %v10666_v43 = vld [vmem:[#allocation2 + $0xaf] sm:$0xff]  ;;  %v1828_v50 = vand.u32 2147483648, %v10602_v10  ;;  %v7324_v2 = vunpack.i.l.bf16 %v10690_v56  ;;  %v7536_v46 = vpack.i.bf16 %v2476_v38, %v2383_v26  ;;  %v434_v38 = vadd.s32 128, %v8565_v1 }
 0x3b6   : > { %v3301_v15 = vsel %vm15851_vm13, %v10666_v43, %v7305_v5  ;;  %v1819_v44 = vsub.f32 1.0, %v1818_v16  ;;  %vm1823_vm13 = vweird.f32 %v10647_v34  ;;  %v1826_v16 = vand.u32 2147483647, %v10602_v10 }
 0x3b7   : > { %v3334_v60 = vsel %vm15852_vm14, %v3301_v15, %v7310_v37  ;;  %vm15855_vm14 = vcmask 261120   ;;  %v7375_v15 = vunpack.i.h.bf16 %v10513_v63  ;;  %v435_v63 = vadd.s32 136, %v8565_v1 }
 0x3b8   : > { %v3367_v5 = vsel %vm15848_vm12, %v3334_v60, %v7315_v3  ;;  %v1820_v37 = vmul.f32 %v10647_v34, %v1819_v44  ;;  %v7526_v3 = vpack.i.bf16 %v15854_v61, %v2416_v17  ;;  %v3302_v11 = vsel %vm15855_vm14, %v2230_v20, %v7320_v49  ;;  %v7383_v17 = vpop.permute.xlu1 %7382  ;;  %v10728_v20 = vpop.permute.xlu2 %7397 }
 0x3b9   : > { %3689 = vmatmul.f32.vlgmr.msrb.gmra.mxu1 %v3367_v5  ;;  %vm1822_vm12 = vweird.f32 %v10602_v10  ;;  %v2210_v44 = vsel %vm9830_vm4, %v8194_v27, 0.0  ;;  %v1829_v49 = vor.u32 1.1754944e-38, %v1828_v50  ;;  %vm15856_vm14 = vcmask 523264   ;;  %v10734_v27 = vld [vmem:[#allocation2 + $0x8f] sm:$0xff] }
 0x3ba   : > { %7547 = vrot.lane.b32.xlu0 %v7546_v18, %s8451_s24  ;;  %v1821_v60 = vadd.f32 %v10647_v34, %v1820_v37  ;;  %7527 = vrot.lane.b32.xlu2 %v7526_v3, %s8453_s29  ;;  %vm1824_vm9 = vmor %vm1822_vm12, %vm1823_vm13  ;;  %v3335_v26 = vsel %vm15856_vm14, %v3302_v11, %v7375_v15  ;;  %vm1827_vm5 = vcmp.eq.f32.partialorder %v1826_v16, 8.507059e+37  ;;  %vm15857_vm3 = vcmask 261120   ;;  %v10731_v3 = vld [vmem:[#allocation2 + $0x90] sm:$0xff] }
 0x3bb   : > { %7537 = vrot.lane.b32.xlu1 %v7536_v46, %s8452_s25  ;;  %v3282_v10 = vsel %vm15857_vm3, %v2210_v44, %v7324_v2  ;;  %v7380_v18 = vunpack.i.h.bf16 %v10594_v62  ;;  %v7325_v37 = vunpack.i.h.bf16 %v10690_v56  ;;  %v7384_v61 = vunpack.i.l.bf16 %v7383_v17  ;;  %v10736_v11 = vld [vmem:[#allocation2 + $0x89] sm:$0xff]  ;;  %v3502_v62 = vld [vmem:[%s15204_s3 + $0xe0] sm:$0xff]  ;;  %vm15859_vm3 = vmmov %vm15856_vm14 }
 0x3bc   : > { %v1825_v5 = vsel %vm1824_vm9, %v10647_v34, %v1821_v60  ;;  %v7389_v46 = vunpack.i.l.bf16 %v10681_v40  ;;  %v566_v2 = vand.u32 15, %v434_v38  ;;  %vm15858_vm9 = vcmask 785408   ;;  %3726 = vmatpush.msra.mxu1 %v3502_v62  ;;  %v15860_v44 = vld [vmem:[#allocation46_spill] sm:$0xff] }
 0x3bd   : > { %v1830_v50 = vsel %vm1827_vm5, %v1829_v49, %v1825_v5  ;;  %v3368_v16 = vsel %vm15858_vm9, %v3335_v26, %v7380_v18  ;;  %v573_v56 = vand.u32 15, %v435_v63  ;;  %v3315_v15 = vsel %vm15859_vm3, %v3282_v10, %v7384_v61  ;;  %vm15862_vm13 = vmmov %vm15858_vm9  ;;  %v15863_v5 = vld [vmem:[#allocation26_spill] sm:$0xff]  ;;  %v7328_v26 = vpop.permute.xlu0 %7327 }
 0x3be   : > { %v2059_v34 = vmul.f32 %v1830_v50, %v10459_v58  ;;  %v7385_v60 = vunpack.i.h.bf16 %v7383_v17  ;;  %v7551_v49 = vpack.i.bf16 %v15860_v44, %v10731_v3  ;;  %vm15861_vm5 = vcmask 261120   ;;  %v15864_v38 = vld [vmem:[#allocation30_spill] sm:$0xff] }
 0x3bf   : > { %v3348_v58 = vsel %vm15862_vm13, %v3315_v15, %v7389_v46  ;;  %v7531_v50 = vpack.i.bf16 %v15863_v5, %v10734_v27  ;;  %v7541_v55 = vpack.i.bf16 %v15864_v38, %v10736_v11  ;;  %v10752_v63 = vld [vmem:[#allocation2 + $0xbf] sm:$0xff]  ;;  %vm15866_vm12 = vmmov %vm15861_vm5  ;;  %vm10758_vm14 = vcmp.ge.s32.totalorder %v566_v2, 1  ;;  %v10762_v18 = vld [vmem:[#allocation2 + $0x97] sm:$0xff] }
 0x3c0   : > { %2097 = vst.msk [vmem:[#allocation2 + $0xa0] sm:$0xff] %vm15861_vm5, %v2059_v34  ;;  %3632 = vmatmul.f32.gmra.mxu0 %v3348_v58  ;;  %v3303_v17 = vsel %vm15866_vm12, %v10752_v63, %v7325_v37  ;;  %v15867_v10 = vmov 0  ;;  %vm10765_vm9 = vcmp.le.s32.totalorder %v573_v56, 14  ;;  %v15870_v61 = vmov 0  ;;  %v10769_v46 = vld [vmem:[#allocation2 + $0x91] sm:$0xff]  ;;  %v10776_v2 = vpop.permute.xlu2 %7407 }
 0x3c1   : > { %3692 = vmatmul.f32.gmra.mxu1 %v3368_v16  ;;  %15865 = vst [vmem:[#allocation31_spill] sm:$0xff] %v10752_v63  ;;  %v15868_v10 = vsel %vm10758_vm14, 4294967295, %v15867_v10  ;;  %v15871_v61 = vsel %vm10765_vm9, 4294967295, %v15870_v61  ;;  %v3501_v37 = vld [vmem:[%s15204_s3 + $0xd8] sm:$0xff]  ;;  %v3336_v34 = vsel %vm15859_vm3, %v3303_v17, %v7385_v60  ;;  %v7390_v62 = vunpack.i.h.bf16 %v10681_v40  ;;  %v15878_v5 = vld [vmem:[#allocation29_spill] sm:$0xff] }
 0x3c2   : > { %7552 = vrot.lane.b32.xlu0 %v7551_v49, %s8451_s24  ;;  %7532 = vrot.lane.b32.xlu2 %v7531_v50, %s8453_s29  ;;  %15869 = vst [vmem:[#allocation24_spill] sm:$0xff] %v15868_v10  ;;  %v10778_v16 = vld [vmem:[#allocation2 + $0x98] sm:$0xff]  ;;  %v2418_v15 = vsel %vm10758_vm14, %v10762_v18, 0.0  ;;  %v2385_v44 = vsel %vm10765_vm9, %v10769_v46, 0.0  ;;  %v3500_v49 = vld [vmem:[%s15204_s3 + $0xd0] sm:$0xff]  ;;  %vm15877_vm12 = vcmask 785408   ;;  %v7330_v17 = vunpack.i.h.bf16 %v7328_v26 }
 0x3c3   : > { %7542 = vrot.lane.b32.xlu1 %v7541_v55, %s8452_s25  ;;  %15872 = vst [vmem:[#allocation46_spill] sm:$0xff] %v15871_v61  ;;  %3727 = vmatpush.msra.mxu1 %v3501_v37  ;;  %v15873_v55 = vld [vmem:[#allocation25_spill] sm:$0xff]  ;;  %v15875_v60 = vld [vmem:[#allocation42_spill] sm:$0xff]  ;;  %v3369_v58 = vsel %vm15877_vm12, %v3336_v34, %v7390_v62  ;;  %v7556_v50 = vpack.i.bf16 %v15878_v5, %v2418_v15  ;;  %v7329_v37 = vunpack.i.l.bf16 %v7328_v26  ;;  %v436_v57 = vadd.s32 144, %v8565_v1  ;;  %v10803_v62 = vld [vmem:[#allocation2 + $0xc7] sm:$0xff] }
 0x3c4   : > { %vm15874_vm5 = vnez %v15873_v55  ;;  %vm15876_vm13 = vnez %v15875_v60  ;;  %15879 = vst [vmem:[#allocation26_spill] sm:$0xff] %v10803_v62  ;;  %vm15882_vm12 = vcmask 261120   ;;  %v7400_v8 = vunpack.i.h.bf16 %v10728_v20 }
 0x3c5   : > { %v2445_v56 = vsel %vm15874_vm5, %v10219_v22, 0.0  ;;  %v2478_v40 = vsel %vm15876_vm13, %v10216_v54, 0.0  ;;  %3728 = vmatpush.msra.mxu1 %v3500_v49  ;;  %v437_v54 = vadd.s32 152, %v8565_v1  ;;  %vm15883_vm4 = vmmov %vm15882_vm12  ;;  %v580_v14 = vand.u32 15, %v436_v57 }
 0x3c6   : > { %v7576_v22 = vpack.i.bf16 %v2445_v56, %v10778_v16  ;;  %v7566_v38 = vpack.i.bf16 %v2478_v40, %v2385_v44  ;;  %v15880_v56 = vld [vmem:[#allocation19_spill] sm:$0xff]  ;;  %vm15886_vm5 = vcmask 785408  }
 0x3c7   : > { %vm15881_vm3 = vnez %v15880_v56  ;;  %v10810_v26 = vld [vmem:[#allocation2 + $0x9f] sm:$0xff]  ;;  %v587_v55 = vand.u32 15, %v437_v54  ;;  %v7399_v56 = vunpack.i.l.bf16 %v10728_v20  ;;  %3729 = vmatpush.msra.mxu1 %v3499_v45  ;;  %vm10831_vm14 = vcmp.ge.s32.totalorder %v580_v14, 1  ;;  %v10835_v45 = vld [vmem:[#allocation2 + $0xa7] sm:$0xff] }
 0x3c8   : > { %v2232_v15 = vsel %vm15881_vm3, %v10803_v62, 0.0  ;;  %v10808_v44 = vpop.permute.xlu2 %7417  ;;  %v10812_v49 = vld [vmem:[#allocation2 + $0x99] sm:$0xff]  ;;  %vm15887_vm3 = vmmov %vm15886_vm5  ;;  %v15888_v20 = vmov 0 }
 0x3c9   : > { %3695 = vmatmul.f32.gmra.mxu1 %v3369_v58  ;;  %v7333_v34 = vpop.permute.xlu0 %7332  ;;  %v7393_v40 = vpop.permute.xlu1 %7392  ;;  %v8197_v58 = vld [vmem:[#allocation2 + $0x1f] sm:$0xff]  ;;  %v3304_v5 = vsel %vm15883_vm4, %v2232_v15, %v7330_v17  ;;  %v7571_v17 = vpack.i.bf16 %v10338_v53, %v10812_v49  ;;  %vm15884_vm4 = vcmask 523264   ;;  %v15889_v20 = vsel %vm10831_vm14, 4294967295, %v15888_v20 }
 0x3ca   : > { %7577 = vrot.lane.b32.xlu0 %v7576_v22, %s8451_s24  ;;  %7557 = vrot.lane.b32.xlu2 %v7556_v50, %s8453_s29  ;;  %v3283_v22 = vsel %vm15882_vm12, %v8197_v58, %v7329_v37  ;;  %v7395_v50 = vunpack.i.h.bf16 %v7393_v40  ;;  %v10821_v52 = vld [vmem:[#allocation2 + $0xa0] sm:$0xff]  ;;  %v7561_v37 = vpack.i.bf16 %v10256_v41, %v10810_v26  ;;  %vm15885_vm12 = vmmov %vm15884_vm4  ;;  %v7335_v15 = vunpack.i.h.bf16 %v7333_v34  ;;  %15890 = vst [vmem:[#allocation30_spill] sm:$0xff] %v15889_v20 }
 0x3cb   : > { %7567 = vrot.lane.b32.xlu1 %v7566_v38, %s8452_s25  ;;  %v7394_v38 = vunpack.i.l.bf16 %v7393_v40  ;;  %v7334_v40 = vunpack.i.l.bf16 %v7333_v34  ;;  %v7581_v41 = vpack.i.bf16 %v10342_v31, %v10821_v52  ;;  %v15891_v53 = vmov 0  ;;  %v10843_v34 = vld [vmem:[#allocation2 + $0xa1] sm:$0xff] }
 0x3cc   : > { %v3337_v54 = vsel %vm15885_vm12, %v3304_v5, %v7395_v50 }
 0x3cd   : > { %v3316_v57 = vsel %vm15884_vm4, %v3283_v22, %v7394_v38  ;;  %v3370_v62 = vsel %vm15887_vm3, %v3337_v54, %v7400_v8  ;;  %vm10839_vm4 = vcmp.le.s32.totalorder %v587_v55, 14  ;;  %v2480_v8 = vsel %vm10159_vm15, %v10378_v21, 0.0  ;;  %v10862_v38 = vld [vmem:[#allocation2 + $0xcf] sm:$0xff]  ;;  %v3497_v54 = vld [vmem:[%s15204_s3 + $0xb8] sm:$0xff] }
 0x3ce   : > { %v3349_v58 = vsel %vm15886_vm5, %v3316_v57, %v7399_v56  ;;  %v15892_v53 = vsel %vm10839_vm4, 4294967295, %v15891_v53  ;;  %v2420_v56 = vsel %vm10831_vm14, %v10835_v45, 0.0  ;;  %v2387_v5 = vsel %vm10839_vm4, %v10843_v34, 0.0  ;;  %15895 = vst [vmem:[#allocation54_spill] sm:$0xff] %v10862_v38  ;;  %v3498_v57 = vld [vmem:[%s15204_s3 + $0xc0] sm:$0xff] }
 0x3cf   : > { %3635 = vmatmul.f32.gmra.mxu0 %v3349_v58  ;;  %15893 = vst [vmem:[#allocation29_spill] sm:$0xff] %v15892_v53  ;;  %vm15894_vm5 = vcmask 261120   ;;  %v7410_v58 = vunpack.i.h.bf16 %v10776_v2  ;;  %3730 = vmatpush.msra.mxu1 %v3498_v57 }
 0x3d0   : > { %v10853_v55 = vpop.permute.xlu2 %7427  ;;  %vm15896_vm3 = vmmov %vm15894_vm5 }
 0x3d1   : > { %3698 = vmatmul.f32.gmra.mxu1 %v3370_v62  ;;  %v7338_v14 = vpop.permute.xlu0 %7337  ;;  %v8198_v62 = vld [vmem:[#allocation2 + $0x27] sm:$0xff]  ;;  %v7403_v22 = vpop.permute.xlu1 %7402  ;;  %v3305_v21 = vsel %vm15896_vm3, %v10862_v38, %v7335_v15  ;;  %v2447_v15 = vsel %vm10175_vm1, %v10390_v33, 0.0  ;;  %vm15898_vm3 = vcmask 785408   ;;  %v438_v33 = vadd.s32 160, %v8565_v1 }
 0x3d2   : > { %7562 = vrot.lane.b32.xlu2 %v7561_v37, %s8453_s29  ;;  %7582 = vrot.lane.b32.xlu0 %v7581_v41, %s8451_s24  ;;  %v2212_v31 = vsel %vm9972_vm6, %v8198_v62, 0.0  ;;  %v7405_v37 = vunpack.i.h.bf16 %v7403_v22  ;;  %v7409_v41 = vunpack.i.l.bf16 %v10776_v2  ;;  %v7586_v62 = vpack.i.bf16 %v10330_v48, %v2420_v56  ;;  %vm15899_vm6 = vmmov %vm15898_vm3 }
 0x3d3   : > { %7572 = vrot.lane.b32.xlu1 %v7571_v17, %s8452_s25  ;;  %v3284_v50 = vsel %vm15894_vm5, %v2212_v31, %v7334_v40  ;;  %v7404_v17 = vunpack.i.l.bf16 %v7403_v22  ;;  %v10874_v40 = vld [vmem:[#allocation2 + $0xa8] sm:$0xff]  ;;  %v7596_v31 = vpack.i.bf16 %v2480_v8, %v2387_v5  ;;  %vm15897_vm5 = vmmov %vm15885_vm12  ;;  %v7340_v38 = vunpack.i.h.bf16 %v7338_v14  ;;  %3731 = vmatpush.msra.mxu1 %v3497_v54  ;;  %v10889_v8 = vld [vmem:[#allocation2 + $0xd7] sm:$0xff] }
 0x3d4   : > { %v3338_v28 = vsel %vm15897_vm5, %v3305_v21, %v7405_v37  ;;  %v7339_v63 = vunpack.i.l.bf16 %v7338_v14  ;;  %v7601_v59 = vpack.i.bf16 %v2447_v15, %v10874_v40  ;;  %v15900_v14 = vld [vmem:[#allocation35_spill] sm:$0xff]  ;;  %v10896_v5 = vld [vmem:[#allocation2 + $0xa9] sm:$0xff]  ;;  %v2449_v15 = vsel %vm10362_vm10, %v10519_v24, 0.0  ;;  %v8202_v24 = vld [vmem:[#allocation2 + $0x37] sm:$0xff] }
 0x3d5   : > { %v3317_v22 = vsel %vm15885_vm12, %v3284_v50, %v7404_v17  ;;  %v3371_v2 = vsel %vm15899_vm6, %v3338_v28, %v7410_v58  ;;  %vm15901_vm12 = vnez %v15900_v14  ;;  %v8201_v50 = vld [vmem:[#allocation2 + $0x2f] sm:$0xff]  ;;  %vm15902_vm6 = vcmask 261120  }
 0x3d6   : > { %v3350_v20 = vsel %vm15898_vm3, %v3317_v22, %v7409_v41  ;;  %v2234_v28 = vsel %vm15901_vm12, %v10889_v8, 0.0  ;;  %v3285_v21 = vsel %vm15902_vm6, %v8201_v50, %v7339_v63  ;;  %vm15903_vm5 = vmmov %vm15902_vm6  ;;  %v3496_v54 = vld [vmem:[%s15204_s3 + $0xb0] sm:$0xff]  ;;  %v7420_v58 = vunpack.i.h.bf16 %v10808_v44 }
 0x3d7   : > { %3638 = vmatmul.f32.gmra.mxu0 %v3350_v20  ;;  %v3306_v37 = vsel %vm15903_vm5, %v2234_v28, %v7340_v38  ;;  %v7419_v41 = vunpack.i.l.bf16 %v10808_v44  ;;  %3732 = vmatpush.msra.mxu1 %v3496_v54  ;;  %v7591_v63 = vpack.i.bf16 %v10410_v42, %v10666_v43  ;;  %v7606_v38 = vpack.i.bf16 %v10478_v6, %v10896_v5 }
 0x3d8   : > { %vm15904_vm3 = vcmask 523264   ;;  %vm15906_vm5 = vcmask 785408   ;;  %v15908_v28 = vmov 0  ;;  %v7616_v42 = vpack.i.bf16 %v2449_v15, %v10486_v35 }
 0x3d9   : > { %3701 = vmatmul.f32.gmra.mxu1 %v3371_v2  ;;  %v7343_v48 = vpop.permute.xlu0 %7342  ;;  %v10894_v56 = vpop.permute.xlu2 %7437  ;;  %vm15905_vm6 = vmmov %vm15904_vm3  ;;  %v7430_v15 = vunpack.i.h.bf16 %v10853_v55 }
 0x3da   : > { %7587 = vrot.lane.b32.xlu2 %v7586_v62, %s8453_s29  ;;  %7602 = vrot.lane.b32.xlu0 %v7601_v59, %s8451_s24  ;;  %v7413_v20 = vpop.permute.xlu1 %7412  ;;  %v594_v59 = vand.u32 15, %v438_v33  ;;  %v7345_v22 = vunpack.i.h.bf16 %v7343_v48  ;;  %v7344_v2 = vunpack.i.l.bf16 %v7343_v48  ;;  %vm15907_vm1 = vmmov %vm15906_vm5  ;;  %v2214_v48 = vsel %vm15876_vm13, %v8202_v24, 0.0  ;;  %v15917_v24 = vld [vmem:[#allocation33_spill] sm:$0xff] }
 0x3db   : > { %7597 = vrot.lane.b32.xlu1 %v7596_v31, %s8452_s25  ;;  %v7415_v17 = vunpack.i.h.bf16 %v7413_v20  ;;  %v7414_v57 = vunpack.i.l.bf16 %v7413_v20 }
 0x3dc   : > { %vm10916_vm12 = vcmp.ge.s32.totalorder %v594_v59, 1 }
 0x3dd   : > { %v3318_v62 = vsel %vm15904_vm3, %v3285_v21, %v7414_v57  ;;  %v3339_v31 = vsel %vm15905_vm6, %v3306_v37, %v7415_v17  ;;  %v15909_v28 = vsel %vm10916_vm12, 4294967295, %v15908_v28  ;;  %v2422_v50 = vsel %vm10916_vm12, %v10674_v9, 0.0  ;;  %v10935_v57 = vld [vmem:[#allocation2 + $0xdf] sm:$0xff] }
 0x3de   : > { %v3351_v33 = vsel %vm15906_vm5, %v3318_v62, %v7419_v41  ;;  %v3372_v44 = vsel %vm15907_vm1, %v3339_v31, %v7420_v58  ;;  %15910 = vst [vmem:[#allocation55_spill] sm:$0xff] %v15909_v28  ;;  %v2482_v37 = vsel %vm10349_vm8, %v10515_v23, 0.0  ;;  %vm15912_vm1 = vcmask 261120   ;;  %v3495_v41 = vld [vmem:[%s15204_s3 + $0xa8] sm:$0xff]  ;;  %vm15914_vm5 = vmmov %vm15905_vm6 }
 0x3df   : > { %3641 = vmatmul.f32.gmra.mxu0 %v3351_v33  ;;  %v3286_v17 = vsel %vm15912_vm1, %v2214_v48, %v7344_v2  ;;  %vm15913_vm3 = vmmov %vm15912_vm1  ;;  %v2451_v23 = vsel %vm10508_vm0, %v10661_v13, 0.0  ;;  %3733 = vmatpush.msra.mxu1 %v3495_v41  ;;  %v7621_v62 = vpack.i.bf16 %v10608_v36, %v2482_v37  ;;  %vm15915_vm1 = vcmask 785408   ;;  %v8205_v37 = vld [vmem:[#allocation2 + $0x3f] sm:$0xff] }
 0x3e0   : > { %v3307_v59 = vsel %vm15913_vm3, %v10935_v57, %v7345_v22  ;;  %vm15916_vm3 = vmmov %vm15915_vm1  ;;  %v3493_v41 = vld [vmem:[%s15204_s3 + $0x98] sm:$0xff] }
 0x3e1   : > { %3704 = vmatmul.f32.gmra.mxu1 %v3372_v44  ;;  %v7348_v6 = vpop.permute.xlu0 %7347 }
 0x3e2   : > { %7592 = vrot.lane.b32.xlu2 %v7591_v63, %s8453_s29  ;;  %7617 = vrot.lane.b32.xlu0 %v7616_v42, %s8451_s24  ;;  %v10926_v20 = vpop.permute.xlu2 %7447  ;;  %v7423_v21 = vpop.permute.xlu1 %7422  ;;  %v7429_v63 = vunpack.i.l.bf16 %v10853_v55  ;;  %v7350_v2 = vunpack.i.h.bf16 %v7348_v6  ;;  %v7349_v33 = vunpack.i.l.bf16 %v7348_v6  ;;  %v7631_v55 = vpack.i.bf16 %v2451_v23, %v10617_v12  ;;  %v10960_v6 = vld [vmem:[#allocation2 + $0xe7] sm:$0xff] }
 0x3e3   : > { %7607 = vrot.lane.b32.xlu1 %v7606_v38, %s8452_s25  ;;  %v7425_v54 = vunpack.i.h.bf16 %v7423_v21  ;;  %v7424_v58 = vunpack.i.l.bf16 %v7423_v21  ;;  %v7611_v38 = vpack.i.bf16 %v10480_v30, %v2422_v50  ;;  %v3494_v30 = vld [vmem:[%s15204_s3 + $0xa0] sm:$0xff]  ;;  %v2484_v21 = vsel %vm10495_vm7, %v10654_v51, 0.0 }
 0x3e4   : > { %3734 = vmatpush.msra.mxu1 %v3494_v30  ;;  %v2453_v23 = vsel %vm10657_vm2, %v10769_v46, 0.0 }
 0x3e5   : > { %v3319_v31 = vsel %vm15905_vm6, %v3286_v17, %v7424_v58  ;;  %v3340_v22 = vsel %vm15914_vm5, %v3307_v59, %v7425_v54  ;;  %vm15918_vm6 = vnez %v15917_v24  ;;  %vm15919_vm5 = vcmask 261120  }
 0x3e6   : > { %v3352_v44 = vsel %vm15915_vm1, %v3319_v31, %v7429_v63  ;;  %v3373_v42 = vsel %vm15916_vm3, %v3340_v22, %v7430_v15  ;;  %v2236_v48 = vsel %vm15918_vm6, %v10960_v6, 0.0  ;;  %v3287_v17 = vsel %vm15919_vm5, %v8205_v37, %v7349_v33  ;;  %vm15920_vm1 = vmmov %vm15919_vm5  ;;  %3735 = vmatpush.msra.mxu1 %v3493_v41 }
 0x3e7   : > { %3644 = vmatmul.f32.gmra.mxu0 %v3352_v44  ;;  %v3308_v59 = vsel %vm15920_vm1, %v2236_v48, %v7350_v2  ;;  %v7440_v15 = vunpack.i.h.bf16 %v10894_v56  ;;  %v7439_v63 = vunpack.i.l.bf16 %v10894_v56  ;;  %vm15921_vm3 = vcmask 523264   ;;  %v10999_v48 = vld [vmem:[#allocation2 + $0xef] sm:$0xff] }
 0x3e8   : > { %vm15922_vm5 = vmmov %vm15921_vm3  ;;  %vm15923_vm1 = vcmask 785408   ;;  %v7646_v46 = vpack.i.bf16 %v2453_v23, %v10736_v11  ;;  %v7641_v41 = vpack.i.bf16 %v10731_v3, %v10668_v4  ;;  %v3491_v4 = vld [vmem:[%s15204_s3 + $0x88] sm:$0xff] }
 0x3e9   : > { %3707 = vmatmul.f32.gmra.mxu1 %v3373_v42  ;;  %v7353_v13 = vpop.permute.xlu0 %7352  ;;  %vm15924_vm13 = vmmov %vm15923_vm1 }
 0x3ea   : > { %7612 = vrot.lane.b32.xlu2 %v7611_v38, %s8453_s29  ;;  %7632 = vrot.lane.b32.xlu0 %v7631_v55, %s8451_s24  ;;  %v7433_v12 = vpop.permute.xlu1 %7432  ;;  %v7626_v38 = vpack.i.bf16 %v10610_v0, %v10549_v7  ;;  %v7355_v2 = vunpack.i.h.bf16 %v7353_v13  ;;  %v7354_v33 = vunpack.i.l.bf16 %v7353_v13  ;;  %v8206_v0 = vld [vmem:[#allocation2 + $0x47] sm:$0xff]  ;;  %v2486_v13 = vsel %vm10650_vm11, %v10762_v18, 0.0 }
 0x3eb   : > { %7622 = vrot.lane.b32.xlu1 %v7621_v62, %s8452_s25  ;;  %v7435_v54 = vunpack.i.h.bf16 %v7433_v12  ;;  %v7434_v58 = vunpack.i.l.bf16 %v7433_v12  ;;  %v7636_v62 = vpack.i.bf16 %v10734_v27, %v2484_v21  ;;  %v2216_v42 = vsel %vm10159_vm15, %v8206_v0, 0.0 }
 0x3ec   : > { %v10965_v50 = vpop.permute.xlu2 %7457  ;;  %vm15937_vm15 = vcmask 785408  }
 0x3ed   : > { %v3320_v31 = vsel %vm15921_vm3, %v3287_v17, %v7434_v58  ;;  %v3341_v22 = vsel %vm15922_vm5, %v3308_v59, %v7435_v54  ;;  %v3492_v17 = vld [vmem:[%s15204_s3 + $0x90] sm:$0xff]  ;;  %v7450_v59 = vunpack.i.h.bf16 %v10926_v20  ;;  %v7449_v54 = vunpack.i.l.bf16 %v10926_v20 }
 0x3ee   : > { %v3353_v44 = vsel %vm15923_vm1, %v3320_v31, %v7439_v63  ;;  %v3374_v56 = vsel %vm15924_vm13, %v3341_v22, %v7440_v15  ;;  %vm15925_vm13 = vcmask 261120   ;;  %v2455_v58 = vsel %vm10765_vm9, %v10843_v34, 0.0  ;;  %3736 = vmatpush.msra.mxu1 %v3492_v17  ;;  %vm15927_vm1 = vmmov %vm15922_vm5  ;;  %v11025_v22 = vld [vmem:[#allocation2 + $0xf7] sm:$0xff] }
 0x3ef   : > { %3647 = vmatmul.f32.gmra.mxu0 %v3353_v44  ;;  %v3288_v11 = vsel %vm15925_vm13, %v2216_v42, %v7354_v33  ;;  %vm15926_vm3 = vmmov %vm15925_vm13  ;;  %v7651_v15 = vpack.i.bf16 %v10810_v26, %v2486_v13  ;;  %vm15928_vm13 = vcmask 785408   ;;  %v7661_v34 = vpack.i.bf16 %v2455_v58, %v10812_v49  ;;  %v3490_v13 = vld [vmem:[%s15204_s3 + $0x80] sm:$0xff] }
 0x3f0   : > { %v3309_v12 = vsel %vm15926_vm3, %v10999_v48, %v7355_v2  ;;  %vm15929_vm3 = vmmov %vm15928_vm13  ;;  %v15930_v2 = vld [vmem:[#allocation47_spill] sm:$0xff]  ;;  %3737 = vmatpush.msra.mxu1 %v3491_v4  ;;  %v7656_v17 = vpack.i.bf16 %v10821_v52, %v10778_v16  ;;  %v8211_v52 = vld [vmem:[#allocation2 + $0x57] sm:$0xff] }
 0x3f1   : > { %3710 = vmatmul.f32.gmra.mxu1 %v3374_v56  ;;  %v7358_v7 = vpop.permute.xlu0 %7357  ;;  %vm15938_vm9 = vmmov %vm15937_vm15  ;;  %v2218_v16 = vsel %vm10349_vm8, %v8211_v52, 0.0  ;;  %v8217_v52 = vld [vmem:[#allocation2 + $0x5f] sm:$0xff] }
 0x3f2   : > { %7627 = vrot.lane.b32.xlu2 %v7626_v38, %s8453_s29  ;;  %7647 = vrot.lane.b32.xlu0 %v7646_v46, %s8451_s24  ;;  %v7443_v30 = vpop.permute.xlu1 %7442  ;;  %v7360_v38 = vunpack.i.h.bf16 %v7358_v7  ;;  %v8209_v46 = vld [vmem:[#allocation2 + $0x4f] sm:$0xff] }
 0x3f3   : > { %7637 = vrot.lane.b32.xlu1 %v7636_v62, %s8452_s25  ;;  %v7445_v21 = vunpack.i.h.bf16 %v7443_v30  ;;  %v7444_v37 = vunpack.i.l.bf16 %v7443_v30  ;;  %v7359_v62 = vunpack.i.l.bf16 %v7358_v7  ;;  %3738 = vmatpush.msra.mxu1 %v3490_v13 }
 0x3f4   : > { %v10993_v55 = vpop.permute.xlu2 %7467 }
 0x3f5   : > { %v3321_v63 = vsel %vm15922_vm5, %v3288_v11, %v7444_v37  ;;  %v3342_v23 = vsel %vm15927_vm1, %v3309_v12, %v7445_v21  ;;  %vm15931_vm5 = vnez %v15930_v2  ;;  %vm15932_vm1 = vnez %v15868_v10  ;;  %v11042_v21 = vld [vmem:[#allocation2 + $0xb1] sm:$0xff] }
 0x3f6   : > { %v3354_v31 = vsel %vm15928_vm13, %v3321_v63, %v7449_v54  ;;  %v3375_v20 = vsel %vm15929_vm3, %v3342_v23, %v7450_v59  ;;  %v2238_v33 = vsel %vm15931_vm5, %v11025_v22, 0.0  ;;  %v2488_v56 = vsel %vm15932_vm1, %v10835_v45, 0.0 }
 0x3f7   : > { %3650 = vmatmul.f32.gmra.mxu0 %v3354_v31  ;;  %vm15933_vm13 = vcmask 261120   ;;  %v7460_v11 = vunpack.i.h.bf16 %v10965_v50  ;;  %v7459_v12 = vunpack.i.l.bf16 %v10965_v50  ;;  %v2457_v37 = vsel %vm10839_vm4, %v11042_v21, 0.0 }
 0x3f8   : > { %v3289_v7 = vsel %vm15933_vm13, %v8209_v46, %v7359_v62  ;;  %vm15934_vm3 = vmmov %vm15933_vm13  ;;  %v7666_v59 = vpack.i.bf16 %v10666_v43, %v2488_v56  ;;  %vm15935_vm13 = vcmask 523264   ;;  %v7676_v23 = vpack.i.bf16 %v2457_v37, %v10896_v5  ;;  %v11072_v46 = vld [vmem:[#allocation2 + $0xc1] sm:$0xff] }
 0x3f9   : > { %3713 = vmatmul.f32.gmra.mxu1 %v3375_v20  ;;  %v7363_v3 = vpop.permute.xlu0 %7362  ;;  %v3310_v0 = vsel %vm15934_vm3, %v2238_v33, %v7360_v38  ;;  %vm15936_vm3 = vmmov %vm15935_vm13  ;;  %v2490_v20 = vsel %vm10831_vm14, %v10674_v9, 0.0  ;;  %v7469_v56 = vunpack.i.l.bf16 %v10993_v55  ;;  %v11077_v9 = vld [vmem:[#allocation2 + $0xb0] sm:$0xff] }
 0x3fa   : > { %7642 = vrot.lane.b32.xlu2 %v7641_v41, %s8453_s29  ;;  %7662 = vrot.lane.b32.xlu0 %v7661_v34, %s8451_s24  ;;  %v7365_v41 = vunpack.i.h.bf16 %v7363_v3  ;;  %v11066_v34 = vld [vmem:[#allocation2 + $0xff] sm:$0xff] }
 0x3fb   : > { %7652 = vrot.lane.b32.xlu1 %v7651_v15, %s8452_s25  ;;  %v7453_v49 = vpop.permute.xlu1 %7452  ;;  %v7364_v15 = vunpack.i.l.bf16 %v7363_v3 }
 0x3fc   : > { %v11030_v44 = vpop.permute.xlu2 %7472  ;;  %v7455_v42 = vunpack.i.h.bf16 %v7453_v49  ;;  %v7454_v30 = vunpack.i.l.bf16 %v7453_v49  ;;  %v7470_v49 = vunpack.i.h.bf16 %v10993_v55 }
 0x3fe   : > { %v3322_v54 = vsel %vm15935_vm13, %v3289_v7, %v7454_v30  ;;  %v3343_v58 = vsel %vm15936_vm3, %v3310_v0, %v7455_v42  ;;  %v15942_v7 = vld [vmem:[#allocation45_spill] sm:$0xff]  ;;  %v7671_v42 = vpack.i.bf16 %v11077_v9, %v10874_v40  ;;  %v15944_v30 = vld [vmem:[#allocation31_spill] sm:$0xff] }
 0x3ff   : > { %v3355_v50 = vsel %vm15937_vm15, %v3322_v54, %v7459_v12  ;;  %v3376_v63 = vsel %vm15938_vm9, %v3343_v58, %v7460_v11  ;;  %vm15940_vm15 = vcmask 261120   ;;  %vm15943_vm13 = vnez %v15942_v7  ;;  %v11086_v54 = vld [vmem:[#allocation2 + $0xb9] sm:$0xff] }
 0x400   : > { %3653 = vmatmul.f32.gmra.mxu0 %v3355_v50  ;;  %v3290_v5 = vsel %vm15940_vm15, %v2218_v16, %v7364_v15  ;;  %vm15941_vm9 = vmmov %vm15940_vm15  ;;  %v2459_v0 = vsel %vm15943_vm13, %v11072_v46, 0.0  ;;  %v7681_v13 = vpack.i.bf16 %v15944_v30, %v2490_v20  ;;  %v8216_v15 = vld [vmem:[#allocation2 + $0x18] sm:$0xff] }
 0x401   : > { %3716 = vmatmul.f32.gmra.mxu1 %v3376_v63  ;;  %v3311_v4 = vsel %vm15941_vm9, %v11066_v34, %v7365_v41  ;;  %vm15945_vm15 = vmmov %vm15936_vm3  ;;  %vm15946_vm9 = vcmask 785408   ;;  %v7691_v58 = vpack.i.bf16 %v2459_v0, %v11086_v54  ;;  %v11105_v0 = vld [vmem:[#allocation2 + $0xc0] sm:$0xff]  ;;  %v15953_v30 = vld [vmem:[#allocation54_spill] sm:$0xff] }
 0x402   : > { %7657 = vrot.lane.b32.xlu2 %v7656_v17, %s8453_s29  ;;  %7677 = vrot.lane.b32.xlu0 %v7676_v23, %s8451_s24  ;;  %vm15947_vm8 = vmmov %vm15946_vm9  ;;  %v15949_v23 = vld [vmem:[#allocation26_spill] sm:$0xff] }
 0x403   : > { %7667 = vrot.lane.b32.xlu1 %v7666_v59, %s8452_s25  ;;  %v7368_v43 = vpop.permute.xlu0 %7367 }
 0x404   : > { %v11060_v38 = vpop.permute.xlu2 %7497  ;;  %v7370_v37 = vunpack.i.h.bf16 %v7368_v43  ;;  %v7369_v17 = vunpack.i.l.bf16 %v7368_v43  ;;  %v2492_v43 = vsel %vm10916_vm12, %v15949_v23, 0.0  ;;  %v15958_v23 = vld [vmem:[#allocation38_spill] sm:$0xff] }
 0x405   : > { %v7463_v62 = vpop.permute.xlu1 %7462 }
 0x406   : > { %v7465_v3 = vunpack.i.h.bf16 %v7463_v62  ;;  %v7464_v33 = vunpack.i.l.bf16 %v7463_v62 }
 0x408   : > { %v3323_v11 = vsel %vm15936_vm3, %v3290_v5, %v7464_v33  ;;  %v3344_v12 = vsel %vm15945_vm15, %v3311_v4, %v7465_v3  ;;  %vm15948_vm3 = vcmask 261120   ;;  %v7475_v5 = vunpack.i.h.bf16 %v11030_v44  ;;  %v8218_v3 = vld [vmem:[#allocation2 + $0xd1] sm:$0xff] }
 0x409   : > { %v3356_v55 = vsel %vm15946_vm9, %v3323_v11, %v7469_v56  ;;  %v3377_v59 = vsel %vm15947_vm8, %v3344_v12, %v7470_v49  ;;  %v3378_v50 = vsel %vm15948_vm3, %v8216_v15, %v7370_v37  ;;  %vm15950_vm8 = vmmov %vm15948_vm3  ;;  %v7474_v4 = vunpack.i.l.bf16 %v11030_v44  ;;  %v15951_v33 = vld [vmem:[#allocation37_spill] sm:$0xff]  ;;  %v11103_v56 = vld [vmem:[#allocation2 + $0xb8] sm:$0xff] }
 0x40a   : > { %3656 = vmatmul.f32.gmra.mxu0 %v3356_v55  ;;  %3719 = vmatmul.f32.gmra.mxu1 %v3377_v59  ;;  %v3291_v16 = vsel %vm15950_vm8, %v8217_v52, %v7369_v17  ;;  %vm15952_vm15 = vnez %v15951_v33  ;;  %vm15954_vm9 = vcmask 523264   ;;  %vm15956_vm8 = vcmask 785408   ;;  %v8221_v59 = vld [vmem:[#allocation2 + $0xc9] sm:$0xff] }
 0x40b   : > { %7672 = vrot.lane.b32.xlu2 %v7671_v42, %s8453_s29  ;;  %7682 = vrot.lane.b32.xlu1 %v7681_v13, %s8452_s25  ;;  %v2461_v49 = vsel %vm15952_vm15, %v8218_v3, 0.0  ;;  %v7686_v42 = vpack.i.bf16 %v11105_v0, %v11103_v56  ;;  %v7696_v13 = vpack.i.bf16 %v15953_v30, %v2492_v43  ;;  %vm15955_vm3 = vmmov %vm15954_vm9  ;;  %v7500_v3 = vunpack.i.h.bf16 %v11060_v38  ;;  %v15962_v30 = vld [vmem:[#allocation39_spill] sm:$0xff] }
 0x40c   : > { %7692 = vrot.lane.b32.xlu0 %v7691_v58, %s8451_s24  ;;  %v7488_v40 = vpop.permute.xlu0 %7487  ;;  %v11092_v41 = vpop.permute.xlu2 %7502  ;;  %vm15957_vm13 = vmmov %vm15956_vm8  ;;  %v7706_v58 = vpack.i.bf16 %v2461_v49, %v8221_v59  ;;  %v7499_v49 = vunpack.i.l.bf16 %v11060_v38  ;;  %vm15966_vm15 = vcmask 785408  }
 0x40d   : > { %v7478_v63 = vpop.permute.xlu1 %7477  ;;  %v7490_v37 = vunpack.i.h.bf16 %v7488_v40  ;;  %v7489_v17 = vunpack.i.l.bf16 %v7488_v40 }
 0x40e   : > { %v7480_v62 = vunpack.i.h.bf16 %v7478_v63  ;;  %v7479_v20 = vunpack.i.l.bf16 %v7478_v63  ;;  %v8222_v63 = vld [vmem:[#allocation2 + $0x67] sm:$0xff] }
 0x410   : > { %v3324_v11 = vsel %vm15954_vm9, %v3291_v16, %v7479_v20  ;;  %v3410_v12 = vsel %vm15955_vm3, %v3378_v50, %v7480_v62  ;;  %v2220_v50 = vsel %vm10495_vm7, %v8222_v63, 0.0  ;;  %vm15959_vm9 = vnez %v15958_v23  ;;  %v8223_v16 = vld [vmem:[#allocation2 + $0x20] sm:$0xff] }
 0x411   : > { %v3357_v44 = vsel %vm15956_vm8, %v3324_v11, %v7474_v4  ;;  %v3442_v55 = vsel %vm15957_vm13, %v3410_v12, %v7475_v5  ;;  %v2494_v43 = vsel %vm15959_vm9, %v10889_v8, 0.0  ;;  %vm15960_vm13 = vcmask 261120   ;;  %v11130_v11 = vld [vmem:[#allocation2 + $0xc8] sm:$0xff]  ;;  %v11132_v8 = vld [vmem:[#allocation2 + $0xd0] sm:$0xff]  ;;  %vm15967_vm9 = vmmov %vm15966_vm15 }
 0x412   : > { %3659 = vmatmul.f32.gmra.mxu0 %v3357_v44  ;;  %3739 = vmatmul.f32.vlgmr.msra.gmra.mxu1 %v3442_v55  ;;  %v3292_v52 = vsel %vm15960_vm13, %v2220_v50, %v7489_v17  ;;  %vm15961_vm3 = vmmov %vm15960_vm13  ;;  %vm15963_vm8 = vnez %v15962_v30  ;;  %v7701_v12 = vpack.i.bf16 %v11132_v8, %v11130_v11  ;;  %vm15964_vm13 = vcmask 523264   ;;  %v8227_v63 = vld [vmem:[#allocation2 + $0xd9] sm:$0xff] }
 0x413   : > { %7687 = vrot.lane.b32.xlu2 %v7686_v42, %s8453_s29  ;;  %7697 = vrot.lane.b32.xlu1 %v7696_v13, %s8452_s25  ;;  %v3379_v62 = vsel %vm15961_vm3, %v8223_v16, %v7490_v37  ;;  %v8224_v42 = vld [vmem:[#allocation2 + $0xe1] sm:$0xff]  ;;  %v7711_v37 = vpack.i.bf16 %v10935_v57, %v2494_v43  ;;  %vm15965_vm3 = vmmov %vm15964_vm13  ;;  %v2504_v30 = vld [vmem:[#allocation2 + $0x118] sm:$0xff] }
 0x414   : > { %7707 = vrot.lane.b32.xlu0 %v7706_v58, %s8451_s24  ;;  %v7493_v15 = vpop.permute.xlu0 %7492  ;;  %v11124_v20 = vpop.permute.xlu2 %7527  ;;  %v2463_v13 = vsel %vm15963_vm8, %v8224_v42, 0.0  ;;  %v15968_v43 = vld [vmem:[#allocation19_spill] sm:$0xff]  ;;  %v7504_v42 = vunpack.i.l.bf16 %v11092_v41  ;;  %vm15976_vm8 = vcmask 785408  }
 0x415   : > { %v7483_v40 = vpop.permute.xlu1 %7482  ;;  %v7495_v55 = vunpack.i.h.bf16 %v7493_v15  ;;  %v7494_v59 = vunpack.i.l.bf16 %v7493_v15  ;;  %v7721_v50 = vpack.i.bf16 %v2463_v13, %v8227_v63  ;;  %v8230_v13 = vld [vmem:[#allocation2 + $0xf1] sm:$0xff] }
 0x416   : > { %v7485_v5 = vunpack.i.h.bf16 %v7483_v40  ;;  %v7484_v4 = vunpack.i.l.bf16 %v7483_v40 }
 0x418   : > { %v3325_v17 = vsel %vm15964_vm13, %v3292_v52, %v7484_v4  ;;  %v3411_v44 = vsel %vm15965_vm3, %v3379_v62, %v7485_v5  ;;  %vm15969_vm13 = vnez %v15968_v43  ;;  %v8228_v52 = vld [vmem:[#allocation2 + $0x6f] sm:$0xff] }
 0x419   : > { %v3358_v38 = vsel %vm15966_vm15, %v3325_v17, %v7499_v49  ;;  %v3443_v58 = vsel %vm15967_vm9, %v3411_v44, %v7500_v3  ;;  %v2496_v15 = vsel %vm15969_vm13, %v10960_v6, 0.0  ;;  %vm15970_vm15 = vcmask 261120   ;;  %v8229_v62 = vld [vmem:[#allocation2 + $0x28] sm:$0xff]  ;;  %v11155_v44 = vld [vmem:[#allocation2 + $0xd8] sm:$0xff]  ;;  %v11157_v6 = vld [vmem:[#allocation2 + $0xe0] sm:$0xff] }
 0x41a   : > { %3662 = vmatmul.f32.gmra.mxu0 %v3358_v38  ;;  %3742 = vmatmul.f32.gmra.mxu1 %v3443_v58  ;;  %v3293_v16 = vsel %vm15970_vm15, %v8228_v52, %v7494_v59  ;;  %vm15971_vm9 = vmmov %vm15970_vm15  ;;  %v7505_v49 = vunpack.i.h.bf16 %v11092_v41  ;;  %v7716_v59 = vpack.i.bf16 %v11157_v6, %v11155_v44  ;;  %vm15974_vm15 = vcmask 523264   ;;  %v8233_v52 = vld [vmem:[#allocation2 + $0xe9] sm:$0xff] }
 0x41b   : > { %7702 = vrot.lane.b32.xlu2 %v7701_v12, %s8453_s29  ;;  %7712 = vrot.lane.b32.xlu1 %v7711_v37, %s8452_s25  ;;  %v3380_v5 = vsel %vm15971_vm9, %v8229_v62, %v7495_v55  ;;  %v15972_v12 = vld [vmem:[#allocation18_spill] sm:$0xff]  ;;  %v7726_v55 = vpack.i.bf16 %v10999_v48, %v2496_v15  ;;  %vm15975_vm9 = vmmov %vm15974_vm15 }
 0x41c   : > { %7722 = vrot.lane.b32.xlu0 %v7721_v50, %s8451_s24  ;;  %v7518_v57 = vpop.permute.xlu0 %7517  ;;  %vm15973_vm3 = vnez %v15972_v12  ;;  %v11153_v17 = vpop.permute.xlu2 %7532  ;;  %v8234_v15 = vld [vmem:[#allocation2 + $0x77] sm:$0xff] }
 0x41d   : > { %v7508_v40 = vpop.permute.xlu1 %7507  ;;  %v2465_v37 = vsel %vm15973_vm3, %v8230_v13, 0.0  ;;  %v7520_v41 = vunpack.i.h.bf16 %v7518_v57  ;;  %v7519_v63 = vunpack.i.l.bf16 %v7518_v57  ;;  %vm15977_vm3 = vmmov %vm15976_vm8 }
 0x41e   : > { %v7510_v4 = vunpack.i.h.bf16 %v7508_v40  ;;  %v7509_v3 = vunpack.i.l.bf16 %v7508_v40  ;;  %v7736_v62 = vpack.i.bf16 %v2465_v37, %v8233_v52  ;;  %v7530_v37 = vunpack.i.h.bf16 %v11124_v20 }
 0x420   : > { %v3326_v38 = vsel %vm15974_vm15, %v3293_v16, %v7509_v3  ;;  %v3412_v58 = vsel %vm15975_vm9, %v3380_v5, %v7510_v4  ;;  %v2222_v16 = vsel %vm10650_vm11, %v8234_v15, 0.0  ;;  %v8235_v3 = vld [vmem:[#allocation2 + $0x30] sm:$0xff]  ;;  %v11191_v15 = vld [vmem:[#allocation2 + $0x100] sm:$0xff] }
 0x421   : > { %v3359_v50 = vsel %vm15976_vm8, %v3326_v38, %v7504_v42  ;;  %v3444_v40 = vsel %vm15977_vm3, %v3412_v58, %v7505_v49  ;;  %vm15978_vm8 = vnez %v15900_v14  ;;  %vm15979_vm3 = vcmask 261120   ;;  %v11180_v38 = vld [vmem:[#allocation2 + $0xf0] sm:$0xff] }
 0x422   : > { %3665 = vmatmul.f32.gmra.mxu0 %v3359_v50  ;;  %3745 = vmatmul.f32.gmra.mxu1 %v3444_v40  ;;  %v2498_v5 = vsel %vm15978_vm8, %v11025_v22, 0.0  ;;  %v3294_v4 = vsel %vm15979_vm3, %v2222_v16, %v7519_v63  ;;  %vm15980_vm15 = vmmov %vm15979_vm3 }
 0x423   : > { %7717 = vrot.lane.b32.xlu2 %v7716_v59, %s8453_s29  ;;  %7727 = vrot.lane.b32.xlu1 %v7726_v55, %s8452_s25  ;;  %v3381_v49 = vsel %vm15980_vm15, %v8235_v3, %v7520_v41  ;;  %v7529_v59 = vunpack.i.l.bf16 %v11124_v20  ;;  %v11178_v55 = vld [vmem:[#allocation2 + $0xe8] sm:$0xff]  ;;  %v7741_v22 = vpack.i.bf16 %v11066_v34, %v2498_v5  ;;  %vm15981_vm3 = vmmov %vm15975_vm9  ;;  %vm15982_vm15 = vcmask 785408   ;;  %v8240_v3 = vld [vmem:[#allocation2 + $0x38] sm:$0xff] }
 0x424   : > { %7737 = vrot.lane.b32.xlu0 %v7736_v62, %s8451_s24  ;;  %v7523_v48 = vpop.permute.xlu0 %7522  ;;  %v7731_v58 = vpack.i.bf16 %v11180_v38, %v11178_v55  ;;  %vm15983_vm8 = vmmov %vm15982_vm15  ;;  %v7558_v20 = vpop.permute.xlu2 %7557 }
 0x425   : > { %v7513_v57 = vpop.permute.xlu1 %7512  ;;  %v7525_v41 = vunpack.i.h.bf16 %v7523_v48  ;;  %v7524_v40 = vunpack.i.l.bf16 %v7523_v48  ;;  %v15984_v48 = vld [vmem:[#allocation23_spill] sm:$0xff] }
 0x426   : > { %v7515_v42 = vunpack.i.h.bf16 %v7513_v57  ;;  %v7514_v13 = vunpack.i.l.bf16 %v7513_v57  ;;  %v8239_v57 = vld [vmem:[#allocation2 + $0x101] sm:$0xff] }
 0x428   : > { %v3327_v63 = vsel %vm15975_vm9, %v3294_v4, %v7514_v13  ;;  %v3413_v50 = vsel %vm15981_vm3, %v3381_v49, %v7515_v42  ;;  %vm15985_vm9 = vnez %v15984_v48 }
 0x429   : > { %v3360_v52 = vsel %vm15982_vm15, %v3327_v63, %v7529_v59  ;;  %v3445_v62 = vsel %vm15983_vm8, %v3413_v50, %v7530_v37  ;;  %v2467_v5 = vsel %vm15985_vm9, %v8239_v57, 0.0  ;;  %vm15986_vm8 = vcmask 261120  }
 0x42a   : > { %3668 = vmatmul.f32.gmra.mxu0 %v3360_v52  ;;  %3748 = vmatmul.f32.gmra.mxu1 %v3445_v62  ;;  %v3295_v4 = vsel %vm15986_vm8, %v10608_v36, %v7524_v40  ;;  %vm15987_vm3 = vmmov %vm15986_vm8  ;;  %v7535_v37 = vunpack.i.h.bf16 %v11153_v17  ;;  %v7534_v59 = vunpack.i.l.bf16 %v11153_v17  ;;  %vm15988_vm15 = vcmask 523264   ;;  %v11206_v40 = vpop.f32.mrf.mxu0  ;;  %v11213_v17 = vld [vmem:[#allocation2 + $0x108] sm:$0xff] }
 0x42b   : > { %7732 = vrot.lane.b32.xlu2 %v7731_v58, %s8453_s29  ;;  %7742 = vrot.lane.b32.xlu1 %v7741_v22, %s8452_s25  ;;  %v3382_v49 = vsel %vm15987_vm3, %v8240_v3, %v7525_v41  ;;  %v8241_v58 = vld [vmem:[#allocation2 + $0xf9] sm:$0xff]  ;;  %vm15989_vm13 = vmmov %vm15988_vm15  ;;  %vm15990_vm9 = vcmask 785408  }
 0x42c   : > { %3238 = vrot.lane.b32.xlu0 %v11191_v15, %s8453_s29  ;;  %v7548_v34 = vpop.permute.xlu0 %7547  ;;  %v7746_v22 = vpack.i.bf16 %v2467_v5, %v8241_v58  ;;  %vm15991_vm8 = vmmov %vm15990_vm9  ;;  %v11208_v41 = vld [vmem:[#allocation2 + $0xf8] sm:$0xff]  ;;  %v2224_v5 = vsel %vm15932_vm1, %v10654_v51, 0.0  ;;  %v7560_v58 = vunpack.i.h.bf16 %v7558_v20 }
 0x42d   : > { %v7538_v16 = vpop.permute.xlu1 %7537  ;;  %v7550_v52 = vunpack.i.h.bf16 %v7548_v34  ;;  %v7549_v62 = vunpack.i.l.bf16 %v7548_v34  ;;  %vm15996_vm1 = vmmov %vm15991_vm8 }
 0x42e   : > { %v7540_v42 = vunpack.i.h.bf16 %v7538_v16  ;;  %v7539_v13 = vunpack.i.l.bf16 %v7538_v16  ;;  %v7563_v16 = vpop.permute.xlu2 %7562 }
 0x430   : > { %v3328_v63 = vsel %vm15988_vm15, %v3295_v4, %v7539_v13  ;;  %v3414_v50 = vsel %vm15989_vm13, %v3382_v49, %v7540_v42  ;;  %vm15992_vm13 = vmmov %vm15987_vm3  ;;  %v8243_v49 = vld [vmem:[#allocation2 + $0x40] sm:$0xff] }
 0x431   : > { %v3361_v57 = vsel %vm15990_vm9, %v3328_v63, %v7534_v59  ;;  %v3446_v36 = vsel %vm15991_vm8, %v3414_v50, %v7535_v37  ;;  %v3296_v3 = vsel %vm15992_vm13, %v2224_v5, %v7549_v62  ;;  %vm15993_vm9 = vmmov %vm15987_vm3  ;;  %v8244_v62 = vld [vmem:[#allocation2 + $0x107] sm:$0xff]  ;;  %v8245_v5 = vld [vmem:[#allocation2 + $0x10f] sm:$0xff] }
 0x432   : > { %3671 = vmatmul.f32.gmra.mxu0 %v3361_v57  ;;  %3751 = vmatmul.f32.gmra.mxu1 %v3446_v36  ;;  %v3383_v42 = vsel %vm15993_vm9, %v8243_v49, %v7550_v52  ;;  %vm15994_vm3 = vmmov %vm15988_vm15  ;;  %v2500_v52 = vsel %vm15918_vm6, %v8244_v62, 0.0 }
 0x433   : > { %3236 = vrot.lane.b32.xlu2 %v11208_v41, %s8453_s29  ;;  %7747 = vrot.lane.b32.xlu1 %v7746_v22, %s8451_s24  ;;  %v7559_v22 = vunpack.i.l.bf16 %v7558_v20  ;;  %vm15995_vm15 = vmmov %vm15994_vm3  ;;  %v11232_v20 = vpop.f32.mrf.mxu0 }
 0x434   : > { %3240 = vrot.lane.b32.xlu0 %v11213_v17, %s8453_s29  ;;  %v7553_v34 = vpop.permute.xlu0 %7552 }
 0x435   : > { %v7543_v4 = vpop.permute.xlu1 %7542  ;;  %v7555_v57 = vunpack.i.h.bf16 %v7553_v34  ;;  %v7554_v36 = vunpack.i.l.bf16 %v7553_v34 }
 0x436   : > { %v7545_v13 = vunpack.i.h.bf16 %v7543_v4  ;;  %v7544_v37 = vunpack.i.l.bf16 %v7543_v4  ;;  %v11222_v59 = vpop.f32.mrf.mxu1  ;;  %v8246_v4 = vld [vmem:[#allocation2 + $0x109] sm:$0xff] }
 0x438   : > { %v3329_v63 = vsel %vm15994_vm3, %v3296_v3, %v7544_v37  ;;  %v3415_v50 = vsel %vm15995_vm15, %v3383_v42, %v7545_v13  ;;  %v8247_v42 = vld [vmem:[#allocation2 + $0x48] sm:$0xff]  ;;  %v7588_v37 = vpop.permute.xlu2 %7587  ;;  %vm16001_vm15 = vmmov %vm15991_vm8 }
 0x439   : > { %v3362_v51 = vsel %vm15991_vm8, %v3329_v63, %v7559_v22  ;;  %v3447_v48 = vsel %vm15996_vm1, %v3415_v50, %v7560_v58  ;;  %vm15997_vm1 = vmmov %vm15993_vm9  ;;  %v7565_v63 = vunpack.i.h.bf16 %v7563_v16  ;;  %v7564_v50 = vunpack.i.l.bf16 %v7563_v16  ;;  %v8248_v16 = vld [vmem:[#allocation2 + $0x111] sm:$0xff] }
 0x43a   : > { %3674 = vmatmul.f32.gmra.mxu0 %v3362_v51  ;;  %3754 = vmatmul.f32.gmra.mxu1 %v3447_v48  ;;  %v3297_v49 = vsel %vm15997_vm1, %v10734_v27, %v7554_v36  ;;  %vm15998_vm13 = vmmov %vm15997_vm1  ;;  %v2470_v51 = vld [vmem:[#allocation2 + $0x117] sm:$0xff] }
 0x43b   : > { %3140 = vrot.lane.b32.xlu2 %v2500_v52, %s8452_s25  ;;  %3142 = vrot.lane.b32.xlu1 %v8245_v5, %s8452_s25  ;;  %v3384_v13 = vsel %vm15998_vm13, %v8247_v42, %v7555_v57  ;;  %vm16000_vm9 = vmmov %vm15994_vm3  ;;  %v11244_v36 = vld [vmem:[#allocation2 + $0x110] sm:$0xff]  ;;  %v2502_v57 = vsel %vm15931_vm5, %v2470_v51, 0.0 }
 0x43c   : > { %3016 = vrot.lane.b32.xlu0 %v8246_v4, %s8451_s24  ;;  %v7578_v34 = vpop.permute.xlu0 %7577 }
 0x43d   : > { %v7568_v3 = vpop.permute.xlu1 %7567  ;;  %v7580_v5 = vunpack.i.h.bf16 %v7578_v34  ;;  %v7579_v4 = vunpack.i.l.bf16 %v7578_v34 }
 0x43e   : > { %v7570_v48 = vunpack.i.h.bf16 %v7568_v3  ;;  %v7569_v58 = vunpack.i.l.bf16 %v7568_v3  ;;  %v11238_v22 = vpop.f32.mrf.mxu1  ;;  %v16002_v3 = vld [vmem:[#allocation48_spill] sm:$0xff] }
 0x43f   : > { %15999 = vst [vmem:[#allocation31_spill] sm:$0xff] %v11238_v22  ;;  %vm16003_vm1 = vnez %v16002_v3 }
 0x440   : > { %v3330_v62 = vsel %vm16000_vm9, %v3297_v49, %v7569_v58  ;;  %v3416_v52 = vsel %vm15994_vm3, %v3384_v13, %v7570_v48  ;;  %v2469_v34 = vsel %vm16003_vm1, %v8248_v16, 0.0  ;;  %v2226_v49 = vsel %vm10831_vm14, %v10762_v18, 0.0  ;;  %v11257_v13 = vpop.f32.mrf.mxu0  ;;  %v8249_v48 = vld [vmem:[#allocation2 + $0x50] sm:$0xff]  ;;  %vm16004_vm9 = vmmov %vm15998_vm13  ;;  %v2471_v16 = vld [vmem:[#allocation2 + $0x11f] sm:$0xff] }
 0x441   : > { %v3363_v12 = vsel %vm16001_vm15, %v3330_v62, %v7564_v50  ;;  %v3448_v27 = vsel %vm15991_vm8, %v3416_v52, %v7565_v63  ;;  %v3385_v58 = vsel %vm16004_vm9, %v8249_v48, %v7580_v5  ;;  %v7590_v52 = vunpack.i.h.bf16 %v7588_v37  ;;  %vm16006_vm15 = vmmov %vm15994_vm3 }
 0x442   : > { %3677 = vmatmul.f32.gmra.mxu0 %v3363_v12  ;;  %3757 = vmatmul.f32.gmra.mxu1 %v3448_v27  ;;  %v3298_v12 = vsel %vm15998_vm13, %v2226_v49, %v7579_v4  ;;  %v7589_v27 = vunpack.i.l.bf16 %v7588_v37  ;;  %vm16007_vm13 = vmmov %vm15991_vm8 }
 0x443   : > { %3242 = vrot.lane.b32.xlu2 %v11244_v36, %s8453_s29  ;;  %3144 = vrot.lane.b32.xlu1 %v2502_v57, %s8452_s25  ;;  %v7593_v57 = vpop.permute.xlu2 %7592 }
 0x444   : > { %3018 = vrot.lane.b32.xlu0 %v2469_v34, %s8451_s24  ;;  %v7583_v51 = vpop.permute.xlu0 %7582 }
 0x445   : > { %v7573_v42 = vpop.permute.xlu1 %7572  ;;  %v7585_v33 = vunpack.i.h.bf16 %v7583_v51  ;;  %v7584_v7 = vunpack.i.l.bf16 %v7583_v51  ;;  %v7594_v51 = vunpack.i.l.bf16 %v7593_v57 }
 0x446   : > { %v7575_v63 = vunpack.i.h.bf16 %v7573_v42  ;;  %v7574_v50 = vunpack.i.l.bf16 %v7573_v42  ;;  %v11261_v62 = vpop.f32.mrf.mxu1  ;;  %v8250_v42 = vld [vmem:[#allocation2 + $0x58] sm:$0xff] }
 0x447   : > { %16005 = vst [vmem:[#allocation26_spill] sm:$0xff] %v11261_v62  ;;  %v3299_v49 = vsel %vm16004_vm9, %v10810_v26, %v7584_v7 }
 0x448   : > { %v3331_v34 = vsel %vm15994_vm3, %v3298_v12, %v7574_v50  ;;  %v3417_v18 = vsel %vm16006_vm15, %v3385_v58, %v7575_v63  ;;  %vm16008_vm3 = vmmov %vm16004_vm9  ;;  %v7595_v50 = vunpack.i.h.bf16 %v7593_v57  ;;  %v2228_v57 = vsel %vm10916_vm12, %v10835_v45, 0.0 }
 0x449   : > { %v3364_v4 = vsel %vm15991_vm8, %v3331_v34, %v7589_v27  ;;  %v3449_v5 = vsel %vm16007_vm13, %v3417_v18, %v7590_v52  ;;  %v3386_v12 = vsel %vm16008_vm3, %v8250_v42, %v7585_v33  ;;  %vm16010_vm8 = vmmov %vm16006_vm15  ;;  %v2505_v34 = vld [vmem:[#allocation2 + $0x120] sm:$0xff]  ;;  %vm16191_vm12 = vcmask 523264  }
 0x44a   : > { %3680 = vmatmul.f32.gmra.mxu0 %v3364_v4  ;;  %3760 = vmatmul.f32.gmra.mxu1 %v3449_v5  ;;  %vm16011_vm9 = vmmov %vm16007_vm13 }
 0x44b   : > { %3146 = vrot.lane.b32.xlu1 %v2471_v16, %s8452_s25  ;;  %3244 = vrot.lane.b32.xlu2 %v2504_v30, %s8453_s29  ;;  %v7613_v33 = vpop.permute.xlu2 %7612 }
 0x44c   : > { %v7603_v63 = vpop.permute.xlu0 %7602  ;;  %v11272_v27 = vpop.f32.mrf.mxu0 }
 0x44d   : > { %v7598_v37 = vpop.permute.xlu1 %7597  ;;  %v7605_v18 = vunpack.i.h.bf16 %v7603_v63  ;;  %v7604_v4 = vunpack.i.l.bf16 %v7603_v63  ;;  %v7615_v63 = vunpack.i.h.bf16 %v7613_v33 }
 0x44e   : > { %v7600_v48 = vunpack.i.h.bf16 %v7598_v37  ;;  %v7599_v58 = vunpack.i.l.bf16 %v7598_v37  ;;  %v11274_v52 = vpop.f32.mrf.mxu1 }
 0x44f   : > { %16009 = vst [vmem:[#allocation54_spill] sm:$0xff] %v11274_v52  ;;  %v3300_v37 = vsel %vm16008_vm3, %v2228_v57, %v7604_v4  ;;  %v8252_v57 = vld [vmem:[#allocation2 + $0x68] sm:$0xff] }
 0x450   : > { %v3332_v16 = vsel %vm16006_vm15, %v3299_v49, %v7599_v58  ;;  %v3418_v30 = vsel %vm16010_vm8, %v3386_v12, %v7600_v48  ;;  %v8251_v49 = vld [vmem:[#allocation2 + $0x60] sm:$0xff]  ;;  %vm16012_vm15 = vmmov %vm16008_vm3 }
 0x451   : > { %v3365_v26 = vsel %vm16007_vm13, %v3332_v16, %v7594_v51  ;;  %v3450_v7 = vsel %vm16011_vm9, %v3418_v30, %v7595_v50  ;;  %v3387_v42 = vsel %vm16012_vm15, %v8251_v49, %v7605_v18  ;;  %v7614_v50 = vunpack.i.l.bf16 %v7613_v33  ;;  %vm16014_vm13 = vmmov %vm16010_vm8 }
 0x452   : > { %3683 = vmatmul.f32.gmra.mxu0 %v3365_v26  ;;  %3763 = vmatmul.f32.gmra.mxu1 %v3450_v7  ;;  %vm16015_vm3 = vmmov %vm16011_vm9 }
 0x453   : > { %3246 = vrot.lane.b32.xlu2 %v2505_v34, %s8453_s29  ;;  %v7628_v18 = vpop.permute.xlu2 %7627  ;;  %s14928_s29 = scalar_lea.vmem [#allocation4], %s6997_s13 }
 0x454   : > { %v7618_v58 = vpop.permute.xlu0 %7617  ;;  %v11286_v51 = vpop.f32.mrf.mxu0  ;;  %v7629_v49 = vunpack.i.l.bf16 %v7628_v18  ;;  %s6928_s30 = sshll.u32 %s14928_s29, 4  ;;  %s6929_s30 = int_to_ptr.vmem [resolvable:$true] %s6928_s30 }
 0x455   : > { %v7608_v5 = vpop.permute.xlu1 %7607  ;;  %v7619_v45 = vunpack.i.l.bf16 %v7618_v58  ;;  %v7620_v2 = vunpack.i.h.bf16 %v7618_v58 }
 0x456   : > { %v7610_v12 = vunpack.i.h.bf16 %v7608_v5  ;;  %v7609_v48 = vunpack.i.l.bf16 %v7608_v5  ;;  %v11288_v16 = vpop.f32.mrf.mxu1 }
 0x457   : > { %16013 = vst [vmem:[#allocation56_spill] sm:$0xff] %v11288_v16  ;;  %v3388_v33 = vsel %vm16012_vm15, %v8252_v57, %v7619_v45 }
 0x458   : > { %v3333_v30 = vsel %vm16010_vm8, %v3300_v37, %v7609_v48  ;;  %v3419_v34 = vsel %vm16014_vm13, %v3387_v42, %v7610_v12  ;;  %vm16017_vm13 = vmmov %vm16015_vm3 }
 0x459   : > { %v3366_v26 = vsel %vm16011_vm9, %v3333_v30, %v7614_v50  ;;  %v3451_v4 = vsel %vm16015_vm3, %v3419_v34, %v7615_v63  ;;  %v8253_v63 = vld [vmem:[#allocation2 + $0x29] sm:$0xff]  ;;  %vm16018_vm9 = vmmov %vm16012_vm15 }
 0x45a   : > { %3686 = vmatmul.f32.gmra.mxu0 %v3366_v26  ;;  %3766 = vmatmul.f32.gmra.mxu1 %v3451_v4  ;;  %v8254_v50 = vld [vmem:[#allocation2 + $0x70] sm:$0xff]  ;;  %vm16019_vm3 = vmmov %vm16018_vm9  ;;  %v7630_v26 = vunpack.i.h.bf16 %v7628_v18 }
 0x45b   : > { %v3389_v30 = vsel %vm16019_vm3, %v8254_v50, %v7620_v2  ;;  %vm16020_vm15 = vmmov %vm16010_vm8  ;;  %v8256_v2 = vld [vmem:[#allocation2 + $0x78] sm:$0xff] }
 0x45c   : > { %v11295_v24 = vpop.f32.mrf.mxu0  ;;  %v7633_v34 = vpop.permute.xlu0 %7632 }
 0x45d   : > { %v7623_v7 = vpop.permute.xlu1 %7622  ;;  %v7634_v4 = vunpack.i.l.bf16 %v7633_v34  ;;  %v7635_v50 = vunpack.i.h.bf16 %v7633_v34 }
 0x45e   : > { %v7624_v5 = vunpack.i.l.bf16 %v7623_v7  ;;  %v11297_v37 = vpop.f32.mrf.mxu1  ;;  %v7625_v48 = vunpack.i.h.bf16 %v7623_v7  ;;  %v8255_v7 = vld [vmem:[#allocation2 + $0x31] sm:$0xff] }
 0x45f   : > { %16016 = vst [vmem:[#allocation57_spill] sm:$0xff] %v11297_v37 }
 0x460   : > { %v3420_v42 = vsel %vm16010_vm8, %v3388_v33, %v7624_v5  ;;  %v3421_v58 = vsel %vm16020_vm15, %v3389_v30, %v7625_v48  ;;  %vm16022_vm8 = vmmov %vm16017_vm13  ;;  %v16023_v5 = vld [vmem:[#allocation43_spill] sm:$0xff]  ;;  %v7643_v48 = vpop.permute.xlu2 %7642 }
 0x461   : > { %v3452_v12 = vsel %vm16017_vm13, %v3420_v42, %v7629_v49  ;;  %v3453_v33 = vsel %vm16022_vm8, %v3421_v58, %v7630_v26  ;;  %vm16024_vm13 = vnez %v16023_v5 }
 0x462   : > { %3769 = vmatmul.f32.gmra.mxu1 %v3452_v12  ;;  %7064 = vmatmul.msk.f32.vlgmr.msra.gmra.mxu0 %vm16018_vm9, %v8253_v63  ;;  %v2509_v49 = vsel %vm16024_vm13, %v8255_v7, 0.0  ;;  %vm16025_vm9 = vmmov %vm16019_vm3  ;;  %v3390_v12 = vsel %vm16019_vm3, %v8256_v2, %v7634_v4  ;;  %v7644_v63 = vunpack.i.l.bf16 %v7643_v48  ;;  %v8257_v7 = vld [vmem:[#allocation2 + $0x39] sm:$0xff] }
 0x463   : > { %vm16027_vm13 = vmmov %vm16019_vm3 }
 0x464   : > { %v11304_v57 = vpop.f32.mrf.mxu0  ;;  %v7648_v4 = vpop.permute.xlu0 %7647 }
 0x465   : > { %v7638_v45 = vpop.permute.xlu1 %7637  ;;  %v7649_v34 = vunpack.i.l.bf16 %v7648_v4  ;;  %v7650_v28 = vunpack.i.h.bf16 %v7648_v4 }
 0x466   : > { %v11306_v14 = vpop.f32.mrf.mxu1  ;;  %v7639_v42 = vunpack.i.l.bf16 %v7638_v45  ;;  %v7640_v26 = vunpack.i.h.bf16 %v7638_v45  ;;  %v8259_v45 = vld [vmem:[#allocation2 + $0x41] sm:$0xff] }
 0x467   : > { %16021 = vst [vmem:[#allocation58_spill] sm:$0xff] %v11306_v14 }
 0x468   : > { %v3422_v18 = vsel %vm16020_vm15, %v3390_v12, %v7639_v42  ;;  %v7645_v12 = vunpack.i.h.bf16 %v7643_v48 }
 0x469   : > { %v3454_v58 = vsel %vm16022_vm8, %v3422_v18, %v7644_v63  ;;  %v16032_v63 = vld [vmem:[#allocation41_spill] sm:$0xff] }
 0x46a   : > { %3772 = vmatmul.f32.gmra.mxu1 %v3453_v33  ;;  %7065 = vmatmul.msk.f32.gmra.mxu0 %vm16025_vm9, %v2509_v49  ;;  %v8258_v33 = vld [vmem:[#allocation2 + $0x80] sm:$0xff]  ;;  %vm16028_vm9 = vmmov %vm16019_vm3 }
 0x46b   : > { %v3391_v49 = vsel %vm16028_vm9, %v8258_v33, %v7635_v50  ;;  %vm16029_vm3 = vmmov %vm16020_vm15  ;;  %v8260_v50 = vld [vmem:[#allocation2 + $0x88] sm:$0xff] }
 0x46c   : > { %v11314_v30 = vpop.f32.mrf.mxu0  ;;  %v3423_v42 = vsel %vm16029_vm3, %v3391_v49, %v7640_v26  ;;  %vm16031_vm15 = vmmov %vm16022_vm8  ;;  %vm16033_vm8 = vnez %v16032_v63  ;;  %v3392_v33 = vsel %vm16028_vm9, %v8260_v50, %v7649_v34  ;;  %v7658_v26 = vpop.permute.xlu2 %7657 }
 0x46d   : > { %v7653_v2 = vpop.permute.xlu1 %7652  ;;  %v3455_v18 = vsel %vm16031_vm15, %v3423_v42, %v7645_v12  ;;  %v7659_v49 = vunpack.i.l.bf16 %v7658_v26  ;;  %v7663_v34 = vpop.permute.xlu0 %7662 }
 0x46e   : > { %v11316_v43 = vpop.f32.mrf.mxu1  ;;  %v7655_v12 = vunpack.i.h.bf16 %v7653_v2  ;;  %v7664_v4 = vunpack.i.l.bf16 %v7663_v34  ;;  %v7665_v47 = vunpack.i.h.bf16 %v7663_v34 }
 0x46f   : > { %16026 = vst [vmem:[#allocation59_spill] sm:$0xff] %v11316_v43 }
 0x472   : > { %3775 = vmatmul.f32.gmra.mxu1 %v3454_v58  ;;  %7066 = vmatmul.msk.f32.gmra.mxu0 %vm16027_vm13, %v8257_v7  ;;  %v2511_v58 = vsel %vm16033_vm8, %v8259_v45, 0.0  ;;  %v7654_v7 = vunpack.i.l.bf16 %v7653_v2  ;;  %vm16034_vm13 = vmmov %vm16028_vm9  ;;  %v8261_v45 = vld [vmem:[#allocation2 + $0x49] sm:$0xff]  ;;  %v8263_v2 = vld [vmem:[#allocation2 + $0x51] sm:$0xff] }
 0x473   : > { %vm16036_vm8 = vmmov %vm16028_vm9 }
 0x474   : > { %v11322_v5 = vpop.f32.mrf.mxu0  ;;  %v3424_v48 = vsel %vm16029_vm3, %v3392_v33, %v7654_v7  ;;  %vm16038_vm9 = vmmov %vm16029_vm3  ;;  %v7660_v33 = vunpack.i.h.bf16 %v7658_v26 }
 0x475   : > { %v3456_v42 = vsel %vm16031_vm15, %v3424_v48, %v7659_v49  ;;  %v7668_v50 = vpop.permute.xlu1 %7667  ;;  %vm16040_vm3 = vmmov %vm16031_vm15  ;;  %v16041_v49 = vld [vmem:[#allocation36_spill] sm:$0xff] }
 0x476   : > { %v11324_v23 = vpop.f32.mrf.mxu1  ;;  %vm16042_vm15 = vnez %v16041_v49 }
 0x477   : > { %16030 = vst [vmem:[#allocation60_spill] sm:$0xff] %v11324_v23 }
 0x47a   : > { %3778 = vmatmul.f32.gmra.mxu1 %v3455_v18  ;;  %7067 = vmatmul.msk.f32.gmra.mxu0 %vm16034_vm13, %v2511_v58  ;;  %v8262_v18 = vld [vmem:[#allocation2 + $0x90] sm:$0xff]  ;;  %vm16037_vm13 = vmmov %vm16036_vm8 }
 0x47b   : > { %v3393_v58 = vsel %vm16037_vm13, %v8262_v18, %v7650_v28  ;;  %v8264_v28 = vld [vmem:[#allocation2 + $0x98] sm:$0xff]  ;;  %vm16043_vm13 = vmmov %vm16036_vm8 }
 0x47c   : > { %v3425_v7 = vsel %vm16038_vm9, %v3393_v58, %v7655_v12  ;;  %v3394_v18 = vsel %vm16043_vm13, %v8264_v28, %v7664_v4  ;;  %v7673_v12 = vpop.permute.xlu2 %7672  ;;  %v7678_v4 = vpop.permute.xlu0 %7677  ;;  %vm16045_vm13 = vmmov %vm16038_vm9 }
 0x47d   : > { %v11332_v31 = vpop.f32.mrf.mxu0  ;;  %v3457_v48 = vsel %vm16040_vm3, %v3425_v7, %v7660_v33  ;;  %v7674_v58 = vunpack.i.l.bf16 %v7673_v12  ;;  %v7670_v33 = vunpack.i.h.bf16 %v7668_v50  ;;  %v7683_v28 = vpop.permute.xlu1 %7682  ;;  %v7679_v34 = vunpack.i.l.bf16 %v7678_v4 }
 0x47e   : > { %v11334_v10 = vpop.f32.mrf.mxu1 }
 0x47f   : > { %16035 = vst [vmem:[#allocation61_spill] sm:$0xff] %v11334_v10 }
 0x482   : > { %3781 = vmatmul.f32.gmra.mxu1 %v3456_v42  ;;  %7068 = vmatmul.msk.f32.gmra.mxu0 %vm16036_vm8, %v8261_v45  ;;  %v2513_v42 = vsel %vm16042_vm15, %v8263_v2, 0.0  ;;  %v7669_v45 = vunpack.i.l.bf16 %v7668_v50  ;;  %v8265_v2 = vld [vmem:[#allocation2 + $0x59] sm:$0xff]  ;;  %vm16044_vm15 = vmmov %vm16036_vm8  ;;  %v8267_v50 = vld [vmem:[#allocation2 + $0x61] sm:$0xff] }
 0x484   : > { %v3426_v26 = vsel %vm16038_vm9, %v3394_v18, %v7669_v45  ;;  %v7675_v18 = vunpack.i.h.bf16 %v7673_v12  ;;  %vm16046_vm9 = vmmov %vm16040_vm3 }
 0x485   : > { %v3458_v7 = vsel %vm16040_vm3, %v3426_v26, %v7674_v58  ;;  %v16047_v58 = vld [vmem:[#allocation25_spill] sm:$0xff] }
 0x486   : > { %vm16048_vm3 = vnez %v16047_v58 }
 0x487   : > { %v11340_v63 = vpop.f32.mrf.mxu0  ;;  %v11342_v39 = vpop.f32.mrf.mxu1 }
 0x488   : > { %16039 = vst [vmem:[#allocation62_spill] sm:$0xff] %v11342_v39  ;;  %v7680_v39 = vunpack.i.h.bf16 %v7678_v4 }
 0x48a   : > { %3784 = vmatmul.f32.gmra.mxu1 %v3457_v48  ;;  %7069 = vmatmul.msk.f32.gmra.mxu0 %vm16036_vm8, %v2513_v42  ;;  %v8266_v48 = vld [vmem:[#allocation2 + $0xa0] sm:$0xff] }
 0x48b   : > { %v3395_v42 = vsel %vm16036_vm8, %v8266_v48, %v7665_v47  ;;  %v8268_v47 = vld [vmem:[#allocation2 + $0xa8] sm:$0xff] }
 0x48c   : > { %v3427_v45 = vsel %vm16045_vm13, %v3395_v42, %v7670_v33  ;;  %v3396_v48 = vsel %vm16036_vm8, %v8268_v47, %v7679_v34  ;;  %v7688_v33 = vpop.permute.xlu2 %7687  ;;  %v7693_v34 = vpop.permute.xlu0 %7692 }
 0x48d   : > { %v3459_v26 = vsel %vm16046_vm9, %v3427_v45, %v7675_v18  ;;  %v7689_v42 = vunpack.i.l.bf16 %v7688_v33  ;;  %v7685_v18 = vunpack.i.h.bf16 %v7683_v28  ;;  %v7690_v47 = vunpack.i.h.bf16 %v7688_v33 }
 0x48e   : > { %v7694_v4 = vunpack.i.l.bf16 %v7693_v34 }
 0x48f   : > { %v11350_v35 = vpop.f32.mrf.mxu0  ;;  %v11352_v32 = vpop.f32.mrf.mxu1 }
 0x492   : > { %3787 = vmatmul.f32.gmra.mxu1 %v3458_v7  ;;  %7070 = vmatmul.msk.f32.gmra.mxu0 %vm16044_vm15, %v8265_v2  ;;  %v2515_v7 = vsel %vm16048_vm3, %v8267_v50, 0.0  ;;  %v7684_v2 = vunpack.i.l.bf16 %v7683_v28  ;;  %vm16049_vm15 = vmmov %vm16036_vm8  ;;  %v8269_v50 = vld [vmem:[#allocation2 + $0x69] sm:$0xff]  ;;  %v8270_v28 = vld [vmem:[#allocation2 + $0x71] sm:$0xff] }
 0x493   : > { %vm16050_vm3 = vmmov %vm16036_vm8 }
 0x494   : > { %v3428_v12 = vsel %vm16045_vm13, %v3396_v48, %v7684_v2  ;;  %vm16052_vm8 = vmmov %vm16045_vm13 }
 0x495   : > { %v3460_v45 = vsel %vm16046_vm9, %v3428_v12, %v7689_v42  ;;  %vm16053_vm13 = vmmov %vm16046_vm9  ;;  %v16054_v42 = vld [vmem:[#allocation28_spill] sm:$0xff] }
 0x496   : > { %vm16055_vm9 = vnez %v16054_v42 }
 0x497   : > { %v11358_v49 = vpop.f32.mrf.mxu0  ;;  %v11360_v60 = vpop.f32.mrf.mxu1 }
 0x49a   : > { %3790 = vmatmul.f32.gmra.mxu1 %v3459_v26  ;;  %7071 = vmatmul.msk.f32.gmra.mxu0 %vm16049_vm15, %v2515_v7  ;;  %vm16051_vm15 = vmmov %vm16050_vm3  ;;  %v7698_v7 = vpop.permute.xlu1 %7697 }
 0x49b   : > { %v3397_v26 = vsel %vm16051_vm15, %v11077_v9, %v7680_v39  ;;  %vm16056_vm15 = vmmov %vm16050_vm3  ;;  %v7703_v9 = vpop.permute.xlu2 %7702 }
 0x49c   : > { %v3429_v2 = vsel %vm16052_vm8, %v3397_v26, %v7685_v18  ;;  %v3398_v39 = vsel %vm16056_vm15, %v11103_v56, %v7694_v4  ;;  %v7704_v18 = vunpack.i.l.bf16 %v7703_v9  ;;  %v7695_v26 = vunpack.i.h.bf16 %v7693_v34  ;;  %v7708_v56 = vpop.permute.xlu0 %7707  ;;  %vm16058_vm15 = vmmov %vm16052_vm8 }
 0x49d   : > { %v3461_v12 = vsel %vm16053_vm13, %v3429_v2, %v7690_v47  ;;  %v7700_v47 = vunpack.i.h.bf16 %v7698_v7  ;;  %v7709_v34 = vunpack.i.l.bf16 %v7708_v56 }
 0x49f   : > { %v11368_v1 = vpop.f32.mrf.mxu0  ;;  %v11370_v10 = vpop.f32.mrf.mxu1 }
 0x4a2   : > { %3793 = vmatmul.f32.gmra.mxu1 %v3460_v45  ;;  %7072 = vmatmul.msk.f32.gmra.mxu0 %vm16050_vm3, %v8269_v50  ;;  %v2517_v45 = vsel %vm16055_vm9, %v8270_v28, 0.0  ;;  %v7699_v50 = vunpack.i.l.bf16 %v7698_v7  ;;  %v8271_v28 = vld [vmem:[#allocation2 + $0x79] sm:$0xff]  ;;  %vm16057_vm9 = vmmov %vm16050_vm3  ;;  %v7713_v4 = vpop.permute.xlu1 %7712  ;;  %v8272_v7 = vld [vmem:[#allocation2 + $0x81] sm:$0xff] }
 0x4a4   : > { %v3430_v33 = vsel %vm16052_vm8, %v3398_v39, %v7699_v50  ;;  %v7705_v50 = vunpack.i.h.bf16 %v7703_v9  ;;  %vm16059_vm8 = vmmov %vm16053_vm13 }
 0x4a5   : > { %v3462_v2 = vsel %vm16053_vm13, %v3430_v33, %v7704_v18  ;;  %v2519_v18 = vsel %vm10362_vm10, %v8272_v7, 0.0  ;;  %vm16061_vm13 = vmmov %vm16050_vm3  ;;  %v8273_v7 = vld [vmem:[#allocation2 + $0x89] sm:$0xff] }
 0x4a7   : > { %v11377_v48 = vpop.f32.mrf.mxu0  ;;  %v11379_v58 = vpop.f32.mrf.mxu1 }
 0x4aa   : > { %3796 = vmatmul.f32.gmra.mxu1 %v3461_v12  ;;  %7073 = vmatmul.msk.f32.gmra.mxu0 %vm16050_vm3, %v2517_v45  ;;  %v3399_v12 = vsel %vm16050_vm3, %v11105_v0, %v7695_v26  ;;  %v3400_v0 = vsel %vm16061_vm13, %v11130_v11, %v7709_v34  ;;  %v7718_v26 = vpop.permute.xlu2 %7717  ;;  %v7723_v11 = vpop.permute.xlu0 %7722 }
 0x4ab   : > { %v3431_v45 = vsel %vm16058_vm15, %v3399_v12, %v7700_v47  ;;  %v7719_v47 = vunpack.i.l.bf16 %v7718_v26  ;;  %v7728_v34 = vpop.permute.xlu1 %7727 }
 0x4ac   : > { %v3463_v33 = vsel %vm16059_vm8, %v3431_v45, %v7705_v50  ;;  %v7715_v50 = vunpack.i.h.bf16 %v7713_v4 }
 0x4af   : > { %v11388_v23 = vpop.f32.mrf.mxu0  ;;  %v11390_v43 = vpop.f32.mrf.mxu1 }
 0x4b2   : > { %3799 = vmatmul.f32.gmra.mxu1 %v3462_v2  ;;  %7074 = vmatmul.msk.f32.gmra.mxu0 %vm16057_vm9, %v8271_v28  ;;  %v7714_v2 = vunpack.i.l.bf16 %v7713_v4  ;;  %vm16060_vm9 = vmmov %vm16050_vm3  ;;  %v7710_v28 = vunpack.i.h.bf16 %v7708_v56  ;;  %v7724_v56 = vunpack.i.l.bf16 %v7723_v11  ;;  %v8274_v4 = vld [vmem:[#allocation2 + $0x91] sm:$0xff] }
 0x4b3   : > { %vm16062_vm3 = vmmov %vm16058_vm15 }
 0x4b4   : > { %v3432_v9 = vsel %vm16062_vm3, %v3400_v0, %v7714_v2  ;;  %vm16063_vm15 = vmmov %vm16059_vm8  ;;  %v7720_v2 = vunpack.i.h.bf16 %v7718_v26 }
 0x4b5   : > { %v3464_v45 = vsel %vm16063_vm15, %v3432_v9, %v7719_v47  ;;  %vm16064_vm8 = vmmov %vm16060_vm9  ;;  %v2521_v47 = vsel %vm10508_vm0, %v8274_v4, 0.0  ;;  %v8275_v4 = vld [vmem:[#allocation2 + $0x99] sm:$0xff] }
 0x4b6   : > { %vm16066_vm13 = vmmov %vm16062_vm3 }
 0x4b7   : > { %v11397_v39 = vpop.f32.mrf.mxu0  ;;  %v11399_v42 = vpop.f32.mrf.mxu1  ;;  %vm16067_vm3 = vmmov %vm16063_vm15 }
 0x4b8   : > { %vm16068_vm15 = vmmov %vm16064_vm8 }
 0x4ba   : > { %3802 = vmatmul.f32.gmra.mxu1 %v3463_v33  ;;  %7075 = vmatmul.msk.f32.gmra.mxu0 %vm16060_vm9, %v2519_v18  ;;  %vm16065_vm9 = vmmov %vm16064_vm8 }
 0x4bb   : > { %v3401_v33 = vsel %vm16065_vm9, %v11132_v8, %v7710_v28  ;;  %v3402_v8 = vsel %vm16064_vm8, %v11155_v44, %v7724_v56  ;;  %v7733_v28 = vpop.permute.xlu2 %7732  ;;  %vm16069_vm9 = vmmov %vm16066_vm13  ;;  %v7738_v44 = vpop.permute.xlu0 %7737 }
 0x4bc   : > { %v3433_v18 = vsel %vm16066_vm13, %v3401_v33, %v7715_v50  ;;  %v7734_v50 = vunpack.i.l.bf16 %v7733_v28  ;;  %vm16071_vm13 = vmmov %vm16067_vm3  ;;  %v7743_v56 = vpop.permute.xlu1 %7742 }
 0x4bd   : > { %v3465_v9 = vsel %vm16067_vm3, %v3433_v18, %v7720_v2  ;;  %v7730_v2 = vunpack.i.h.bf16 %v7728_v34  ;;  %vm16072_vm3 = vmmov %vm16064_vm8 }
 0x4bf   : > { %v11408_v12 = vpop.f32.mrf.mxu0  ;;  %v11410_v14 = vpop.f32.mrf.mxu1 }
 0x4c2   : > { %3805 = vmatmul.f32.gmra.mxu1 %v3464_v45  ;;  %7076 = vmatmul.msk.f32.gmra.mxu0 %vm16064_vm8, %v8273_v7  ;;  %v7729_v45 = vunpack.i.l.bf16 %v7728_v34  ;;  %v7725_v7 = vunpack.i.h.bf16 %v7723_v11  ;;  %vm16074_vm8 = vmmov %vm16069_vm9  ;;  %v7739_v11 = vunpack.i.l.bf16 %v7738_v44  ;;  %v8276_v34 = vld [vmem:[#allocation2 + $0xa1] sm:$0xff] }
 0x4c4   : > { %v3434_v26 = vsel %vm16069_vm9, %v3402_v8, %v7729_v45  ;;  %v7735_v45 = vunpack.i.h.bf16 %v7733_v28  ;;  %vm16075_vm9 = vmmov %vm16071_vm13 }
 0x4c5   : > { %v3466_v18 = vsel %vm16071_vm13, %v3434_v26, %v7734_v50  ;;  %v2523_v50 = vsel %vm10657_vm2, %v8276_v34, 0.0  ;;  %vm16076_vm13 = vmmov %vm16072_vm3  ;;  %v3239_v34 = vpop.permute.xlu0 %3238 }
 0x4c7   : > { %v11417_v0 = vpop.f32.mrf.mxu0  ;;  %v11419_v19 = vpop.f32.mrf.mxu1 }
 0x4ca   : > { %3808 = vmatmul.f32.gmra.mxu1 %v3465_v9  ;;  %7077 = vmatmul.msk.f32.gmra.mxu0 %vm16068_vm15, %v2521_v47  ;;  %vm16073_vm15 = vmmov %vm16072_vm3 }
 0x4cb   : > { %v3403_v9 = vsel %vm16073_vm15, %v11157_v6, %v7725_v7  ;;  %v3404_v6 = vsel %vm16072_vm3, %v11178_v55, %v7739_v11  ;;  %v2506_v7 = vld [vmem:[#allocation2 + $0x119] sm:$0xff]  ;;  %vm16077_vm15 = vmmov %vm16072_vm3  ;;  %v7745_v55 = vunpack.i.h.bf16 %v7743_v56  ;;  %v7748_v11 = vpop.permute.xlu1 %7747 }
 0x4cc   : > { %v3435_v47 = vsel %vm16074_vm8, %v3403_v9, %v7730_v2  ;;  %7094 = vmatmul.msk.f32.gmra.mxu2 %vm16077_vm15, %v2506_v7  ;;  %v3237_v9 = vpop.permute.xlu2 %3236  ;;  %vm16079_vm15 = vmmov %vm16072_vm3 }
 0x4cd   : > { %v3467_v26 = vsel %vm16075_vm9, %v3435_v47, %v7735_v45  ;;  %v7740_v47 = vunpack.i.h.bf16 %v7738_v44 }
 0x4cf   : > { %v11428_v33 = vpop.f32.mrf.mxu0  ;;  %v11430_v37 = vpop.f32.mrf.mxu1 }
 0x4d0   : > { %16070 = vst [vmem:[#allocation63_spill] sm:$0xff] %v11428_v33 }
 0x4d2   : > { %3811 = vmatmul.f32.gmra.mxu1 %v3466_v18  ;;  %7078 = vmatmul.msk.f32.gmra.mxu0 %vm16072_vm3, %v8275_v4  ;;  %v7744_v18 = vunpack.i.l.bf16 %v7743_v56 }
 0x4d4   : > { %v3436_v28 = vsel %vm16074_vm8, %v3404_v6, %v7744_v18  ;;  %v3405_v18 = vsel %vm16072_vm3, %v11180_v38, %v7740_v47  ;;  %v3241_v38 = vpop.permute.xlu0 %3240 }
 0x4d5   : > { %v3468_v45 = vsel %vm16075_vm9, %v3436_v28, %v3237_v9  ;;  %v3437_v28 = vsel %vm16074_vm8, %v3405_v18, %v7745_v55  ;;  %v7749_v9 = vunpack.i.l.bf16 %v7748_v11 }
 0x4d7   : > { %v11437_v8 = vpop.f32.mrf.mxu0  ;;  %v11439_v29 = vpop.f32.mrf.mxu1 }
 0x4da   : > { %3814 = vmatmul.f32.gmra.mxu1 %v3467_v26  ;;  %7079 = vmatmul.msk.f32.gmra.mxu0 %vm16076_vm13, %v2523_v50  ;;  %v8277_v26 = vld [vmem:[#allocation2 + $0xa9] sm:$0xff]  ;;  %vm16078_vm13 = vmmov %vm16072_vm3  ;;  %v2507_v50 = vld [vmem:[#allocation2 + $0x121] sm:$0xff] }
 0x4db   : > { %v2539_v7 = vsel %vm16003_vm1, %v2507_v50, 0.0  ;;  %vm16081_vm1 = vmmov %vm16072_vm3  ;;  %v3143_v50 = vpop.permute.xlu1 %3142 }
 0x4dc   : > { %7095 = vmatmul.msk.f32.gmra.mxu2 %vm16079_vm15, %v2539_v7  ;;  %vm16082_vm3 = vmmov %vm16081_vm1 }
 0x4dd   : > { %v3406_v47 = vsel %vm16082_vm3, %v11208_v41, %v7749_v9  ;;  %vm16083_vm15 = vmmov %vm16074_vm8  ;;  %v3017_v9 = vpop.permute.xlu0 %3016 }
 0x4de   : > { %vm16084_vm8 = vmmov %vm16075_vm9 }
 0x4df   : > { %v11449_v2 = vpop.f32.mrf.mxu1  ;;  %v11451_v4 = vpop.f32.mrf.mxu0  ;;  %vm16087_vm3 = vmmov %vm16084_vm8 }
 0x4e2   : > { %3817 = vmatmul.f32.gmra.mxu1 %v3468_v45  ;;  %7080 = vmatmul.msk.f32.gmra.mxu0 %vm16078_vm13, %v8277_v26  ;;  %v3469_v45 = vsel %vm16075_vm9, %v3437_v28, %v3239_v34  ;;  %vm16080_vm13 = vnez %v15871_v61  ;;  %v3141_v26 = vpop.permute.xlu2 %3140  ;;  %v7750_v34 = vunpack.i.h.bf16 %v7748_v11  ;;  %vm16085_vm9 = vmmov %vm16081_vm1  ;;  %v2527_v11 = vsel %vm10839_vm4, %v11072_v46, 0.0 }
 0x4e3   : > { %v2525_v56 = vsel %vm16080_vm13, %v11042_v21, 0.0  ;;  %v3438_v55 = vsel %vm16083_vm15, %v3406_v47, %v3141_v26  ;;  %vm16086_vm13 = vmmov %vm16083_vm15  ;;  %v3145_v61 = vpop.permute.xlu1 %3144 }
 0x4e4   : > { %v3470_v18 = vsel %vm16084_vm8, %v3438_v55, %v3241_v38  ;;  %v3407_v28 = vsel %vm16081_vm1, %v11191_v15, %v7750_v34  ;;  %vm16088_vm15 = vmmov %vm16081_vm1 }
 0x4e5   : > { %v3439_v41 = vsel %vm16086_vm13, %v3407_v28, %v3143_v50  ;;  %vm16089_vm8 = vmmov %vm16081_vm1  ;;  %v3019_v55 = vpop.permute.xlu0 %3018 }
 0x4e7   : > { %v11460_v6 = vpop.f32.mrf.mxu1  ;;  %v11462_v44 = vpop.f32.mrf.mxu0 }
 0x4ea   : > { %3820 = vmatmul.f32.gmra.mxu1 %v3469_v45  ;;  %7081 = vmatmul.msk.f32.gmra.mxu0 %vm16081_vm1, %v2525_v56  ;;  %v3243_v21 = vpop.permute.xlu2 %3242 }
 0x4eb   : > { %v3471_v26 = vsel %vm16087_vm3, %v3439_v41, %v3243_v21  ;;  %v3147_v46 = vpop.permute.xlu1 %3146 }
 0x4ef   : > { %v11472_v7 = vpop.f32.mrf.mxu1  ;;  %v11474_v3 = vpop.f32.mrf.mxu0 }
 0x4f2   : > { %3823 = vmatmul.f32.gmra.mxu1 %v3470_v18  ;;  %7082 = vmatmul.msk.f32.gmra.mxu0 %vm16085_vm9, %v11086_v54  ;;  %v3408_v54 = vsel %vm16089_vm8, %v11213_v17, %v3017_v9  ;;  %v3245_v15 = vpop.permute.xlu2 %3244  ;;  %vm16090_vm9 = vmmov %vm16086_vm13  ;;  %v3409_v18 = vsel %vm16081_vm1, %v11244_v36, %v3019_v55 }
 0x4f3   : > { %v3440_v38 = vsel %vm16090_vm9, %v3408_v54, %v3145_v61  ;;  %vm16091_vm13 = vmmov %vm16087_vm3 }
 0x4f4   : > { %v3472_v34 = vsel %vm16091_vm13, %v3440_v38, %v3245_v15  ;;  %vm16092_vm3 = vmmov %vm16090_vm9  ;;  %v11506_v15 = vpop.f32.mrf.mxu2 }
 0x4f5   : > { %v3441_v21 = vsel %vm16092_vm3, %v3409_v18, %v3147_v46  ;;  %16094 = vst [vmem:[#allocation64_spill] sm:$0xff] %v11506_v15  ;;  %vm16105_vm8 = vmmov %vm16092_vm3 }
 0x4f6   : > { %vm16106_vm9 = vmmov %vm16092_vm3 }
 0x4f7   : > { %v11483_v45 = vpop.f32.mrf.mxu1  ;;  %v3862_v56 = vpop.f32.mrf.mxu0  ;;  %vm16108_vm1 = vmmov %vm16092_vm3 }
 0x4f8   : > { %vm16155_vm2 = vmmov %vm16108_vm1 }
 0x4fa   : > { %3826 = vmatmul.f32.gmra.mxu1 %v3471_v26  ;;  %7083 = vmatmul.msk.f32.gmra.mxu0 %vm16088_vm15, %v2527_v11  ;;  %v3247_v28 = vpop.permute.xlu2 %3246  ;;  %vm16093_vm15 = vmmov %vm16091_vm13 }
 0x4fb   : > { %v3473_v9 = vsel %vm16093_vm15, %v3441_v21, %v3247_v28  ;;  %vm16107_vm13 = vmmov %vm16092_vm3 }
 0x4fc   : > { %v11514_v18 = vpop.f32.mrf.mxu2  ;;  %vm16109_vm3 = vmmov %vm16108_vm1 }
 0x4fd   : > { %16096 = vst [vmem:[#allocation66_spill] sm:$0xff] %v11514_v18  ;;  %vm16110_vm15 = vmmov %vm16108_vm1 }
 0x4ff   : > { %v11493_v47 = vpop.f32.mrf.mxu1  ;;  %v3865_v50 = vpop.f32.mrf.mxu0 }
 0x502   : > { %3829 = vmatmul.f32.gmra.mxu1 %v3472_v34 }
 0x504   : > { %v11520_v28 = vpop.f32.mrf.mxu2 }
 0x505   : > { %16098 = vst [vmem:[#allocation68_spill] sm:$0xff] %v11520_v28  ;;  %v11541_v28 = vld [vmem:[%s15205_s4] ss:$0 sm:$0xff] }
 0x506   : > { %v3637_v33 = vadd.f32 %v11541_v28, %v11272_v27  ;;  %v3643_v27 = vadd.f32 %v11541_v28, %v11295_v24 }
 0x507   : > { %v11499_v41 = vpop.f32.mrf.mxu1  ;;  %v3868_v17 = vpop.f32.mrf.mxu0 }
 0x50a   : > { %3832 = vmatmul.f32.gmra.mxu1 %v3473_v9 }
 0x50c   : > { %v11526_v25 = vpop.f32.mrf.mxu2 }
 0x50d   : > { %16100 = vst [vmem:[#allocation70_spill] sm:$0xff] %v11526_v25  ;;  %v3628_v25 = vadd.f32 %v11541_v28, %v11206_v40 }
 0x50f   : > { %v11502_v61 = vpop.f32.mrf.mxu1  ;;  %v3871_v26 = vpop.f32.mrf.mxu0  ;;  %v3741_v22 = vadd.f32 %v11352_v32, %v3628_v25 }
 0x517   : > { %v11504_v11 = vpop.f32.mrf.mxu1  ;;  %v3874_v54 = vpop.f32.mrf.mxu0 }
 0x51f   : > { %v11508_v38 = vpop.f32.mrf.mxu1  ;;  %v3877_v36 = vpop.f32.mrf.mxu0 }
 0x527   : > { %v11510_v55 = vpop.f32.mrf.mxu1  ;;  %v11512_v34 = vpop.f32.mrf.mxu0 }
 0x528   : > { %16095 = vst [vmem:[#allocation65_spill] sm:$0xff] %v11510_v55  ;;  %v11532_v55 = vpop.f32.mrf.mxu2 }
 0x529   : > { %16102 = vst [vmem:[#allocation72_spill] sm:$0xff] %v11532_v55 }
 0x52f   : > { %v11516_v46 = vpop.f32.mrf.mxu1  ;;  %v11518_v21 = vpop.f32.mrf.mxu0 }
 0x530   : > { %16097 = vst [vmem:[#allocation67_spill] sm:$0xff] %v11516_v46  ;;  %v11554_v62 = vpop.f32.mrf.mxu2 }
 0x531   : > { %16104 = vst [vmem:[#allocation74_spill] sm:$0xff] %v11554_v62 }
 0x537   : > { %v11522_v9 = vpop.f32.mrf.mxu1  ;;  %v11524_v53 = vpop.f32.mrf.mxu0 }
 0x538   : > { %16099 = vst [vmem:[#allocation69_spill] sm:$0xff] %v11522_v9  ;;  %v3631_v9 = vadd.f32 %v11541_v28, %v11232_v20 }
 0x53a   : > { %v3744_v55 = vadd.f32 %v11360_v60, %v3631_v9  ;;  %v3750_v60 = vadd.f32 %v11379_v58, %v3637_v33  ;;  %v11567_v9 = vadd.f32 %v11451_v4, %v3741_v22  ;;  %v3756_v58 = vadd.f32 %v11399_v42, %v3643_v27 }
 0x53c   : > { %v11561_v40 = vadd.f32 %v11462_v44, %v3744_v55  ;;  %v3951_v22 = vsel %vm16106_vm9, %v11567_v9, 0.0  ;;  %v3649_v44 = vadd.f32 %v11541_v28, %v11314_v30  ;;  %v11595_v42 = vadd.f32 %v3868_v17, %v3756_v58  ;;  %v11597_v55 = vpop.f32.mrf.mxu2  ;;  %vm16112_vm9 = vmmov %vm16108_vm1 }
 0x53e   : > { %v3952_v25 = vsel %vm16105_vm8, %v11561_v40, 0.0  ;;  %v3960_v27 = vsel %vm16110_vm15, %v11595_v42, 0.0  ;;  %vm16111_vm8 = vmmov %vm16108_vm1 }
 0x53f   : > { %v11528_v15 = vpop.f32.mrf.mxu1  ;;  %v11530_v16 = vpop.f32.mrf.mxu0  ;;  %v3953_v24 = vadd.f32 %v3952_v25, %v3951_v22  ;;  %v3661_v22 = vadd.f32 %v11541_v28, %v11350_v35  ;;  %vm16115_vm15 = vmmov %vm16108_vm1 }
 0x540   : > { %16101 = vst [vmem:[#allocation71_spill] sm:$0xff] %v11528_v15  ;;  %v3634_v15 = vadd.f32 %v11541_v28, %v11257_v13  ;;  %v3640_v13 = vadd.f32 %v11541_v28, %v11286_v51  ;;  %v3646_v51 = vadd.f32 %v11541_v28, %v11304_v57 }
 0x542   : > { %v3747_v20 = vadd.f32 %v11370_v10, %v3634_v15  ;;  %v3753_v32 = vadd.f32 %v11390_v43, %v3640_v13  ;;  %v11577_v10 = vadd.f32 %v3862_v56, %v3750_v60  ;;  %v3759_v56 = vadd.f32 %v11410_v14, %v3646_v51 }
 0x543   : > { %v3655_v14 = vadd.f32 %v11541_v28, %v11332_v31 }
 0x544   : > { %v11570_v62 = vadd.f32 %v11474_v3, %v3747_v20  ;;  %v11586_v33 = vadd.f32 %v3865_v50, %v3753_v32  ;;  %v3956_v57 = vsel %vm16108_vm1, %v11577_v10, 0.0  ;;  %v3652_v50 = vadd.f32 %v11541_v28, %v11322_v5 }
 0x545   : > { %v3762_v20 = vadd.f32 %v11419_v19, %v3649_v44  ;;  %v11604_v60 = vadd.f32 %v3871_v26, %v3759_v56  ;;  %v3658_v19 = vadd.f32 %v11541_v28, %v11340_v63  ;;  %v3768_v5 = vadd.f32 %v11439_v29, %v3655_v14 }
 0x546   : > { %v3954_v3 = vsel %vm16107_vm13, %v11570_v62, 0.0  ;;  %v3958_v13 = vsel %vm16109_vm3, %v11586_v33, 0.0  ;;  %v3765_v17 = vadd.f32 %v11430_v37, %v3652_v50  ;;  %vm16113_vm13 = vmmov %vm16108_vm1  ;;  %v3670_v50 = vadd.f32 %v11541_v28, %v11377_v48 }
 0x547   : > { %v11534_v52 = vpop.f32.mrf.mxu1  ;;  %v11536_v18 = vpop.f32.mrf.mxu0  ;;  %v3955_v15 = vadd.f32 %v3954_v3, %v3953_v24  ;;  %v11611_v32 = vadd.f32 %v3874_v54, %v3762_v20  ;;  %v3962_v26 = vsel %vm16111_vm8, %v11604_v60, 0.0  ;;  %v3771_v54 = vadd.f32 %v11449_v2, %v3658_v19  ;;  %vm16114_vm3 = vmmov %vm16108_vm1 }
 0x548   : > { %16103 = vst [vmem:[#allocation73_spill] sm:$0xff] %v11534_v52  ;;  %v11618_v51 = vadd.f32 %v3877_v36, %v3765_v17  ;;  %v11628_v63 = vadd.f32 %v11512_v34, %v3768_v5  ;;  %v3664_v36 = vadd.f32 %v11541_v28, %v11358_v49  ;;  %v3774_v24 = vadd.f32 %v11460_v6, %v3661_v22  ;;  %v11638_v2 = vpop.f32.mrf.mxu2  ;;  %vm16116_vm8 = vmmov %vm16108_vm1 }
 0x549   : > { %v3957_v30 = vadd.f32 %v3956_v57, %v3955_v15  ;;  %v3964_v3 = vsel %vm16112_vm9, %v11611_v32, 0.0  ;;  %v11636_v56 = vadd.f32 %v11518_v21, %v3771_v54  ;;  %v3667_v57 = vadd.f32 %v11541_v28, %v11368_v1  ;;  %vm16117_vm9 = vmmov %vm16108_vm1 }
 0x54a   : > { %v3966_v44 = vsel %vm16113_vm13, %v11618_v51, 0.0  ;;  %v3777_v34 = vadd.f32 %v11472_v7, %v3664_v36  ;;  %v3968_v15 = vsel %vm16108_vm1, %v11628_v63, 0.0  ;;  %v11646_v49 = vadd.f32 %v11524_v53, %v3774_v24  ;;  %vm16118_vm13 = vmmov %vm16108_vm1  ;;  %v16119_v24 = vld [vmem:[#allocation10_spill] sm:$0xff] }
 0x54b   : > { %v3959_v25 = vadd.f32 %v3958_v13, %v3957_v30  ;;  %v3780_v21 = vadd.f32 %v11483_v45, %v3667_v57  ;;  %v3970_v20 = vsel %vm16114_vm3, %v11636_v56, 0.0  ;;  %v3673_v53 = vadd.f32 %v11541_v28, %v11388_v23  ;;  %vm16121_vm3 = vmmov %vm16108_vm1 }
 0x54c   : > { %v11654_v13 = vadd.f32 %v11530_v16, %v3777_v34  ;;  %v3783_v14 = vadd.f32 %v11493_v47, %v3670_v50  ;;  %v3972_v48 = vsel %vm16115_vm15, %v11646_v49, 0.0  ;;  %v3676_v16 = vadd.f32 %v11541_v28, %v11397_v39  ;;  %v16123_v50 = vld [vmem:[#allocation63_spill] sm:$0xff]  ;;  %vm16127_vm15 = vmmov %vm16108_vm1 }
 0x54d   : > { %v3961_v58 = vadd.f32 %v3960_v27, %v3959_v25  ;;  %v11664_v45 = vadd.f32 %v11536_v18, %v3780_v21  ;;  %v3786_v27 = vadd.f32 %v11499_v41, %v3673_v53  ;;  %v3679_v47 = vadd.f32 %v11541_v28, %v11408_v12  ;;  %v16125_v53 = vld [vmem:[#allocation54_spill] sm:$0xff] }
 0x54e   : > { %v3974_v25 = vsel %vm16116_vm8, %v11654_v13, 0.0  ;;  %v3789_v5 = vadd.f32 %v11502_v61, %v3676_v16  ;;  %v3682_v41 = vadd.f32 %v11541_v28, %v11417_v0  ;;  %v11698_v0 = vmul.u32 2, %v16119_v24  ;;  %v16128_v16 = vld [vmem:[#allocation14_spill] sm:$0xff]  ;;  %vm16133_vm8 = vmmov %vm16108_vm1 }
 0x54f   : > { %v11550_v46 = vpop.f32.mrf.mxu1  ;;  %v11552_v52 = vpop.f32.mrf.mxu0  ;;  %v3963_v29 = vadd.f32 %v3962_v26, %v3961_v58  ;;  %v3976_v18 = vsel %vm16117_vm9, %v11664_v45, 0.0  ;;  %v3685_v21 = vadd.f32 %v11541_v28, %v16123_v50  ;;  %vm16149_vm9 = vmmov %vm16108_vm1 }
 0x550   : > { %v11672_v19 = vadd.f32 %v11552_v52, %v3783_v14  ;;  %v11681_v58 = vpop.f32.mrf.mxu2  ;;  %v3792_v52 = vadd.f32 %v11504_v11, %v3679_v47  ;;  %v16126_v14 = vld [vmem:[#allocation67_spill] sm:$0xff] }
 0x551   : > { %v3965_v35 = vadd.f32 %v3964_v3, %v3963_v29 }
 0x552   : > { %v3978_v22 = vsel %vm16118_vm13, %v11672_v19, 0.0 }
 0x553   : > { %v3967_v6 = vadd.f32 %v3966_v44, %v3965_v35  ;;  %v16120_v44 = vld [vmem:[#allocation13_spill] sm:$0xff] }
 0x555   : > { %v3969_v1 = vadd.f32 %v3968_v15, %v3967_v6  ;;  %v16122_v15 = vld [vmem:[#allocation31_spill] sm:$0xff] }
 0x556   : > { %v3694_v6 = vadd.f32 %v11541_v28, %v16122_v15 }
 0x557   : > { %v11588_v43 = vpop.f32.mrf.mxu1  ;;  %v3898_v4 = vpop.f32.mrf.mxu0  ;;  %v3971_v17 = vadd.f32 %v3970_v20, %v3969_v1  ;;  %v16124_v1 = vld [vmem:[#allocation26_spill] sm:$0xff] }
 0x558   : > { %v11679_v26 = vadd.f32 %v3898_v4, %v3786_v27  ;;  %v3795_v4 = vadd.f32 %v11508_v38, %v3682_v41  ;;  %v3691_v38 = vadd.f32 %v11541_v28, %v11222_v59  ;;  %v16129_v27 = vld [vmem:[#allocation65_spill] sm:$0xff] }
 0x559   : > { %v3973_v23 = vadd.f32 %v3972_v48, %v3971_v17  ;;  %v16132_v41 = vld [vmem:[#allocation73_spill] sm:$0xff] }
 0x55a   : > { %v3980_v29 = vsel %vm16108_vm1, %v11679_v26, 0.0 }
 0x55b   : > { %v3975_v39 = vadd.f32 %v3974_v25, %v3973_v23  ;;  %v3798_v25 = vadd.f32 %v16129_v27, %v3685_v21  ;;  %v16130_v23 = vld [vmem:[#allocation69_spill] sm:$0xff]  ;;  %v16138_v21 = vld [vmem:[#allocation58_spill] sm:$0xff] }
 0x55c   : > { %v3804_v47 = vadd.f32 %v16130_v23, %v3691_v38  ;;  %v16137_v38 = vld [vmem:[#allocation57_spill] sm:$0xff]  ;;  %v16142_v23 = vld [vmem:[#allocation66_spill] sm:$0xff] }
 0x55d   : > { %v3977_v12 = vadd.f32 %v3976_v18, %v3975_v39  ;;  %v16131_v18 = vld [vmem:[#allocation71_spill] sm:$0xff] }
 0x55e   : > { %v3807_v39 = vadd.f32 %v16131_v18, %v3694_v6  ;;  %v3706_v6 = vadd.f32 %v11541_v28, %v16137_v38 }
 0x55f   : > { %v11620_v31 = vpop.f32.mrf.mxu1  ;;  %v3901_v37 = vpop.f32.mrf.mxu0  ;;  %v3979_v11 = vadd.f32 %v3978_v22, %v3977_v12 }
 0x560   : > { %v11688_v54 = vadd.f32 %v3901_v37, %v3789_v5  ;;  %v3688_v37 = vadd.f32 %v11541_v28, %v11437_v8  ;;  %v3700_v8 = vadd.f32 %v11541_v28, %v16125_v53  ;;  %v11743_v53 = vpop.f32.mrf.mxu2 }
 0x561   : > { %v3981_v20 = vadd.f32 %v3980_v29, %v3979_v11  ;;  %v16135_v29 = vld [vmem:[#allocation16_spill] sm:$0xff] }
 0x562   : > { %v3982_v57 = vsel %vm16121_vm3, %v11688_v54, 0.0  ;;  %v3801_v48 = vadd.f32 %v16126_v14, %v3688_v37  ;;  %v3813_v22 = vadd.f32 %v11550_v46, %v3700_v8  ;;  %v16136_v11 = vld [vmem:[#allocation56_spill] sm:$0xff]  ;;  %v3709_v46 = vadd.f32 %v11541_v28, %v16138_v21  ;;  %v16140_v8 = vld [vmem:[#allocation59_spill] sm:$0xff]  ;;  %vm16156_vm3 = vmmov %vm16108_vm1 }
 0x563   : > { %v3983_v5 = vadd.f32 %v3982_v57, %v3981_v20  ;;  %v3703_v37 = vadd.f32 %v11541_v28, %v16136_v11  ;;  %v16139_v20 = vld [vmem:[#allocation64_spill] sm:$0xff]  ;;  %v3712_v14 = vadd.f32 %v11541_v28, %v16140_v8 }
 0x567   : > { %v11656_v7 = vpop.f32.mrf.mxu1  ;;  %v3904_v30 = vpop.f32.mrf.mxu0 }
 0x568   : > { %v11695_v36 = vadd.f32 %v3904_v30, %v3792_v52  ;;  %v3697_v30 = vadd.f32 %v11541_v28, %v16124_v1  ;;  %v11739_v1 = vadd.f32 %v16139_v20, %v3801_v48  ;;  %v16145_v48 = vld [vmem:[#allocation70_spill] sm:$0xff]  ;;  %v3816_v20 = vadd.f32 %v11588_v43, %v3703_v37 }
 0x56a   : > { %v3984_v17 = vsel %vm16127_vm15, %v11695_v36, 0.0  ;;  %v3810_v52 = vadd.f32 %v16132_v41, %v3697_v30  ;;  %v16143_v41 = vld [vmem:[#allocation68_spill] sm:$0xff]  ;;  %vm16157_vm15 = vmmov %vm16108_vm1 }
 0x56b   : > { %v3985_v15 = vadd.f32 %v3984_v17, %v3983_v5  ;;  %v16141_v17 = vld [vmem:[#allocation60_spill] sm:$0xff]  ;;  %v11752_v5 = vadd.f32 %v16142_v23, %v3804_v47  ;;  %v11755_v11 = vadd.f32 %v16143_v41, %v3807_v39  ;;  %v16151_v47 = vld [vmem:[#allocation22_spill] sm:$0xff]  ;;  %v16152_v39 = vld [vmem:[#allocation61_spill] sm:$0xff] }
 0x56c   : > { %v11749_v27 = vadd.f32 %v11541_v28, %v16141_v17  ;;  %v11758_v38 = vadd.f32 %v16145_v48, %v3810_v52  ;;  %v16150_v17 = vld [vmem:[#allocation8_spill] sm:$0xff]  ;;  %vm966_vm13 = vcmp.lt.s32.totalorder %v16151_v47, %v11698_v0  ;;  %v3990_v52 = vsel %vm16108_vm1, %v11739_v1, 0.0 }
 0x56d   : > { %16144 = vst [vmem:[#allocation10_spill] sm:$0xff] %v11755_v11  ;;  %v11767_v24 = vmul.u32 2, %v16150_v17  ;;  %v3992_v37 = vsel %vm16155_vm2, %v11752_v5, 0.0  ;;  %v3994_v23 = vsel %vm16108_vm1, %v11755_v11, 0.0 }
 0x56e   : > { %16146 = vst [vmem:[#allocation13_spill] sm:$0xff] %v11758_v38 }
 0x56f   : > { %v11690_v61 = vpop.f32.mrf.mxu1  ;;  %v3907_v3 = vpop.f32.mrf.mxu0 }
 0x570   : > { %v11705_v34 = vadd.f32 %v3907_v3, %v3795_v4  ;;  %v16134_v3 = vld [vmem:[#allocation15_spill] sm:$0xff]  ;;  %v16165_v4 = vld [vmem:[#allocation17_spill] sm:$0xff]  ;;  %v3825_v11 = vadd.f32 %v11690_v61, %v3712_v14 }
 0x572   : > { %v3986_v12 = vsel %vm16133_vm8, %v11705_v34, 0.0  ;;  %vm957_vm8 = vcmp.ge.s32.totalorder %v16151_v47, %v11767_v24 }
 0x573   : > { %v3987_v18 = vadd.f32 %v3986_v12, %v3985_v15  ;;  %v11773_v12 = vadd.f32 %v11541_v28, %v16152_v39  ;;  %v16154_v15 = vld [vmem:[#allocation34_spill] sm:$0xff]  ;;  %vm11795_vm0 = vmand %vm957_vm8, %vm966_vm13  ;;  %v16161_v39 = vmov 1.0   ;;  %vm954_vm13 = vcmp.ge.s32.totalorder %v16165_v4, %v11767_v24 }
 0x574   : > { %vm955_vm4 = vcmp.ge.s32.totalorder %v16154_v15, %v11767_v24  ;;  %7096 = vmatpush.msk.msrb.mxu3 %vm11795_vm0, %v16161_v39  ;;  %vm16166_vm8 = vcmp.lt.s32.totalorder %v16154_v15, %v11698_v0  ;;  %v3822_v15 = vadd.f32 %v11656_v7, %v3709_v46  ;;  %v16175_v7 = vmov 0 }
 0x575   : > { %vm11820_vm1 = vmand %vm955_vm4, %vm16166_vm8 }
 0x577   : > { %v11732_v50 = vpop.f32.mrf.mxu1  ;;  %v3910_v57 = vpop.f32.mrf.mxu0 }
 0x578   : > { %v11741_v30 = vadd.f32 %v3910_v57, %v3798_v25  ;;  %v16147_v25 = vld [vmem:[#allocation72_spill] sm:$0xff] }
 0x579   : > { %v11761_v57 = vadd.f32 %v16147_v25, %v3813_v22  ;;  %v16153_v22 = vld [vmem:[#allocation20_spill] sm:$0xff]  ;;  %v16160_v25 = vld [vmem:[#allocation74_spill] sm:$0xff] }
 0x57a   : > { %v3988_v21 = vsel %vm16149_vm9, %v11741_v30, 0.0  ;;  %vm956_vm9 = vcmp.ge.s32.totalorder %v16153_v22, %v11767_v24  ;;  %vm16162_vm2 = vcmp.lt.s32.totalorder %v16153_v22, %v11698_v0  ;;  %v16169_v22 = vld [vmem:[#allocation9_spill] sm:$0xff] }
 0x57b   : > { %16148 = vst [vmem:[#allocation31_spill] sm:$0xff] %v11761_v57  ;;  %v3989_v8 = vadd.f32 %v3988_v21, %v3987_v18  ;;  %v3996_v18 = vsel %vm16156_vm3, %v11758_v38, 0.0  ;;  %v3998_v41 = vsel %vm16157_vm15, %v11761_v57, 0.0  ;;  %v11800_v21 = vadd.f32 %v16160_v25, %v3816_v20  ;;  %vm11808_vm3 = vmand %vm956_vm9, %vm16162_vm2  ;;  %v16182_v57 = vld [vmem:[#allocation7_spill] sm:$0xff] }
 0x57c   : > { %vm963_vm15 = vcmp.lt.s32.totalorder %v16165_v4, %v11698_v0  ;;  %v3819_v20 = vadd.f32 %v11620_v31, %v3706_v6  ;;  %vm962_vm2 = vcmp.lt.s32.totalorder %v16169_v22, %v11698_v0  ;;  %v3943_v4 = vpop.f32.mrf.mxu2  ;;  %7097 = vmatpush.msk.msrb.mxu3 %vm11808_vm3, %v16161_v39  ;;  %v994_v31 = vmul.u32 2, %v16169_v22 }
 0x57d   : > { %v3991_v43 = vadd.f32 %v3990_v52, %v3989_v8  ;;  %vm11838_vm8 = vmand %vm954_vm13, %vm963_vm15  ;;  %vm16174_vm13 = vcmp.ge.s32.totalorder %v16169_v22, %v11767_v24  ;;  %v991_v38 = vmul.u32 2, %v16182_v57  ;;  %v4000_v14 = vsel %vm16191_vm12, %v11800_v21, 0.0 }
 0x57e   : > { %7098 = vmatpush.msk.msrb.mxu3 %vm11820_vm1, %v16161_v39  ;;  %vm11856_vm15 = vmand %vm16174_vm13, %vm962_vm2  ;;  %vm11861_vm10 = vcmp.ge.s32.totalorder %v16150_v17, %v994_v31  ;;  %v11874_v22 = vadd.f32 %v11597_v55, %v3819_v20  ;;  %v16188_v55 = vmul.u32 2, %v16128_v16  ;;  %v11964_v31 = vadd.f32 %v11681_v58, %v3825_v11 }
 0x57f   : > { %v3993_v8 = vadd.f32 %v3992_v37, %v3991_v43  ;;  %v3830_v47 = vpop.f32.mrf.mxu1  ;;  %v16170_v37 = vld [vmem:[#allocation11_spill] sm:$0xff]  ;;  %v16176_v7 = vsel %vm11856_vm15, 4294967295, %v16175_v7 }
 0x580   : > { %vm961_vm4 = vcmp.lt.s32.totalorder %v16170_v37, %v11698_v0  ;;  %v993_v6 = vmul.u32 2, %v16170_v37  ;;  %vm16183_vm2 = vcmp.ge.s32.totalorder %v16170_v37, %v11767_v24  ;;  %vm11895_vm6 = vcmp.lt.s32.totalorder %v16150_v17, %v16188_v55  ;;  %7099 = vmatpush.msk.msrb.mxu3 %vm11838_vm8, %v16161_v39 }
 0x581   : > { %v3995_v25 = vadd.f32 %v3994_v23, %v3993_v8  ;;  %v16173_v23 = vld [vmem:[#allocation12_spill] sm:$0xff]  ;;  %vm11883_vm13 = vmand %vm16183_vm2, %vm961_vm4 }
 0x582   : > { %v992_v8 = vmul.u32 2, %v16173_v23  ;;  %vm11888_vm5 = vcmp.ge.s32.totalorder %v16150_v17, %v993_v6  ;;  %vm16192_vm4 = vcmp.lt.s32.totalorder %v16173_v23, %v11698_v0  ;;  %vm16193_vm2 = vcmp.ge.s32.totalorder %v16173_v23, %v11767_v24  ;;  %7100 = vmatpush.msk.msrb.mxu3 %vm11856_vm15, %v16161_v39 }
 0x583   : > { %v3997_v35 = vadd.f32 %v3996_v18, %v3995_v25  ;;  %v16179_v18 = vmul.u32 2, %v16120_v44  ;;  %vm11910_vm14 = vmand %vm16193_vm2, %vm16192_vm4  ;;  %v11927_v6 = vadd.f32 %v11638_v2, %v3822_v15  ;;  %v3828_v23 = vadd.f32 %v11732_v50, %v11749_v27 }
 0x584   : > { %vm11915_vm11 = vcmp.ge.s32.totalorder %v16150_v17, %v992_v8  ;;  %v16201_v2 = vmov 0.0   ;;  %vm1009_vm4 = vmand %vm11888_vm5, %vm11895_vm6  ;;  %vm11948_vm2 = vcmp.ge.s32.totalorder %v16150_v17, %v991_v38  ;;  %v16204_v27 = vmul.u32 2, %v16135_v29  ;;  %7101 = vmatpush.msk.msrb.mxu3 %vm11883_vm13, %v16161_v39 }
 0x585   : > { %vm11868_vm9 = vcmp.lt.s32.totalorder %v16150_v17, %v16179_v18  ;;  %v3999_v20 = vadd.f32 %v3998_v41, %v3997_v35  ;;  %v16198_v35 = vmul.u32 2, %v16134_v3  ;;  %v16207_v18 = vld [vmem:[#allocation62_spill] sm:$0xff]  ;;  %v3831_v38 = vadd.f32 %v3830_v47, %v11773_v12 }
 0x586   : > { %vm1010_vm7 = vmand %vm11861_vm10, %vm11868_vm9  ;;  %vm11955_vm10 = vcmp.lt.s32.totalorder %v16150_v17, %v16204_v27  ;;  %v3721_v25 = vadd.f32 %v11541_v28, %v16207_v18  ;;  %vm16209_vm5 = vcmp.lt.s32.totalorder %v16182_v57, %v11698_v0  ;;  %vm16210_vm9 = vcmp.ge.s32.totalorder %v16182_v57, %v11767_v24  ;;  %v3946_v24 = vpop.f32.mrf.mxu2  ;;  %7102 = vmatpush.msk.msrb.mxu3 %vm11910_vm14, %v16161_v39 }
 0x587   : > { %vm11922_vm12 = vcmp.lt.s32.totalorder %v16150_v17, %v16198_v35  ;;  %v4001_v3 = vadd.f32 %v4000_v14, %v3999_v20  ;;  %v3833_v8 = vpop.f32.mrf.mxu1  ;;  %v7019_v15 = vsel %vm1010_vm7, 1.0, %v16201_v2  ;;  %vm16208_vm7 = vcmask 523264  }
 0x588   : > { %v4002_v55 = vsel %vm16208_vm7, %v11874_v22, 0.0  ;;  %vm1008_vm6 = vmand %vm11915_vm11, %vm11922_vm12  ;;  %v7018_v58 = vsel %vm1009_vm4, 1.0, %v16201_v2  ;;  %vm16213_vm15 = vcmask 523264   ;;  %v11988_v17 = vadd.f32 %v11743_v53, %v3828_v23 }
 0x589   : > { %v4003_v29 = vadd.f32 %v4002_v55, %v4001_v3  ;;  %vm11980_vm7 = vmand %vm16210_vm9, %vm16209_vm5  ;;  %v4004_v11 = vsel %vm16213_vm15, %v11927_v6, 0.0  ;;  %v3834_v12 = vadd.f32 %v3833_v8, %v3721_v25  ;;  %v1022_v47 = vmul.f32 0.001953125, %v7019_v15 }
 0x58a   : > { %vm1007_vm11 = vmand %vm11948_vm2, %vm11955_vm10  ;;  %v7017_v57 = vsel %vm1008_vm6, 1.0, %v16201_v2  ;;  %v4006_v61 = vsel %vm16213_vm15, %v11964_v31, 0.0  ;;  %v12000_v53 = vadd.f32 %v3943_v4, %v3831_v38  ;;  %v1021_v14 = vmul.f32 0.001953125, %v7018_v58  ;;  %7103 = vmatpush.msk.msrb.mxu3 %vm11980_vm7, %v16161_v39 }
 0x58b   : > { %v4005_v0 = vadd.f32 %v4004_v11, %v4003_v29  ;;  %v7016_v37 = vsel %vm1007_vm11, 1.0, %v16201_v2  ;;  %vm16214_vm12 = vmmov %vm16213_vm15  ;;  %v12008_v41 = vadd.f32 %v3946_v24, %v3834_v12  ;;  %v1020_v23 = vmul.f32 0.001953125, %v7017_v57 }
 0x58c   : > { %v4008_v35 = vsel %vm16214_vm12, %v11988_v17, 0.0  ;;  %4058 = vmatpush.msra.mxu3 %v1022_v47  ;;  %vm16215_vm4 = vmmov %vm16214_vm12  ;;  %v1019_v8 = vmul.f32 0.001953125, %v7016_v37  ;;  %vm16218_vm6 = vnez %v16176_v7 }
 0x58d   : > { %v4007_v20 = vadd.f32 %v4006_v61, %v4005_v0  ;;  %v4010_v4 = vsel %vm16215_vm4, %v12000_v53, 0.0  ;;  %vm16216_vm2 = vmmov %vm16215_vm4 }
 0x58e   : > { %4059 = vmatpush.msra.mxu3 %v1021_v14  ;;  %v4012_v50 = vsel %vm16216_vm2, %v12008_v41, 0.0  ;;  %vm16217_vm10 = vmmov %vm16216_vm2 }
 0x58f   : > { %v4009_v3 = vadd.f32 %v4008_v35, %v4007_v20 }
 0x590   : > { %4060 = vmatpush.msra.mxu3 %v1020_v23 }
 0x591   : > { %v4011_v15 = vadd.f32 %v4010_v4, %v4009_v3 }
 0x592   : > { %4061 = vmatpush.msra.mxu3 %v1019_v8 }
 0x593   : > { %v4013_v27 = vadd.f32 %v4012_v50, %v4011_v15 }
 0x595   : > { %v4014_v2 = vrot.slane %v4013_v27, 4 }
 0x597   : > { %v4015_v46 = vadd.f32 %v4014_v2, %v4013_v27 }
 0x599   : > { %v4016_v18 = vrot.slane %v4015_v46, 2 }
 0x59b   : > { %v4017_v25 = vadd.f32 %v4016_v18, %v4015_v46 }
 0x59d   : > { %v4018_v55 = vrot.slane %v4017_v25, 1 }
 0x59f   : > { %v4019_v38 = vadd.f32 %v4018_v55, %v4017_v25 }
 0x5a1   : > { %7104 = vmatmul.msk.f32.vlgmr.msrb.gmra.mxu3 %vm16217_vm10, %v4019_v38 }
 0x5a2   : > { %7106 = vmatpush.msk.msrb.mxu3 %vm11795_vm0, %v16161_v39  ;;  %vm16219_vm0 = vcmask 261120  }
 0x5a4   : > { %7107 = vmatpush.msk.msrb.mxu3 %vm11808_vm3, %v16161_v39  ;;  %vm16221_vm3 = vmmov %vm16216_vm2 }
 0x5a6   : > { %7108 = vmatpush.msk.msrb.mxu3 %vm11820_vm1, %v16161_v39  ;;  %vm16222_vm1 = vmmov %vm16216_vm2 }
 0x5a7   : > { %vm16225_vm5 = vmmov %vm16222_vm1 }
 0x5a8   : > { %7109 = vmatpush.msk.msrb.mxu3 %vm11838_vm8, %v16161_v39  ;;  %vm16223_vm8 = vmmov %vm16222_vm1 }
 0x5a9   : > { %vm16226_vm9 = vmmov %vm16222_vm1 }
 0x5aa   : > { %7110 = vmatpush.msk.msrb.mxu3 %vm16218_vm6, %v16161_v39  ;;  %vm16228_vm11 = vmmov %vm16222_vm1 }
 0x5ab   : > { %vm16229_vm15 = vmmov %vm16222_vm1 }
 0x5ac   : > { %7111 = vmatpush.msk.msrb.mxu3 %vm11883_vm13, %v16161_v39  ;;  %vm16224_vm13 = vmmov %vm16222_vm1 }
 0x5ad   : > { %vm16230_vm12 = vmmov %vm16222_vm1 }
 0x5ae   : > { %7112 = vmatpush.msk.msrb.mxu3 %vm11910_vm14, %v16161_v39  ;;  %vm16220_vm14 = vmmov %vm16216_vm2 }
 0x5af   : > { %vm16231_vm4 = vmmov %vm16222_vm1 }
 0x5b0   : > { %7113 = vmatpush.msk.msrb.mxu3 %vm11980_vm7, %v16161_v39  ;;  %vm16227_vm7 = vmmov %vm16222_vm1 }
 0x5b1   : > { %vm16232_vm2 = vmmov %vm16222_vm1 }
 0x5b2   : > { %vm16233_vm10 = vmmov %vm16222_vm1 }
 0x5b3   : > { %vm16234_vm6 = vmmov %vm16222_vm1 }
 0x624   : > { %v4040_v48 = vpop.f32.mrf.mxu3 }
 0x625   : > { %7105 = vmatmul.msk.f32.vlgmr.msra.gmra.mxu3 %vm16219_vm0, %v4040_v48  ;;  %vm16235_vm0 = vmmov %vm16222_vm1 }
 0x626   : > { %4238 = vmatpush.msra.mxu3 %v1022_v47 }
 0x628   : > { %4239 = vmatpush.msra.mxu3 %v1021_v14 }
 0x62a   : > { %4240 = vmatpush.msra.mxu3 %v1020_v23 }
 0x62c   : > { %4241 = vmatpush.msra.mxu3 %v1019_v8 }
 0x6a8   : > { %v4063_v59 = vpop.f32.mrf.mxu3 }
 0x6a9   : > { %v12040_v52 = vperm.slane %v4063_v59, 0 }
 0x6ab   : > { %v12044_v43 = vsub.f32 %v11567_v9, %v12040_v52  ;;  %v12048_v7 = vsub.f32 %v11561_v40, %v12040_v52  ;;  %v12052_v39 = vsub.f32 %v11570_v62, %v12040_v52  ;;  %v12056_v44 = vsub.f32 %v11577_v10, %v12040_v52 }
 0x6ac   : > { %v12064_v9 = vsub.f32 %v11586_v33, %v12040_v52  ;;  %v12070_v62 = vsub.f32 %v11595_v42, %v12040_v52  ;;  %v12078_v12 = vsub.f32 %v11604_v60, %v12040_v52  ;;  %v12085_v42 = vsub.f32 %v11611_v32, %v12040_v52 }
 0x6ad   : > { %v4099_v16 = vmul.f32 %v12044_v43, %v12044_v43  ;;  %v4100_v29 = vmul.f32 %v12048_v7, %v12048_v7  ;;  %v4101_v40 = vmul.f32 %v12052_v39, %v12052_v39  ;;  %v4102_v10 = vmul.f32 %v12056_v44, %v12056_v44 }
 0x6ae   : > { %v4103_v33 = vmul.f32 %v12064_v9, %v12064_v9  ;;  %v4104_v24 = vmul.f32 %v12070_v62, %v12070_v62  ;;  %v12092_v60 = vsub.f32 %v11618_v51, %v12040_v52  ;;  %v4105_v14 = vmul.f32 %v12078_v12, %v12078_v12 }
 0x6af   : > { %v4131_v28 = vsel %vm16220_vm14, %v4099_v16, 0.0  ;;  %v4132_v58 = vsel %vm16221_vm3, %v4100_v29, 0.0  ;;  %v4134_v47 = vsel %vm16222_vm1, %v4101_v40, 0.0  ;;  %v4136_v57 = vsel %vm16223_vm8, %v4102_v10, 0.0  ;;  %vm16236_vm14 = vmmov %vm16235_vm0 }
 0x6b0   : > { %v4133_v11 = vadd.f32 %v4132_v58, %v4131_v28  ;;  %v4138_v20 = vsel %vm16224_vm13, %v4103_v33, 0.0  ;;  %v12099_v32 = vsub.f32 %v11628_v63, %v12040_v52  ;;  %v4106_v35 = vmul.f32 %v12085_v42, %v12085_v42  ;;  %vm16237_vm3 = vmmov %vm16235_vm0 }
 0x6b1   : > { %v4140_v23 = vsel %vm16225_vm5, %v4104_v24, 0.0  ;;  %v12106_v51 = vsub.f32 %v11636_v56, %v12040_v52  ;;  %v4107_v4 = vmul.f32 %v12092_v60, %v12092_v60  ;;  %v4142_v8 = vsel %vm16226_vm9, %v4105_v14, 0.0  ;;  %vm16239_vm1 = vmmov %vm16235_vm0 }
 0x6b2   : > { %v4135_v0 = vadd.f32 %v4134_v47, %v4133_v11  ;;  %v12113_v63 = vsub.f32 %v11646_v49, %v12040_v52  ;;  %v4108_v50 = vmul.f32 %v12099_v32, %v12099_v32  ;;  %v4144_v27 = vsel %vm16227_vm7, %v4106_v35, 0.0  ;;  %vm16241_vm8 = vmmov %vm16235_vm0 }
 0x6b3   : > { %v12120_v56 = vsub.f32 %v11654_v13, %v12040_v52  ;;  %v4109_v46 = vmul.f32 %v12106_v51, %v12106_v51  ;;  %v4146_v18 = vsel %vm16228_vm11, %v4107_v4, 0.0  ;;  %v12127_v49 = vsub.f32 %v11664_v45, %v12040_v52  ;;  %vm16243_vm13 = vmmov %vm16235_vm0 }
 0x6b4   : > { %v4137_v61 = vadd.f32 %v4136_v57, %v4135_v0  ;;  %v4110_v55 = vmul.f32 %v12113_v63, %v12113_v63  ;;  %v4148_v38 = vsel %vm16229_vm15, %v4108_v50, 0.0  ;;  %v12134_v13 = vsub.f32 %v11672_v19, %v12040_v52  ;;  %vm16244_vm5 = vmmov %vm16235_vm0 }
 0x6b5   : > { %v4111_v59 = vmul.f32 %v12120_v56, %v12120_v56  ;;  %v4150_v16 = vsel %vm16230_vm12, %v4109_v46, 0.0  ;;  %v12141_v45 = vsub.f32 %v11679_v26, %v12040_v52  ;;  %v4112_v40 = vmul.f32 %v12127_v49, %v12127_v49  ;;  %vm16245_vm9 = vmmov %vm16235_vm0 }
 0x6b6   : > { %v4139_v37 = vadd.f32 %v4138_v20, %v4137_v61  ;;  %v4152_v10 = vsel %vm16231_vm4, %v4110_v55, 0.0  ;;  %v12148_v19 = vsub.f32 %v11688_v54, %v12040_v52  ;;  %v4113_v58 = vmul.f32 %v12134_v13, %v12134_v13  ;;  %vm16246_vm7 = vmmov %vm16235_vm0 }
 0x6b7   : > { %v4154_v11 = vsel %vm16232_vm2, %v4111_v59, 0.0  ;;  %v12155_v26 = vsub.f32 %v11695_v36, %v12040_v52  ;;  %v4114_v47 = vmul.f32 %v12141_v45, %v12141_v45  ;;  %v4156_v0 = vsel %vm16233_vm10, %v4112_v40, 0.0  ;;  %v16242_v59 = vld [vmem:[#allocation31_spill] sm:$0xff]  ;;  %vm16247_vm11 = vmmov %vm16235_vm0 }
 0x6b8   : > { %v4141_v3 = vadd.f32 %v4140_v23, %v4139_v37  ;;  %v12162_v54 = vsub.f32 %v11705_v34, %v12040_v52  ;;  %v4115_v57 = vmul.f32 %v12148_v19, %v12148_v19  ;;  %v4158_v61 = vsel %vm16234_vm6, %v4113_v58, 0.0  ;;  %vm16248_vm15 = vmmov %vm16235_vm0 }
 0x6b9   : > { %v12169_v36 = vsub.f32 %v11741_v30, %v12040_v52  ;;  %v4116_v20 = vmul.f32 %v12155_v26, %v12155_v26  ;;  %v4160_v37 = vsel %vm16235_vm0, %v4114_v47, 0.0  ;;  %v12176_v34 = vsub.f32 %v11739_v1, %v12040_v52  ;;  %vm16249_vm12 = vmmov %vm16235_vm0 }
 0x6ba   : > { %v4143_v15 = vadd.f32 %v4142_v8, %v4141_v3  ;;  %v4117_v23 = vmul.f32 %v12162_v54, %v12162_v54  ;;  %v4162_v3 = vsel %vm16236_vm14, %v4115_v57, 0.0  ;;  %v12183_v30 = vsub.f32 %v11752_v5, %v12040_v52  ;;  %vm16250_vm4 = vmmov %vm16235_vm0 }
 0x6bb   : > { %v4118_v8 = vmul.f32 %v12169_v36, %v12169_v36  ;;  %v12218_v47 = vsub.f32 %v11874_v22, %v12040_v52  ;;  %v12232_v22 = vsub.f32 %v11964_v31, %v12040_v52  ;;  %v12246_v31 = vsub.f32 %v12000_v53, %v12040_v52  ;;  %vm16251_vm2 = vmmov %vm16235_vm0 }
 0x6bc   : > { %v4145_v2 = vadd.f32 %v4144_v27, %v4143_v15  ;;  %v4164_v15 = vsel %vm16237_vm3, %v4116_v20, 0.0  ;;  %v16238_v27 = vld [vmem:[#allocation10_spill] sm:$0xff]  ;;  %v4166_v46 = vsel %vm16239_vm1, %v4117_v23, 0.0  ;;  %v4120_v55 = vmul.f32 %v12183_v30, %v12183_v30  ;;  %vm16252_vm10 = vmmov %vm16235_vm0 }
 0x6bd   : > { %v12190_v1 = vsub.f32 %v16238_v27, %v12040_v52  ;;  %v4129_v53 = vmul.f32 %v12246_v31, %v12246_v31  ;;  %vm16253_vm6 = vmmov %vm16235_vm0  ;;  %vm16255_vm3 = vcmask 261120  }
 0x6be   : > { %v4147_v25 = vadd.f32 %v4146_v18, %v4145_v2  ;;  %v4119_v2 = vmul.f32 %v12176_v34, %v12176_v34  ;;  %vm16254_vm14 = vmmov %vm16235_vm0 }
 0x6c0   : > { %v4149_v48 = vadd.f32 %v4148_v38, %v4147_v25  ;;  %v16240_v25 = vld [vmem:[#allocation13_spill] sm:$0xff]  ;;  %v4168_v38 = vsel %vm16241_vm8, %v4118_v8, 0.0  ;;  %v4170_v40 = vsel %vm16243_vm13, %v4119_v2, 0.0 }
 0x6c1   : > { %v12197_v5 = vsub.f32 %v16240_v25, %v12040_v52 }
 0x6c2   : > { %v4151_v29 = vadd.f32 %v4150_v16, %v4149_v48  ;;  %v12204_v16 = vsub.f32 %v16242_v59, %v12040_v52 }
 0x6c3   : > { %v4122_v58 = vmul.f32 %v12197_v5, %v12197_v5 }
 0x6c4   : > { %v4153_v28 = vadd.f32 %v4152_v10, %v4151_v29  ;;  %v4121_v29 = vmul.f32 %v12190_v1, %v12190_v1 }
 0x6c6   : > { %v4155_v33 = vadd.f32 %v4154_v11, %v4153_v28  ;;  %v12211_v28 = vsub.f32 %v11800_v21, %v12040_v52  ;;  %v4172_v11 = vsel %vm16244_vm5, %v4120_v55, 0.0  ;;  %v12225_v21 = vsub.f32 %v11927_v6, %v12040_v52 }
 0x6c7   : > { %v12239_v6 = vsub.f32 %v11988_v17, %v12040_v52  ;;  %v12253_v17 = vsub.f32 %v12008_v41, %v12040_v52  ;;  %v4190_v41 = vsel %vm16253_vm6, %v4129_v53, 0.0  ;;  %vm16283_vm6 = vmmov %vm16235_vm0 }
 0x6c8   : > { %v4157_v24 = vadd.f32 %v4156_v0, %v4155_v33  ;;  %v4123_v0 = vmul.f32 %v12204_v16, %v12204_v16 }
 0x6c9   : > { %v4128_v2 = vmul.f32 %v12239_v6, %v12239_v6 }
 0x6ca   : > { %v4159_v14 = vadd.f32 %v4158_v61, %v4157_v24  ;;  %v4174_v24 = vsel %vm16245_vm9, %v4121_v29, 0.0  ;;  %v4124_v61 = vmul.f32 %v12211_v28, %v12211_v28 }
 0x6cc   : > { %v4161_v35 = vadd.f32 %v4160_v37, %v4159_v14  ;;  %v4176_v14 = vsel %vm16246_vm7, %v4122_v58, 0.0  ;;  %v4125_v37 = vmul.f32 %v12218_v47, %v12218_v47 }
 0x6ce   : > { %v4163_v4 = vadd.f32 %v4162_v3, %v4161_v35  ;;  %v4178_v35 = vsel %vm16247_vm11, %v4123_v0, 0.0  ;;  %v4126_v3 = vmul.f32 %v12225_v21, %v12225_v21 }
 0x6d0   : > { %v4165_v50 = vadd.f32 %v4164_v15, %v4163_v4  ;;  %v4180_v4 = vsel %vm16248_vm15, %v4124_v61, 0.0  ;;  %v4127_v15 = vmul.f32 %v12232_v22, %v12232_v22  ;;  %v5101_v61 = vld [vmem:[#allocation3 + $0x8] sm:$0xff] }
 0x6d1   : > { %5369 = vrot.lane.b32.xlu0 %v5101_v61, %s8452_s25 }
 0x6d2   : > { %v4167_v18 = vadd.f32 %v4166_v46, %v4165_v50  ;;  %v4182_v50 = vsel %vm16249_vm12, %v4125_v37, 0.0  ;;  %v4184_v46 = vsel %vm16250_vm4, %v4126_v3, 0.0  ;;  %v4186_v25 = vsel %vm16251_vm2, %v4127_v15, 0.0  ;;  %v5102_v37 = vld [vmem:[#allocation3 + $0x10] sm:$0xff] }
 0x6d3   : > { %5371 = vrot.lane.b32.xlu1 %v5102_v37, %s8452_s25 }
 0x6d4   : > { %v4169_v48 = vadd.f32 %v4168_v38, %v4167_v18  ;;  %v4130_v38 = vmul.f32 %v12253_v17, %v12253_v17 }
 0x6d6   : > { %v4171_v10 = vadd.f32 %v4170_v40, %v4169_v48  ;;  %v4188_v48 = vsel %vm16252_vm10, %v4128_v2, 0.0  ;;  %v4192_v29 = vsel %vm16235_vm0, %v4130_v38, 0.0  ;;  %vm16282_vm10 = vmmov %vm16235_vm0 }
 0x6d8   : > { %v4173_v33 = vadd.f32 %v4172_v11, %v4171_v10 }
 0x6da   : > { %v4175_v57 = vadd.f32 %v4174_v24, %v4173_v33 }
 0x6dc   : > { %v4177_v20 = vadd.f32 %v4176_v14, %v4175_v57 }
 0x6de   : > { %v4179_v23 = vadd.f32 %v4178_v35, %v4177_v20 }
 0x6e0   : > { %v4181_v8 = vadd.f32 %v4180_v4, %v4179_v23 }
 0x6e2   : > { %v4183_v27 = vadd.f32 %v4182_v50, %v4181_v8 }
 0x6e4   : > { %v4185_v18 = vadd.f32 %v4184_v46, %v4183_v27 }
 0x6e6   : > { %v4187_v55 = vadd.f32 %v4186_v25, %v4185_v18 }
 0x6e8   : > { %v4189_v59 = vadd.f32 %v4188_v48, %v4187_v55 }
 0x6ea   : > { %v4191_v52 = vadd.f32 %v4190_v41, %v4189_v59 }
 0x6ec   : > { %v4193_v40 = vadd.f32 %v4192_v29, %v4191_v52 }
 0x6ee   : > { %v4194_v10 = vrot.slane %v4193_v40, 4 }
 0x6f0   : > { %v4195_v58 = vadd.f32 %v4194_v10, %v4193_v40 }
 0x6f2   : > { %v4196_v11 = vrot.slane %v4195_v58, 2 }
 0x6f4   : > { %v4197_v33 = vadd.f32 %v4196_v11, %v4195_v58  ;;  %v12351_v58 = vld [vmem:[%s15207_s6] ss:$0 sm:$0xff] }
 0x6f6   : > { %v4198_v0 = vrot.slane %v4197_v33, 1 }
 0x6f8   : > { %v4199_v24 = vadd.f32 %v4198_v0, %v4197_v33 }
 0x6fa   : > { %7114 = vmatmul.msk.f32.vlgmr.msrb.gmra.mxu3 %vm16254_vm14, %v4199_v24 }
 0x77d   : > { %v4220_v57 = vpop.f32.mrf.mxu3 }
 0x77e   : > { %7115 = vmatmul.msk.f32.vlgmr.msra.gmra.mxu3 %vm16255_vm3, %v4220_v57 }
 0x801   : > { %v4243_v14 = vpop.f32.mrf.mxu3 }
 0x802   : > { %v4244_v20 = vadd.f32 1e-05, %v4243_v14 }
 0x804   : > { %8058 = vrsqrt.f32 %v4244_v20  ;;  %vm4252_vm8 = vweird.f32 %v4244_v20 }
 0x80a   : > { %v8059_v35 = vpop.eup %8058 }
 0x80b   : > { %v4247_v23 = vmul.f32 %v8059_v35, %v4244_v20  ;;  %vm4253_vm1 = vweird.f32 %v8059_v35 }
 0x80c   : > { %vm4254_vm13 = vmor %vm4252_vm8, %vm4253_vm1 }
 0x80d   : > { %v4248_v3 = vmul.f32 %v8059_v35, %v4247_v23 }
 0x80f   : > { %v4249_v4 = vmul.f32 0.5, %v4248_v3 }
 0x811   : > { %v4250_v8 = vsub.f32 1.5, %v4249_v4 }
 0x813   : > { %v4251_v15 = vmul.f32 %v8059_v35, %v4250_v8 }
 0x815   : > { %v4255_v50 = vsel %vm4254_vm13, %v8059_v35, %v4251_v15  ;;  %vm16286_vm13 = vmmov %vm16283_vm6 }
 0x816   : > { %v12270_v27 = vperm.slane %v4255_v50, 0 }
 0x818   : > { %v4257_v2 = vmul.f32 %v12270_v27, %v12044_v43  ;;  %v4258_v46 = vmul.f32 %v12270_v27, %v12048_v7  ;;  %v4262_v18 = vmul.f32 %v12270_v27, %v12070_v62  ;;  %v4263_v53 = vmul.f32 %v12270_v27, %v12078_v12  ;;  %v12295_v12 = vld [vmem:[%s15206_s5] ss:$0 sm:$0xff] }
 0x819   : > { %v4264_v25 = vmul.f32 %v12270_v27, %v12085_v42  ;;  %v4265_v55 = vmul.f32 %v12270_v27, %v12092_v60  ;;  %v4266_v38 = vmul.f32 %v12270_v27, %v12099_v32  ;;  %v4267_v43 = vmul.f32 %v12270_v27, %v12106_v51 }
 0x81a   : > { %v4268_v7 = vmul.f32 %v12270_v27, %v12113_v63  ;;  %v4269_v62 = vmul.f32 %v12270_v27, %v12120_v56  ;;  %v4270_v42 = vmul.f32 %v12270_v27, %v12127_v49  ;;  %v4271_v60 = vmul.f32 %v12270_v27, %v12134_v13 }
 0x81b   : > { %v4272_v32 = vmul.f32 %v12270_v27, %v12141_v45  ;;  %v4273_v51 = vmul.f32 %v12270_v27, %v12148_v19  ;;  %v4274_v63 = vmul.f32 %v12270_v27, %v12155_v26  ;;  %v4275_v56 = vmul.f32 %v12270_v27, %v12162_v54 }
 0x81c   : > { %v4276_v48 = vmul.f32 %v12270_v27, %v12169_v36  ;;  %v4277_v49 = vmul.f32 %v12270_v27, %v12176_v34  ;;  %v4278_v13 = vmul.f32 %v12270_v27, %v12183_v30  ;;  %v4279_v45 = vmul.f32 %v12270_v27, %v12190_v1 }
 0x81d   : > { %v4280_v19 = vmul.f32 %v12270_v27, %v12197_v5  ;;  %v4281_v26 = vmul.f32 %v12270_v27, %v12204_v16  ;;  %v4282_v54 = vmul.f32 %v12270_v27, %v12211_v28  ;;  %v4283_v36 = vmul.f32 %v12270_v27, %v12218_v47 }
 0x81e   : > { %v4284_v34 = vmul.f32 %v12270_v27, %v12225_v21  ;;  %v4285_v30 = vmul.f32 %v12270_v27, %v12232_v22  ;;  %v4286_v1 = vmul.f32 %v12270_v27, %v12239_v6  ;;  %v4287_v5 = vmul.f32 %v12270_v27, %v12246_v31 }
 0x81f   : > { %v4288_v16 = vmul.f32 %v12270_v27, %v12253_v17  ;;  %v4292_v28 = vmul.f32 %v12295_v12, %v4257_v2  ;;  %v4293_v59 = vmul.f32 %v12295_v12, %v4258_v46  ;;  %v4297_v47 = vmul.f32 %v12295_v12, %v4262_v18 }
 0x820   : > { %v4298_v21 = vmul.f32 %v12295_v12, %v4263_v53  ;;  %v4299_v41 = vmul.f32 %v12295_v12, %v4264_v25  ;;  %v4300_v22 = vmul.f32 %v12295_v12, %v4265_v55  ;;  %v4301_v6 = vmul.f32 %v12295_v12, %v4266_v38 }
 0x821   : > { %v4302_v52 = vmul.f32 %v12295_v12, %v4267_v43  ;;  %v4303_v31 = vmul.f32 %v12295_v12, %v4268_v7  ;;  %v4304_v17 = vmul.f32 %v12295_v12, %v4269_v62  ;;  %v4305_v29 = vmul.f32 %v12295_v12, %v4270_v42 }
 0x822   : > { %v4306_v40 = vmul.f32 %v12295_v12, %v4271_v60  ;;  %v4307_v10 = vmul.f32 %v12295_v12, %v4272_v32  ;;  %v4308_v11 = vmul.f32 %v12295_v12, %v4273_v51  ;;  %v4309_v33 = vmul.f32 %v12295_v12, %v4274_v63 }
 0x823   : > { %v4310_v0 = vmul.f32 %v12295_v12, %v4275_v56  ;;  %v4311_v24 = vmul.f32 %v12295_v12, %v4276_v48  ;;  %v4312_v57 = vmul.f32 %v12295_v12, %v4277_v49  ;;  %v4313_v61 = vmul.f32 %v12295_v12, %v4278_v13 }
 0x824   : > { %v4314_v14 = vmul.f32 %v12295_v12, %v4279_v45  ;;  %v4315_v20 = vmul.f32 %v12295_v12, %v4280_v19  ;;  %v4316_v37 = vmul.f32 %v12295_v12, %v4281_v26  ;;  %v4317_v35 = vmul.f32 %v12295_v12, %v4282_v54 }
 0x825   : > { %v4318_v23 = vmul.f32 %v12295_v12, %v4283_v36  ;;  %v4319_v3 = vmul.f32 %v12295_v12, %v4284_v34  ;;  %v4320_v4 = vmul.f32 %v12295_v12, %v4285_v30  ;;  %v4321_v8 = vmul.f32 %v12295_v12, %v4286_v1 }
 0x826   : > { %v4322_v15 = vmul.f32 %v12295_v12, %v4287_v5  ;;  %v4323_v50 = vmul.f32 %v12295_v12, %v4288_v16  ;;  %v4259_v2 = vmul.f32 %v12270_v27, %v12052_v39  ;;  %v12372_v46 = vadd.f32 %v12351_v58, %v4292_v28 }
 0x827   : > { %v12375_v18 = vadd.f32 %v12351_v58, %v4293_v59  ;;  %v12378_v53 = vadd.f32 %v12351_v58, %v4297_v47  ;;  %v12381_v25 = vadd.f32 %v12351_v58, %v4298_v21  ;;  %v12384_v55 = vadd.f32 %v12351_v58, %v4299_v41 }
 0x828   : > { %v12387_v38 = vadd.f32 %v12351_v58, %v4300_v22  ;;  %v12390_v39 = vadd.f32 %v12351_v58, %v4301_v6  ;;  %v12393_v43 = vadd.f32 %v12351_v58, %v4302_v52  ;;  %v12396_v7 = vadd.f32 %v12351_v58, %v4303_v31 }
 0x829   : > { %16256 = vst [vmem:[#allocation63_spill] sm:$0xff] %v12381_v25  ;;  %v12399_v62 = vadd.f32 %v12351_v58, %v4304_v17  ;;  %v12402_v42 = vadd.f32 %v12351_v58, %v4305_v29  ;;  %v12405_v60 = vadd.f32 %v12351_v58, %v4306_v40  ;;  %v12408_v32 = vadd.f32 %v12351_v58, %v4307_v10 }
 0x82a   : > { %16257 = vst [vmem:[#allocation26_spill] sm:$0xff] %v12384_v55  ;;  %v12411_v51 = vadd.f32 %v12351_v58, %v4308_v11  ;;  %v12414_v63 = vadd.f32 %v12351_v58, %v4309_v33  ;;  %v12417_v56 = vadd.f32 %v12351_v58, %v4310_v0  ;;  %v12420_v48 = vadd.f32 %v12351_v58, %v4311_v24 }
 0x82b   : > { %16258 = vst [vmem:[#allocation54_spill] sm:$0xff] %v12387_v38  ;;  %v12423_v49 = vadd.f32 %v12351_v58, %v4312_v57  ;;  %v12426_v13 = vadd.f32 %v12351_v58, %v4313_v61  ;;  %v12429_v45 = vadd.f32 %v12351_v58, %v4314_v14  ;;  %v12432_v19 = vadd.f32 %v12351_v58, %v4315_v20 }
 0x82c   : > { %16259 = vst [vmem:[#allocation67_spill] sm:$0xff] %v12390_v39  ;;  %v12435_v26 = vadd.f32 %v12351_v58, %v4316_v37  ;;  %v12438_v54 = vadd.f32 %v12351_v58, %v4317_v35  ;;  %v12441_v36 = vadd.f32 %v12351_v58, %v4318_v23  ;;  %v12444_v34 = vadd.f32 %v12351_v58, %v4319_v3 }
 0x82d   : > { %16260 = vst [vmem:[#allocation14_spill] sm:$0xff] %v12393_v43  ;;  %v12447_v30 = vadd.f32 %v12351_v58, %v4320_v4  ;;  %v12450_v1 = vadd.f32 %v12351_v58, %v4321_v8  ;;  %v12453_v5 = vadd.f32 %v12351_v58, %v4322_v15  ;;  %v12456_v16 = vadd.f32 %v12351_v58, %v4323_v50 }
 0x82e   : > { %16261 = vst [vmem:[#allocation65_spill] sm:$0xff] %v12396_v7  ;;  %v7116_v28 = vmul.f32 -1.442695, %v12372_v46  ;;  %v7117_v59 = vmul.f32 -1.442695, %v12375_v18  ;;  %v4294_v47 = vmul.f32 %v12295_v12, %v4259_v2  ;;  %v4260_v23 = vmul.f32 %v12270_v27, %v12056_v44 }
 0x82f   : > { %16262 = vst [vmem:[#allocation69_spill] sm:$0xff] %v12399_v62  ;;  %v4261_v15 = vmul.f32 %v12270_v27, %v12064_v9 }
 0x830   : > { %16263 = vst [vmem:[#allocation71_spill] sm:$0xff] %v12402_v42  ;;  %8060 = vpow2.f32 %v7116_v28  ;;  %v12462_v21 = vadd.f32 %v12351_v58, %v4294_v47 }
 0x831   : > { %16264 = vst [vmem:[#allocation73_spill] sm:$0xff] %v12405_v60  ;;  %8062 = vpow2.f32 %v7117_v59 }
 0x832   : > { %16265 = vst [vmem:[#allocation15_spill] sm:$0xff] %v12408_v32  ;;  %v7118_v31 = vmul.f32 -1.442695, %v12462_v21 }
 0x833   : > { %16266 = vst [vmem:[#allocation16_spill] sm:$0xff] %v12411_v51 }
 0x834   : > { %16267 = vst [vmem:[#allocation56_spill] sm:$0xff] %v12414_v63 }
 0x835   : > { %16268 = vst [vmem:[#allocation57_spill] sm:$0xff] %v12417_v56 }
 0x836   : > { %16269 = vst [vmem:[#allocation58_spill] sm:$0xff] %v12420_v48  ;;  %v8061_v41 = vpop.eup %8060 }
 0x837   : > { %16270 = vst [vmem:[#allocation64_spill] sm:$0xff] %v12423_v49  ;;  %v8063_v22 = vpop.eup %8062  ;;  %v4455_v6 = vadd.f32 1.0, %v8061_v41  ;;  %v4295_v41 = vmul.f32 %v12295_v12, %v4260_v23 }
 0x838   : > { %16271 = vst [vmem:[#allocation59_spill] sm:$0xff] %v12426_v13  ;;  %v4456_v52 = vadd.f32 1.0, %v8063_v22 }
 0x839   : > { %16272 = vst [vmem:[#allocation60_spill] sm:$0xff] %v12429_v45  ;;  %8064 = vrcp.f32 %v4455_v6  ;;  %v4498_v0 = vand.u32 2147483648, %v4455_v6  ;;  %v4496_v61 = vand.u32 2147483647, %v4455_v6  ;;  %vm4492_vm7 = vweird.f32 %v4455_v6 }
 0x83a   : > { %16273 = vst [vmem:[#allocation66_spill] sm:$0xff] %v12432_v19  ;;  %8066 = vrcp.f32 %v4456_v52  ;;  %v4513_v14 = vand.u32 2147483648, %v4456_v52  ;;  %v4511_v37 = vand.u32 2147483647, %v4456_v52  ;;  %vm4507_vm15 = vweird.f32 %v4456_v52 }
 0x83b   : > { %16274 = vst [vmem:[#allocation68_spill] sm:$0xff] %v12435_v26  ;;  %8068 = vpow2.f32 %v7118_v31  ;;  %v4499_v4 = vor.u32 1.1754944e-38, %v4498_v0  ;;  %vm4497_vm12 = vcmp.eq.f32.partialorder %v4496_v61, 8.507059e+37  ;;  %v12476_v27 = vadd.f32 %v12351_v58, %v4295_v41 }
 0x83c   : > { %16275 = vst [vmem:[#allocation70_spill] sm:$0xff] %v12438_v54  ;;  %v4514_v2 = vor.u32 1.1754944e-38, %v4513_v14  ;;  %vm4512_vm2 = vcmp.eq.f32.partialorder %v4511_v37, 8.507059e+37  ;;  %v7123_v41 = vmul.f32 -1.442695, %v12384_v55 }
 0x83d   : > { %16276 = vst [vmem:[#allocation72_spill] sm:$0xff] %v12441_v36 }
 0x83e   : > { %16277 = vst [vmem:[#allocation8_spill] sm:$0xff] %v12444_v34 }
 0x83f   : > { %16278 = vst [vmem:[#allocation22_spill] sm:$0xff] %v12447_v30  ;;  %v8065_v17 = vpop.eup %8064 }
 0x840   : > { %16279 = vst [vmem:[#allocation61_spill] sm:$0xff] %v12450_v1  ;;  %v8067_v29 = vpop.eup %8066  ;;  %v4488_v40 = vmul.f32 %v8065_v17, %v4455_v6  ;;  %vm4493_vm5 = vweird.f32 %v8065_v17  ;;  %v4296_v6 = vmul.f32 %v12295_v12, %v4261_v15 }
 0x841   : > { %16280 = vst [vmem:[#allocation20_spill] sm:$0xff] %v12453_v5  ;;  %v4503_v10 = vmul.f32 %v8067_v29, %v4456_v52  ;;  %v8069_v33 = vpop.eup %8068  ;;  %vm4508_vm9 = vweird.f32 %v8067_v29  ;;  %vm4494_vm11 = vmor %vm4492_vm7, %vm4493_vm5 }
 0x842   : > { %16281 = vst [vmem:[#allocation34_spill] sm:$0xff] %v12456_v16  ;;  %v4489_v11 = vsub.f32 1.0, %v4488_v40  ;;  %v4457_v35 = vadd.f32 1.0, %v8069_v33  ;;  %vm4509_vm4 = vmor %vm4507_vm15, %vm4508_vm9  ;;  %v12479_v31 = vadd.f32 %v12351_v58, %v4296_v6  ;;  %v7125_v6 = vmul.f32 -1.442695, %v12390_v39 }
 0x843   : > { %v4504_v24 = vsub.f32 1.0, %v4503_v10 }
 0x844   : > { %v4490_v57 = vmul.f32 %v8065_v17, %v4489_v11  ;;  %8070 = vrcp.f32 %v4457_v35  ;;  %v4526_v40 = vand.u32 2147483647, %v4457_v35  ;;  %v7120_v0 = vmul.f32 -1.442695, %v12479_v31 }
 0x845   : > { %v4505_v20 = vmul.f32 %v8067_v29, %v4504_v24  ;;  %vm4522_vm14 = vweird.f32 %v4457_v35 }
 0x846   : > { %v4491_v3 = vadd.f32 %v8065_v17, %v4490_v57  ;;  %v16284_v57 = vld [vmem:[#allocation44_spill] sm:$0xff]  ;;  %vm4527_vm8 = vcmp.eq.f32.partialorder %v4526_v40, 8.507059e+37  ;;  %v7129_v40 = vmul.f32 -1.442695, %v12402_v42 }
 0x847   : > { %v4506_v8 = vadd.f32 %v8067_v29, %v4505_v20  ;;  %vm16285_vm3 = vnez %v16284_v57 }
 0x848   : > { %v4495_v50 = vsel %vm4494_vm11, %v8065_v17, %v4491_v3 }
 0x849   : > { %v4500_v28 = vsel %vm4497_vm12, %v4499_v4, %v4495_v50  ;;  %v4510_v59 = vsel %vm4509_vm4, %v8067_v29, %v4506_v8 }
 0x84a   : > { %v4515_v47 = vsel %vm4512_vm2, %v4514_v2, %v4510_v59  ;;  %v4967_v44 = vmul.f32 %v4500_v28, %v12372_v46  ;;  %v8071_v52 = vpop.eup %8070  ;;  %v4528_v46 = vand.u32 2147483648, %v4457_v35  ;;  %v16287_v28 = vld [vmem:[#allocation40_spill] sm:$0xff] }
 0x84b   : > { %v4968_v22 = vmul.f32 %v4515_v47, %v12375_v18  ;;  %v4518_v9 = vmul.f32 %v8071_v52, %v4457_v35  ;;  %vm4523_vm0 = vweird.f32 %v8071_v52  ;;  %v7119_v18 = vmul.f32 -1.442695, %v12476_v27 }
 0x84c   : > { %5005 = vst.msk [vmem:[#allocation3 + $0x18] sm:$0xff] %vm16282_vm10, %v4967_v44  ;;  %vm4524_vm1 = vmor %vm4522_vm14, %vm4523_vm0  ;;  %v4529_v14 = vor.u32 1.1754944e-38, %v4528_v46  ;;  %vm16288_vm5 = vnez %v16287_v28  ;;  %v7121_v44 = vmul.f32 -1.442695, %v12378_v53  ;;  %v7128_v46 = vmul.f32 -1.442695, %v12399_v62 }
 0x84d   : > { %5006 = vst.msk [vmem:[#allocation3 + $0x20] sm:$0xff] %vm16283_vm6, %v4968_v22  ;;  %v4519_v17 = vsub.f32 1.0, %v4518_v9  ;;  %8072 = vpow2.f32 %v7119_v18  ;;  %v7124_v22 = vmul.f32 -1.442695, %v12387_v38  ;;  %v7130_v18 = vmul.f32 -1.442695, %v12405_v60  ;;  %vm16289_vm0 = vmmov %vm16283_vm6 }
 0x84e   : > { %8074 = vpow2.f32 %v7120_v0  ;;  %v7133_v0 = vmul.f32 -1.442695, %v12414_v63 }
 0x84f   : > { %v4520_v29 = vmul.f32 %v8071_v52, %v4519_v17  ;;  %v7127_v17 = vmul.f32 -1.442695, %v12396_v7 }
 0x851   : > { %v4521_v24 = vadd.f32 %v8071_v52, %v4520_v29 }
 0x853   : > { %v5039_v12 = vld [vmem:[#allocation3 + $0x17] sm:$0xff]  ;;  %v4525_v37 = vsel %vm4524_vm1, %v8071_v52, %v4521_v24  ;;  %v8073_v35 = vpop.eup %8072  ;;  %v7126_v52 = vmul.f32 -1.442695, %v12393_v43  ;;  %v7134_v24 = vmul.f32 -1.442695, %v12417_v56 }
 0x854   : > { %v5103_v10 = vld [vmem:[#allocation3 + $0x18] sm:$0xff]  ;;  %v5104_v33 = vld [vmem:[#allocation3 + $0x20] sm:$0xff]  ;;  %v5199_v61 = vsel %vm16285_vm3, %v5039_v12, 0.0  ;;  %v4530_v23 = vsel %vm4527_vm8, %v4529_v14, %v4525_v37  ;;  %v8075_v4 = vpop.eup %8074  ;;  %v12489_v8 = vadd.f32 1.0, %v8073_v35  ;;  %v7135_v14 = vmul.f32 -1.442695, %v12420_v48 }
 0x855   : > { %v5040_v11 = vld [vmem:[#allocation3 + $0x1f] sm:$0xff]  ;;  %v7751_v20 = vpack.i.bf16 %v5199_v61, %v5103_v10  ;;  %v4969_v3 = vmul.f32 %v4530_v23, %v12462_v21  ;;  %v12491_v2 = vadd.f32 1.0, %v8075_v4  ;;  %v7122_v21 = vmul.f32 -1.442695, %v12381_v25 }
 0x856   : > { %v7756_v58 = vpack.i.bf16 %v5040_v11, %v5104_v33  ;;  %8076 = vrcp.f32 %v12489_v8  ;;  %v7131_v10 = vmul.f32 -1.442695, %v12408_v32  ;;  %v7132_v11 = vmul.f32 -1.442695, %v12411_v51 }
 0x857   : > { %7752 = vrot.lane.b32.xlu2 %v7751_v20, %s8452_s25  ;;  %5007 = vst.msk [vmem:[#allocation3 + $0x28] sm:$0xff] %vm16286_vm13, %v4969_v3  ;;  %8078 = vrcp.f32 %v12491_v2  ;;  %v4543_v20 = vand.u32 2147483648, %v12489_v8  ;;  %v4541_v35 = vand.u32 2147483647, %v12489_v8  ;;  %v4558_v4 = vand.u32 2147483648, %v12491_v2 }
 0x858   : > { %7757 = vrot.lane.b32.xlu0 %v7756_v58, %s8452_s25  ;;  %8080 = vpow2.f32 %v7121_v44  ;;  %v7136_v44 = vmul.f32 -1.442695, %v12423_v49  ;;  %vm4537_vm11 = vweird.f32 %v12489_v8  ;;  %vm4552_vm12 = vweird.f32 %v12491_v2 }
 0x859   : > { %8082 = vpow2.f32 %v7122_v21  ;;  %vm4542_vm4 = vcmp.eq.f32.partialorder %v4541_v35, 8.507059e+37  ;;  %v7142_v35 = vmul.f32 -1.442695, %v12441_v36 }
 0x85a   : > { %8084 = vpow2.f32 %v7123_v41 }
 0x85b   : > { %8086 = vpow2.f32 %v7124_v22  ;;  %v4544_v22 = vor.u32 1.1754944e-38, %v4543_v20 }
 0x85c   : > { %v8077_v9 = vpop.eup %8076  ;;  %8088 = vpow2.f32 %v7125_v6 }
 0x85d   : > { %v8079_v29 = vpop.eup %8078  ;;  %v4533_v12 = vmul.f32 %v8077_v9, %v12489_v8  ;;  %8090 = vpow2.f32 %v7126_v52  ;;  %vm4538_vm9 = vweird.f32 %v8077_v9  ;;  %v7137_v8 = vmul.f32 -1.442695, %v12426_v13 }
 0x85e   : > { %v5041_v15 = vld [vmem:[#allocation3 + $0x27] sm:$0xff]  ;;  %v4548_v33 = vmul.f32 %v8079_v29, %v12491_v2  ;;  %v8081_v58 = vpop.eup %8080  ;;  %8092 = vpow2.f32 %v7127_v17  ;;  %vm4553_vm7 = vweird.f32 %v8079_v29  ;;  %vm4539_vm15 = vmor %vm4537_vm11, %vm4538_vm9 }
 0x85f   : > { %v5105_v50 = vld [vmem:[#allocation3 + $0x28] sm:$0xff]  ;;  %v5201_v59 = vsel %vm16288_vm5, %v5041_v15, 0.0  ;;  %v4534_v61 = vsub.f32 1.0, %v4533_v12  ;;  %v12516_v23 = vpop.eup %8082  ;;  %8094 = vpow2.f32 %v7128_v46  ;;  %vm4554_vm2 = vmor %vm4552_vm12, %vm4553_vm7  ;;  %v4559_v46 = vor.u32 1.1754944e-38, %v4558_v4 }
 0x860   : > { %v7761_v47 = vpack.i.bf16 %v5201_v59, %v5105_v50  ;;  %v4549_v37 = vsub.f32 1.0, %v4548_v33  ;;  %v12520_v15 = vpop.eup %8084  ;;  %v4556_v59 = vand.u32 2147483647, %v12491_v2  ;;  %8096 = vpow2.f32 %v7129_v40  ;;  %vm16314_vm7 = vmmov %vm16289_vm0 }
 0x861   : > { %v4535_v3 = vmul.f32 %v8077_v9, %v4534_v61  ;;  %8098 = vpow2.f32 %v7130_v18  ;;  %v7138_v2 = vmul.f32 -1.442695, %v12429_v45  ;;  %v7143_v4 = vmul.f32 -1.442695, %v12444_v34 }
 0x862   : > { %7762 = vrot.lane.b32.xlu1 %v7761_v47, %s8452_s25  ;;  %v4550_v50 = vmul.f32 %v8079_v29, %v4549_v37  ;;  %v12523_v47 = vpop.eup %8086  ;;  %8100 = vpow2.f32 %v7131_v10  ;;  %vm4557_vm10 = vcmp.eq.f32.partialorder %v4556_v59, 8.507059e+37  ;;  %v7139_v37 = vmul.f32 -1.442695, %v12432_v19 }
 0x863   : > { %v4536_v21 = vadd.f32 %v8077_v9, %v4535_v3  ;;  %v8089_v41 = vpop.eup %8088  ;;  %8102 = vpow2.f32 %v7132_v11  ;;  %v12536_v11 = vadd.f32 1.0, %v8081_v58 }
 0x864   : > { %v4551_v6 = vadd.f32 %v8079_v29, %v4550_v50  ;;  %v8091_v52 = vpop.eup %8090  ;;  %8104 = vpow2.f32 %v7133_v0  ;;  %v7144_v50 = vmul.f32 -1.442695, %v12447_v30 }
 0x865   : > { %v4540_v17 = vsel %vm4539_vm15, %v8077_v9, %v4536_v21  ;;  %v8093_v12 = vpop.eup %8092  ;;  %8106 = vpow2.f32 %v7134_v24  ;;  %v7141_v24 = vmul.f32 -1.442695, %v12438_v54  ;;  %v7146_v21 = vmul.f32 -1.442695, %v12453_v5 }
 0x866   : > { %v4545_v40 = vsel %vm4542_vm4, %v4544_v22, %v4540_v17  ;;  %v4555_v33 = vsel %vm4554_vm2, %v8079_v29, %v4551_v6  ;;  %v8095_v20 = vpop.eup %8094  ;;  %8108 = vpow2.f32 %v7135_v14  ;;  %v7147_v6 = vmul.f32 -1.442695, %v12456_v16 }
 0x867   : > { %v4560_v18 = vsel %vm4557_vm10, %v4559_v46, %v4555_v33  ;;  %v4970_v61 = vmul.f32 %v4545_v40, %v12476_v27  ;;  %v8097_v10 = vpop.eup %8096  ;;  %8110 = vpow2.f32 %v7136_v44  ;;  %v7140_v27 = vmul.f32 -1.442695, %v12435_v26 }
 0x868   : > { %v4971_v9 = vmul.f32 %v4560_v18, %v12479_v31  ;;  %v8099_v29 = vpop.eup %8098  ;;  %8112 = vpow2.f32 %v7137_v8  ;;  %v7145_v44 = vmul.f32 -1.442695, %v12450_v1  ;;  %v12549_v17 = vadd.f32 1.0, %v12516_v23 }
 0x869   : > { %5008 = vst.msk [vmem:[#allocation3 + $0x30] sm:$0xff] %vm16283_vm6, %v4970_v61  ;;  %v8101_v0 = vpop.eup %8100  ;;  %8114 = vpow2.f32 %v7138_v2  ;;  %v12552_v46 = vadd.f32 1.0, %v12520_v15  ;;  %v12555_v18 = vadd.f32 1.0, %v12523_v47  ;;  %v12557_v61 = vadd.f32 1.0, %v8089_v41  ;;  %v16291_v2 = vld [vmem:[#allocation21_spill] sm:$0xff] }
 0x86a   : > { %5009 = vst.msk [vmem:[#allocation3 + $0x38] sm:$0xff] %vm16289_vm0, %v4971_v9  ;;  %v8103_v3 = vpop.eup %8102  ;;  %8116 = vpow2.f32 %v7139_v37  ;;  %vm16292_vm14 = vnez %v16291_v2  ;;  %v12563_v23 = vadd.f32 1.0, %v8093_v12  ;;  %v12571_v47 = vadd.f32 1.0, %v8099_v29 }
 0x86b   : > { %v8105_v31 = vpop.eup %8104  ;;  %8118 = vrcp.f32 %v12536_v11  ;;  %16290 = vst [vmem:[#allocation74_spill] sm:$0xff] %v12557_v61  ;;  %v12573_v2 = vadd.f32 1.0, %v8101_v0  ;;  %vm4567_vm1 = vweird.f32 %v12536_v11  ;;  %v16320_v5 = vand.u32 2147483648, %v12552_v46 }
 0x86c   : > { %v8107_v14 = vpop.eup %8106  ;;  %8120 = vpow2.f32 %v7140_v27  ;;  %v12561_v27 = vadd.f32 1.0, %v8091_v52  ;;  %16294 = vst [vmem:[#allocation9_spill] sm:$0xff] %v12563_v23  ;;  %v12577_v52 = vadd.f32 1.0, %v8105_v31  ;;  %v16323_v62 = vand.u32 2147483648, %v12555_v18 }
 0x86d   : > { %v8109_v58 = vpop.eup %8108  ;;  %8122 = vpow2.f32 %v7141_v24  ;;  %v12761_v32 = vor.u32 1.1754944e-38, %v16320_v5  ;;  %v16325_v43 = vand.u32 2147483648, %v12557_v61  ;;  %vm4582_vm12 = vweird.f32 %v12549_v17 }
 0x86e   : > { %v8111_v59 = vpop.eup %8110  ;;  %8124 = vpow2.f32 %v7142_v35  ;;  %16293 = vst [vmem:[#allocation17_spill] sm:$0xff] %v12561_v27  ;;  %v12567_v35 = vadd.f32 1.0, %v8095_v20  ;;  %v12582_v20 = vadd.f32 1.0, %v8109_v58  ;;  %v16328_v55 = vand.u32 2147483648, %v12561_v27 }
 0x86f   : > { %v8113_v22 = vpop.eup %8112  ;;  %8126 = vpow2.f32 %v7143_v4  ;;  %v12569_v4 = vadd.f32 1.0, %v8097_v10  ;;  %16298 = vst [vmem:[#allocation62_spill] sm:$0xff] %v12577_v52  ;;  %v12584_v10 = vadd.f32 1.0, %v8111_v59  ;;  %v4571_v59 = vand.u32 2147483647, %v12536_v11 }
 0x870   : > { %v8115_v8 = vpop.eup %8114  ;;  %8128 = vpow2.f32 %v7144_v50  ;;  %16295 = vst [vmem:[#allocation11_spill] sm:$0xff] %v12567_v35  ;;  %v12580_v50 = vadd.f32 1.0, %v8107_v14  ;;  %v5042_v1 = vld [vmem:[#allocation3 + $0x2f] sm:$0xff]  ;;  %v12779_v5 = vor.u32 1.1754944e-38, %v16325_v43  ;;  %v12789_v25 = vor.u32 1.1754944e-38, %v16328_v55 }
 0x871   : > { %v5043_v40 = vld [vmem:[#allocation3 + $0x37] sm:$0xff]  ;;  %v8117_v37 = vpop.eup %8116  ;;  %8130 = vpow2.f32 %v7145_v44  ;;  %16296 = vst [vmem:[#allocation12_spill] sm:$0xff] %v12569_v4  ;;  %v12586_v44 = vadd.f32 1.0, %v8113_v22  ;;  %vm4572_vm9 = vcmp.eq.f32.partialorder %v4571_v59, 8.507059e+37  ;;  %vm4597_vm4 = vweird.f32 %v12552_v46 }
 0x872   : > { %v5107_v33 = vld [vmem:[#allocation3 + $0x38] sm:$0xff]  ;;  %v5203_v9 = vsel %vm16292_vm14, %v5043_v40, 0.0  ;;  %v12565_v24 = vpop.eup %8118  ;;  %8132 = vpow2.f32 %v7146_v21  ;;  %v12575_v40 = vadd.f32 1.0, %v8103_v3  ;;  %16299 = vst [vmem:[#allocation10_spill] sm:$0xff] %v12580_v50  ;;  %v12588_v21 = vadd.f32 1.0, %v8115_v8  ;;  %v5106_v60 = vld [vmem:[#allocation3 + $0x30] sm:$0xff] }
 0x873   : > { %v7771_v15 = vpack.i.bf16 %v5203_v9, %v5107_v33  ;;  %v8121_v41 = vpop.eup %8120  ;;  %8134 = vpow2.f32 %v7147_v6  ;;  %16300 = vst [vmem:[#allocation13_spill] sm:$0xff] %v12582_v20  ;;  %v4563_v0 = vmul.f32 %v12565_v24, %v12536_v11  ;;  %v12593_v31 = vadd.f32 1.0, %v8117_v37 }
 0x874   : > { %16297 = vst [vmem:[#allocation7_spill] sm:$0xff] %v12575_v40  ;;  %v8123_v12 = vpop.eup %8122  ;;  %8136 = vrcp.f32 %v12549_v17  ;;  %v12595_v6 = vadd.f32 1.0, %v8121_v41  ;;  %v4573_v9 = vand.u32 2147483648, %v12536_v11  ;;  %vm4568_vm8 = vweird.f32 %v12565_v24 }
 0x875   : > { %7772 = vrot.lane.b32.xlu0 %v7771_v15, %s8452_s25  ;;  %16301 = vst [vmem:[#allocation31_spill] sm:$0xff] %v12584_v10  ;;  %v8125_v29 = vpop.eup %8124  ;;  %8138 = vrcp.f32 %v12552_v46  ;;  %v12599_v58 = vadd.f32 1.0, %v8123_v12  ;;  %v4564_v22 = vsub.f32 1.0, %v4563_v0  ;;  %v5896_v15 = vld [vmem:[%s15208_s7 + $0xf8] sm:$0xff]  ;;  %vm4569_vm13 = vmor %vm4567_vm1, %vm4568_vm8  ;;  %vm4612_vm0 = vweird.f32 %v12555_v18 }
 0x876   : > { %16302 = vst [vmem:[#allocation75_spill] sm:$0xff] %v12586_v44  ;;  %v8127_v3 = vpop.eup %8126  ;;  %8140 = vrcp.f32 %v12555_v18  ;;  %v12603_v8 = vadd.f32 1.0, %v8125_v29  ;;  %6150 = vmatpush.msra.mxu2 %v5896_v15 }
 0x877   : > { %16303 = vst [vmem:[#allocation76_spill] sm:$0xff] %v12588_v21  ;;  %v8129_v14 = vpop.eup %8128  ;;  %8142 = vrcp.f32 %v12557_v61  ;;  %v12611_v12 = vadd.f32 1.0, %v8127_v3  ;;  %v4565_v0 = vmul.f32 %v12565_v24, %v4564_v22 }
 0x878   : > { %16304 = vst [vmem:[#allocation77_spill] sm:$0xff] %v12593_v31  ;;  %v8131_v33 = vpop.eup %8130  ;;  %8144 = vrcp.f32 %v12561_v27  ;;  %v12616_v28 = vadd.f32 1.0, %v8129_v14 }
 0x879   : > { %16305 = vst [vmem:[#allocation78_spill] sm:$0xff] %v12595_v6  ;;  %v8133_v41 = vpop.eup %8132  ;;  %8146 = vrcp.f32 %v12563_v23  ;;  %v12623_v3 = vadd.f32 1.0, %v8131_v33  ;;  %v4566_v22 = vadd.f32 %v12565_v24, %v4565_v0  ;;  %v4574_v33 = vor.u32 1.1754944e-38, %v4573_v9 }
 0x87a   : > { %16306 = vst [vmem:[#allocation79_spill] sm:$0xff] %v12599_v58  ;;  %v8135_v29 = vpop.eup %8134  ;;  %8148 = vrcp.f32 %v12567_v35  ;;  %v12630_v14 = vadd.f32 1.0, %v8133_v41 }
 0x87b   : > { %16307 = vst [vmem:[#allocation80_spill] sm:$0xff] %v12603_v8  ;;  %v12621_v16 = vpop.eup %8136  ;;  %8150 = vrcp.f32 %v12569_v4  ;;  %v4570_v0 = vsel %vm4569_vm13, %v12565_v24, %v4566_v22  ;;  %v12645_v37 = vadd.f32 1.0, %v8135_v29 }
 0x87c   : > { %16308 = vst [vmem:[#allocation81_spill] sm:$0xff] %v12611_v12  ;;  %v12628_v15 = vpop.eup %8138  ;;  %8152 = vrcp.f32 %v12571_v47  ;;  %v4575_v11 = vsel %vm4572_vm9, %v4574_v33, %v4570_v0  ;;  %v16318_v0 = vand.u32 2147483648, %v12549_v17  ;;  %vm4583_vm11 = vweird.f32 %v12621_v16 }
 0x87d   : > { %16309 = vst [vmem:[#allocation82_spill] sm:$0xff] %v12616_v28  ;;  %v12638_v57 = vpop.eup %8140  ;;  %8154 = vrcp.f32 %v12573_v2  ;;  %v4972_v24 = vmul.f32 %v4575_v11, %v12378_v53  ;;  %v12747_v11 = vmul.f32 %v12621_v16, %v12549_v17  ;;  %vm4598_vm15 = vweird.f32 %v12628_v15  ;;  %vm13007_vm8 = vmor %vm4582_vm12, %vm4583_vm11 }
 0x87e   : > { %16310 = vst [vmem:[#allocation83_spill] sm:$0xff] %v12623_v3  ;;  %v12643_v41 = vpop.eup %8142  ;;  %8156 = vrcp.f32 %v12575_v40  ;;  %v12753_v51 = vor.u32 1.1754944e-38, %v16318_v0  ;;  %v12771_v0 = vor.u32 1.1754944e-38, %v16323_v62  ;;  %vm4613_vm6 = vweird.f32 %v12638_v57  ;;  %vm13021_vm11 = vmor %vm4597_vm4, %vm4598_vm15 }
 0x87f   : > { %16311 = vst [vmem:[#allocation84_spill] sm:$0xff] %v12630_v14  ;;  %v12649_v30 = vpop.eup %8144  ;;  %8158 = vrcp.f32 %v12577_v52  ;;  %v12775_v7 = vmul.f32 %v12643_v41, %v12557_v61  ;;  %vm4628_vm1 = vweird.f32 %v12643_v41 }
 0x880   : > { %16312 = vst [vmem:[#allocation85_spill] sm:$0xff] %v12645_v37  ;;  %v12655_v59 = vpop.eup %8146  ;;  %8160 = vrcp.f32 %v12580_v50  ;;  %v12783_v39 = vmul.f32 %v12649_v30, %v12561_v27 }
 0x881   : > { %v12661_v33 = vpop.eup %8148  ;;  %5010 = vst.msk [vmem:[#allocation3 + $0x40] sm:$0xff] %vm16314_vm7, %v4972_v24  ;;  %8162 = vrcp.f32 %v12582_v20  ;;  %v12793_v62 = vmul.f32 %v12655_v59, %v12563_v23 }
 0x882   : > { %16313 = vst [vmem:[#allocation86_spill] sm:$0xff] %v12661_v33  ;;  %v12668_v53 = vpop.eup %8150  ;;  %8164 = vrcp.f32 %v12584_v10  ;;  %v12801_v43 = vmul.f32 %v12661_v33, %v12567_v35  ;;  %v16338_v33 = vand.u32 2147483648, %v12571_v47 }
 0x883   : > { %v12674_v29 = vpop.eup %8152  ;;  %8166 = vrcp.f32 %v12586_v44  ;;  %16319 = vst [vmem:[#allocation90_spill] sm:$0xff] %v12753_v51  ;;  %v16333_v51 = vand.u32 2147483648, %v12567_v35  ;;  %v12811_v55 = vmul.f32 %v12668_v53, %v12569_v4  ;;  %vm16453_vm14 = vweird.f32 %v12668_v53 }
 0x884   : > { %v12680_v24 = vpop.eup %8154  ;;  %8168 = vrcp.f32 %v12588_v21  ;;  %16321 = vst [vmem:[#allocation91_spill] sm:$0xff] %v12761_v32  ;;  %v12825_v35 = vor.u32 1.1754944e-38, %v16338_v33 }
 0x885   : > { %v12686_v34 = vpop.eup %8156  ;;  %8170 = vrcp.f32 %v12593_v31  ;;  %16324 = vst [vmem:[#allocation93_spill] sm:$0xff] %v12771_v0  ;;  %v16330_v0 = vand.u32 2147483648, %v12563_v23  ;;  %v12807_v61 = vor.u32 1.1754944e-38, %v16333_v51  ;;  %v12821_v23 = vmul.f32 %v12674_v29, %v12571_v47 }
 0x886   : > { %v12692_v36 = vpop.eup %8158  ;;  %8172 = vrcp.f32 %v12595_v6  ;;  %16326 = vst [vmem:[#allocation94_spill] sm:$0xff] %v12779_v5  ;;  %v12829_v51 = vmul.f32 %v12680_v24, %v12573_v2 }
 0x887   : > { %v12698_v54 = vpop.eup %8160  ;;  %8174 = vrcp.f32 %v12599_v58  ;;  %16329 = vst [vmem:[#allocation96_spill] sm:$0xff] %v12789_v25  ;;  %v12797_v32 = vor.u32 1.1754944e-38, %v16330_v0  ;;  %v16335_v25 = vand.u32 2147483648, %v12569_v4  ;;  %v7766_v0 = vpack.i.bf16 %v5042_v1, %v5106_v60 }
 0x888   : > { %16315 = vst [vmem:[#allocation87_spill] sm:$0xff] %v12698_v54  ;;  %v12704_v26 = vpop.eup %8162  ;;  %v5044_v19 = vld [vmem:[#allocation3 + $0x3f] sm:$0xff]  ;;  %8176 = vrcp.f32 %v12603_v8  ;;  %v12840_v60 = vmul.f32 %v12686_v34, %v12575_v40  ;;  %v16343_v1 = vand.u32 2147483648, %v12575_v40  ;;  %v16347_v40 = vand.u32 2147483648, %v12580_v50 }
 0x889   : > { %v5108_v45 = vld [vmem:[#allocation3 + $0x40] sm:$0xff]  ;;  %v12710_v13 = vpop.eup %8164  ;;  %8178 = vrcp.f32 %v12611_v12  ;;  %16331 = vst [vmem:[#allocation97_spill] sm:$0xff] %v12797_v32  ;;  %v12815_v27 = vor.u32 1.1754944e-38, %v16335_v25  ;;  %7767 = vrot.lane.b32.xlu2 %v7766_v0, %s8452_s25 }
 0x88a   : > { %v7776_v9 = vpack.i.bf16 %v5044_v19, %v5108_v45  ;;  %v12715_v49 = vpop.eup %8166  ;;  %8180 = vrcp.f32 %v12616_v28  ;;  %v12765_v19 = vmul.f32 %v12638_v57, %v12555_v18  ;;  %16334 = vst [vmem:[#allocation99_spill] sm:$0xff] %v12807_v61  ;;  %v16340_v61 = vand.u32 2147483648, %v12573_v2 }
 0x88b   : > { %v12721_v48 = vpop.eup %8168  ;;  %8182 = vrcp.f32 %v12623_v3  ;;  %16336 = vst [vmem:[#allocation100_spill] sm:$0xff] %v12815_v27  ;;  %v12844_v33 = vor.u32 1.1754944e-38, %v16343_v1  ;;  %v16345_v27 = vand.u32 2147483648, %v12577_v52  ;;  %v12862_v1 = vor.u32 1.1754944e-38, %v16347_v40 }
 0x88c   : > { %16316 = vst [vmem:[#allocation88_spill] sm:$0xff] %v12721_v48  ;;  %7777 = vrot.lane.b32.xlu1 %v7776_v9, %s8452_s25  ;;  %v12728_v45 = vpop.eup %8170  ;;  %8184 = vrcp.f32 %v12630_v14  ;;  %v12757_v9 = vmul.f32 %v12628_v15, %v12552_v46  ;;  %v12833_v4 = vor.u32 1.1754944e-38, %v16340_v61  ;;  %v12875_v0 = vmul.f32 %v12710_v13, %v12584_v10 }
 0x88d   : > { %v12734_v22 = vpop.eup %8172  ;;  %8186 = vrcp.f32 %v12645_v37  ;;  %16339 = vst [vmem:[#allocation102_spill] sm:$0xff] %v12825_v35  ;;  %v12848_v35 = vmul.f32 %v12692_v36, %v12577_v52  ;;  %v12852_v61 = vor.u32 1.1754944e-38, %v16345_v27  ;;  %v16349_v52 = vand.u32 2147483648, %v12582_v20 }
 0x88e   : > { %v12740_v56 = vpop.eup %8174  ;;  %16341 = vst [vmem:[#allocation103_spill] sm:$0xff] %v12833_v4  ;;  %v12858_v4 = vmul.f32 %v12698_v54, %v12580_v50  ;;  %v12883_v40 = vmul.f32 %v12715_v49, %v12586_v44 }
 0x88f   : > { %16317 = vst [vmem:[#allocation89_spill] sm:$0xff] %v12740_v56  ;;  %v12749_v63 = vpop.eup %8176  ;;  %v12870_v27 = vor.u32 1.1754944e-38, %v16349_v52  ;;  %v5895_v52 = vld [vmem:[%s15208_s7 + $0xf0] sm:$0xff] }
 0x890   : > { %v12767_v42 = vpop.eup %8178  ;;  %16344 = vst [vmem:[#allocation105_spill] sm:$0xff] %v12844_v33  ;;  %v12866_v33 = vmul.f32 %v12704_v26, %v12582_v20  ;;  %6151 = vmatpush.msra.mxu2 %v5895_v52  ;;  %v16364_v52 = vand.u32 2147483647, %v12552_v46 }
 0x891   : > { %16322 = vst [vmem:[#allocation92_spill] sm:$0xff] %v12767_v42  ;;  %v12785_v38 = vpop.eup %8180 }
 0x892   : > { %16327 = vst [vmem:[#allocation95_spill] sm:$0xff] %v12785_v38  ;;  %v12803_v5 = vpop.eup %8182  ;;  %vm12927_vm10 = vcmp.eq.f32.partialorder %v16364_v52, 8.507059e+37  ;;  %v12949_v52 = vmul.f32 %v12767_v42, %v12611_v12  ;;  %v16390_v42 = vld [vmem:[#allocation91_spill] sm:$0xff] }
 0x893   : > { %16332 = vst [vmem:[#allocation98_spill] sm:$0xff] %v12803_v5  ;;  %v12817_v32 = vpop.eup %8184 }
 0x894   : > { %16337 = vst [vmem:[#allocation101_spill] sm:$0xff] %v12817_v32  ;;  %v12835_v25 = vpop.eup %8186 }
 0x895   : > { %16342 = vst [vmem:[#allocation104_spill] sm:$0xff] %v12835_v25 }
 0x896   : > { %16346 = vst [vmem:[#allocation106_spill] sm:$0xff] %v12852_v61  ;;  %v16351_v61 = vand.u32 2147483648, %v12584_v10  ;;  %v4579_v10 = vsub.f32 1.0, %v12747_v11  ;;  %v16361_v11 = vand.u32 2147483647, %v12549_v17 }
 0x897   : > { %16348 = vst [vmem:[#allocation107_spill] sm:$0xff] %v12862_v1  ;;  %v16353_v1 = vand.u32 2147483648, %v12586_v44  ;;  %v4594_v44 = vsub.f32 1.0, %v12757_v9 }
 0x898   : > { %16350 = vst [vmem:[#allocation108_spill] sm:$0xff] %v12870_v27  ;;  %v12879_v54 = vor.u32 1.1754944e-38, %v16351_v61  ;;  %v12895_v27 = vmul.f32 %v12721_v48, %v12588_v21  ;;  %v16355_v61 = vand.u32 2147483648, %v12588_v21  ;;  %v12913_v48 = vmul.f32 %v12734_v22, %v12595_v6 }
 0x899   : > { %v12887_v50 = vor.u32 1.1754944e-38, %v16353_v1  ;;  %v12905_v1 = vmul.f32 %v12728_v45, %v12593_v31  ;;  %vm12921_vm2 = vcmp.eq.f32.partialorder %v16361_v11, 8.507059e+37  ;;  %v12941_v11 = vmul.f32 %v12749_v63, %v12603_v8 }
 0x89a   : > { %16352 = vst [vmem:[#allocation109_spill] sm:$0xff] %v12879_v54  ;;  %v12899_v54 = vor.u32 1.1754944e-38, %v16355_v61  ;;  %v16359_v61 = vand.u32 2147483648, %v12595_v6  ;;  %v16371_v21 = vand.u32 2147483648, %v12611_v12  ;;  %v4580_v12 = vmul.f32 %v12621_v16, %v4579_v10 }
 0x89b   : > { %16354 = vst [vmem:[#allocation110_spill] sm:$0xff] %v12887_v50  ;;  %v16357_v50 = vand.u32 2147483648, %v12593_v31  ;;  %v4639_v10 = vsub.f32 1.0, %v12783_v39  ;;  %v16378_v39 = vand.u32 2147483647, %v12555_v18  ;;  %v4849_v46 = vsub.f32 1.0, %v12913_v48 }
 0x89c   : > { %16356 = vst [vmem:[#allocation111_spill] sm:$0xff] %v12899_v54  ;;  %v12917_v54 = vor.u32 1.1754944e-38, %v16359_v61 }
 0x89d   : > { %v12909_v20 = vor.u32 1.1754944e-38, %v16357_v50  ;;  %v12933_v50 = vmul.f32 %v12740_v56, %v12599_v58  ;;  %v12953_v56 = vor.u32 1.1754944e-38, %v16371_v21  ;;  %v4595_v21 = vmul.f32 %v12628_v15, %v4594_v44 }
 0x89e   : > { %16360 = vst [vmem:[#allocation113_spill] sm:$0xff] %v12917_v54  ;;  %v16369_v54 = vand.u32 2147483648, %v12603_v8  ;;  %v4654_v44 = vsub.f32 1.0, %v12793_v62  ;;  %vm12998_vm9 = vcmp.eq.f32.partialorder %v16378_v39, 8.507059e+37  ;;  %v16384_v39 = vld [vmem:[#allocation86_spill] sm:$0xff] }
 0x89f   : > { %16358 = vst [vmem:[#allocation112_spill] sm:$0xff] %v12909_v20  ;;  %v16367_v20 = vand.u32 2147483648, %v12599_v58 }
 0x8a0   : > { %v12945_v6 = vor.u32 1.1754944e-38, %v16369_v54  ;;  %16372 = vst [vmem:[#allocation116_spill] sm:$0xff] %v12953_v56  ;;  %v12966_v54 = vmul.f32 %v12803_v5, %v12623_v3  ;;  %v16375_v56 = vand.u32 2147483648, %v12623_v3  ;;  %v16377_v3 = vld [vmem:[#allocation74_spill] sm:$0xff] }
 0x8a1   : > { %v12937_v61 = vor.u32 1.1754944e-38, %v16367_v20  ;;  %v12957_v20 = vmul.f32 %v12785_v38, %v12616_v28  ;;  %v16389_v38 = vld [vmem:[#allocation90_spill] sm:$0xff] }
 0x8a2   : > { %16370 = vst [vmem:[#allocation115_spill] sm:$0xff] %v12945_v6  ;;  %v4609_v6 = vsub.f32 1.0, %v12765_v19  ;;  %v12973_v8 = vor.u32 1.1754944e-38, %v16375_v56  ;;  %v4669_v56 = vsub.f32 1.0, %v12801_v43  ;;  %v4684_v19 = vsub.f32 1.0, %v12811_v55 }
 0x8a3   : > { %16368 = vst [vmem:[#allocation114_spill] sm:$0xff] %v12937_v61  ;;  %v16373_v61 = vand.u32 2147483648, %v12616_v28  ;;  %v4624_v28 = vsub.f32 1.0, %v12775_v7  ;;  %v4729_v7 = vsub.f32 1.0, %v12840_v60  ;;  %v4581_v55 = vadd.f32 %v12621_v16, %v4580_v12  ;;  %v16383_v60 = vld [vmem:[#allocation17_spill] sm:$0xff] }
 0x8a4   : > { %16376 = vst [vmem:[#allocation118_spill] sm:$0xff] %v12973_v8  ;;  %v4699_v8 = vsub.f32 1.0, %v12821_v23  ;;  %v4610_v43 = vmul.f32 %v12638_v57, %v4609_v6  ;;  %vm4642_vm13 = vweird.f32 %v16383_v60  ;;  %v4789_v6 = vsub.f32 1.0, %v12875_v0  ;;  %v16388_v0 = vld [vmem:[#allocation11_spill] sm:$0xff]  ;;  %v16391_v23 = vld [vmem:[#allocation12_spill] sm:$0xff] }
 0x8a5   : > { %v12961_v58 = vor.u32 1.1754944e-38, %v16373_v61  ;;  %v12977_v61 = vmul.f32 %v12817_v32, %v12630_v14  ;;  %v4744_v14 = vsub.f32 1.0, %v12848_v35  ;;  %v4759_v35 = vsub.f32 1.0, %v12858_v4 }
 0x8a6   : > { %v4774_v4 = vsub.f32 1.0, %v12866_v33  ;;  %v4804_v12 = vsub.f32 1.0, %v12883_v40  ;;  %v4834_v32 = vsub.f32 1.0, %v12905_v1  ;;  %v4585_v5 = vsel %vm13007_vm8, %v12621_v16, %v4581_v55 }
 0x8a7   : > { %16374 = vst [vmem:[#allocation117_spill] sm:$0xff] %v12961_v58  ;;  %v12981_v58 = vmul.f32 %v12835_v25, %v12645_v37  ;;  %v4714_v37 = vsub.f32 1.0, %v12829_v51  ;;  %v4596_v51 = vadd.f32 %v12628_v15, %v4595_v21  ;;  %v4819_v21 = vsub.f32 1.0, %v12895_v27  ;;  %v16387_v25 = vld [vmem:[#allocation9_spill] sm:$0xff] }
 0x8a8   : > { %vm4657_vm12 = vweird.f32 %v16387_v25  ;;  %vm4672_vm15 = vweird.f32 %v16388_v0  ;;  %v4864_v27 = vsub.f32 1.0, %v12933_v50  ;;  %v4879_v40 = vsub.f32 1.0, %v12941_v11 }
 0x8a9   : > { %v4600_v33 = vsel %vm13021_vm11, %v12628_v15, %v4596_v51  ;;  %v4590_v1 = vsel %vm12921_vm2, %v16389_v38, %v4585_v5  ;;  %v4894_v16 = vsub.f32 1.0, %v12949_v52  ;;  %v16392_v15 = vld [vmem:[#allocation63_spill] sm:$0xff]  ;;  %v16393_v51 = vld [vmem:[#allocation26_spill] sm:$0xff]  ;;  %v4611_v11 = vadd.f32 %v12638_v57, %v4610_v43  ;;  %vm16394_vm11 = vmmov %vm16314_vm7 }
 0x8aa   : > { %v4605_v48 = vsel %vm12927_vm10, %v16390_v42, %v4600_v33  ;;  %v4973_v55 = vmul.f32 %v4590_v1, %v16392_v15  ;;  %v4909_v38 = vsub.f32 1.0, %v12957_v20  ;;  %v4924_v5 = vsub.f32 1.0, %v12966_v54  ;;  %vm13072_vm2 = vmor %vm4612_vm0, %vm4613_vm6 }
 0x8ab   : > { %v4974_v50 = vmul.f32 %v4605_v48, %v16393_v51  ;;  %v4939_v42 = vsub.f32 1.0, %v12977_v61  ;;  %v4954_v31 = vsub.f32 1.0, %v12981_v58  ;;  %v4625_v9 = vmul.f32 %v12643_v41, %v4624_v28  ;;  %v16406_v48 = vld [vmem:[#allocation10_spill] sm:$0xff] }
 0x8ac   : > { %v4640_v52 = vmul.f32 %v12649_v30, %v4639_v10  ;;  %v4655_v43 = vmul.f32 %v12655_v59, %v4654_v44  ;;  %v4670_v17 = vmul.f32 %v16384_v39, %v4669_v56  ;;  %5011 = vst.msk [vmem:[#allocation3 + $0x48] sm:$0xff] %vm16394_vm11, %v4973_v55  ;;  %v4685_v28 = vmul.f32 %v12668_v53, %v4684_v19  ;;  %vm16397_vm11 = vmmov %vm16314_vm7  ;;  %v16398_v10 = vld [vmem:[#allocation7_spill] sm:$0xff]  ;;  %v16400_v19 = vld [vmem:[#allocation62_spill] sm:$0xff] }
 0x8ad   : > { %v4700_v20 = vmul.f32 %v12674_v29, %v4699_v8  ;;  %v4715_v54 = vmul.f32 %v12680_v24, %v4714_v37  ;;  %v4730_v61 = vmul.f32 %v12686_v34, %v4729_v7  ;;  %5012 = vst.msk [vmem:[#allocation3 + $0x50] sm:$0xff] %vm16397_vm11, %v4974_v50  ;;  %v16399_v44 = vld [vmem:[#allocation87_spill] sm:$0xff]  ;;  %v4745_v18 = vmul.f32 %v12692_v36, %v4744_v14 }
 0x8ae   : > { %v4760_v56 = vmul.f32 %v16399_v44, %v4759_v35  ;;  %v4775_v33 = vmul.f32 %v12704_v26, %v4774_v4  ;;  %v4615_v8 = vsel %vm13072_vm2, %v12638_v57, %v4611_v11  ;;  %vm16401_vm11 = vweird.f32 %v16377_v3  ;;  %v16404_v35 = vld [vmem:[#allocation88_spill] sm:$0xff]  ;;  %v16405_v57 = vld [vmem:[#allocation93_spill] sm:$0xff] }
 0x8af   : > { %vm13095_vm4 = vmor %vm16401_vm11, %vm4628_vm1  ;;  %v4790_v14 = vmul.f32 %v12710_v13, %v4789_v6  ;;  %v13101_v7 = vmul.f32 %v12715_v49, %v4804_v12  ;;  %v13104_v4 = vmul.f32 %v16404_v35, %v4819_v21  ;;  %v4620_v1 = vsel %vm12998_vm9, %v16405_v57, %v4615_v8  ;;  %v16421_v11 = vld [vmem:[#allocation89_spill] sm:$0xff]  ;;  %v16422_v8 = vld [vmem:[#allocation54_spill] sm:$0xff] }
 0x8b0   : > { %v16407_v15 = vand.u32 2147483647, %v16377_v3  ;;  %v16410_v6 = vand.u32 2147483647, %v16383_v60  ;;  %v16411_v12 = vmov 0  ;;  %v16415_v51 = vmov 0 }
 0x8b1   : > { %v16414_v21 = vand.u32 2147483647, %v16387_v25  ;;  %vm16418_vm2 = vweird.f32 %v12649_v30  ;;  %v13138_v62 = vmul.f32 %v12728_v45, %v4834_v32  ;;  %v13141_v50 = vmul.f32 %v12734_v22, %v4849_v46  ;;  %v16495_v32 = vld [vmem:[#allocation80_spill] sm:$0xff] }
 0x8b2   : > { %vm13112_vm1 = vcmp.eq.f32.partialorder %v16407_v15, 8.507059e+37  ;;  %vm13118_vm11 = vcmp.eq.f32.partialorder %v16410_v6, 8.507059e+37  ;;  %vm13133_vm10 = vmor %vm4642_vm13, %vm16418_vm2  ;;  %v13144_v58 = vmul.f32 %v16421_v11, %v4864_v27  ;;  %v4975_v57 = vmul.f32 %v4620_v1, %v16422_v8  ;;  %v16423_v15 = vld [vmem:[#allocation13_spill] sm:$0xff]  ;;  %v16431_v27 = vld [vmem:[#allocation92_spill] sm:$0xff] }
 0x8b3   : > { %v16412_v12 = vsel %vm13118_vm11, 4294967295, %v16411_v12  ;;  %vm13124_vm0 = vcmp.eq.f32.partialorder %v16414_v21, 8.507059e+37  ;;  %v16424_v6 = vand.u32 2147483647, %v16388_v0  ;;  %v16425_v60 = vmov 0  ;;  %v16433_v21 = vld [vmem:[#allocation95_spill] sm:$0xff] }
 0x8b4   : > { %16413 = vst [vmem:[#allocation74_spill] sm:$0xff] %v16412_v12  ;;  %v16416_v51 = vsel %vm13124_vm0, 4294967295, %v16415_v51  ;;  %vm16428_vm2 = vweird.f32 %v12655_v59  ;;  %v13164_v46 = vmul.f32 %v12749_v63, %v4879_v40  ;;  %v13167_v1 = vmul.f32 %v16431_v27, %v4894_v16  ;;  %v16445_v16 = vld [vmem:[#allocation101_spill] sm:$0xff] }
 0x8b5   : > { %16417 = vst [vmem:[#allocation17_spill] sm:$0xff] %v16416_v51  ;;  %vm13150_vm6 = vcmp.eq.f32.partialorder %v16424_v6, 8.507059e+37  ;;  %vm13159_vm8 = vmor %vm4657_vm12, %vm16428_vm2  ;;  %v13170_v8 = vmul.f32 %v16433_v21, %v4909_v38  ;;  %v16435_v6 = vld [vmem:[#allocation98_spill] sm:$0xff]  ;;  %v16437_v51 = vld [vmem:[#allocation31_spill] sm:$0xff]  ;;  %v16438_v25 = vand.u32 2147483647, %v16391_v23  ;;  %vm16442_vm9 = vweird.f32 %v16384_v39 }
 0x8b6   : > { %v16426_v60 = vsel %vm13150_vm6, 4294967295, %v16425_v60  ;;  %16432 = vst [vmem:[#allocation9_spill] sm:$0xff] %v13167_v1  ;;  %v16439_v12 = vmov 0  ;;  %vm13187_vm7 = vmor %vm4672_vm15, %vm16442_vm9  ;;  %v13192_v38 = vmul.f32 %v16445_v16, %v4939_v42  ;;  %vm16447_vm2 = vcmask 523264   ;;  %v13232_v16 = vld [vmem:[#allocation3 + $0x47] sm:$0xff] }
 0x8b7   : > { %16427 = vst [vmem:[#allocation86_spill] sm:$0xff] %v16426_v60  ;;  %v13173_v60 = vmul.f32 %v16435_v6, %v4924_v5  ;;  %vm13178_vm12 = vcmp.eq.f32.partialorder %v16438_v25, 8.507059e+37  ;;  %v13195_v5 = vadd.f32 %v12643_v41, %v4625_v9  ;;  %v13198_v25 = vadd.f32 %v12649_v30, %v4640_v52  ;;  %v16457_v9 = vld [vmem:[#allocation104_spill] sm:$0xff] }
 0x8b8   : > { %16434 = vst [vmem:[#allocation11_spill] sm:$0xff] %v13170_v8  ;;  %v16440_v12 = vsel %vm13178_vm12, 4294967295, %v16439_v12  ;;  %v16448_v8 = vld [vmem:[#allocation75_spill] sm:$0xff]  ;;  %v16449_v0 = vand.u32 2147483647, %v12571_v47  ;;  %vm16454_vm5 = vweird.f32 %v16391_v23  ;;  %v13221_v52 = vmul.f32 %v16457_v9, %v4954_v31 }
 0x8b9   : > { %16436 = vst [vmem:[#allocation90_spill] sm:$0xff] %v13173_v60  ;;  %v13201_v60 = vadd.f32 %v12655_v59, %v4655_v43  ;;  %vm13216_vm3 = vmor %vm16454_vm5, %vm16453_vm14  ;;  %v13224_v43 = vadd.f32 %v16384_v39, %v4670_v17  ;;  %v16462_v1 = vmov 0  ;;  %v13242_v31 = vld [vmem:[#allocation3 + $0x4f] sm:$0xff]  ;;  %v13251_v9 = vadd.f32 %v12692_v36, %v4745_v18 }
 0x8ba   : > { %16441 = vst [vmem:[#allocation91_spill] sm:$0xff] %v16440_v12  ;;  %vm13207_vm15 = vcmp.eq.f32.partialorder %v16449_v0, 8.507059e+37  ;;  %v16450_v12 = vmov 0  ;;  %v13230_v0 = vadd.f32 %v12674_v29, %v4700_v20  ;;  %v5110_v17 = vld [vmem:[#allocation3 + $0x50] sm:$0xff]  ;;  %v13248_v20 = vadd.f32 %v12686_v34, %v4730_v61 }
 0x8bb   : > { %16446 = vst [vmem:[#allocation12_spill] sm:$0xff] %v13192_v38  ;;  %v16451_v12 = vsel %vm13207_vm15, 4294967295, %v16450_v12  ;;  %v5109_v38 = vld [vmem:[#allocation3 + $0x48] sm:$0xff]  ;;  %v16469_v23 = vand.u32 2147483647, %v16398_v10  ;;  %vm16473_vm13 = vweird.f32 %v12674_v29  ;;  %v7786_v18 = vpack.i.bf16 %v13242_v31, %v5110_v17  ;;  %v16637_v61 = vld [vmem:[#allocation111_spill] sm:$0xff] }
 0x8bc   : > { %5013 = vst.msk [vmem:[#allocation3 + $0x58] sm:$0xff] %vm16447_vm2, %v4975_v57  ;;  %v13227_v57 = vadd.f32 %v12668_v53, %v4685_v28  ;;  %v13245_v28 = vadd.f32 %v12680_v24, %v4715_v54  ;;  %v16470_v54 = vmov 0  ;;  %vm16484_vm12 = vweird.f32 %v12573_v2 }
 0x8bd   : > { %16452 = vst [vmem:[#allocation63_spill] sm:$0xff] %v16451_v12  ;;  %v16461_v12 = vand.u32 2147483647, %v12573_v2  ;;  %vm13262_vm9 = vcmp.eq.f32.partialorder %v16469_v23, 8.507059e+37  ;;  %v13280_v23 = vadd.f32 %v12710_v13, %v4790_v14  ;;  %v4630_v14 = vsel %vm13095_vm4, %v12643_v41, %v13195_v5  ;;  %7787 = vrot.lane.b32.xlu0 %v7786_v18, %s8452_s25  ;;  %v16524_v55 = vld [vmem:[#allocation9_spill] sm:$0xff]  ;;  %v16531_v18 = vld [vmem:[#allocation76_spill] sm:$0xff] }
 0x8be   : > { %16458 = vst [vmem:[#allocation26_spill] sm:$0xff] %v13221_v52  ;;  %v13254_v52 = vadd.f32 %v16399_v44, %v4760_v56  ;;  %v16471_v54 = vsel %vm13262_vm9, 4294967295, %v16470_v54  ;;  %v13277_v56 = vadd.f32 %v12704_v26, %v4775_v33  ;;  %vm16483_vm9 = vweird.f32 %v12680_v24 }
 0x8bf   : > { %16459 = vst [vmem:[#allocation7_spill] sm:$0xff] %v13232_v16  ;;  %vm13237_vm14 = vcmp.eq.f32.partialorder %v16461_v12, 8.507059e+37  ;;  %v5894_v12 = vld [vmem:[%s15208_s7 + $0xe8] sm:$0xff]  ;;  %vm13297_vm6 = vmor %vm16484_vm12, %vm16483_vm9  ;;  %v4645_v17 = vsel %vm13133_vm10, %v12649_v30, %v13198_v25  ;;  %v16488_v37 = vand.u32 2147483647, %v16406_v48  ;;  %vm16491_vm10 = vweird.f32 %v12686_v34 }
 0x8c0   : > { %v16463_v1 = vsel %vm13237_vm14, 4294967295, %v16462_v1  ;;  %16465 = vst [vmem:[#allocation62_spill] sm:$0xff] %v13242_v31  ;;  %vm16474_vm14 = vweird.f32 %v12571_v47  ;;  %6152 = vmatpush.msra.mxu2 %v5894_v12  ;;  %v16480_v47 = vand.u32 2147483647, %v16400_v19  ;;  %v4660_v12 = vsel %vm13159_vm8, %v12655_v59, %v13201_v60  ;;  %v16487_v31 = vld [vmem:[#allocation79_spill] sm:$0xff] }
 0x8c1   : > { %16464 = vst [vmem:[#allocation87_spill] sm:$0xff] %v16463_v1  ;;  %vm13271_vm15 = vmor %vm16474_vm14, %vm16473_vm13  ;;  %v16479_v1 = vld [vmem:[#allocation78_spill] sm:$0xff]  ;;  %vm13319_vm4 = vcmp.eq.f32.partialorder %v16488_v37, 8.507059e+37  ;;  %vm16492_vm9 = vweird.f32 %v16398_v10  ;;  %v13334_v59 = vadd.f32 %v12715_v49, %v13101_v7  ;;  %v13338_v3 = vadd.f32 %v16404_v35, %v13104_v4  ;;  %v16555_v4 = vld [vmem:[#allocation67_spill] sm:$0xff] }
 0x8c2   : > { %16466 = vst [vmem:[#allocation88_spill] sm:$0xff] %v13251_v9  ;;  %vm13288_vm13 = vcmp.eq.f32.partialorder %v16480_v47, 8.507059e+37  ;;  %v5893_v47 = vld [vmem:[%s15208_s7 + $0xe0] sm:$0xff]  ;;  %vm13327_vm14 = vmor %vm16492_vm9, %vm16491_vm10  ;;  %v13342_v60 = vadd.f32 %v12728_v45, %v13138_v62  ;;  %v4675_v10 = vsel %vm13187_vm7, %v16384_v39, %v13224_v43  ;;  %vm16499_vm12 = vweird.f32 %v12692_v36  ;;  %v16623_v7 = vld [vmem:[#allocation109_spill] sm:$0xff] }
 0x8c3   : > { %16467 = vst [vmem:[#allocation93_spill] sm:$0xff] %v13254_v52  ;;  %vm16500_vm5 = vweird.f32 %v16400_v19  ;;  %v13366_v39 = vadd.f32 %v12734_v22, %v13141_v50  ;;  %v13370_v62 = vadd.f32 %v16421_v11, %v13144_v58  ;;  %v13374_v40 = vadd.f32 %v12749_v63, %v13164_v46  ;;  %v5892_v50 = vld [vmem:[%s15208_s7 + $0xd8] sm:$0xff]  ;;  %v13399_v46 = vld [vmem:[#allocation3 + $0x57] sm:$0xff]  ;;  %6153 = vmatpush.msra.mxu2 %v5893_v47 }
 0x8c4   : > { %16472 = vst [vmem:[#allocation10_spill] sm:$0xff] %v16471_v54  ;;  %v16477_v54 = vld [vmem:[#allocation42_spill] sm:$0xff]  ;;  %v4690_v19 = vsel %vm13216_vm3, %v12668_v53, %v13227_v57  ;;  %v16503_v5 = vand.u32 2147483647, %v16437_v51  ;;  %vm16507_vm9 = vweird.f32 %v16406_v48  ;;  %v5111_v25 = vld [vmem:[#allocation3 + $0x58] sm:$0xff]  ;;  %v4705_v42 = vsel %vm13271_vm15, %v12674_v29, %v13230_v0  ;;  %v16593_v29 = vld [vmem:[#allocation101_spill] sm:$0xff] }
 0x8c5   : > { %vm16478_vm2 = vnez %v16477_v54  ;;  %16510 = vst [vmem:[#allocation89_spill] sm:$0xff] %v13399_v46  ;;  %v16512_v57 = vld [vmem:[#allocation96_spill] sm:$0xff]  ;;  %v13432_v0 = vadd.f32 %v16431_v27, %v16524_v55  ;;  %v16528_v47 = vld [vmem:[#allocation86_spill] sm:$0xff]  ;;  %v16533_v37 = vmov 0  ;;  %v4735_v33 = vsel %vm13327_vm14, %v12686_v34, %v13248_v20  ;;  %6154 = vmatpush.msra.mxu2 %v5892_v50  ;;  %v16553_v20 = vld [vmem:[#allocation63_spill] sm:$0xff] }
 0x8c6   : > { %v5205_v52 = vsel %vm16478_vm2, %v13232_v16, 0.0  ;;  %vm13360_vm2 = vmor %vm16500_vm5, %vm16499_vm12  ;;  %vm13386_vm7 = vcmp.eq.f32.partialorder %v16503_v5, 8.507059e+37  ;;  %vm16506_vm12 = vweird.f32 %v16399_v44  ;;  %v4650_v48 = vsel %vm13118_vm11, %v16512_v57, %v4645_v17  ;;  %v16516_v5 = vld [vmem:[#allocation81_spill] sm:$0xff]  ;;  %v16530_v57 = vld [vmem:[#allocation82_spill] sm:$0xff] }
 0x8c7   : > { %v7781_v2 = vpack.i.bf16 %v5205_v52, %v5109_v38  ;;  %v16496_v38 = vand.u32 2147483647, %v16423_v15  ;;  %vm13395_vm8 = vmor %vm16507_vm9, %vm16506_vm12  ;;  %v16511_v52 = vld [vmem:[#allocation94_spill] sm:$0xff]  ;;  %v16517_v16 = vand.u32 2147483647, %v16448_v8  ;;  %vm16521_vm12 = vweird.f32 %v16423_v15 }
 0x8c8   : > { %v4635_v43 = vsel %vm13112_vm1, %v16511_v52, %v4630_v14  ;;  %vm16520_vm1 = vweird.f32 %v12704_v26  ;;  %v16525_v14 = vld [vmem:[#allocation27_spill] sm:$0xff]  ;;  %v4720_v17 = vsel %vm13297_vm6, %v12680_v24, %v13245_v28  ;;  %vm16529_vm15 = vnez %v16528_v47  ;;  %v5880_v52 = vld [vmem:[%s15208_s7 + $0x78] sm:$0xff] }
 0x8c9   : > { %vm13351_vm10 = vcmp.eq.f32.partialorder %v16496_v38, 8.507059e+37  ;;  %7782 = vrot.lane.b32.xlu2 %v7781_v2, %s8452_s25  ;;  %v16514_v2 = vld [vmem:[#allocation97_spill] sm:$0xff]  ;;  %vm13417_vm9 = vcmp.eq.f32.partialorder %v16517_v16, 8.507059e+37  ;;  %vm13426_vm11 = vmor %vm16521_vm12, %vm16520_vm1  ;;  %vm16535_vm5 = vweird.f32 %v12710_v13  ;;  %vm16536_vm6 = vweird.f32 %v16437_v51  ;;  %v16541_v47 = vld [vmem:[#allocation91_spill] sm:$0xff]  ;;  %6037 = vmatpush.msrb.mxu3 %v5880_v52 }
 0x8ca   : > { %v4665_v38 = vsel %vm13124_vm0, %v16514_v2, %v4660_v12  ;;  %vm16526_vm0 = vnez %v16525_v14  ;;  %v16527_v12 = vld [vmem:[#allocation99_spill] sm:$0xff]  ;;  %v16532_v2 = vand.u32 2147483647, %v16531_v18  ;;  %vm13458_vm3 = vmor %vm16536_vm6, %vm16535_vm5  ;;  %vm16548_vm14 = vweird.f32 %v12715_v49  ;;  %v16556_v50 = vld [vmem:[#allocation14_spill] sm:$0xff] }
 0x8cb   : > { %v5207_v16 = vsel %vm16526_vm0, %v13399_v46, 0.0  ;;  %v4680_v15 = vsel %vm16529_vm15, %v16527_v12, %v4675_v10  ;;  %v16539_v10 = vld [vmem:[#allocation88_spill] sm:$0xff]  ;;  %vm16542_vm15 = vnez %v16541_v47  ;;  %v16543_v51 = vld [vmem:[#allocation83_spill] sm:$0xff]  ;;  %v16544_v46 = vld [vmem:[#allocation77_spill] sm:$0xff]  ;;  %vm16549_vm1 = vweird.f32 %v16448_v8 }
 0x8cc   : > { %vm13450_vm12 = vcmp.eq.f32.partialorder %v16532_v2, 8.507059e+37  ;;  %v7791_v28 = vpack.i.bf16 %v5207_v16, %v5111_v25  ;;  %v4750_v55 = vsel %vm13360_vm2, %v12692_v36, %v16539_v10  ;;  %v16540_v12 = vld [vmem:[#allocation100_spill] sm:$0xff]  ;;  %v16545_v14 = vand.u32 2147483647, %v16544_v46  ;;  %vm13484_vm0 = vmor %vm16549_vm1, %vm16548_vm14  ;;  %v16552_v36 = vld [vmem:[#allocation102_spill] sm:$0xff] }
 0x8cd   : > { %v16534_v37 = vsel %vm13450_vm12, 4294967295, %v16533_v37  ;;  %v4695_v2 = vsel %vm16542_vm15, %v16540_v12, %v4690_v19  ;;  %v16546_v25 = vmov 0  ;;  %vm16554_vm2 = vnez %v16553_v20  ;;  %v16567_v52 = vld [vmem:[#allocation103_spill] sm:$0xff]  ;;  %v16581_v53 = vld [vmem:[#allocation90_spill] sm:$0xff] }
 0x8ce   : > { %vm13476_vm6 = vcmp.eq.f32.partialorder %v16545_v14, 8.507059e+37  ;;  %v4710_v30 = vsel %vm16554_vm2, %v16552_v36, %v4705_v42  ;;  %v4976_v19 = vmul.f32 %v4635_v43, %v16555_v4  ;;  %v4977_v16 = vmul.f32 %v4650_v48, %v16556_v50  ;;  %v16557_v14 = vld [vmem:[#allocation65_spill] sm:$0xff]  ;;  %v16565_v42 = vld [vmem:[#allocation11_spill] sm:$0xff]  ;;  %7792 = vrot.lane.b32.xlu1 %v7791_v28, %s8452_s25  ;;  %v16605_v9 = vld [vmem:[#allocation26_spill] sm:$0xff] }
 0x8cf   : > { %v16547_v25 = vsel %vm13476_vm6, 4294967295, %v16546_v25  ;;  %v4978_v10 = vmul.f32 %v4665_v38, %v16557_v14  ;;  %v16558_v12 = vand.u32 2147483647, %v16479_v1  ;;  %v16559_v47 = vmov 0  ;;  %v16566_v48 = vld [vmem:[#allocation93_spill] sm:$0xff]  ;;  %v16568_v36 = vld [vmem:[#allocation87_spill] sm:$0xff] }
 0x8d0   : > { %vm16561_vm1 = vweird.f32 %v16404_v35  ;;  %vm16562_vm14 = vweird.f32 %v16531_v18  ;;  %v13510_v43 = vadd.f32 %v16433_v21, %v16565_v42  ;;  %v4765_v38 = vsel %vm13395_vm8, %v16399_v44, %v16566_v48  ;;  %v16570_v18 = vld [vmem:[#allocation69_spill] sm:$0xff]  ;;  %v16583_v48 = vld [vmem:[#allocation10_spill] sm:$0xff] }
 0x8d1   : > { %vm13496_vm15 = vcmp.eq.f32.partialorder %v16558_v12, 8.507059e+37  ;;  %vm13504_vm5 = vmor %vm16562_vm14, %vm16561_vm1  ;;  %vm16569_vm2 = vnez %v16568_v36  ;;  %v4979_v4 = vmul.f32 %v4680_v15, %v16570_v18  ;;  %v16571_v50 = vand.u32 2147483647, %v16487_v31  ;;  %v16582_v42 = vld [vmem:[#allocation105_spill] sm:$0xff]  ;;  %v16585_v36 = vld [vmem:[#allocation71_spill] sm:$0xff] }
 0x8d2   : > { %v16560_v47 = vsel %vm13496_vm15, 4294967295, %v16559_v47  ;;  %v4725_v20 = vsel %vm16569_vm2, %v16567_v52, %v4720_v17  ;;  %v16572_v14 = vmov 0  ;;  %v16574_v12 = vand.u32 2147483647, %v16495_v32  ;;  %v16630_v58 = vld [vmem:[#allocation110_spill] sm:$0xff] }
 0x8d3   : > { %vm13523_vm1 = vcmp.eq.f32.partialorder %v16571_v50, 8.507059e+37  ;;  %v16575_v28 = vmov 0  ;;  %vm16577_vm8 = vweird.f32 %v12728_v45  ;;  %vm16578_vm15 = vweird.f32 %v16544_v46  ;;  %v5891_v46 = vld [vmem:[%s15208_s7 + $0xd0] sm:$0xff]  ;;  %v16587_v50 = vld [vmem:[#allocation84_spill] sm:$0xff] }
 0x8d4   : > { %v16573_v14 = vsel %vm13523_vm1, 4294967295, %v16572_v14  ;;  %vm13529_vm14 = vcmp.eq.f32.partialorder %v16574_v12, 8.507059e+37  ;;  %vm13537_vm6 = vmor %vm16578_vm15, %vm16577_vm8  ;;  %v13543_v17 = vadd.f32 %v16435_v6, %v16581_v53  ;;  %v4780_v15 = vsel %vm13426_vm11, %v12704_v26, %v13277_v56  ;;  %v16592_v56 = vld [vmem:[#allocation12_spill] sm:$0xff]  ;;  %v16595_v53 = vld [vmem:[#allocation73_spill] sm:$0xff]  ;;  %6155 = vmatpush.msra.mxu2 %v5891_v46 }
 0x8d5   : > { %v16576_v28 = vsel %vm13529_vm14, 4294967295, %v16575_v28  ;;  %vm16584_vm2 = vnez %v16583_v48  ;;  %v4980_v18 = vmul.f32 %v4695_v2, %v16585_v36  ;;  %vm16586_vm14 = vcmask 523264   ;;  %v5875_v36 = vld [vmem:[%s15208_s7 + $0x50] sm:$0xff] }
 0x8d6   : > { %v4740_v52 = vsel %vm16584_vm2, %v16582_v42, %v4735_v33  ;;  %5014 = vst.msk [vmem:[#allocation3 + $0x60] sm:$0xff] %vm16586_vm14, %v4976_v19  ;;  %vm4942_vm15 = vweird.f32 %v16587_v50  ;;  %vm16588_vm8 = vweird.f32 %v12734_v22  ;;  %vm16589_vm1 = vweird.f32 %v16479_v1  ;;  %v16594_v19 = vld [vmem:[#allocation106_spill] sm:$0xff]  ;;  %vm16596_vm11 = vmmov %vm16586_vm14  ;;  %v16597_v1 = vld [vmem:[#allocation85_spill] sm:$0xff] }
 0x8d7   : > { %vm13562_vm12 = vmor %vm16589_vm1, %vm16588_vm8  ;;  %v13568_v33 = vadd.f32 %v16593_v29, %v16592_v56  ;;  %v4795_v2 = vsel %vm13458_vm3, %v12710_v13, %v13280_v23  ;;  %v4755_v12 = vsel %vm13288_vm13, %v16594_v19, %v4750_v55  ;;  %v4981_v42 = vmul.f32 %v4710_v30, %v16595_v53  ;;  %5015 = vst.msk [vmem:[#allocation3 + $0x68] sm:$0xff] %vm16596_vm11, %v4977_v16  ;;  %v16606_v23 = vld [vmem:[#allocation104_spill] sm:$0xff]  ;;  %v16607_v30 = vld [vmem:[#allocation107_spill] sm:$0xff] }
 0x8d8   : > { %v16598_v48 = vand.u32 2147483647, %v16516_v5  ;;  %vm16601_vm2 = vweird.f32 %v16421_v11  ;;  %vm16602_vm3 = vweird.f32 %v16487_v31  ;;  %v13596_v24 = vadd.f32 %v16606_v23, %v16605_v9  ;;  %v16608_v56 = vld [vmem:[#allocation15_spill] sm:$0xff]  ;;  %vm16609_vm13 = vmmov %vm16596_vm11  ;;  %v16648_v9 = vld [vmem:[#allocation113_spill] sm:$0xff] }
 0x8d9   : > { %vm13590_vm8 = vmor %vm16602_vm3, %vm16601_vm2  ;;  %v4810_v55 = vsel %vm13484_vm0, %v12715_v49, %v13334_v59  ;;  %v4770_v16 = vsel %vm13319_vm4, %v16607_v30, %v4765_v38  ;;  %v4982_v19 = vmul.f32 %v4725_v20, %v16608_v56  ;;  %5016 = vst.msk [vmem:[#allocation3 + $0x70] sm:$0xff] %vm16609_vm13, %v4978_v10  ;;  %v16610_v31 = vand.u32 2147483647, %v16530_v57  ;;  %v16617_v59 = vld [vmem:[#allocation108_spill] sm:$0xff]  ;;  %v5876_v56 = vld [vmem:[%s15208_s7 + $0x58] sm:$0xff] }
 0x8da   : > { %vm13582_vm14 = vcmp.eq.f32.partialorder %v16598_v48, 8.507059e+37  ;;  %vm4943_vm2 = vweird.f32 %v16593_v29  ;;  %vm16613_vm3 = vweird.f32 %v12749_v63  ;;  %vm16614_vm0 = vweird.f32 %v16495_v32  ;;  %v16618_v10 = vld [vmem:[#allocation16_spill] sm:$0xff]  ;;  %vm16619_vm4 = vmmov %vm16609_vm13 }
 0x8db   : > { %vm13609_vm11 = vcmp.eq.f32.partialorder %v16610_v31, 8.507059e+37  ;;  %vm13618_vm1 = vmor %vm16614_vm0, %vm16613_vm3  ;;  %v4825_v41 = vsel %vm13504_vm5, %v16404_v35, %v13338_v3  ;;  %v4785_v34 = vsel %vm13351_vm10, %v16617_v59, %v4780_v15  ;;  %v4983_v38 = vmul.f32 %v4740_v52, %v16618_v10  ;;  %5017 = vst.msk [vmem:[#allocation3 + $0x78] sm:$0xff] %vm16619_vm4, %v4979_v4  ;;  %v16624_v4 = vld [vmem:[#allocation56_spill] sm:$0xff]  ;;  %v5879_v52 = vld [vmem:[%s15208_s7 + $0x70] sm:$0xff] }
 0x8dc   : > { %v16620_v32 = vand.u32 2147483647, %v16543_v51  ;;  %v4840_v35 = vsel %vm13537_vm6, %v12728_v45, %v13342_v60  ;;  %v4855_v3 = vsel %vm13562_vm12, %v12734_v22, %v13366_v39  ;;  %v4800_v8 = vsel %vm13386_vm7, %v16623_v7, %v4795_v2  ;;  %vm16625_vm10 = vmmov %vm16619_vm4  ;;  %v5878_v45 = vld [vmem:[%s15208_s7 + $0x68] sm:$0xff]  ;;  %6038 = vmatpush.msrb.mxu3 %v5879_v52  ;;  %v16639_v2 = vld [vmem:[#allocation58_spill] sm:$0xff] }
 0x8dd   : > { %v4984_v15 = vmul.f32 %v4755_v12, %v16624_v4  ;;  %5018 = vst.msk [vmem:[#allocation3 + $0x80] sm:$0xff] %vm16625_vm10, %v4980_v18  ;;  %v5890_v22 = vld [vmem:[%s15208_s7 + $0xc8] sm:$0xff]  ;;  %vm16626_vm12 = vweird.f32 %v16431_v27  ;;  %vm16627_vm7 = vweird.f32 %v16516_v5  ;;  %v4870_v39 = vsel %vm13590_vm8, %v16421_v11, %v13370_v62  ;;  %v16631_v18 = vld [vmem:[#allocation57_spill] sm:$0xff]  ;;  %vm16632_vm6 = vmmov %vm16619_vm4 }
 0x8de   : > { %vm13633_vm13 = vcmp.eq.f32.partialorder %v16620_v32, 8.507059e+37  ;;  %vm13663_vm5 = vmor %vm16627_vm7, %vm16626_vm12  ;;  %v4815_v44 = vsel %vm13417_vm9, %v16630_v58, %v4810_v55  ;;  %v4985_v46 = vmul.f32 %v4770_v16, %v16631_v18  ;;  %5019 = vst.msk [vmem:[#allocation3 + $0x88] sm:$0xff] %vm16632_vm6, %v4981_v42  ;;  %6156 = vmatpush.msra.mxu2 %v5890_v22  ;;  %vm16633_vm3 = vweird.f32 %v16433_v21  ;;  %v5877_v12 = vld [vmem:[%s15208_s7 + $0x60] sm:$0xff]  ;;  %v13718_v48 = vld [vmem:[#allocation3 + $0x5f] sm:$0xff]  ;;  %6039 = vmatpush.msrb.mxu3 %v5878_v45 }
 0x8df   : > { %vm16634_vm0 = vweird.f32 %v16530_v57  ;;  %v4885_v11 = vsel %vm13618_vm1, %v12749_v63, %v13374_v40  ;;  %v4900_v62 = vsel %vm13663_vm5, %v16431_v27, %v13432_v0  ;;  %vm16638_vm9 = vnez %v16534_v37  ;;  %vm16640_vm8 = vmmov %vm16632_vm6  ;;  %v16645_v40 = vld [vmem:[#allocation112_spill] sm:$0xff]  ;;  %5021 = vst.msk [vmem:[#allocation3 + $0x98] sm:$0xff] %vm16632_vm6, %v4983_v38  ;;  %v13728_v55 = vld [vmem:[#allocation3 + $0x67] sm:$0xff] }
 0x8e0   : > { %vm13680_vm4 = vmor %vm16634_vm0, %vm16633_vm3  ;;  %v4830_v26 = vsel %vm16638_vm9, %v16637_v61, %v4825_v41  ;;  %v4986_v57 = vmul.f32 %v4785_v34, %v16639_v2  ;;  %5020 = vst.msk [vmem:[#allocation3 + $0x90] sm:$0xff] %vm16640_vm8, %v4982_v19  ;;  %vm4958_vm10 = vweird.f32 %v16606_v23  ;;  %vm16641_vm1 = vweird.f32 %v16435_v6  ;;  %v16647_v37 = vld [vmem:[#allocation64_spill] sm:$0xff]  ;;  %v5113_v30 = vld [vmem:[#allocation3 + $0x68] sm:$0xff]  ;;  %6040 = vmatpush.msrb.mxu3 %v5877_v12 }
 0x8e1   : > { %vm16642_vm12 = vweird.f32 %v16543_v51  ;;  %v4915_v27 = vsel %vm13680_vm4, %v16433_v21, %v13510_v43  ;;  %vm16646_vm5 = vnez %v16547_v25  ;;  %v4987_v42 = vmul.f32 %v4800_v8, %v16647_v37  ;;  %v5112_v51 = vld [vmem:[#allocation3 + $0x60] sm:$0xff]  ;;  %v16650_v43 = vld [vmem:[#allocation59_spill] sm:$0xff]  ;;  %vm16651_vm0 = vmmov %vm16632_vm6 }
 0x8e2   : > { %vm13705_vm7 = vmor %vm16642_vm12, %vm16641_vm1  ;;  %v4845_v0 = vsel %vm16646_vm5, %v16645_v40, %v4840_v35  ;;  %vm16649_vm3 = vnez %v16560_v47  ;;  %v4988_v25 = vmul.f32 %v4815_v44, %v16650_v43  ;;  %5022 = vst.msk [vmem:[#allocation3 + $0xa0] sm:$0xff] %vm16651_vm0, %v4984_v15  ;;  %v7796_v16 = vpack.i.bf16 %v13718_v48, %v5112_v51  ;;  %v16652_v19 = vld [vmem:[#allocation114_spill] sm:$0xff]  ;;  %v16656_v31 = vld [vmem:[#allocation60_spill] sm:$0xff]  ;;  %6041 = vmatpush.msrb.mxu3 %v5876_v56 }
 0x8e3   : > { %v4930_v13 = vsel %vm13705_vm7, %v16435_v6, %v13543_v17  ;;  %v4860_v21 = vsel %vm16649_vm3, %v16648_v9, %v4855_v3  ;;  %vm16653_vm4 = vnez %v16573_v14  ;;  %v16654_v17 = vld [vmem:[#allocation115_spill] sm:$0xff]  ;;  %vm16655_vm9 = vnez %v16576_v28  ;;  %v16657_v41 = vld [vmem:[#allocation32_spill] sm:$0xff]  ;;  %vm16659_vm1 = vmmov %vm16651_vm0 }
 0x8e4   : > { %v4875_v6 = vsel %vm16653_vm4, %v16652_v19, %v4870_v39  ;;  %v4890_v47 = vsel %vm16655_vm9, %v16654_v17, %v4885_v11  ;;  %v4989_v49 = vmul.f32 %v4830_v26, %v16656_v31  ;;  %vm16658_vm8 = vnez %v16657_v41  ;;  %5023 = vst.msk [vmem:[#allocation3 + $0xa8] sm:$0xff] %vm16659_vm1, %v4985_v46  ;;  %v13746_v34 = vld [vmem:[#allocation3 + $0x6f] sm:$0xff]  ;;  %vm13758_vm7 = vmor %vm4942_vm15, %vm4943_vm2  ;;  %v13766_v8 = vld [vmem:[#allocation3 + $0x77] sm:$0xff] }
 0x8e5   : > { %v5209_v59 = vsel %vm16658_vm8, %v13728_v55, 0.0  ;;  %v5114_v10 = vld [vmem:[#allocation3 + $0x70] sm:$0xff]  ;;  %v16660_v38 = vand.u32 2147483647, %v16587_v50  ;;  %v16665_v32 = vld [vmem:[#allocation66_spill] sm:$0xff]  ;;  %vm16666_vm5 = vmmov %vm16651_vm0  ;;  %7797 = vrot.lane.b32.xlu2 %v7796_v16, %s8452_s25  ;;  %v16667_v4 = vand.u32 2147483648, %v16587_v50  ;;  %vm16668_vm15 = vweird.f32 %v16597_v1  ;;  %6042 = vmatpush.msrb.mxu3 %v5875_v36  ;;  %v5370_v36 = vpop.permute.xlu0 %5369 }
 0x8e6   : > { %v4990_v35 = vmul.f32 %v4845_v0, %v16665_v32  ;;  %v7801_v3 = vpack.i.bf16 %v5209_v59, %v5113_v30  ;;  %5024 = vst.msk [vmem:[#allocation3 + $0xb0] sm:$0xff] %vm16666_vm5, %v4986_v57  ;;  %v7806_v7 = vpack.i.bf16 %v13746_v34, %v5114_v10  ;;  %vm13774_vm2 = vmor %vm16668_vm15, %vm4958_vm10  ;;  %v4945_v45 = vsel %vm13758_vm7, %v16593_v29, %v13568_v33  ;;  %v16671_v22 = vld [vmem:[#allocation116_spill] sm:$0xff]  ;;  %v16674_v44 = vld [vmem:[#allocation117_spill] sm:$0xff] }
 0x8e7   : > { %vm13750_vm12 = vcmp.eq.f32.partialorder %v16660_v38, 8.507059e+37  ;;  %v4949_v15 = vor.u32 1.1754944e-38, %v16667_v4  ;;  %v4905_v60 = vsel %vm13582_vm14, %v16671_v22, %v4900_v62  ;;  %v16672_v39 = vld [vmem:[#allocation68_spill] sm:$0xff]  ;;  %vm16673_vm6 = vmmov %vm16651_vm0  ;;  %v4960_v58 = vsel %vm13774_vm2, %v16606_v23, %v13596_v24  ;;  %v16675_v46 = vld [vmem:[#allocation70_spill] sm:$0xff] }
 0x8e8   : > { %v4991_v50 = vmul.f32 %v4860_v21, %v16672_v39  ;;  %5025 = vst.msk [vmem:[#allocation3 + $0xb8] sm:$0xff] %vm16673_vm6, %v4987_v42  ;;  %v4920_v18 = vsel %vm13609_vm11, %v16674_v44, %v4915_v27  ;;  %v4992_v29 = vmul.f32 %v4875_v6, %v16675_v46  ;;  %7802 = vrot.lane.b32.xlu0 %v7801_v3, %s8452_s25  ;;  %vm16676_vm10 = vmmov %vm16651_vm0  ;;  %v13798_v33 = vld [vmem:[#allocation3 + $0x87] sm:$0xff]  ;;  %v16677_v23 = vand.u32 2147483648, %v16597_v1  ;;  %v16679_v11 = vld [vmem:[#allocation72_spill] sm:$0xff] }
 0x8e9   : > { %5026 = vst.msk [vmem:[#allocation3 + $0xc0] sm:$0xff] %vm16676_vm10, %v4988_v25  ;;  %7807 = vrot.lane.b32.xlu1 %v7806_v7, %s8452_s25  ;;  %v16678_v5 = vld [vmem:[#allocation118_spill] sm:$0xff]  ;;  %v4993_v62 = vmul.f32 %v4890_v47, %v16679_v11  ;;  %vm16680_vm14 = vmmov %vm16651_vm0  ;;  %v5115_v61 = vld [vmem:[#allocation3 + $0x78] sm:$0xff]  ;;  %v16683_v12 = vand.u32 2147483647, %v16597_v1  ;;  %v4950_v20 = vsel %vm13750_vm12, %v4949_v15, %v4945_v45 }
 0x8ea   : > { %v4964_v24 = vor.u32 1.1754944e-38, %v16677_v23  ;;  %v4935_v53 = vsel %vm13633_vm13, %v16678_v5, %v4930_v13  ;;  %5027 = vst.msk [vmem:[#allocation3 + $0xc8] sm:$0xff] %vm16680_vm14, %v4989_v49  ;;  %v16681_v26 = vld [vmem:[#allocation50_spill] sm:$0xff]  ;;  %v5889_v57 = vld [vmem:[%s15208_s7 + $0xc0] sm:$0xff]  ;;  %v16684_v63 = vld [vmem:[#allocation8_spill] sm:$0xff] }
 0x8eb   : > { %vm16682_vm11 = vnez %v16681_v26  ;;  %vm4962_vm3 = vcmp.eq.f32.partialorder %v16683_v12, 8.507059e+37  ;;  %v4994_v27 = vmul.f32 %v4905_v60, %v16684_v63  ;;  %vm16685_vm13 = vmmov %vm16651_vm0  ;;  %v13822_v40 = vld [vmem:[#allocation3 + $0x7f] sm:$0xff]  ;;  %6157 = vmatpush.msra.mxu2 %v5889_v57  ;;  %v16686_v42 = vld [vmem:[#allocation22_spill] sm:$0xff]  ;;  %5029 = vst.msk [vmem:[#allocation3 + $0xd8] sm:$0xff] %vm16651_vm0, %v4991_v50 }
 0x8ec   : > { %v5211_v2 = vsel %vm16682_vm11, %v13766_v8, 0.0  ;;  %5028 = vst.msk [vmem:[#allocation3 + $0xd0] sm:$0xff] %vm16685_vm13, %v4990_v35  ;;  %v5874_v0 = vld [vmem:[%s15208_s7 + $0x48] sm:$0xff]  ;;  %v4965_v37 = vsel %vm4962_vm3, %v4964_v24, %v4960_v58  ;;  %v4995_v51 = vmul.f32 %v4920_v18, %v16686_v42  ;;  %v5116_v1 = vld [vmem:[#allocation3 + $0x80] sm:$0xff]  ;;  %v5117_v13 = vld [vmem:[#allocation3 + $0x88] sm:$0xff] }
 0x8ed   : > { %v16687_v9 = vld [vmem:[#allocation52_spill] sm:$0xff]  ;;  %6043 = vmatpush.msrb.mxu3 %v5874_v0  ;;  %v5873_v43 = vld [vmem:[%s15208_s7 + $0x40] sm:$0xff]  ;;  %v16689_v25 = vld [vmem:[#allocation61_spill] sm:$0xff]  ;;  %v7811_v16 = vpack.i.bf16 %v5211_v2, %v5115_v61  ;;  %v7816_v49 = vpack.i.bf16 %v13822_v40, %v5116_v1 }
 0x8ee   : > { %vm16688_vm4 = vnez %v16687_v9  ;;  %v4996_v30 = vmul.f32 %v4935_v53, %v16689_v25  ;;  %vm16690_vm9 = vmmov %vm16651_vm0  ;;  %v5872_v56 = vld [vmem:[%s15208_s7 + $0x38] sm:$0xff]  ;;  %v16691_v19 = vld [vmem:[#allocation20_spill] sm:$0xff] }
 0x8ef   : > { %v5213_v21 = vsel %vm16688_vm4, %v13798_v33, 0.0  ;;  %5030 = vst.msk [vmem:[#allocation3 + $0xe0] sm:$0xff] %vm16690_vm9, %v4992_v29  ;;  %v4997_v6 = vmul.f32 %v4950_v20, %v16691_v19  ;;  %vm16692_vm1 = vmmov %vm16651_vm0  ;;  %6044 = vmatpush.msrb.mxu3 %v5873_v43  ;;  %v5888_v17 = vld [vmem:[%s15208_s7 + $0xb8] sm:$0xff]  ;;  %7812 = vrot.lane.b32.xlu2 %v7811_v16, %s8452_s25  ;;  %v13853_v10 = vld [vmem:[#allocation3 + $0x97] sm:$0xff] }
 0x8f0   : > { %5031 = vst.msk [vmem:[#allocation3 + $0xe8] sm:$0xff] %vm16692_vm1, %v4993_v62  ;;  %v16693_v47 = vld [vmem:[#allocation34_spill] sm:$0xff]  ;;  %vm16694_vm12 = vmmov %vm16651_vm0  ;;  %v7821_v59 = vpack.i.bf16 %v5213_v21, %v5117_v13  ;;  %6158 = vmatpush.msra.mxu2 %v5888_v17  ;;  %7817 = vrot.lane.b32.xlu0 %v7816_v49, %s8452_s25  ;;  %v5871_v38 = vld [vmem:[%s15208_s7 + $0x30] sm:$0xff]  ;;  %v5372_v13 = vpop.permute.xlu1 %5371 }
 0x8f1   : > { %v4998_v31 = vmul.f32 %v4965_v37, %v16693_v47  ;;  %5032 = vst.msk [vmem:[#allocation3 + $0xf0] sm:$0xff] %vm16694_vm12, %v4994_v27  ;;  %vm16695_vm7 = vmmov %vm16651_vm0  ;;  %6045 = vmatpush.msrb.mxu3 %v5872_v56  ;;  %v13859_v14 = vld [vmem:[#allocation3 + $0x8f] sm:$0xff]  ;;  %v5870_v32 = vld [vmem:[%s15208_s7 + $0x28] sm:$0xff] }
 0x8f2   : > { %5033 = vst.msk [vmem:[#allocation3 + $0xf8] sm:$0xff] %vm16695_vm7, %v4995_v51  ;;  %vm16696_vm5 = vmmov %vm16651_vm0  ;;  %7822 = vrot.lane.b32.xlu1 %v7821_v59, %s8452_s25  ;;  %v5118_v28 = vld [vmem:[#allocation3 + $0x90] sm:$0xff]  ;;  %v5119_v35 = vld [vmem:[#allocation3 + $0x98] sm:$0xff] }
 0x8f3   : > { %5034 = vst.msk [vmem:[#allocation3 + $0x100] sm:$0xff] %vm16696_vm5, %v4996_v30  ;;  %vm16697_vm15 = vmmov %vm16651_vm0  ;;  %6046 = vmatpush.msrb.mxu3 %v5871_v38  ;;  %v5869_v3 = vld [vmem:[%s15208_s7 + $0x20] sm:$0xff]  ;;  %v16699_v7 = vld [vmem:[#allocation24_spill] sm:$0xff]  ;;  %v7826_v22 = vpack.i.bf16 %v13859_v14, %v5118_v28 }
 0x8f4   : > { %5035 = vst.msk [vmem:[#allocation3 + $0x108] sm:$0xff] %vm16697_vm15, %v4997_v6  ;;  %vm16698_vm2 = vmmov %vm16651_vm0  ;;  %vm16700_vm6 = vnez %v16699_v7  ;;  %v13871_v15 = vld [vmem:[#allocation3 + $0x9f] sm:$0xff]  ;;  %v5868_v60 = vld [vmem:[%s15208_s7 + $0x18] sm:$0xff] }
 0x8f5   : > { %5036 = vst.msk [vmem:[#allocation3 + $0x110] sm:$0xff] %vm16698_vm2, %v4998_v31  ;;  %v5215_v4 = vsel %vm16700_vm6, %v13853_v10, 0.0  ;;  %v5120_v52 = vld [vmem:[#allocation3 + $0xa0] sm:$0xff]  ;;  %6047 = vmatpush.msrb.mxu3 %v5870_v32  ;;  %v13884_v44 = vld [vmem:[#allocation3 + $0xb7] sm:$0xff]  ;;  %v5121_v23 = vld [vmem:[#allocation3 + $0xa8] sm:$0xff] }
 0x8f6   : > { %v5887_v45 = vld [vmem:[%s15208_s7 + $0xb0] sm:$0xff]  ;;  %v7831_v39 = vpack.i.bf16 %v5215_v4, %v5119_v35  ;;  %v7836_v50 = vpack.i.bf16 %v13871_v15, %v5120_v52  ;;  %v5866_v46 = vld [vmem:[%s15208_s7 + $0x8] sm:$0xff]  ;;  %v16702_v24 = vld [vmem:[#allocation30_spill] sm:$0xff]  ;;  %v7753_v52 = vpop.permute.xlu2 %7752 }
 0x8f7   : > { %6159 = vmatpush.msra.mxu2 %v5887_v45  ;;  %6048 = vmatpush.msrb.mxu3 %v5869_v3  ;;  %v13882_v58 = vld [vmem:[#allocation3 + $0xa7] sm:$0xff]  ;;  %vm16703_vm10 = vnez %v16702_v24  ;;  %v5886_v53 = vld [vmem:[%s15208_s7 + $0xa8] sm:$0xff]  ;;  %v5865_v61 = vld [vmem:[%s15208_s7] sm:$0xff] }
 0x8f8   : > { %7827 = vrot.lane.b32.xlu2 %v7826_v22, %s8452_s25  ;;  %16701 = vst [vmem:[#allocation54_spill] sm:$0xff] %v13882_v58  ;;  %7832 = vrot.lane.b32.xlu0 %v7831_v39, %s8452_s25  ;;  %v5867_v18 = vld [vmem:[%s15208_s7 + $0x10] sm:$0xff]  ;;  %v5217_v5 = vsel %vm16703_vm10, %v13882_v58, 0.0  ;;  %v16704_v11 = vld [vmem:[#allocation44_spill] sm:$0xff]  ;;  %v5058_v2 = vld [vmem:[#allocation3 + $0xaf] sm:$0xff]  ;;  %v7754_v39 = vunpack.i.l.bf16 %v7753_v52 }
 0x8f9   : > { %6049 = vmatpush.msrb.mxu3 %v5868_v60  ;;  %v5037_v29 = vld [vmem:[#allocation3 + $0x7] sm:$0xff]  ;;  %vm16705_vm14 = vnez %v16704_v11  ;;  %6160 = vmatpush.msra.mxu2 %v5886_v53  ;;  %v5122_v57 = vld [vmem:[#allocation3 + $0xb0] sm:$0xff]  ;;  %v5123_v12 = vld [vmem:[#allocation3 + $0xb8] sm:$0xff]  ;;  %v7841_v0 = vpack.i.bf16 %v5217_v5, %v5121_v23  ;;  %v7755_v60 = vunpack.i.h.bf16 %v7753_v52 }
 0x8fa   : > { %7837 = vrot.lane.b32.xlu1 %v7836_v50, %s8452_s25  ;;  %v5069_v62 = vsel %vm16705_vm14, %v5037_v29, 0.0  ;;  %v16706_v20 = vld [vmem:[#allocation55_spill] sm:$0xff]  ;;  %vm16708_vm13 = vmmov %vm16651_vm0  ;;  %v7846_v37 = vpack.i.bf16 %v5058_v2, %v5122_v57  ;;  %v13910_v51 = vld [vmem:[#allocation3 + $0xc7] sm:$0xff] }
 0x8fb   : > { %6050 = vmatpush.msrb.mxu3 %v5867_v18  ;;  %vm16707_vm3 = vnez %v16706_v20  ;;  %v5737_v27 = vsel %vm16708_vm13, %v5069_v62, %v5370_v36  ;;  %v5885_v1 = vld [vmem:[%s15208_s7 + $0xa0] sm:$0xff]  ;;  %v5884_v43 = vld [vmem:[%s15208_s7 + $0x98] sm:$0xff]  ;;  %v5060_v25 = vld [vmem:[#allocation3 + $0xbf] sm:$0xff] }
 0x8fc   : > { %v5219_v63 = vsel %vm16707_vm3, %v13884_v44, 0.0  ;;  %v5038_v21 = vld [vmem:[#allocation3 + $0xf] sm:$0xff]  ;;  %v5124_v30 = vld [vmem:[#allocation3 + $0xc0] sm:$0xff]  ;;  %6161 = vmatpush.msra.mxu2 %v5885_v1  ;;  %vm16711_vm9 = vmmov %vm16692_vm1 }
 0x8fd   : > { %6051 = vmatpush.msrb.mxu3 %v5866_v46  ;;  %v7851_v42 = vpack.i.bf16 %v5219_v63, %v5123_v12  ;;  %v5928_v16 = vld [vmem:[%s15208_s7 + $0x1f8] sm:$0xff]  ;;  %v5126_v47 = vld [vmem:[#allocation3 + $0xd0] sm:$0xff]  ;;  %v5738_v31 = vsel %vm16711_vm9, %v5038_v21, %v5372_v13  ;;  %v7856_v49 = vpack.i.bf16 %v5060_v25, %v5124_v30  ;;  %v5127_v32 = vld [vmem:[#allocation3 + $0xd8] sm:$0xff] }
 0x8fe   : > { %6376 = vmatpush.msrb.mxu1 %v5928_v16  ;;  %v5125_v56 = vld [vmem:[#allocation3 + $0xc8] sm:$0xff]  ;;  %6162 = vmatpush.msra.mxu2 %v5884_v43  ;;  %v13928_v28 = vld [vmem:[#allocation3 + $0xd7] sm:$0xff]  ;;  %v5883_v3 = vld [vmem:[%s15208_s7 + $0x90] sm:$0xff]  ;;  %v7768_v11 = vpop.permute.xlu2 %7767 }
 0x8ff   : > { %6052 = vmatpush.msrb.mxu3 %v5865_v61  ;;  %v16709_v19 = vld [vmem:[#allocation38_spill] sm:$0xff]  ;;  %v5927_v4 = vld [vmem:[%s15208_s7 + $0x1f0] sm:$0xff]  ;;  %v16712_v45 = vld [vmem:[#allocation19_spill] sm:$0xff] }
 0x900   : > { %7842 = vrot.lane.b32.xlu2 %v7841_v0, %s8452_s25  ;;  %6053 = vmatmul.f32.vlgmr.msrb.gmra.mxu3 %v5737_v27  ;;  %vm16710_vm0 = vnez %v16709_v19  ;;  %v5062_v17 = vld [vmem:[#allocation3 + $0xcf] sm:$0xff]  ;;  %v13932_v35 = vld [vmem:[#allocation3 + $0xe7] sm:$0xff]  ;;  %vm16713_vm1 = vnez %v16712_v45  ;;  %v5882_v50 = vld [vmem:[%s15208_s7 + $0x88] sm:$0xff] }
 0x901   : > { %7847 = vrot.lane.b32.xlu0 %v7846_v37, %s8452_s25  ;;  %7239 = vmatpush.msra.mxu3 %v5928_v16  ;;  %v5221_v6 = vsel %vm16710_vm0, %v13910_v51, 0.0  ;;  %v7866_v38 = vpack.i.bf16 %v5062_v17, %v5126_v47  ;;  %v5223_v22 = vsel %vm16713_vm1, %v13928_v28, 0.0  ;;  %v5926_v18 = vld [vmem:[%s15208_s7 + $0x1e8] sm:$0xff]  ;;  %v5133_v46 = vld [vmem:[#allocation3 + $0x9] sm:$0xff]  ;;  %v5128_v61 = vld [vmem:[#allocation3 + $0xe0] sm:$0xff] }
 0x902   : > { %7852 = vrot.lane.b32.xlu1 %v7851_v42, %s8452_s25  ;;  %v7861_v59 = vpack.i.bf16 %v5221_v6, %v5125_v56  ;;  %6163 = vmatpush.msra.mxu2 %v5883_v3  ;;  %v5881_v29 = vld [vmem:[%s15208_s7 + $0x80] sm:$0xff]  ;;  %v16714_v5 = vld [vmem:[#allocation40_spill] sm:$0xff]  ;;  %v5129_v2 = vld [vmem:[#allocation3 + $0xe8] sm:$0xff]  ;;  %v7871_v27 = vpack.i.bf16 %v5223_v22, %v5127_v32 }
 0x903   : > { %6377 = vmatpush.msrb.mxu1 %v5927_v4  ;;  %v5925_v36 = vld [vmem:[%s15208_s7 + $0x1e0] sm:$0xff]  ;;  %vm16715_vm12 = vnez %v16714_v5  ;;  %7240 = vmatpush.msra.mxu3 %v5927_v4  ;;  %v5064_v62 = vld [vmem:[#allocation3 + $0xdf] sm:$0xff]  ;;  %vm16718_vm5 = vmmov %vm16698_vm2 }
 0x904   : > { %v8278_v23 = vld [vmem:[#allocation3 + $0x17] sm:$0xff]  ;;  %6164 = vmatpush.msra.mxu2 %v5882_v50  ;;  %vm16719_vm15 = vmmov %vm16698_vm2  ;;  %v5924_v37 = vld [vmem:[%s15208_s7 + $0x1d8] sm:$0xff]  ;;  %v7876_v42 = vpack.i.bf16 %v5064_v62, %v5128_v61 }
 0x905   : > { %v5071_v53 = vsel %vm16715_vm12, %v8278_v23, 0.0  ;;  %v16716_v57 = vld [vmem:[#allocation35_spill] sm:$0xff]  ;;  %6378 = vmatpush.msrb.mxu1 %v5926_v18  ;;  %v5769_v0 = vsel %vm16719_vm15, %v5133_v46, %v7755_v60  ;;  %7241 = vmatpush.msra.mxu3 %v5926_v18  ;;  %v5923_v21 = vld [vmem:[%s15208_s7 + $0x1d0] sm:$0xff]  ;;  %v5922_v43 = vld [vmem:[%s15208_s7 + $0x1c8] sm:$0xff] }
 0x906   : > { %vm16717_vm7 = vnez %v16716_v57  ;;  %v5739_v63 = vsel %vm16718_vm5, %v5071_v53, %v7754_v39  ;;  %6165 = vmatpush.msra.mxu2 %v5881_v29  ;;  %v13968_v13 = vld [vmem:[#allocation3 + $0xf7] sm:$0xff]  ;;  %v5066_v25 = vld [vmem:[#allocation3 + $0xef] sm:$0xff]  ;;  %v16720_v6 = vld [vmem:[#allocation33_spill] sm:$0xff] }
 0x907   : > { %v5225_v12 = vsel %vm16717_vm7, %v13932_v35, 0.0  ;;  %6379 = vmatpush.msrb.mxu1 %v5925_v36  ;;  %6166 = vmatmul.f32.vlgmr.msra.gmra.mxu2 %v5769_v0  ;;  %v5130_v30 = vld [vmem:[#allocation3 + $0xf0] sm:$0xff]  ;;  %v5131_v56 = vld [vmem:[#allocation3 + $0xf8] sm:$0xff]  ;;  %vm16721_vm2 = vnez %v16720_v6  ;;  %v5197_v3 = vld [vmem:[#allocation3 + $0x107] sm:$0xff] }
 0x908   : > { %7857 = vrot.lane.b32.xlu2 %v7856_v49, %s8452_s25  ;;  %6056 = vmatmul.f32.gmra.mxu3 %v5738_v31  ;;  %v7881_v1 = vpack.i.bf16 %v5225_v12, %v5129_v2  ;;  %v5921_v16 = vld [vmem:[%s15208_s7 + $0x1c0] sm:$0xff]  ;;  %v5227_v17 = vsel %vm16721_vm2, %v13968_v13, 0.0  ;;  %v5068_v47 = vld [vmem:[#allocation3 + $0xff] sm:$0xff]  ;;  %v7886_v49 = vpack.i.bf16 %v5066_v25, %v5130_v30  ;;  %v6605_v50 = vld [vmem:[%s15210_s9 + $0x18] sm:$0xff]  ;;  %v7758_v12 = vpop.permute.xlu0 %7757 }
 0x909   : > { %7862 = vrot.lane.b32.xlu0 %v7861_v59, %s8452_s25  ;;  %6380 = vmatpush.msrb.mxu1 %v5924_v37  ;;  %v5132_v31 = vld [vmem:[#allocation3 + $0x100] sm:$0xff]  ;;  %v5920_v59 = vld [vmem:[%s15208_s7 + $0x1b8] sm:$0xff]  ;;  %v5918_v52 = vld [vmem:[%s15208_s7 + $0x1a8] sm:$0xff]  ;;  %v7759_v0 = vunpack.i.l.bf16 %v7758_v12 }
 0x90a   : > { %7867 = vrot.lane.b32.xlu1 %v7866_v38, %s8452_s25  ;;  %7242 = vmatpush.msra.mxu3 %v5925_v36  ;;  %v7891_v38 = vpack.i.bf16 %v5227_v17, %v5131_v56  ;;  %v7896_v32 = vpack.i.bf16 %v5068_v47, %v5132_v31  ;;  %v5919_v4 = vld [vmem:[%s15208_s7 + $0x1b0] sm:$0xff]  ;;  %v16722_v22 = vld [vmem:[#allocation47_spill] sm:$0xff]  ;;  %v5301_v39 = vld [vmem:[#allocation3 + $0x118] sm:$0xff] }
 0x90b   : > { %6381 = vmatpush.msrb.mxu1 %v5923_v21  ;;  %vm16723_vm13 = vnez %v16722_v22  ;;  %v5917_v18 = vld [vmem:[%s15208_s7 + $0x1a0] sm:$0xff]  ;;  %6714 = vmatpush.msrb.mxu2 %v6605_v50  ;;  %v5302_v29 = vld [vmem:[#allocation3 + $0x120] sm:$0xff]  ;;  %v5916_v23 = vld [vmem:[%s15208_s7 + $0x198] sm:$0xff] }
 0x90c   : > { %7243 = vmatpush.msra.mxu3 %v5924_v37  ;;  %v5229_v60 = vsel %vm16723_vm13, %v5197_v3, 0.0  ;;  %v5198_v46 = vld [vmem:[#allocation3 + $0x10f] sm:$0xff]  ;;  %v5135_v62 = vld [vmem:[#allocation3 + $0x19] sm:$0xff]  ;;  %v8279_v30 = vld [vmem:[#allocation3 + $0x27] sm:$0xff] }
 0x90d   : > { %6382 = vmatpush.msrb.mxu1 %v5922_v43  ;;  %v7901_v36 = vpack.i.bf16 %v5229_v60, %v5301_v39  ;;  %v7906_v53 = vpack.i.bf16 %v5198_v46, %v5302_v29  ;;  %v5134_v61 = vld [vmem:[#allocation3 + $0x11] sm:$0xff]  ;;  %v5915_v2 = vld [vmem:[%s15208_s7 + $0x190] sm:$0xff]  ;;  %vm16726_vm15 = vmmov %vm16718_vm5 }
 0x90e   : > { %7244 = vmatpush.msra.mxu3 %v5923_v21  ;;  %v16724_v21 = vld [vmem:[#allocation43_spill] sm:$0xff]  ;;  %v8280_v56 = vld [vmem:[#allocation3 + $0x1f] sm:$0xff]  ;;  %vm16727_vm13 = vmmov %vm16718_vm5 }
 0x90f   : > { %6383 = vmatpush.msrb.mxu1 %v5921_v16  ;;  %vm16725_vm9 = vnez %v16724_v21  ;;  %v5913_v25 = vld [vmem:[%s15208_s7 + $0x180] sm:$0xff]  ;;  %v5740_v17 = vsel %vm16718_vm5, %v8280_v56, %v7759_v0  ;;  %v16730_v60 = vld [vmem:[#allocation21_spill] sm:$0xff] }
 0x910   : > { %7872 = vrot.lane.b32.xlu2 %v7871_v27, %s8452_s25  ;;  %6059 = vmatmul.f32.gmra.mxu3 %v5739_v63  ;;  %v7763_v63 = vpop.permute.xlu1 %7762  ;;  %v7760_v27 = vunpack.i.h.bf16 %v7758_v12  ;;  %v14038_v46 = vld [vmem:[#allocation3 + $0x41] sm:$0xff]  ;;  %v14040_v29 = vld [vmem:[#allocation3 + $0x39] sm:$0xff]  ;;  %v14048_v12 = vld [vmem:[#allocation3 + $0x49] sm:$0xff] }
 0x911   : > { %7877 = vrot.lane.b32.xlu0 %v7876_v42, %s8452_s25  ;;  %6384 = vmatpush.msrb.mxu1 %v5920_v59  ;;  %v7764_v37 = vunpack.i.l.bf16 %v7763_v63  ;;  %v5914_v42 = vld [vmem:[%s15208_s7 + $0x188] sm:$0xff]  ;;  %v5909_v21 = vld [vmem:[%s15208_s7 + $0x160] sm:$0xff] }
 0x912   : > { %7882 = vrot.lane.b32.xlu1 %v7881_v1, %s8452_s25  ;;  %7245 = vmatpush.msra.mxu3 %v5922_v43  ;;  %v5136_v1 = vld [vmem:[#allocation3 + $0x21] sm:$0xff]  ;;  %v5166_v43 = vsel %vm16725_vm9, %v5134_v61, 0.0  ;;  %v16734_v61 = vld [vmem:[#allocation36_spill] sm:$0xff]  ;;  %v14254_v58 = vld [vmem:[#allocation3 + $0xe9] sm:$0xff] }
 0x913   : > { %6385 = vmatpush.msrb.mxu1 %v5919_v4  ;;  %v5770_v47 = vsel %vm16726_vm15, %v5166_v43, %v7760_v27  ;;  %vm16732_vm15 = vmmov %vm16718_vm5  ;;  %vm16735_vm2 = vnez %v16734_v61  ;;  %v14053_v27 = vld [vmem:[#allocation3 + $0x51] sm:$0xff]  ;;  %v5911_v61 = vld [vmem:[%s15208_s7 + $0x170] sm:$0xff]  ;;  %16781 = vst [vmem:[#allocation79_spill] sm:$0xff] %v14254_v58 }
 0x914   : > { %7246 = vmatpush.msra.mxu3 %v5921_v16  ;;  %v5269_v16 = vsel %vm16705_vm14, %v8279_v30, 0.0  ;;  %6169 = vmatmul.f32.gmra.mxu2 %v5770_v47  ;;  %v8282_v43 = vld [vmem:[#allocation3 + $0x37] sm:$0xff] }
 0x915   : > { %6386 = vmatpush.msrb.mxu1 %v5918_v52  ;;  %v5833_v31 = vsel %vm16727_vm13, %v5269_v16, %v7764_v37  ;;  %vm16731_vm13 = vnez %v16730_v60  ;;  %v16740_v47 = vld [vmem:[#allocation28_spill] sm:$0xff]  ;;  %v8287_v7 = vld [vmem:[#allocation3 + $0x30] sm:$0xff] }
 0x916   : > { %7247 = vmatpush.msra.mxu3 %v5920_v59  ;;  %v5236_v59 = vsel %vm16725_vm9, %v5136_v1, 0.0  ;;  %v5073_v39 = vsel %vm16731_vm13, %v8279_v30, 0.0  ;;  %vm16733_vm9 = vmmov %vm16718_vm5  ;;  %v16737_v30 = vld [vmem:[#allocation25_spill] sm:$0xff] }
 0x917   : > { %6387 = vmatpush.msrb.mxu1 %v5917_v18  ;;  %v5741_v50 = vsel %vm16718_vm5, %v5073_v39, %v7764_v37  ;;  %v14079_v39 = vld [vmem:[#allocation3 + $0x71] sm:$0xff] }
 0x918   : > { %7887 = vrot.lane.b32.xlu2 %v7886_v49, %s8452_s25  ;;  %7248 = vmatpush.msra.mxu3 %v5919_v4  ;;  %v14024_v49 = vld [vmem:[#allocation3 + $0x31] sm:$0xff]  ;;  %v7765_v4 = vunpack.i.h.bf16 %v7763_v63 }
 0x919   : > { %7892 = vrot.lane.b32.xlu0 %v7891_v38, %s8452_s25  ;;  %6388 = vmatpush.msrb.mxu1 %v5916_v23  ;;  %v5137_v38 = vld [vmem:[#allocation3 + $0x29] sm:$0xff] }
 0x91a   : > { %7897 = vrot.lane.b32.xlu1 %v7896_v32, %s8452_s25  ;;  %7249 = vmatpush.msra.mxu3 %v5918_v52  ;;  %v16728_v32 = vld [vmem:[#allocation41_spill] sm:$0xff]  ;;  %v7769_v52 = vunpack.i.l.bf16 %v7768_v11 }
 0x91b   : > { %6389 = vmatpush.msrb.mxu1 %v5915_v2  ;;  %6062 = vmatmul.f32.gmra.mxu3 %v5740_v17  ;;  %vm16729_vm14 = vnez %v16728_v32  ;;  %v7778_v17 = vpop.permute.xlu1 %7777 }
 0x91c   : > { %7250 = vmatpush.msra.mxu3 %v5917_v18  ;;  %v5238_v3 = vsel %vm16729_vm14, %v14024_v49, 0.0  ;;  %v5771_v18 = vsel %vm16732_vm15, %v5135_v62, %v7765_v4  ;;  %v5168_v0 = vsel %vm16729_vm14, %v5136_v1, 0.0  ;;  %v14067_v1 = vld [vmem:[#allocation3 + $0x59] sm:$0xff]  ;;  %v7779_v5 = vunpack.i.l.bf16 %v7778_v17 }
 0x91d   : > { %6390 = vmatpush.msrb.mxu1 %v5914_v42  ;;  %6172 = vmatmul.f32.gmra.mxu2 %v5771_v18  ;;  %v8283_v18 = vld [vmem:[#allocation3 + $0x3f] sm:$0xff] }
 0x91e   : > { %7251 = vmatpush.msra.mxu3 %v5916_v23 }
 0x91f   : > { %6391 = vmatpush.msrb.mxu1 %v5913_v25 }
 0x920   : > { %7902 = vrot.lane.b32.xlu2 %v7901_v36, %s8452_s25  ;;  %7252 = vmatpush.msra.mxu3 %v5915_v2  ;;  %v8281_v36 = vld [vmem:[#allocation3 + $0x2f] sm:$0xff]  ;;  %v5240_v2 = vsel %vm16735_vm2, %v14038_v46, 0.0 }
 0x921   : > { %7907 = vrot.lane.b32.xlu0 %v7906_v53, %s8452_s25  ;;  %6392 = vmatmul.f32.vlgmr.msrb.gmra.mxu1 %v5833_v31  ;;  %v5742_v23 = vsel %vm16733_vm9, %v8281_v36, %v7769_v52  ;;  %v7773_v53 = vpop.permute.xlu0 %7772  ;;  %vm16736_vm9 = vmmov %vm16718_vm5  ;;  %vm16738_vm5 = vnez %v16737_v30 }
 0x922   : > { %5625 = vrot.lane.b32.xlu1 %v5135_v62, %s8452_s25  ;;  %7253 = vmatpush.msra.mxu3 %v5914_v42  ;;  %v7770_v62 = vunpack.i.h.bf16 %v7768_v11  ;;  %v7774_v63 = vunpack.i.l.bf16 %v7773_v53  ;;  %v14058_v42 = vld [vmem:[#allocation3 + $0x61] sm:$0xff]  ;;  %v5242_v16 = vsel %vm16738_vm5, %v14053_v27, 0.0  ;;  %vm16739_vm15 = vmmov %vm16736_vm9 }
 0x923   : > { %6065 = vmatmul.f32.gmra.mxu3 %v5741_v50  ;;  %vm16743_vm14 = vmmov %vm16739_vm15  ;;  %v14081_v50 = vld [vmem:[#allocation3 + $0x69] sm:$0xff] }
 0x924   : > { %7254 = vmatpush.msra.mxu3 %v5913_v25  ;;  %v5772_v37 = vsel %vm16736_vm9, %v5168_v0, %v7770_v62  ;;  %v5271_v25 = vsel %vm16715_vm12, %v8282_v43, 0.0  ;;  %vm16741_vm9 = vnez %v16740_v47  ;;  %vm16742_vm12 = vnez %v16477_v54  ;;  %vm16744_vm1 = vmmov %vm16743_vm14  ;;  %v14169_v54 = vld [vmem:[#allocation3 + $0xb9] sm:$0xff] }
 0x925   : > { %6175 = vmatmul.f32.gmra.mxu2 %v5772_v37  ;;  %v5835_v56 = vsel %vm16739_vm15, %v5271_v25, %v7774_v63  ;;  %v5244_v31 = vsel %vm16741_vm9, %v14058_v42, 0.0  ;;  %v5075_v11 = vsel %vm16742_vm12, %v8282_v43, 0.0  ;;  %v5744_v36 = vsel %vm16744_vm1, %v8283_v18, %v7779_v5  ;;  %v14100_v43 = vld [vmem:[#allocation3 + $0x91] sm:$0xff]  ;;  %v14112_v5 = vld [vmem:[#allocation3 + $0x89] sm:$0xff]  ;;  %16768 = vst [vmem:[#allocation31_spill] sm:$0xff] %v14169_v54  ;;  %v5903_v47 = vld [vmem:[%s15208_s7 + $0x130] sm:$0xff] }
 0x926   : > { %v5743_v4 = vsel %vm16739_vm15, %v5075_v11, %v7774_v63  ;;  %v14094_v63 = vld [vmem:[#allocation3 + $0x81] sm:$0xff]  ;;  %v5170_v0 = vsel %vm16735_vm2, %v14024_v49, 0.0  ;;  %16747 = vst [vmem:[#allocation13_spill] sm:$0xff] %v14100_v43  ;;  %v16748_v25 = vld [vmem:[#allocation7_spill] sm:$0xff]  ;;  %vm16751_vm15 = vmmov %vm16744_vm1 }
 0x927   : > { %v16752_v11 = vld [vmem:[#allocation53_spill] sm:$0xff]  ;;  %v16754_v18 = vld [vmem:[#allocation27_spill] sm:$0xff]  ;;  %vm16756_vm2 = vmmov %vm16751_vm15 }
 0x928   : > { %5627 = vrot.lane.b32.xlu2 %v5236_v59, %s8452_s25  ;;  %v7775_v59 = vunpack.i.h.bf16 %v7773_v53 }
 0x929   : > { %5629 = vrot.lane.b32.xlu0 %v5137_v38, %s8452_s25  ;;  %6395 = vmatmul.f32.gmra.mxu1 %v5742_v23 }
 0x92a   : > { %5631 = vrot.lane.b32.xlu1 %v5238_v3, %s8452_s25  ;;  %v7783_v3 = vpop.permute.xlu2 %7782  ;;  %v5773_v52 = vsel %vm16743_vm14, %v5137_v38, %v7775_v59  ;;  %v7780_v38 = vunpack.i.h.bf16 %v7778_v17  ;;  %v16749_v17 = vld [vmem:[#allocation51_spill] sm:$0xff] }
 0x92b   : > { %6068 = vmatmul.f32.gmra.mxu3 %v5742_v23  ;;  %v16745_v23 = vld [vmem:[#allocation49_spill] sm:$0xff]  ;;  %v7784_v62 = vunpack.i.l.bf16 %v7783_v3  ;;  %vm16750_vm14 = vnez %v16749_v17  ;;  %v7785_v49 = vunpack.i.h.bf16 %v7783_v3 }
 0x92c   : > { %vm16746_vm3 = vnez %v16745_v23  ;;  %v5774_v37 = vsel %vm16744_vm1, %v5170_v0, %v7780_v38  ;;  %vm16753_vm1 = vnez %v16752_v11  ;;  %v14126_v38 = vld [vmem:[#allocation3 + $0xa1] sm:$0xff]  ;;  %v14128_v0 = vld [vmem:[#allocation3 + $0x99] sm:$0xff] }
 0x92d   : > { %6178 = vmatmul.f32.gmra.mxu2 %v5773_v52  ;;  %v5246_v53 = vsel %vm16746_vm3, %v14079_v39, 0.0  ;;  %v5775_v3 = vsel %vm16756_vm2, %v14040_v29, %v7785_v49  ;;  %16757 = vst [vmem:[#allocation92_spill] sm:$0xff] %v14126_v38  ;;  %v8351_v17 = vld [vmem:[#allocation3 + $0x99] sm:$0xff] }
 0x92e   : > { %16758 = vst [vmem:[#allocation95_spill] sm:$0xff] %v14128_v0 }
 0x92f   : > { %v7788_v60 = vpop.permute.xlu0 %7787 }
 0x930   : > { %5633 = vrot.lane.b32.xlu2 %v14040_v29, %s8452_s25  ;;  %v7789_v52 = vunpack.i.l.bf16 %v7788_v60  ;;  %v7790_v49 = vunpack.i.h.bf16 %v7788_v60  ;;  %v16765_v60 = vld [vmem:[#allocation89_spill] sm:$0xff] }
 0x931   : > { %5635 = vrot.lane.b32.xlu0 %v5240_v2, %s8452_s25  ;;  %6398 = vmatmul.f32.gmra.mxu1 %v5835_v56  ;;  %v14089_v2 = vld [vmem:[#allocation3 + $0x79] sm:$0xff] }
 0x932   : > { %5637 = vrot.lane.b32.xlu1 %v14048_v12, %s8452_s25 }
 0x933   : > { %6071 = vmatmul.f32.gmra.mxu3 %v5743_v4  ;;  %v5250_v4 = vsel %vm16753_vm1, %v14100_v43, 0.0  ;;  %vm16760_vm1 = vmmov %vm16756_vm2  ;;  %v14287_v43 = vld [vmem:[#allocation3 + $0xf9] sm:$0xff] }
 0x934   : > { %vm16764_vm2 = vmmov %vm16760_vm1  ;;  %16786 = vst [vmem:[#allocation94_spill] sm:$0xff] %v14287_v43 }
 0x935   : > { %6181 = vmatmul.f32.gmra.mxu2 %v5774_v37  ;;  %v16759_v37 = vld [vmem:[#allocation62_spill] sm:$0xff] }
 0x938   : > { %5639 = vrot.lane.b32.xlu2 %v5242_v16, %s8452_s25  ;;  %v5273_v16 = vsel %vm16731_vm13, %v16748_v25, 0.0  ;;  %vm16755_vm13 = vnez %v16754_v18  ;;  %v5902_v18 = vld [vmem:[%s15208_s7 + $0x128] sm:$0xff] }
 0x939   : > { %5641 = vrot.lane.b32.xlu0 %v14067_v1, %s8452_s25  ;;  %6401 = vmatmul.f32.gmra.mxu1 %v5744_v36  ;;  %v5837_v59 = vsel %vm16751_vm15, %v5273_v16, %v7784_v62  ;;  %v5746_v16 = vsel %vm16760_vm1, %v16759_v37, %v7789_v52  ;;  %v14144_v52 = vld [vmem:[#allocation3 + $0xb1] sm:$0xff]  ;;  %v14153_v37 = vld [vmem:[#allocation3 + $0xc1] sm:$0xff] }
 0x93a   : > { %5643 = vrot.lane.b32.xlu1 %v5244_v31, %s8452_s25  ;;  %v5248_v31 = vsel %vm16750_vm14, %v14094_v63, 0.0 }
 0x93b   : > { %6074 = vmatmul.f32.gmra.mxu3 %v5744_v36  ;;  %v5077_v36 = vsel %vm16755_vm13, %v16748_v25, 0.0 }
 0x93d   : > { %6184 = vmatmul.f32.gmra.mxu2 %v5775_v3  ;;  %v5912_v3 = vld [vmem:[%s15208_s7 + $0x178] sm:$0xff] }
 0x93e   : > { %6263 = vmatpush.msrb.mxu0 %v5912_v3 }
 0x93f   : > { %v14105_v56 = vpop.permute.xlu2 %7797 }
 0x940   : > { %5645 = vrot.lane.b32.xlu2 %v14081_v50, %s8452_s25  ;;  %6264 = vmatpush.msrb.mxu0 %v5911_v61  ;;  %v5079_v61 = vsel %vm16658_vm8, %v16765_v60, 0.0 }
 0x941   : > { %5647 = vrot.lane.b32.xlu0 %v5246_v53, %s8452_s25  ;;  %6404 = vmatmul.f32.gmra.mxu1 %v5837_v59  ;;  %v5745_v53 = vsel %vm16751_vm15, %v5077_v36, %v7784_v62  ;;  %v16761_v62 = vld [vmem:[#allocation46_spill] sm:$0xff]  ;;  %v5172_v36 = vsel %vm16738_vm5, %v14038_v46, 0.0  ;;  %v16766_v46 = vld [vmem:[#allocation29_spill] sm:$0xff]  ;;  %vm16771_vm5 = vmmov %vm16764_vm2 }
 0x942   : > { %5649 = vrot.lane.b32.xlu1 %v14089_v2, %s8452_s25  ;;  %vm16762_vm15 = vnez %v16761_v62  ;;  %v14139_v59 = vld [vmem:[#allocation3 + $0xa9] sm:$0xff]  ;;  %vm16767_vm1 = vnez %v16766_v46 }
 0x943   : > { %6077 = vmatmul.f32.gmra.mxu3 %v5745_v53  ;;  %v5252_v29 = vsel %vm16762_vm15, %v14126_v38, 0.0  ;;  %16763 = vst [vmem:[#allocation98_spill] sm:$0xff] %v14139_v59  ;;  %v5776_v53 = vsel %vm16764_vm2, %v5172_v36, %v7790_v49  ;;  %v5254_v49 = vsel %vm16767_vm1, %v14144_v52, 0.0  ;;  %v14201_v46 = vld [vmem:[#allocation3 + $0xc9] sm:$0xff]  ;;  %vm16773_vm1 = vmmov %vm16764_vm2 }
 0x944   : > { %16772 = vst [vmem:[#allocation75_spill] sm:$0xff] %v14201_v46 }
 0x945   : > { %6187 = vmatmul.f32.gmra.mxu2 %v5776_v53  ;;  %v16769_v53 = vld [vmem:[#allocation45_spill] sm:$0xff] }
 0x948   : > { %5651 = vrot.lane.b32.xlu2 %v5248_v31, %s8452_s25  ;;  %v7793_v31 = vpop.permute.xlu1 %7792 }
 0x949   : > { %5653 = vrot.lane.b32.xlu0 %v14112_v5, %s8452_s25  ;;  %6407 = vmatmul.f32.gmra.mxu1 %v5746_v16  ;;  %v14134_v25 = vpop.permute.xlu2 %7812  ;;  %v7795_v32 = vunpack.i.h.bf16 %v7793_v31 }
 0x94a   : > { %5655 = vrot.lane.b32.xlu1 %v5250_v4, %s8452_s25  ;;  %v7794_v4 = vunpack.i.l.bf16 %v7793_v31  ;;  %v14193_v31 = vld [vmem:[#allocation3 + $0xd1] sm:$0xff] }
 0x94b   : > { %6080 = vmatmul.f32.gmra.mxu3 %v5746_v16  ;;  %v5910_v16 = vld [vmem:[%s15208_s7 + $0x168] sm:$0xff] }
 0x94c   : > { %6265 = vmatpush.msrb.mxu0 %v5910_v16  ;;  %v5747_v16 = vsel %vm16764_vm2, %v5079_v61, %v7794_v4 }
 0x94e   : > { %6266 = vmatpush.msrb.mxu0 %v5909_v21 }
 0x950   : > { %5657 = vrot.lane.b32.xlu2 %v14128_v0, %s8452_s25  ;;  %v5277_v0 = vsel %vm16755_vm13, %v13728_v55, 0.0  ;;  %vm16787_vm13 = vmmov %vm16764_vm2 }
 0x951   : > { %5659 = vrot.lane.b32.xlu0 %v5252_v29, %s8452_s25  ;;  %v5275_v29 = vsel %vm16742_vm12, %v16765_v60, 0.0  ;;  %vm16770_vm12 = vnez %v16769_v53  ;;  %v14213_v60 = vld [vmem:[#allocation3 + $0xd9] sm:$0xff] }
 0x952   : > { %5661 = vrot.lane.b32.xlu1 %v14139_v59, %s8452_s25  ;;  %v5839_v36 = vsel %vm16764_vm2, %v5275_v29, %v7794_v4  ;;  %v5256_v30 = vsel %vm16770_vm12, %v14153_v37, 0.0  ;;  %v14177_v3 = vpop.permute.xlu2 %7827  ;;  %v7799_v29 = vunpack.i.l.bf16 %v14105_v56  ;;  %v6604_v59 = vld [vmem:[%s15210_s9 + $0x10] sm:$0xff]  ;;  %16776 = vst [vmem:[#allocation42_spill] sm:$0xff] %v14213_v60 }
 0x953   : > { %6410 = vmatmul.f32.gmra.mxu1 %v5839_v36  ;;  %6083 = vmatmul.f32.gmra.mxu3 %v5747_v16  ;;  %v5907_v4 = vld [vmem:[%s15208_s7 + $0x150] sm:$0xff] }
 0x954   : > { %v5748_v21 = vsel %vm16773_vm1, %v13718_v48, %v7799_v29  ;;  %6715 = vmatpush.msrb.mxu2 %v6604_v59  ;;  %v5906_v48 = vld [vmem:[%s15208_s7 + $0x148] sm:$0xff]  ;;  %v14227_v16 = vld [vmem:[#allocation3 + $0xe1] sm:$0xff] }
 0x958   : > { %5663 = vrot.lane.b32.xlu2 %v5254_v49, %s8452_s25 }
 0x959   : > { %5665 = vrot.lane.b32.xlu0 %v14169_v54, %s8452_s25  ;;  %v5777_v54 = vsel %vm16771_vm5, %v14048_v12, %v7795_v32  ;;  %v16774_v32 = vld [vmem:[#allocation37_spill] sm:$0xff] }
 0x95a   : > { %5667 = vrot.lane.b32.xlu1 %v5256_v30, %s8452_s25  ;;  %v14180_v49 = vpop.permute.xlu0 %7802  ;;  %v5908_v30 = vld [vmem:[%s15208_s7 + $0x158] sm:$0xff]  ;;  %6190 = vmatmul.f32.gmra.mxu2 %v5777_v54  ;;  %vm16775_vm5 = vnez %v16774_v32  ;;  %v7800_v54 = vunpack.i.h.bf16 %v14105_v56  ;;  %v14229_v59 = vpop.permute.xlu2 %7842  ;;  %v5174_v56 = vsel %vm16741_vm9, %v14053_v27, 0.0  ;;  %vm16780_vm9 = vmmov %vm16764_vm2 }
 0x95b   : > { %v14182_v36 = vpop.permute.xlu1 %7807  ;;  %6267 = vmatpush.msrb.mxu0 %v5908_v30  ;;  %v5258_v12 = vsel %vm16775_vm5, %v14193_v31, 0.0  ;;  %6413 = vmatmul.f32.gmra.mxu1 %v5748_v21  ;;  %v7804_v29 = vunpack.i.l.bf16 %v14180_v49  ;;  %16777 = vst [vmem:[#allocation78_spill] sm:$0xff] %v14229_v59 }
 0x95c   : > { %6086 = vmatmul.f32.gmra.mxu3 %v5748_v21 }
 0x95d   : > { %6268 = vmatpush.msrb.mxu0 %v5907_v4  ;;  %v5904_v4 = vld [vmem:[%s15208_s7 + $0x138] sm:$0xff]  ;;  %v5841_v27 = vsel %vm16780_vm9, %v5277_v0, %v7804_v29  ;;  %v7809_v0 = vunpack.i.l.bf16 %v14182_v36  ;;  %vm16785_vm9 = vmmov %vm16764_vm2 }
 0x95f   : > { %6269 = vmatpush.msrb.mxu0 %v5906_v48  ;;  %v5778_v48 = vsel %vm16764_vm2, %v5174_v56, %v7800_v54 }
 0x960   : > { %5669 = vrot.lane.b32.xlu2 %v14201_v46, %s8452_s25  ;;  %v16778_v46 = vld [vmem:[#allocation39_spill] sm:$0xff] }
 0x961   : > { %5671 = vrot.lane.b32.xlu0 %v5258_v12, %s8452_s25  ;;  %v5905_v12 = vld [vmem:[%s15208_s7 + $0x140] sm:$0xff]  ;;  %vm16779_vm1 = vnez %v16778_v46 }
 0x962   : > { %5673 = vrot.lane.b32.xlu1 %v14213_v60, %s8452_s25  ;;  %v14223_v61 = vpop.permute.xlu0 %7817  ;;  %v14234_v60 = vld [vmem:[#allocation3 + $0xf1] sm:$0xff]  ;;  %v5260_v38 = vsel %vm16779_vm1, %v14227_v16, 0.0  ;;  %6270 = vmatpush.msrb.mxu0 %v5905_v12  ;;  %v16782_v12 = vld [vmem:[#allocation18_spill] sm:$0xff]  ;;  %v14285_v62 = vpop.permute.xlu2 %7857 }
 0x963   : > { %6193 = vmatmul.f32.gmra.mxu2 %v5778_v48  ;;  %vm16783_vm15 = vnez %v16782_v12  ;;  %6416 = vmatmul.f32.gmra.mxu1 %v5841_v27  ;;  %v5233_v48 = vld [vmem:[#allocation3 + $0x109] sm:$0xff]  ;;  %v7819_v41 = vunpack.i.l.bf16 %v14223_v61 }
 0x964   : > { %v14225_v30 = vpop.permute.xlu1 %7822  ;;  %v5262_v21 = vsel %vm16783_vm15, %v14234_v60, 0.0  ;;  %6271 = vmatpush.msrb.mxu0 %v5904_v4  ;;  %v14271_v4 = vld [vmem:[#allocation3 + $0x108] sm:$0xff]  ;;  %v5901_v27 = vld [vmem:[%s15208_s7 + $0x120] sm:$0xff]  ;;  %v5192_v26 = vsel %vm16783_vm15, %v14227_v16, 0.0 }
 0x965   : > { %16784 = vst [vmem:[#allocation80_spill] sm:$0xff] %v14271_v4  ;;  %v7911_v59 = vpack.i.bf16 %v14271_v4, %v5233_v48 }
 0x966   : > { %6272 = vmatpush.msrb.mxu0 %v5903_v47 }
 0x968   : > { %5675 = vrot.lane.b32.xlu2 %v5260_v38, %s8452_s25  ;;  %v7805_v38 = vunpack.i.h.bf16 %v14180_v49  ;;  %6273 = vmatpush.msrb.mxu0 %v5902_v18  ;;  %v14279_v49 = vld [vmem:[#allocation3 + $0x101] sm:$0xff] }
 0x969   : > { %5677 = vrot.lane.b32.xlu0 %v14254_v58, %s8452_s25  ;;  %v5900_v58 = vld [vmem:[%s15208_s7 + $0x118] sm:$0xff] }
 0x96a   : > { %5679 = vrot.lane.b32.xlu1 %v5262_v21, %s8452_s25  ;;  %v14267_v54 = vpop.permute.xlu0 %7832  ;;  %v5081_v21 = vsel %vm16682_vm11, %v13728_v55, 0.0  ;;  %6274 = vmatpush.msrb.mxu0 %v5901_v27  ;;  %v5779_v18 = vsel %vm16787_vm13, %v14067_v1, %v7805_v38  ;;  %v5234_v55 = vld [vmem:[#allocation3 + $0x111] sm:$0xff] }
 0x96b   : > { %v5749_v47 = vsel %vm16785_vm9, %v5081_v21, %v7804_v29  ;;  %6196 = vmatmul.f32.gmra.mxu2 %v5779_v18  ;;  %v5750_v29 = vsel %vm16764_vm2, %v13746_v34, %v7809_v0  ;;  %v5899_v21 = vld [vmem:[%s15208_s7 + $0x110] sm:$0xff]  ;;  %v16788_v27 = vld [vmem:[#allocation23_spill] sm:$0xff]  ;;  %v5898_v1 = vld [vmem:[%s15208_s7 + $0x108] sm:$0xff]  ;;  %v7810_v34 = vunpack.i.h.bf16 %v14182_v36  ;;  %v7814_v18 = vunpack.i.l.bf16 %v14134_v25 }
 0x96c   : > { %v14269_v56 = vpop.permute.xlu1 %7837  ;;  %6089 = vmatmul.f32.gmra.mxu3 %v5749_v47  ;;  %vm16789_vm9 = vnez %v16788_v27  ;;  %6275 = vmatpush.msrb.mxu0 %v5900_v58  ;;  %v14308_v38 = vld [vmem:[#allocation3 + $0x110] sm:$0xff]  ;;  %v16790_v0 = vld [vmem:[#allocation48_spill] sm:$0xff]  ;;  %v5176_v36 = vsel %vm16746_vm3, %v14058_v42, 0.0  ;;  %v5186_v42 = vsel %vm16770_vm12, %v14144_v52, 0.0  ;;  %vm16793_vm3 = vmmov %vm16764_vm2 }
 0x96d   : > { %v5264_v47 = vsel %vm16789_vm9, %v14279_v49, 0.0  ;;  %6419 = vmatmul.f32.gmra.mxu1 %v5750_v29  ;;  %vm16791_vm13 = vnez %v16790_v0 }
 0x96e   : > { %v5266_v48 = vsel %vm16791_vm13, %v5234_v55, 0.0  ;;  %6276 = vmatpush.msrb.mxu0 %v5899_v21  ;;  %v7860_v55 = vunpack.i.h.bf16 %v14285_v62  ;;  %v5780_v21 = vsel %vm16764_vm2, %v5176_v36, %v7810_v34  ;;  %vm16792_vm13 = vmmov %vm16764_vm2  ;;  %v5083_v36 = vsel %vm16688_vm4, %v13766_v8, 0.0 }
 0x970   : > { %5681 = vrot.lane.b32.xlu2 %v14287_v43, %s8452_s25  ;;  %6277 = vmatpush.msrb.mxu0 %v5898_v1  ;;  %v5279_v1 = vsel %vm16658_vm8, %v13766_v8, 0.0  ;;  %v14338_v34 = vsel %vm16793_vm3, %v5186_v42, %v7860_v55  ;;  %vm16794_vm8 = vmmov %vm16764_vm2  ;;  %v5291_v55 = vsel %vm16710_vm0, %v13928_v28, 0.0  ;;  %v5095_v8 = vsel %vm16717_vm7, %v13928_v28, 0.0 }
 0x971   : > { %5683 = vrot.lane.b32.xlu0 %v5264_v47, %s8452_s25  ;;  %v7916_v47 = vpack.i.bf16 %v14308_v38, %v5266_v48  ;;  %v5843_v43 = vsel %vm16792_vm13, %v5279_v1, %v7814_v18  ;;  %v14331_v48 = vpop.permute.xlu2 %7872  ;;  %vm16795_vm13 = vmmov %vm16764_vm2  ;;  %v5178_v28 = vsel %vm16750_vm14, %v14079_v39, 0.0  ;;  %v5091_v39 = vsel %vm16710_vm0, %v13884_v44, 0.0 }
 0x972   : > { %7912 = vrot.lane.b32.xlu1 %v7911_v59, %s8452_s25  ;;  %v5897_v59 = vld [vmem:[%s15208_s7 + $0x100] sm:$0xff]  ;;  %vm16796_vm3 = vmmov %vm16764_vm2 }
 0x973   : > { %v14313_v58 = vpop.permute.xlu0 %7847  ;;  %6278 = vmatpush.msrb.mxu0 %v5897_v59  ;;  %6199 = vmatmul.f32.gmra.mxu2 %v5780_v21  ;;  %v5751_v21 = vsel %vm16794_vm8, %v5083_v36, %v7814_v18  ;;  %v5752_v52 = vsel %vm16796_vm3, %v13822_v40, %v7819_v41  ;;  %vm16797_vm8 = vmmov %vm16764_vm2  ;;  %v7824_v40 = vunpack.i.l.bf16 %v14225_v30 }
 0x974   : > { %v14315_v4 = vpop.permute.xlu1 %7852  ;;  %6092 = vmatmul.f32.gmra.mxu3 %v5750_v29  ;;  %v7815_v29 = vunpack.i.h.bf16 %v14134_v25  ;;  %vm16799_vm3 = vmmov %vm16764_vm2 }
 0x975   : > { %6422 = vmatmul.f32.gmra.mxu1 %v5843_v43  ;;  %v7874_v43 = vunpack.i.l.bf16 %v14331_v48  ;;  %v7854_v36 = vunpack.i.l.bf16 %v14315_v4  ;;  %vm16802_vm0 = vmmov %vm16764_vm2 }
 0x976   : > { %v5781_v25 = vsel %vm16795_vm13, %v14081_v50, %v7815_v29  ;;  %v7820_v50 = vunpack.i.h.bf16 %v14223_v61  ;;  %vm16798_vm13 = vmmov %vm16764_vm2  ;;  %v5281_v61 = vsel %vm16682_vm11, %v13798_v33, 0.0 }
 0x977   : > { %v14361_v1 = vsel %vm16764_vm2, %v5291_v55, %v7874_v43  ;;  %v14364_v18 = vsel %vm16797_vm8, %v5095_v8, %v7874_v43  ;;  %v5287_v55 = vsel %vm16703_vm10, %v13884_v44, 0.0  ;;  %vm16800_vm8 = vmmov %vm16764_vm2 }
 0x978   : > { %7917 = vrot.lane.b32.xlu2 %v7916_v47, %s8452_s25  ;;  %v5782_v43 = vsel %vm16798_vm13, %v5178_v28, %v7820_v50  ;;  %v14394_v8 = vsel %vm16800_vm8, %v5091_v39, %v7854_v36  ;;  %v7825_v50 = vunpack.i.h.bf16 %v14225_v30  ;;  %vm16801_vm11 = vmmov %vm16764_vm2  ;;  %vm16806_vm8 = vnez %v16712_v45 }
 0x979   : > { %v14367_v42 = vpop.permute.xlu2 %7887  ;;  %vm16803_vm13 = vmmov %vm16802_vm0 }
 0x97b   : > { %v14341_v59 = vpop.permute.xlu0 %7862  ;;  %6202 = vmatmul.f32.gmra.mxu2 %v5781_v25  ;;  %v5845_v25 = vsel %vm16799_vm3, %v5281_v61, %v7824_v40  ;;  %vm16804_vm3 = vmmov %vm16802_vm0 }
 0x97c   : > { %v14343_v47 = vpop.permute.xlu1 %7867  ;;  %6095 = vmatmul.f32.gmra.mxu3 %v5751_v21  ;;  %v7890_v21 = vunpack.i.h.bf16 %v14367_v42  ;;  %v7864_v44 = vunpack.i.l.bf16 %v14341_v59 }
 0x97d   : > { %6425 = vmatmul.f32.gmra.mxu1 %v5752_v52 }
 0x97e   : > { %v14401_v28 = vsel %vm16801_vm11, %v5192_v26, %v7890_v21  ;;  %v5783_v21 = vsel %vm16803_vm13, %v14089_v2, %v7825_v50  ;;  %v5093_v26 = vsel %vm16806_vm8, %v13910_v51, 0.0  ;;  %vm16807_vm11 = vmmov %vm16802_vm0  ;;  %v5188_v50 = vsel %vm16775_vm5, %v14153_v37, 0.0 }
 0x97f   : > { %v14432_v2 = vsel %vm16802_vm0, %v5093_v26, %v7864_v44  ;;  %vm16808_vm13 = vmmov %vm16802_vm0 }
 0x983   : > { %v14370_v29 = vpop.permute.xlu0 %7877  ;;  %6205 = vmatmul.f32.gmra.mxu2 %v5782_v43  ;;  %v7829_v43 = vunpack.i.l.bf16 %v14177_v3  ;;  %v14407_v19 = vpop.f32.mrf.mxu3 }
 0x984   : > { %v14372_v41 = vpop.permute.xlu1 %7882  ;;  %6098 = vmatmul.f32.gmra.mxu3 %v5752_v52  ;;  %v14391_v52 = vsel %vm16764_vm2, %v5287_v55, %v7854_v36  ;;  %v5085_v36 = vsel %vm16700_vm6, %v13798_v33, 0.0  ;;  %v14418_v55 = vpop.permute.xlu2 %7902  ;;  %vm16805_vm2 = vnez %v16706_v20  ;;  %v7850_v20 = vunpack.i.h.bf16 %v14313_v58 }
 0x985   : > { %6428 = vmatmul.f32.gmra.mxu1 %v5845_v25  ;;  %v7870_v25 = vunpack.i.h.bf16 %v14343_v47  ;;  %v5753_v30 = vsel %vm16802_vm0, %v5085_v36, %v7824_v40  ;;  %v5754_v39 = vsel %vm16804_vm3, %v13859_v14, %v7829_v43  ;;  %v5289_v33 = vsel %vm16805_vm2, %v13910_v51, 0.0  ;;  %vm16809_vm3 = vmmov %vm16802_vm0 }
 0x986   : > { %v14429_v40 = vsel %vm16807_vm11, %v5289_v33, %v7864_v44  ;;  %v7830_v43 = vunpack.i.h.bf16 %v14177_v3  ;;  %v7834_v36 = vunpack.i.l.bf16 %v14267_v54  ;;  %v7880_v51 = vunpack.i.h.bf16 %v14370_v29 }
 0x987   : > { %v14438_v14 = vsel %vm16808_vm13, %v5188_v50, %v7870_v25  ;;  %v7884_v44 = vunpack.i.l.bf16 %v14372_v41  ;;  %vm16810_vm11 = vnez %v16752_v11  ;;  %v5283_v25 = vsel %vm16688_vm4, %v13853_v10, 0.0  ;;  %vm16811_vm13 = vmmov %vm16802_vm0 }
 0x988   : > { %v5180_v37 = vsel %vm16810_vm11, %v14094_v63, 0.0  ;;  %vm16813_vm4 = vnez %v16720_v6 }
 0x989   : > { %v5784_v3 = vsel %vm16802_vm0, %v5180_v37, %v7830_v43  ;;  %v5097_v9 = vsel %vm16813_vm4, %v13932_v35, 0.0 }
 0x98b   : > { %v14413_v16 = vpop.permute.xlu0 %7892  ;;  %6208 = vmatmul.f32.gmra.mxu2 %v5783_v21  ;;  %v8284_v21 = vld [vmem:[#allocation3 + $0x18] sm:$0xff]  ;;  %v14448_v26 = vpop.f32.mrf.mxu3 }
 0x98c   : > { %v14404_v61 = vpop.permute.xlu1 %7897  ;;  %6101 = vmatmul.f32.gmra.mxu3 %v5753_v30  ;;  %v5628_v43 = vpop.permute.xlu2 %5627 }
 0x98d   : > { %6431 = vmatmul.f32.gmra.mxu1 %v5754_v39 }
 0x993   : > { %v14454_v50 = vpop.permute.xlu0 %7907  ;;  %6211 = vmatmul.f32.gmra.mxu2 %v5784_v3  ;;  %v7894_v3 = vunpack.i.l.bf16 %v14413_v16 }
 0x994   : > { %v5626_v30 = vpop.permute.xlu1 %5625  ;;  %6104 = vmatmul.f32.gmra.mxu3 %v5754_v39  ;;  %v5293_v39 = vsel %vm16806_vm8, %v13932_v35, 0.0  ;;  %v5087_v35 = vsel %vm16703_vm10, %v13853_v10, 0.0  ;;  %vm16816_vm8 = vmmov %vm16802_vm0  ;;  %v5295_v10 = vsel %vm16717_vm7, %v13968_v13, 0.0  ;;  %vm16818_vm10 = vnez %v16722_v22 }
 0x995   : > { %v5801_v33 = vsel %vm16809_vm3, %v8284_v21, %v5626_v30  ;;  %v5847_v30 = vsel %vm16811_vm13, %v5283_v25, %v7834_v36  ;;  %v5190_v21 = vsel %vm16779_vm1, %v14193_v31, 0.0  ;;  %vm16812_vm3 = vmmov %vm16802_vm0  ;;  %v7835_v31 = vunpack.i.h.bf16 %v14267_v54  ;;  %v8285_v25 = vld [vmem:[#allocation3 + $0x20] sm:$0xff]  ;;  %v6603_v54 = vld [vmem:[%s15210_s9 + $0x8] sm:$0xff] }
 0x996   : > { %6279 = vmatmul.f32.vlgmr.msrb.gmra.mxu0 %v5801_v33  ;;  %6434 = vmatmul.f32.gmra.mxu1 %v5847_v30  ;;  %v14461_v63 = vsel %vm16812_vm3, %v5190_v21, %v7880_v51  ;;  %v14470_v33 = vsel %vm16802_vm0, %v5293_v39, %v7884_v44  ;;  %vm16814_vm13 = vmmov %vm16802_vm0  ;;  %v7839_v51 = vunpack.i.l.bf16 %v14269_v56  ;;  %v7900_v30 = vunpack.i.h.bf16 %v14404_v61 }
 0x997   : > { %v14473_v37 = vsel %vm16814_vm13, %v5097_v9, %v7884_v44  ;;  %vm16815_vm3 = vmmov %vm16802_vm0  ;;  %v5755_v21 = vsel %vm16816_vm8, %v5087_v35, %v7834_v36  ;;  %v5785_v44 = vsel %vm16802_vm0, %v14112_v5, %v7835_v31  ;;  %6716 = vmatpush.msrb.mxu2 %v6603_v54  ;;  %v5099_v24 = vsel %vm16818_vm10, %v13968_v13, 0.0  ;;  %v14497_v36 = vpop.f32.mrf.mxu3  ;;  %v14499_v9 = vpop.f32.mrf.mxu2  ;;  %v8286_v35 = vld [vmem:[#allocation3 + $0x28] sm:$0xff] }
 0x998   : > { %v5802_v45 = vsel %vm16815_vm3, %v8285_v25, %v5628_v43  ;;  %vm16817_vm13 = vmmov %vm16802_vm0  ;;  %v7840_v13 = vunpack.i.h.bf16 %v14269_v56 }
 0x999   : > { %v5756_v39 = vsel %vm16817_vm13, %v13871_v15, %v7839_v51  ;;  %vm16819_vm3 = vmmov %vm16802_vm0  ;;  %v5194_v15 = vsel %vm16789_vm9, %v14234_v60, 0.0  ;;  %v16822_v51 = vld [vmem:[#allocation78_spill] sm:$0xff] }
 0x99a   : > { %v14502_v5 = vsel %vm16819_vm3, %v5295_v10, %v7894_v3  ;;  %vm16820_vm8 = vmmov %vm16802_vm0  ;;  %v7844_v25 = vunpack.i.l.bf16 %v16822_v51 }
 0x99b   : > { %6214 = vmatmul.f32.gmra.mxu2 %v5785_v44  ;;  %v14505_v43 = vsel %vm16820_vm8, %v5099_v24, %v7894_v3  ;;  %v5630_v57 = vpop.permute.xlu0 %5629  ;;  %vm16821_vm7 = vmmov %vm16802_vm0  ;;  %v16823_v3 = vld [vmem:[#allocation13_spill] sm:$0xff]  ;;  %v16824_v44 = vld [vmem:[#allocation46_spill] sm:$0xff] }
 0x99c   : > { %6107 = vmatmul.f32.gmra.mxu3 %v5755_v21  ;;  %v14511_v31 = vsel %vm16821_vm7, %v5194_v15, %v7900_v30  ;;  %v5803_v21 = vsel %vm16802_vm0, %v8286_v35, %v5630_v57  ;;  %v5632_v54 = vpop.permute.xlu1 %5631  ;;  %vm16825_vm13 = vnez %v16824_v44  ;;  %vm16826_vm3 = vmmov %vm16802_vm0  ;;  %v16827_v30 = vld [vmem:[#allocation54_spill] sm:$0xff]  ;;  %vm16829_vm7 = vnez %v16790_v0 }
 0x99d   : > { %v5182_v10 = vsel %vm16825_vm13, %v16823_v3, 0.0  ;;  %v5285_v56 = vsel %vm16700_vm6, %v16827_v30, 0.0  ;;  %vm16828_vm8 = vmmov %vm16802_vm0  ;;  %v5196_v15 = vsel %vm16829_vm7, %v14279_v49, 0.0  ;;  %v5634_v30 = vpop.permute.xlu2 %5633 }
 0x99e   : > { %6282 = vmatmul.f32.gmra.mxu0 %v5802_v45  ;;  %6437 = vmatmul.f32.gmra.mxu1 %v5756_v39  ;;  %v7910_v45 = vunpack.i.h.bf16 %v14454_v50  ;;  %v5786_v60 = vsel %vm16826_vm3, %v5182_v10, %v7840_v13  ;;  %v5849_v24 = vsel %vm16828_vm8, %v5285_v56, %v7844_v25  ;;  %v7849_v13 = vunpack.i.l.bf16 %v14313_v58  ;;  %vm16830_vm6 = vmmov %vm16802_vm0  ;;  %v8288_v10 = vld [vmem:[#allocation3 + $0xa7] sm:$0xff]  ;;  %v16832_v56 = vld [vmem:[#allocation95_spill] sm:$0xff] }
 0x99f   : > { %v6063_v57 = vpop.f32.mrf.mxu3  ;;  %v14528_v35 = vpop.f32.mrf.mxu2  ;;  %v5804_v3 = vsel %vm16830_vm6, %v8287_v7, %v5632_v54  ;;  %vm16831_vm3 = vmmov %vm16802_vm0  ;;  %v8290_v7 = vld [vmem:[#allocation3 + $0x38] sm:$0xff] }
 0x9a0   : > { %vm16833_vm8 = vmmov %vm16802_vm0 }
 0x9a3   : > { %6217 = vmatmul.f32.gmra.mxu2 %v5786_v60  ;;  %v5089_v60 = vsel %vm16805_vm2, %v8288_v10, 0.0  ;;  %vm16834_vm2 = vmmov %vm16802_vm0  ;;  %v16836_v10 = vld [vmem:[#allocation29_spill] sm:$0xff] }
 0x9a4   : > { %6110 = vmatmul.f32.gmra.mxu3 %v5756_v39  ;;  %v7845_v39 = vunpack.i.h.bf16 %v16822_v51  ;;  %v5757_v49 = vsel %vm16831_vm3, %v5089_v60, %v7844_v25  ;;  %v8289_v51 = vld [vmem:[#allocation3 + $0xaf] sm:$0xff]  ;;  %vm16837_vm6 = vnez %v16836_v10  ;;  %vm16838_vm3 = vmmov %vm16802_vm0 }
 0x9a5   : > { %v14549_v25 = vld [vmem:[%s15209_s8] ss:$0 sm:$0xff] }
 0x9a6   : > { %6285 = vmatmul.f32.gmra.mxu0 %v5803_v21  ;;  %6440 = vmatmul.f32.gmra.mxu1 %v5849_v24  ;;  %v14531_v21 = vsel %vm16802_vm0, %v5196_v15, %v7910_v45  ;;  %v5787_v45 = vsel %vm16833_vm8, %v16832_v56, %v7845_v39  ;;  %v5638_v24 = vpop.permute.xlu1 %5637  ;;  %v5758_v15 = vsel %vm16802_vm0, %v8289_v51, %v7849_v13  ;;  %v16835_v39 = vld [vmem:[#allocation92_spill] sm:$0xff]  ;;  %vm16839_vm8 = vmmov %vm16802_vm0 }
 0x9a7   : > { %v6066_v0 = vpop.f32.mrf.mxu3  ;;  %v14542_v54 = vpop.f32.mrf.mxu2  ;;  %v5184_v60 = vsel %vm16837_vm6, %v16835_v39, 0.0  ;;  %v6064_v56 = vadd.f32 %v14549_v25, %v6063_v57  ;;  %v7859_v39 = vunpack.i.l.bf16 %v14285_v62  ;;  %v16840_v57 = vld [vmem:[#allocation98_spill] sm:$0xff] }
 0x9a8   : > { %v5788_v13 = vsel %vm16838_vm3, %v5184_v60, %v7850_v20  ;;  %v6067_v60 = vadd.f32 %v14549_v25, %v6066_v0  ;;  %vm16842_vm3 = vmmov %vm16802_vm0 }
 0x9ab   : > { %6220 = vmatmul.f32.gmra.mxu2 %v5787_v45  ;;  %v5636_v45 = vpop.permute.xlu0 %5635 }
 0x9ac   : > { %6113 = vmatmul.f32.gmra.mxu3 %v5757_v49  ;;  %v5640_v49 = vpop.permute.xlu2 %5639 }
 0x9ae   : > { %6288 = vmatmul.f32.gmra.mxu0 %v5804_v3  ;;  %6443 = vmatmul.f32.gmra.mxu1 %v5758_v15  ;;  %v5805_v3 = vsel %vm16834_vm2, %v8290_v7, %v5634_v30  ;;  %v14557_v51 = vpop.permute.xlu1 %5643  ;;  %vm16841_vm2 = vmmov %vm16802_vm0 }
 0x9af   : > { %v6069_v58 = vpop.f32.mrf.mxu3  ;;  %v6176_v30 = vpop.f32.mrf.mxu2 }
 0x9b0   : > { %v14559_v7 = vadd.f32 %v6176_v30, %v6064_v56  ;;  %v6070_v0 = vadd.f32 %v14549_v25, %v6069_v58 }
 0x9b3   : > { %6223 = vmatmul.f32.gmra.mxu2 %v5788_v13  ;;  %v8292_v13 = vld [vmem:[#allocation3 + $0xbf] sm:$0xff] }
 0x9b4   : > { %6116 = vmatmul.f32.gmra.mxu3 %v5758_v15  ;;  %v8291_v15 = vld [vmem:[#allocation3 + $0x40] sm:$0xff]  ;;  %v5760_v56 = vsel %vm16841_vm2, %v8292_v13, %v7859_v39  ;;  %v14571_v62 = vpop.permute.xlu2 %5645  ;;  %v8294_v13 = vld [vmem:[#allocation3 + $0x50] sm:$0xff]  ;;  %vm16845_vm2 = vmmov %vm16802_vm0 }
 0x9b5   : > { %v5806_v20 = vsel %vm16839_vm8, %v8291_v15, %v5636_v45  ;;  %v8293_v15 = vld [vmem:[#allocation3 + $0x48] sm:$0xff]  ;;  %vm16843_vm8 = vmmov %vm16802_vm0 }
 0x9b6   : > { %6291 = vmatmul.f32.gmra.mxu0 %v5805_v3  ;;  %6446 = vmatmul.f32.gmra.mxu1 %v14391_v52  ;;  %v7855_v3 = vunpack.i.h.bf16 %v14315_v4  ;;  %v14573_v45 = vpop.permute.xlu1 %5649 }
 0x9b7   : > { %v6072_v30 = vpop.f32.mrf.mxu3  ;;  %v6179_v4 = vpop.f32.mrf.mxu2 }
 0x9b8   : > { %v5789_v52 = vsel %vm16802_vm0, %v16840_v57, %v7855_v3  ;;  %v14569_v27 = vadd.f32 %v6179_v4, %v6067_v60  ;;  %v7865_v57 = vunpack.i.h.bf16 %v14341_v59  ;;  %v6073_v58 = vadd.f32 %v14549_v25, %v6072_v30  ;;  %v8295_v4 = vld [vmem:[#allocation3 + $0xcf] sm:$0xff] }
 0x9bb   : > { %6226 = vmatmul.f32.gmra.mxu2 %v5789_v52  ;;  %v7869_v52 = vunpack.i.l.bf16 %v14343_v47 }
 0x9bc   : > { %6119 = vmatmul.f32.gmra.mxu3 %v14394_v8  ;;  %v5807_v8 = vsel %vm16842_vm3, %v8293_v15, %v5638_v24  ;;  %v14583_v60 = vpop.permute.xlu2 %5651  ;;  %v5808_v24 = vsel %vm16843_vm8, %v8294_v13, %v5640_v49  ;;  %v8296_v49 = vld [vmem:[#allocation3 + $0x58] sm:$0xff]  ;;  %vm16846_vm3 = vmmov %vm16802_vm0 }
 0x9bd   : > { %v5762_v59 = vsel %vm16845_vm2, %v8295_v4, %v7869_v52  ;;  %vm16847_vm8 = vmmov %vm16802_vm0 }
 0x9be   : > { %6294 = vmatmul.f32.gmra.mxu0 %v5806_v20  ;;  %6449 = vmatmul.f32.gmra.mxu1 %v5760_v56  ;;  %vm16849_vm2 = vmmov %vm16802_vm0 }
 0x9bf   : > { %v6075_v3 = vpop.f32.mrf.mxu3  ;;  %v6182_v39 = vpop.f32.mrf.mxu2 }
 0x9c0   : > { %v14579_v20 = vadd.f32 %v6182_v39, %v6070_v0  ;;  %v6076_v30 = vadd.f32 %v14549_v25, %v6075_v3  ;;  %v6602_v3 = vld [vmem:[%s15210_s9] sm:$0xff] }
 0x9c1   : > { %6717 = vmatpush.msrb.mxu2 %v6602_v3 }
 0x9c3   : > { %6229 = vmatmul.f32.gmra.mxu2 %v14338_v34  ;;  %v16844_v34 = vld [vmem:[#allocation31_spill] sm:$0xff] }
 0x9c4   : > { %6122 = vmatmul.f32.gmra.mxu3 %v5760_v56  ;;  %v14586_v56 = vpop.permute.xlu1 %5655 }
 0x9c6   : > { %6297 = vmatmul.f32.gmra.mxu0 %v5807_v8  ;;  %6452 = vmatmul.f32.gmra.mxu1 %v14429_v40  ;;  %v5791_v40 = vsel %vm16802_vm0, %v16844_v34, %v7865_v57  ;;  %v5642_v8 = vpop.permute.xlu0 %5641  ;;  %v7875_v34 = vunpack.i.h.bf16 %v14331_v48  ;;  %v8298_v48 = vld [vmem:[#allocation3 + $0xdf] sm:$0xff] }
 0x9c7   : > { %v6078_v47 = vpop.f32.mrf.mxu3  ;;  %v6185_v15 = vpop.f32.mrf.mxu2  ;;  %v5809_v39 = vsel %vm16846_vm3, %v8296_v49, %v5642_v8  ;;  %vm16850_vm3 = vmmov %vm16802_vm0 }
 0x9c8   : > { %v14593_v0 = vadd.f32 %v6185_v15, %v6073_v58  ;;  %v8297_v58 = vld [vmem:[#allocation3 + $0x60] sm:$0xff] }
 0x9c9   : > { %v5810_v4 = vsel %vm16847_vm8, %v8297_v58, %v14557_v51  ;;  %v6079_v51 = vadd.f32 %v14549_v25, %v6078_v47  ;;  %vm16851_vm8 = vmmov %vm16802_vm0 }
 0x9cb   : > { %6232 = vmatmul.f32.gmra.mxu2 %v5791_v40  ;;  %v7879_v40 = vunpack.i.l.bf16 %v14370_v29 }
 0x9cc   : > { %6125 = vmatmul.f32.gmra.mxu3 %v14432_v2  ;;  %v14596_v2 = vpop.permute.xlu2 %5657  ;;  %v14598_v57 = vpop.permute.xlu1 %5661 }
 0x9cd   : > { %v5764_v29 = vsel %vm16849_vm2, %v8298_v48, %v7879_v40  ;;  %vm16853_vm2 = vmmov %vm16802_vm0 }
 0x9ce   : > { %6300 = vmatmul.f32.gmra.mxu0 %v5808_v24  ;;  %6455 = vmatmul.f32.gmra.mxu1 %v5762_v59  ;;  %v5648_v47 = vpop.permute.xlu0 %5647 }
 0x9cf   : > { %v6081_v52 = vpop.f32.mrf.mxu3  ;;  %v6188_v13 = vpop.f32.mrf.mxu2 }
 0x9d0   : > { %v14603_v24 = vadd.f32 %v6188_v13, %v6076_v30  ;;  %v6082_v40 = vadd.f32 %v14549_v25, %v6081_v52 }
 0x9d3   : > { %6235 = vmatmul.f32.gmra.mxu2 %v14438_v14  ;;  %v14612_v14 = vpop.f32.mrf.mxu1 }
 0x9d4   : > { %6128 = vmatmul.f32.gmra.mxu3 %v5762_v59  ;;  %v14618_v15 = vpop.permute.xlu2 %5663 }
 0x9d6   : > { %6303 = vmatmul.f32.gmra.mxu0 %v5809_v39  ;;  %6458 = vmatmul.f32.gmra.mxu1 %v14361_v1  ;;  %v16848_v1 = vld [vmem:[#allocation75_spill] sm:$0xff]  ;;  %v14621_v39 = vpop.permute.xlu1 %5667 }
 0x9d7   : > { %v5793_v59 = vsel %vm16802_vm0, %v16848_v1, %v7875_v34  ;;  %v6084_v8 = vpop.f32.mrf.mxu3 }
 0x9db   : > { %6238 = vmatmul.f32.gmra.mxu2 %v5793_v59  ;;  %v14628_v34 = vpop.f32.mrf.mxu1  ;;  %v7889_v59 = vunpack.i.l.bf16 %v14367_v42  ;;  %v6085_v42 = vadd.f32 %v14549_v25, %v6084_v8 }
 0x9dc   : > { %6131 = vmatmul.f32.gmra.mxu3 %v14364_v18  ;;  %v8299_v18 = vld [vmem:[#allocation3 + $0x68] sm:$0xff]  ;;  %v14633_v3 = vpop.permute.xlu2 %5669 }
 0x9dd   : > { %v6191_v49 = vpop.f32.mrf.mxu2  ;;  %v5811_v13 = vsel %vm16850_vm3, %v8299_v18, %v14571_v62  ;;  %vm16854_vm3 = vmmov %vm16802_vm0 }
 0x9de   : > { %6306 = vmatmul.f32.gmra.mxu0 %v5810_v4  ;;  %6461 = vmatmul.f32.gmra.mxu1 %v5764_v29  ;;  %v14623_v30 = vadd.f32 %v6191_v49, %v6079_v51  ;;  %v7885_v4 = vunpack.i.h.bf16 %v14372_v41  ;;  %v14638_v48 = vpop.permute.xlu1 %5673  ;;  %v8301_v41 = vld [vmem:[#allocation3 + $0xef] sm:$0xff] }
 0x9df   : > { %v6087_v58 = vpop.f32.mrf.mxu3  ;;  %v5766_v51 = vsel %vm16853_vm2, %v8301_v41, %v7889_v59  ;;  %vm16857_vm2 = vmmov %vm16802_vm0 }
 0x9e0   : > { %v6088_v8 = vadd.f32 %v14549_v25, %v6087_v58 }
 0x9e3   : > { %6241 = vmatmul.f32.gmra.mxu2 %v14461_v63  ;;  %v8300_v63 = vld [vmem:[#allocation3 + $0x70] sm:$0xff]  ;;  %v14646_v18 = vpop.f32.mrf.mxu1 }
 0x9e4   : > { %6134 = vmatmul.f32.gmra.mxu3 %v5764_v29  ;;  %v5812_v29 = vsel %vm16851_vm8, %v8300_v63, %v5648_v47  ;;  %v14650_v47 = vpop.permute.xlu2 %5675  ;;  %v7895_v63 = vunpack.i.h.bf16 %v14413_v16  ;;  %vm16855_vm8 = vmmov %vm16802_vm0  ;;  %v8304_v16 = vld [vmem:[#allocation3 + $0xff] sm:$0xff] }
 0x9e6   : > { %6309 = vmatmul.f32.gmra.mxu0 %v5811_v13  ;;  %6464 = vmatmul.f32.gmra.mxu1 %v14470_v33  ;;  %v6194_v1 = vpop.f32.mrf.mxu2  ;;  %v16852_v33 = vld [vmem:[#allocation42_spill] sm:$0xff] }
 0x9e7   : > { %v14636_v62 = vadd.f32 %v6194_v1, %v6082_v40  ;;  %v5795_v52 = vsel %vm16802_vm0, %v16852_v33, %v7885_v4  ;;  %v8302_v1 = vld [vmem:[#allocation3 + $0x78] sm:$0xff]  ;;  %v14654_v4 = vpop.permute.xlu1 %5679  ;;  %v7899_v33 = vunpack.i.l.bf16 %v14404_v61 }
 0x9e9   : > { %v5768_v61 = vsel %vm16857_vm2, %v8304_v16, %v7899_v33  ;;  %v8306_v33 = vld [vmem:[#allocation3 + $0x107] sm:$0xff]  ;;  %vm16862_vm2 = vmmov %vm16802_vm0 }
 0x9eb   : > { %6244 = vmatmul.f32.gmra.mxu2 %v5795_v52  ;;  %v14663_v41 = vpop.f32.mrf.mxu1 }
 0x9ec   : > { %6137 = vmatmul.f32.gmra.mxu3 %v14473_v37  ;;  %v5813_v37 = vsel %vm16854_vm3, %v8302_v1, %v14573_v45  ;;  %v8303_v45 = vld [vmem:[#allocation3 + $0x80] sm:$0xff]  ;;  %vm16858_vm3 = vmmov %vm16802_vm0 }
 0x9ee   : > { %6312 = vmatmul.f32.gmra.mxu0 %v5812_v29  ;;  %6467 = vmatmul.f32.gmra.mxu1 %v5766_v51  ;;  %v6197_v13 = vpop.f32.mrf.mxu2 }
 0x9ef   : > { %v6090_v49 = vpop.f32.mrf.mxu3  ;;  %v14648_v40 = vadd.f32 %v6197_v13, %v6085_v42  ;;  %v14673_v42 = vpop.permute.xlu1 %7912 }
 0x9f0   : > { %v5654_v13 = vpop.permute.xlu0 %5653  ;;  %v6091_v1 = vadd.f32 %v14549_v25, %v6090_v49 }
 0x9f3   : > { %6247 = vmatmul.f32.gmra.mxu2 %v14401_v28  ;;  %v14667_v28 = vpop.permute.xlu2 %5681 }
 0x9f4   : > { %6140 = vmatmul.f32.gmra.mxu3 %v5766_v51  ;;  %v5814_v51 = vsel %vm16855_vm8, %v8303_v45, %v14583_v60  ;;  %vm16859_vm8 = vmmov %vm16802_vm0 }
 0x9f6   : > { %6315 = vmatmul.f32.gmra.mxu0 %v5813_v37  ;;  %6470 = vmatmul.f32.gmra.mxu1 %v14502_v5  ;;  %v6200_v29 = vpop.f32.mrf.mxu2  ;;  %v16856_v5 = vld [vmem:[#allocation79_spill] sm:$0xff] }
 0x9f7   : > { %v6093_v59 = vpop.f32.mrf.mxu3  ;;  %v14661_v52 = vadd.f32 %v6200_v29, %v6088_v8  ;;  %v5797_v58 = vsel %vm16802_vm0, %v16856_v5, %v7895_v63  ;;  %v7915_v8 = vunpack.i.h.bf16 %v14673_v42  ;;  %v14680_v63 = vpop.f32.mrf.mxu1 }
 0x9f8   : > { %v6094_v16 = vadd.f32 %v14549_v25, %v6093_v59  ;;  %v5936_v59 = vld [vmem:[%s15208_s7 + $0x238] sm:$0xff] }
 0x9f9   : > { %6497 = vmatpush.msrb.mxu3 %v5936_v59 }
 0x9fb   : > { %6250 = vmatmul.f32.gmra.mxu2 %v5797_v58  ;;  %v14686_v5 = vpop.permute.xlu2 %7917  ;;  %v7904_v58 = vunpack.i.l.bf16 %v14418_v55 }
 0x9fc   : > { %6143 = vmatmul.f32.gmra.mxu3 %v14505_v43  ;;  %v8305_v43 = vld [vmem:[#allocation3 + $0x88] sm:$0xff] }
 0x9fd   : > { %v5815_v45 = vsel %vm16858_vm3, %v8305_v43, %v5654_v13  ;;  %v7920_v43 = vunpack.i.h.bf16 %v14686_v5  ;;  %vm16863_vm3 = vmmov %vm16802_vm0 }
 0x9fe   : > { %6318 = vmatmul.f32.gmra.mxu0 %v5814_v51  ;;  %6473 = vmatmul.f32.gmra.mxu1 %v5768_v61  ;;  %v6203_v60 = vpop.f32.mrf.mxu2  ;;  %v5297_v51 = vsel %vm16813_vm4, %v8306_v33, 0.0  ;;  %vm16860_vm4 = vmmov %vm16802_vm0 }
 0x9ff   : > { %v6096_v37 = vpop.f32.mrf.mxu3  ;;  %v14677_v29 = vadd.f32 %v6203_v60, %v6091_v1  ;;  %v5861_v49 = vsel %vm16859_vm8, %v5297_v51, %v7915_v8  ;;  %v5267_v1 = vld [vmem:[#allocation3 + $0x117] sm:$0xff]  ;;  %v7905_v60 = vunpack.i.h.bf16 %v14418_v55  ;;  %v16861_v55 = vld [vmem:[#allocation94_spill] sm:$0xff]  ;;  %vm16865_vm8 = vmmov %vm16802_vm0 }
 0xa00   : > { %v5299_v8 = vsel %vm16818_vm10, %v5267_v1, 0.0  ;;  %vm16864_vm10 = vmmov %vm16802_vm0 }
 0xa01   : > { %v5863_v33 = vsel %vm16802_vm0, %v5299_v8, %v7904_v58  ;;  %v5799_v51 = vsel %vm16862_vm2, %v16861_v55, %v7905_v60  ;;  %v6097_v58 = vadd.f32 %v14549_v25, %v6096_v37  ;;  %v5268_v8 = vld [vmem:[#allocation3 + $0x11f] sm:$0xff]  ;;  %vm16867_vm2 = vcmask 261120  }
 0xa02   : > { %v5931_v55 = vld [vmem:[%s15208_s7 + $0x210] sm:$0xff] }
 0xa03   : > { %6253 = vmatmul.f32.gmra.mxu2 %v14511_v31 }
 0xa04   : > { %6146 = vmatmul.f32.gmra.mxu3 %v5768_v61 }
 0xa06   : > { %6321 = vmatmul.f32.gmra.mxu0 %v5815_v45  ;;  %6476 = vmatmul.f32.gmra.mxu1 %v5861_v49  ;;  %v6206_v61 = vpop.f32.mrf.mxu2  ;;  %v8307_v45 = vld [vmem:[#allocation3 + $0x90] sm:$0xff]  ;;  %v5935_v49 = vld [vmem:[%s15208_s7 + $0x230] sm:$0xff] }
 0xa07   : > { %v6099_v13 = vpop.f32.mrf.mxu3  ;;  %v14692_v6 = vadd.f32 %v6206_v61, %v6094_v16  ;;  %v5816_v31 = vsel %vm16860_vm4, %v8307_v45, %v14586_v56  ;;  %v8308_v56 = vld [vmem:[#allocation3 + $0x10f] sm:$0xff]  ;;  %v14708_v16 = vpop.f32.mrf.mxu1  ;;  %6498 = vmatpush.msrb.mxu3 %v5935_v49  ;;  %v7909_v61 = vunpack.i.l.bf16 %v14454_v50  ;;  %vm16866_vm4 = vmmov %vm16802_vm0 }
 0xa08   : > { %v5862_v22 = vsel %vm16863_vm3, %v8308_v56, %v7920_v43  ;;  %v5933_v43 = vld [vmem:[%s15208_s7 + $0x220] sm:$0xff]  ;;  %v5932_v50 = vld [vmem:[%s15208_s7 + $0x218] sm:$0xff]  ;;  %vm16868_vm3 = vmmov %vm16802_vm0 }
 0xa09   : > { %v5864_v59 = vsel %vm16865_vm8, %v5268_v8, %v7909_v61  ;;  %v8310_v61 = vld [vmem:[#allocation3 + $0xa0] sm:$0xff]  ;;  %vm16871_vm8 = vmmov %vm16802_vm0 }
 0xa0b   : > { %6256 = vmatmul.f32.gmra.mxu2 %v5799_v51  ;;  %v5660_v51 = vpop.permute.xlu0 %5659 }
 0xa0c   : > { %6482 = vmatmul.f32.vlgmr.msra.gmra.mxu3 %v5863_v33  ;;  %v8309_v33 = vld [vmem:[#allocation3 + $0x98] sm:$0xff] }
 0xa0d   : > { %v5817_v37 = vsel %vm16864_vm10, %v8309_v33, %v14596_v2  ;;  %v6100_v2 = vadd.f32 %v14549_v25, %v6099_v13  ;;  %v8311_v13 = vld [vmem:[#allocation3 + $0x29] sm:$0xff] }
 0xa0e   : > { %6324 = vmatmul.f32.gmra.mxu0 %v5816_v31  ;;  %6479 = vmatmul.f32.gmra.mxu1 %v5862_v22  ;;  %v6209_v60 = vpop.f32.mrf.mxu2  ;;  %v5934_v31 = vld [vmem:[%s15208_s7 + $0x228] sm:$0xff] }
 0xa0f   : > { %v6102_v1 = vpop.f32.mrf.mxu3  ;;  %v14712_v45 = vadd.f32 %v6209_v60, %v6097_v58  ;;  %6499 = vmatpush.msrb.mxu3 %v5934_v31  ;;  %v5930_v58 = vld [vmem:[%s15208_s7 + $0x208] sm:$0xff]  ;;  %v5818_v60 = vsel %vm16866_vm4, %v8310_v61, %v5660_v51  ;;  %v8312_v31 = vld [vmem:[%s8585_s14] sm:$0xff]  ;;  %vm16872_vm4 = vmmov %vm16867_vm2 }
 0xa10   : > { %v16869_v51 = vld [vmem:[#allocation43_spill] sm:$0xff] }
 0xa11   : > { %6500 = vmatpush.msrb.mxu3 %v5933_v43  ;;  %v6103_v43 = vadd.f32 %v14549_v25, %v6102_v1  ;;  %vm16870_vm10 = vnez %v16869_v51 }
 0xa13   : > { %6259 = vmatmul.f32.gmra.mxu2 %v14531_v21  ;;  %6501 = vmatpush.msrb.mxu3 %v5932_v50  ;;  %v5929_v21 = vld [vmem:[%s15208_s7 + $0x200] sm:$0xff]  ;;  %v8313_v50 = vld [vmem:[#allocation3 + $0xa8] sm:$0xff] }
 0xa14   : > { %6485 = vmatmul.f32.gmra.mxu3 %v5864_v59  ;;  %v5819_v59 = vsel %vm16868_vm3, %v8313_v50, %v14598_v57  ;;  %vm16874_vm3 = vmmov %vm16872_vm4 }
 0xa15   : > { %6502 = vmatpush.msrb.mxu3 %v5931_v55  ;;  %v8314_v55 = vld [vmem:[#allocation3 + $0x31] sm:$0xff] }
 0xa16   : > { %6327 = vmatmul.f32.gmra.mxu0 %v5817_v37  ;;  %v6212_v56 = vpop.f32.mrf.mxu2 }
 0xa17   : > { %v6105_v49 = vpop.f32.mrf.mxu3  ;;  %v14731_v22 = vadd.f32 %v6212_v56, %v6100_v2  ;;  %6503 = vmatpush.msrb.mxu3 %v5930_v58  ;;  %v5306_v2 = vsel %vm16870_vm10, %v8314_v55, 0.0  ;;  %v8315_v56 = vld [vmem:[%s8585_s14 + $0x8] sm:$0xff]  ;;  %vm16875_vm10 = vmmov %vm16802_vm0 }
 0xa18   : > { %v6106_v1 = vadd.f32 %v14549_v25, %v6105_v49  ;;  %v8319_v55 = vld [vmem:[#allocation3 + $0xb8] sm:$0xff] }
 0xa19   : > { %6504 = vmatpush.msrb.mxu3 %v5929_v21 }
 0xa1b   : > { %7180 = vmatmul.msk.f32.vlgmr.msrb.gmra.mxu2 %vm16867_vm2, %v8312_v31  ;;  %vm16873_vm2 = vmmov %vm16802_vm0  ;;  %v8318_v31 = vld [vmem:[%s8585_s14 + $0x10] sm:$0xff] }
 0xa1c   : > { %7148 = vmatmul.msk.f32.vlgmr.msrb.gmra.mxu3 %vm16802_vm0, %v8311_v13  ;;  %v8317_v13 = vld [vmem:[#allocation3 + $0x39] sm:$0xff] }
 0xa1e   : > { %6330 = vmatmul.f32.gmra.mxu0 %v5818_v60  ;;  %v6215_v33 = vpop.f32.mrf.mxu2  ;;  %v8316_v60 = vld [vmem:[#allocation3 + $0xb0] sm:$0xff] }
 0xa1f   : > { %v6108_v8 = vpop.f32.mrf.mxu3  ;;  %v14744_v37 = vadd.f32 %v6215_v33, %v6103_v43  ;;  %v5820_v57 = vsel %vm16802_vm0, %v8316_v60, %v14618_v15  ;;  %v5666_v43 = vpop.permute.xlu0 %5665  ;;  %v8320_v15 = vld [vmem:[#allocation3 + $0x41] sm:$0xff] }
 0xa20   : > { %v6109_v33 = vadd.f32 %v14549_v25, %v6108_v8  ;;  %v5821_v51 = vsel %vm16875_vm10, %v8319_v55, %v5666_v43  ;;  %v8323_v43 = vld [vmem:[#allocation3 + $0x49] sm:$0xff] }
 0xa23   : > { %7181 = vmatmul.msk.f32.gmra.mxu2 %vm16872_vm4, %v8315_v56  ;;  %vm16878_vm4 = vmmov %vm16802_vm0 }
 0xa24   : > { %7149 = vmatmul.msk.f32.gmra.mxu3 %vm16871_vm8, %v5306_v2  ;;  %v16876_v2 = vld [vmem:[#allocation41_spill] sm:$0xff]  ;;  %vm16879_vm0 = vmmov %vm16874_vm3 }
 0xa25   : > { %vm16877_vm8 = vnez %v16876_v2  ;;  %vm16881_vm10 = vmmov %vm16879_vm0 }
 0xa26   : > { %6333 = vmatmul.f32.gmra.mxu0 %v5819_v59  ;;  %v6218_v21 = vpop.f32.mrf.mxu2  ;;  %v5308_v56 = vsel %vm16877_vm8, %v8320_v15, 0.0  ;;  %v8325_v15 = vld [vmem:[#allocation3 + $0xc8] sm:$0xff]  ;;  %vm16882_vm8 = vmmov %vm16873_vm2 }
 0xa27   : > { %v6111_v58 = vpop.f32.mrf.mxu3  ;;  %v14754_v61 = vadd.f32 %v6218_v21, %v6106_v1  ;;  %v8321_v1 = vld [vmem:[%s8585_s14 + $0x18] sm:$0xff]  ;;  %v5823_v2 = vsel %vm16882_vm8, %v8325_v15, %v14633_v3  ;;  %v8328_v3 = vld [vmem:[#allocation3 + $0xd0] sm:$0xff]  ;;  %v8330_v15 = vld [vmem:[%s8585_s14 + $0x30] sm:$0xff] }
 0xa28   : > { %v6112_v8 = vadd.f32 %v14549_v25, %v6111_v58 }
 0xa2b   : > { %7182 = vmatmul.msk.f32.gmra.mxu2 %vm16874_vm3, %v8318_v31  ;;  %vm16880_vm3 = vmmov %vm16873_vm2 }
 0xa2c   : > { %7150 = vmatmul.msk.f32.gmra.mxu3 %vm16873_vm2, %v8317_v13  ;;  %v8322_v13 = vld [vmem:[#allocation3 + $0xc0] sm:$0xff] }
 0xa2d   : > { %v5822_v31 = vsel %vm16873_vm2, %v8322_v13, %v14621_v39  ;;  %v8326_v39 = vld [vmem:[#allocation3 + $0x51] sm:$0xff] }
 0xa2e   : > { %6336 = vmatmul.f32.gmra.mxu0 %v5820_v57  ;;  %v6221_v50 = vpop.f32.mrf.mxu2 }
 0xa2f   : > { %v6114_v49 = vpop.f32.mrf.mxu3  ;;  %v14762_v59 = vadd.f32 %v6221_v50, %v6109_v33  ;;  %v8324_v33 = vld [vmem:[%s8585_s14 + $0x20] sm:$0xff] }
 0xa30   : > { %v6115_v50 = vadd.f32 %v14549_v25, %v6114_v49  ;;  %v5672_v49 = vpop.permute.xlu0 %5671 }
 0xa33   : > { %7183 = vmatmul.msk.f32.gmra.mxu2 %vm16879_vm0, %v8321_v1  ;;  %vm16885_vm0 = vmmov %vm16873_vm2 }
 0xa34   : > { %7151 = vmatmul.msk.f32.gmra.mxu3 %vm16878_vm4, %v5308_v56  ;;  %v16883_v56 = vld [vmem:[#allocation36_spill] sm:$0xff]  ;;  %vm16886_vm2 = vmmov %vm16881_vm10 }
 0xa35   : > { %vm16884_vm4 = vnez %v16883_v56  ;;  %vm16889_vm8 = vmmov %vm16886_vm2 }
 0xa36   : > { %6339 = vmatmul.f32.gmra.mxu0 %v5821_v51  ;;  %v6224_v60 = vpop.f32.mrf.mxu2  ;;  %v5310_v1 = vsel %vm16884_vm4, %v8326_v39, 0.0  ;;  %vm16891_vm4 = vmmov %vm16885_vm0 }
 0xa37   : > { %v6117_v21 = vpop.f32.mrf.mxu3  ;;  %v14771_v57 = vadd.f32 %v6224_v60, %v6112_v8  ;;  %v14785_v8 = vpop.f32.mrf.mxu0  ;;  %v8327_v60 = vld [vmem:[%s8585_s14 + $0x28] sm:$0xff] }
 0xa38   : > { %v6118_v13 = vadd.f32 %v14549_v25, %v6117_v21 }
 0xa3b   : > { %7184 = vmatmul.msk.f32.gmra.mxu2 %vm16881_vm10, %v8324_v33  ;;  %vm16888_vm10 = vmmov %vm16885_vm0 }
 0xa3c   : > { %7152 = vmatmul.msk.f32.gmra.mxu3 %vm16880_vm3, %v8323_v43  ;;  %vm16887_vm3 = vmmov %vm16885_vm0 }
 0xa3e   : > { %6342 = vmatmul.f32.gmra.mxu0 %v5822_v31  ;;  %v6227_v58 = vpop.f32.mrf.mxu2 }
 0xa3f   : > { %v6120_v55 = vpop.f32.mrf.mxu3  ;;  %v14779_v51 = vadd.f32 %v6227_v58, %v6115_v50  ;;  %v5824_v50 = vsel %vm16887_vm3, %v8328_v3, %v5672_v49  ;;  %v8329_v58 = vld [vmem:[#allocation3 + $0x59] sm:$0xff] }
 0xa40   : > { %v6121_v39 = vadd.f32 %v14549_v25, %v6120_v55 }
 0xa43   : > { %7185 = vmatmul.msk.f32.gmra.mxu2 %vm16886_vm2, %v8327_v60  ;;  %v8331_v60 = vld [vmem:[#allocation3 + $0xd8] sm:$0xff]  ;;  %vm16894_vm2 = vmmov %vm16887_vm3 }
 0xa44   : > { %7153 = vmatmul.msk.f32.gmra.mxu3 %vm16885_vm0, %v5310_v1  ;;  %v5825_v49 = vsel %vm16891_vm4, %v8331_v60, %v14638_v48  ;;  %vm16895_vm3 = vmmov %vm16889_vm8  ;;  %v8334_v48 = vld [vmem:[#allocation3 + $0xe0] sm:$0xff] }
 0xa45   : > { %vm16899_vm4 = vmmov %vm16895_vm3 }
 0xa46   : > { %6345 = vmatmul.f32.gmra.mxu0 %v5823_v2  ;;  %v6230_v43 = vpop.f32.mrf.mxu2  ;;  %v14797_v2 = vpop.f32.mrf.mxu0 }
 0xa47   : > { %v6123_v31 = vpop.f32.mrf.mxu3  ;;  %v14791_v33 = vadd.f32 %v6230_v43, %v6118_v13  ;;  %v8332_v13 = vld [vmem:[#allocation3 + $0x61] sm:$0xff] }
 0xa48   : > { %v16892_v43 = vld [vmem:[#allocation25_spill] sm:$0xff]  ;;  %v6124_v55 = vadd.f32 %v14549_v25, %v6123_v31 }
 0xa49   : > { %vm16893_vm0 = vnez %v16892_v43  ;;  %v5678_v43 = vpop.permute.xlu0 %5677 }
 0xa4a   : > { %v5312_v3 = vsel %vm16893_vm0, %v8332_v13, 0.0  ;;  %v8336_v13 = vld [vmem:[%s8585_s14 + $0x40] sm:$0xff]  ;;  %vm16901_vm0 = vmmov %vm16894_vm2 }
 0xa4b   : > { %7186 = vmatmul.msk.f32.gmra.mxu2 %vm16889_vm8, %v8330_v15  ;;  %vm16898_vm8 = vmmov %vm16894_vm2 }
 0xa4c   : > { %7154 = vmatmul.msk.f32.gmra.mxu3 %vm16888_vm10, %v8329_v58  ;;  %vm16897_vm10 = vmmov %vm16894_vm2 }
 0xa4d   : > { %v5826_v60 = vsel %vm16897_vm10, %v8334_v48, %v14650_v47  ;;  %v8338_v47 = vld [vmem:[#allocation3 + $0x71] sm:$0xff]  ;;  %vm16905_vm10 = vmmov %vm16899_vm4 }
 0xa4e   : > { %6348 = vmatmul.f32.gmra.mxu0 %v5824_v50  ;;  %v6233_v56 = vpop.f32.mrf.mxu2  ;;  %v8333_v50 = vld [vmem:[%s8585_s14 + $0x38] sm:$0xff]  ;;  %v16902_v48 = vld [vmem:[#allocation28_spill] sm:$0xff] }
 0xa4f   : > { %v6126_v21 = vpop.f32.mrf.mxu3  ;;  %v14800_v1 = vadd.f32 %v6233_v56, %v6121_v39  ;;  %v14810_v39 = vpop.f32.mrf.mxu0 }
 0xa50   : > { %v6127_v31 = vadd.f32 %v14549_v25, %v6126_v21 }
 0xa51   : > { %16890 = vst [vmem:[#allocation96_spill] sm:$0xff] %v14800_v1 }
 0xa53   : > { %7187 = vmatmul.msk.f32.gmra.mxu2 %vm16895_vm3, %v8333_v50  ;;  %vm16904_vm3 = vmmov %vm16901_vm0 }
 0xa54   : > { %7155 = vmatmul.msk.f32.gmra.mxu3 %vm16894_vm2, %v5312_v3  ;;  %vm16903_vm2 = vnez %v16902_v48  ;;  %v8342_v48 = vld [vmem:[%s8585_s14 + $0x50] sm:$0xff] }
 0xa56   : > { %6351 = vmatmul.f32.gmra.mxu0 %v5825_v49  ;;  %v6236_v15 = vpop.f32.mrf.mxu2  ;;  %v8335_v49 = vld [vmem:[#allocation3 + $0x69] sm:$0xff] }
 0xa57   : > { %v6129_v58 = vpop.f32.mrf.mxu3  ;;  %v14812_v56 = vadd.f32 %v6236_v15, %v6124_v55  ;;  %v8337_v55 = vld [vmem:[#allocation3 + $0xe8] sm:$0xff] }
 0xa58   : > { %v5827_v15 = vsel %vm16901_vm0, %v8337_v55, %v5678_v43  ;;  %v6130_v21 = vadd.f32 %v14549_v25, %v6129_v58  ;;  %v8340_v43 = vld [vmem:[#allocation3 + $0xf0] sm:$0xff] }
 0xa59   : > { %16896 = vst [vmem:[#allocation74_spill] sm:$0xff] %v14812_v56  ;;  %v14823_v56 = vpop.f32.mrf.mxu0 }
 0xa5b   : > { %7188 = vmatmul.msk.f32.gmra.mxu2 %vm16899_vm4, %v8336_v13  ;;  %vm16908_vm4 = vmmov %vm16901_vm0 }
 0xa5c   : > { %7156 = vmatmul.msk.f32.gmra.mxu3 %vm16898_vm8, %v8335_v49  ;;  %v8339_v49 = vld [vmem:[%s8585_s14 + $0x48] sm:$0xff]  ;;  %vm16907_vm8 = vmmov %vm16901_vm0 }
 0xa5d   : > { %v5828_v55 = vsel %vm16907_vm8, %v8340_v43, %v14654_v4  ;;  %vm16909_vm0 = vmmov %vm16905_vm10  ;;  %v8344_v43 = vld [vmem:[#allocation3 + $0x81] sm:$0xff] }
 0xa5e   : > { %6354 = vmatmul.f32.gmra.mxu0 %v5826_v60  ;;  %v6239_v50 = vpop.f32.mrf.mxu2  ;;  %v5314_v60 = vsel %vm16903_vm2, %v8338_v47, 0.0  ;;  %v8341_v47 = vld [vmem:[#allocation3 + $0x79] sm:$0xff]  ;;  %vm16911_vm2 = vmmov %vm16904_vm3 }
 0xa5f   : > { %v6132_v3 = vpop.f32.mrf.mxu3  ;;  %v14820_v1 = vadd.f32 %v6239_v50, %v6127_v31  ;;  %vm16914_vm8 = vmmov %vm16909_vm0 }
 0xa60   : > { %v6133_v58 = vadd.f32 %v14549_v25, %v6132_v3  ;;  %v5684_v3 = vpop.permute.xlu0 %5683 }
 0xa61   : > { %16900 = vst [vmem:[#allocation97_spill] sm:$0xff] %v14820_v1 }
 0xa63   : > { %7189 = vmatmul.msk.f32.gmra.mxu2 %vm16905_vm10, %v8339_v49  ;;  %vm16913_vm10 = vmmov %vm16911_vm2 }
 0xa64   : > { %7157 = vmatmul.msk.f32.gmra.mxu3 %vm16904_vm3, %v5314_v60  ;;  %vm16912_vm3 = vnez %v16745_v23  ;;  %v8347_v23 = vld [vmem:[#allocation3 + $0x89] sm:$0xff] }
 0xa66   : > { %6357 = vmatmul.f32.gmra.mxu0 %v5827_v15  ;;  %v6242_v31 = vpop.f32.mrf.mxu2  ;;  %v14835_v15 = vpop.f32.mrf.mxu0 }
 0xa67   : > { %v6135_v13 = vpop.f32.mrf.mxu3  ;;  %v14831_v50 = vadd.f32 %v6242_v31, %v6130_v21  ;;  %v8343_v31 = vld [vmem:[#allocation3 + $0xf8] sm:$0xff] }
 0xa68   : > { %v5829_v4 = vsel %vm16911_vm2, %v8343_v31, %v14667_v28  ;;  %v8346_v28 = vld [vmem:[#allocation3 + $0x100] sm:$0xff] }
 0xa69   : > { %16906 = vst [vmem:[#allocation17_spill] sm:$0xff] %v14831_v50 }
 0xa6b   : > { %7190 = vmatmul.msk.f32.gmra.mxu2 %vm16909_vm0, %v8342_v48  ;;  %vm16916_vm0 = vmmov %vm16911_vm2 }
 0xa6c   : > { %7158 = vmatmul.msk.f32.gmra.mxu3 %vm16908_vm4, %v8341_v47  ;;  %v8345_v47 = vld [vmem:[%s8585_s14 + $0x58] sm:$0xff]  ;;  %vm16915_vm4 = vmmov %vm16911_vm2 }
 0xa6d   : > { %v5830_v31 = vsel %vm16915_vm4, %v8346_v28, %v5684_v3  ;;  %vm16917_vm2 = vmmov %vm16914_vm8  ;;  %v8349_v28 = vld [vmem:[#allocation3 + $0x91] sm:$0xff] }
 0xa6e   : > { %6360 = vmatmul.f32.gmra.mxu0 %v5828_v55  ;;  %v6245_v49 = vpop.f32.mrf.mxu2  ;;  %v5316_v55 = vsel %vm16912_vm3, %v8344_v43, 0.0  ;;  %v14850_v48 = vpop.f32.mrf.mxu0  ;;  %v7914_v43 = vunpack.i.l.bf16 %v14673_v42  ;;  %vm16919_vm3 = vmmov %vm16916_vm0  ;;  %v8350_v42 = vld [vmem:[%s8585_s14 + $0x68] sm:$0xff] }
 0xa6f   : > { %v6138_v60 = vpop.f32.mrf.mxu3  ;;  %v14841_v21 = vadd.f32 %v6245_v49, %v6133_v58  ;;  %v6136_v58 = vadd.f32 %v14549_v25, %v6135_v13  ;;  %vm16922_vm4 = vmmov %vm16916_vm0 }
 0xa71   : > { %16910 = vst [vmem:[#allocation81_spill] sm:$0xff] %v14841_v21 }
 0xa73   : > { %7191 = vmatmul.msk.f32.gmra.mxu2 %vm16914_vm8, %v8345_v47  ;;  %vm16921_vm8 = vmmov %vm16917_vm2 }
 0xa74   : > { %7159 = vmatmul.msk.f32.gmra.mxu3 %vm16913_vm10, %v5316_v55  ;;  %v6139_v55 = vadd.f32 %v14549_v25, %v6138_v60  ;;  %vm16920_vm10 = vmmov %vm16916_vm0  ;;  %v7919_v60 = vunpack.i.l.bf16 %v14686_v5 }
 0xa76   : > { %6363 = vmatmul.f32.gmra.mxu0 %v5829_v4  ;;  %v6248_v21 = vpop.f32.mrf.mxu2  ;;  %v8348_v4 = vld [vmem:[%s8585_s14 + $0x60] sm:$0xff]  ;;  %v14861_v1 = vpop.f32.mrf.mxu0 }
 0xa77   : > { %v6141_v49 = vpop.f32.mrf.mxu3  ;;  %v14853_v50 = vadd.f32 %v6248_v21, %v6136_v58  ;;  %v16918_v58 = vld [vmem:[#allocation80_spill] sm:$0xff] }
 0xa78   : > { %v5831_v3 = vsel %vm16919_vm3, %v16918_v58, %v7914_v43  ;;  %v5832_v43 = vsel %vm16922_vm4, %v14308_v38, %v7919_v60  ;;  %v8354_v60 = vld [vmem:[%s8585_s14 + $0x78] sm:$0xff] }
 0xa7b   : > { %7192 = vmatmul.msk.f32.gmra.mxu2 %vm16917_vm2, %v8348_v4 }
 0xa7c   : > { %7160 = vmatmul.msk.f32.gmra.mxu3 %vm16916_vm0, %v8347_v23  ;;  %v6142_v23 = vadd.f32 %v14549_v25, %v6141_v49 }
 0xa7e   : > { %6366 = vmatmul.f32.gmra.mxu0 %v5830_v31  ;;  %v6251_v47 = vpop.f32.mrf.mxu2  ;;  %v5318_v31 = vsel %vm16750_vm14, %v8349_v28, 0.0  ;;  %v14878_v58 = vpop.f32.mrf.mxu0  ;;  %vm16923_vm14 = vmmov %vm16916_vm0 }
 0xa7f   : > { %v6144_v13 = vpop.f32.mrf.mxu3  ;;  %v14863_v21 = vadd.f32 %v6251_v47, %v6139_v55  ;;  %vm16924_vm0 = vmmov %vm16917_vm2 }
 0xa80   : > { %v6145_v5 = vadd.f32 %v14549_v25, %v6144_v13  ;;  %vm16925_vm2 = vmmov %vm16919_vm3 }
 0xa81   : > { %vm16926_vm3 = vmmov %vm16924_vm0 }
 0xa82   : > { %vm16930_vm4 = vmmov %vm16924_vm0 }
 0xa83   : > { %7193 = vmatmul.msk.f32.gmra.mxu2 %vm16921_vm8, %v8350_v42  ;;  %v8353_v42 = vld [vmem:[#allocation3 + $0xa1] sm:$0xff]  ;;  %vm16929_vm8 = vmmov %vm16925_vm2 }
 0xa84   : > { %7161 = vmatmul.msk.f32.gmra.mxu3 %vm16920_vm10, %v5318_v31  ;;  %v5320_v38 = vsel %vm16810_vm11, %v8353_v42, 0.0  ;;  %vm16927_vm11 = vmmov %vm16925_vm2 }
 0xa85   : > { %vm16928_vm10 = vmmov %vm16924_vm0 }
 0xa86   : > { %6369 = vmatmul.f32.gmra.mxu0 %v5831_v3  ;;  %v6254_v55 = vpop.f32.mrf.mxu2  ;;  %v8352_v3 = vld [vmem:[%s8585_s14 + $0x70] sm:$0xff] }
 0xa87   : > { %v6147_v4 = vpop.f32.mrf.mxu3  ;;  %v14874_v47 = vadd.f32 %v6254_v55, %v6142_v23  ;;  %v6055_v23 = vadd.f32 %v14549_v25, %v14407_v19  ;;  %v6058_v19 = vadd.f32 %v14549_v25, %v14448_v26  ;;  %v8357_v26 = vld [vmem:[#allocation3 + $0xb1] sm:$0xff] }
 0xa88   : > { %v6148_v13 = vadd.f32 %v14549_v25, %v6147_v4  ;;  %v14908_v4 = vpop.f32.mrf.mxu1 }
 0xa89   : > { %v6168_v11 = vadd.f32 %v14499_v9, %v6055_v23  ;;  %v6171_v9 = vadd.f32 %v14528_v35, %v6058_v19  ;;  %v14917_v23 = vld [vmem:[%s15211_s10] ss:$0 sm:$0xff] }
 0xa8b   : > { %7194 = vmatmul.msk.f32.gmra.mxu2 %vm16924_vm0, %v8352_v3  ;;  %v6281_v3 = vadd.f32 %v14785_v8, %v6168_v11  ;;  %v5322_v11 = vsel %vm16825_vm13, %v8357_v26, 0.0  ;;  %vm16932_vm13 = vmmov %vm16925_vm2 }
 0xa8c   : > { %7162 = vmatmul.msk.f32.gmra.mxu3 %vm16923_vm14, %v8351_v17  ;;  %vm16931_vm14 = vmmov %vm16925_vm2 }
 0xa8d   : > { %v6394_v42 = vadd.f32 %v14612_v14, %v6281_v3  ;;  %v8358_v14 = vld [vmem:[%s8585_s14 + $0x88] sm:$0xff]  ;;  %v6061_v3 = vadd.f32 %v14549_v25, %v14497_v36 }
 0xa8e   : > { %6372 = vmatmul.f32.gmra.mxu0 %v5832_v43  ;;  %v6257_v28 = vpop.f32.mrf.mxu2  ;;  %v8359_v25 = vld [vmem:[#allocation3 + $0xb9] sm:$0xff] }
 0xa8f   : > { %v14884_v49 = vpop.f32.mrf.mxu3  ;;  %v14886_v31 = vadd.f32 %v6257_v28, %v6145_v5  ;;  %v8355_v5 = vld [vmem:[#allocation3 + $0xa9] sm:$0xff] }
 0xa90   : > { %v8356_v28 = vld [vmem:[%s8585_s14 + $0x80] sm:$0xff]  ;;  %v14934_v19 = vpop.f32.mrf.mxu1 }
 0xa93   : > { %7195 = vmatmul.msk.f32.gmra.mxu2 %vm16926_vm3, %v8354_v60  ;;  %vm16933_vm3 = vmmov %vm16925_vm2 }
 0xa94   : > { %7163 = vmatmul.msk.f32.gmra.mxu3 %vm16925_vm2, %v5320_v38 }
 0xa96   : > { %v6260_v55 = vpop.f32.mrf.mxu2 }
 0xa97   : > { %v14896_v43 = vadd.f32 %v6260_v55, %v6148_v13  ;;  %v14898_v17 = vpop.f32.mrf.mxu3  ;;  %v6284_v13 = vadd.f32 %v14797_v2, %v6171_v9  ;;  %v8360_v9 = vld [vmem:[%s8585_s14 + $0x90] sm:$0xff] }
 0xa98   : > { %v14946_v26 = vpop.f32.mrf.mxu1 }
 0xa99   : > { %v6397_v44 = vadd.f32 %v14628_v34, %v6284_v13 }
 0xa9b   : > { %7196 = vmatmul.msk.f32.gmra.mxu2 %vm16928_vm10, %v8356_v28  ;;  %v6174_v28 = vadd.f32 %v14542_v54, %v6061_v3  ;;  %vm16935_vm10 = vmmov %vm16925_vm2 }
 0xa9c   : > { %7164 = vmatmul.msk.f32.gmra.mxu3 %vm16927_vm11, %v8355_v5  ;;  %vm16934_vm11 = vmmov %vm16924_vm0 }
 0xa9e   : > { %v6719_v60 = vpop.f32.mrf.mxu2 }
 0xa9f   : > { %v6506_v38 = vpop.f32.mrf.mxu3 }
 0xaa0   : > { %v6507_v8 = vadd.f32 %v6506_v38, %v6394_v42  ;;  %v14936_v42 = vpop.f32.mrf.mxu0 }
 0xaa1   : > { %v6305_v32 = vadd.f32 %v14936_v42, %v14623_v30 }
 0xaa2   : > { %v6815_v55 = vadd.f32 %v6719_v60, %v6507_v8  ;;  %v6287_v60 = vadd.f32 %v14810_v39, %v6174_v28  ;;  %v6290_v39 = vadd.f32 %v14823_v56, %v14559_v7  ;;  %v6293_v28 = vadd.f32 %v14835_v15, %v14569_v27 }
 0xaa3   : > { %7197 = vmatmul.msk.f32.gmra.mxu2 %vm16930_vm4, %v8358_v14  ;;  %vm16938_vm4 = vmmov %vm16925_vm2 }
 0xaa4   : > { %7165 = vmatmul.msk.f32.gmra.mxu3 %vm16929_vm8, %v5322_v11  ;;  %v6851_v35 = vadd.f32 %v14917_v23, %v6815_v55  ;;  %v6400_v54 = vadd.f32 %v14646_v18, %v6287_v60  ;;  %v6403_v7 = vadd.f32 %v14663_v41, %v6290_v39  ;;  %v8364_v60 = vld [vmem:[%s8585_s14 + $0xa0] sm:$0xff]  ;;  %vm16937_vm8 = vmmov %vm16924_vm0  ;;  %v8366_v39 = vld [vmem:[%s8585_s14 + $0xa8] sm:$0xff] }
 0xaa6   : > { %6883 = vst.msk [vmem:[%s14928_s29] sm:$0xff] %vm16931_vm14, %v6851_v35  ;;  %v6722_v5 = vpop.f32.mrf.mxu2  ;;  %v8361_v35 = vld [vmem:[#allocation3 + $0xc1] sm:$0xff]  ;;  %vm16939_vm14 = vmmov %vm16925_vm2 }
 0xaa7   : > { %v6509_v2 = vpop.f32.mrf.mxu3  ;;  %v5324_v3 = vsel %vm16837_vm6, %v8361_v35, 0.0  ;;  %vm16936_vm6 = vmmov %vm16925_vm2 }
 0xaa8   : > { %v6510_v38 = vadd.f32 %v6509_v2, %v6397_v44  ;;  %v14950_v11 = vpop.f32.mrf.mxu0  ;;  %v8362_v44 = vld [vmem:[%s8585_s14 + $0x98] sm:$0xff] }
 0xaa9   : > { %v6308_v42 = vadd.f32 %v14950_v11, %v14636_v62 }
 0xaaa   : > { %v6816_v36 = vadd.f32 %v6722_v5, %v6510_v38  ;;  %v8363_v38 = vld [vmem:[#allocation3 + $0xc9] sm:$0xff] }
 0xaab   : > { %7198 = vmatmul.msk.f32.gmra.mxu2 %vm16924_vm0, %v8360_v9  ;;  %v6406_v9 = vadd.f32 %v14680_v63, %v6293_v28 }
 0xaac   : > { %7166 = vmatmul.msk.f32.gmra.mxu3 %vm16932_vm13, %v8359_v25  ;;  %v6852_v34 = vadd.f32 %v14917_v23, %v6816_v36  ;;  %v14966_v36 = vpop.f32.mrf.mxu1  ;;  %vm16940_vm13 = vmmov %vm16924_vm0 }
 0xaad   : > { %vm16941_vm0 = vmmov %vm16925_vm2  ;;  %v6421_v62 = vadd.f32 %v14966_v36, %v6308_v42 }
 0xaae   : > { %6884 = vst.msk [vmem:[%s14928_s29 + $0x8] sm:$0xff] %vm16925_vm2, %v6852_v34  ;;  %v6725_v13 = vpop.f32.mrf.mxu2  ;;  %vm16943_vm2 = vmmov %vm16937_vm8 }
 0xaaf   : > { %v6512_v8 = vpop.f32.mrf.mxu3 }
 0xab0   : > { %v6513_v55 = vadd.f32 %v6512_v8, %v6400_v54  ;;  %v14968_v25 = vpop.f32.mrf.mxu0  ;;  %v6296_v54 = vadd.f32 %v14850_v48, %v14579_v20 }
 0xab2   : > { %v6817_v14 = vadd.f32 %v6725_v13, %v6513_v55  ;;  %v8365_v13 = vld [vmem:[#allocation3 + $0xd1] sm:$0xff]  ;;  %v6409_v20 = vadd.f32 %v14708_v16, %v6296_v54 }
 0xab3   : > { %7199 = vmatmul.msk.f32.gmra.mxu2 %vm16934_vm11, %v8362_v44  ;;  %v5326_v55 = vsel %vm16770_vm12, %v8365_v13, 0.0  ;;  %v6299_v44 = vadd.f32 %v14861_v1, %v14593_v0  ;;  %vm16942_vm12 = vmmov %vm16941_vm0 }
 0xab4   : > { %7167 = vmatmul.msk.f32.gmra.mxu3 %vm16933_vm3, %v5324_v3  ;;  %v6853_v18 = vadd.f32 %v14917_v23, %v6817_v14  ;;  %v14982_v14 = vpop.f32.mrf.mxu1  ;;  %vm16944_vm3 = vmmov %vm16941_vm0 }
 0xab5   : > { %v6412_v16 = vadd.f32 %v14908_v4, %v6299_v44  ;;  %vm16945_vm11 = vmmov %vm16941_vm0 }
 0xab6   : > { %6885 = vst.msk [vmem:[%s14928_s29 + $0x10] sm:$0xff] %vm16935_vm10, %v6853_v18  ;;  %v6728_v2 = vpop.f32.mrf.mxu2  ;;  %vm16946_vm10 = vmmov %vm16943_vm2 }
 0xab7   : > { %v6515_v56 = vpop.f32.mrf.mxu3 }
 0xab8   : > { %v6516_v5 = vadd.f32 %v6515_v56, %v6403_v7  ;;  %v14984_v35 = vpop.f32.mrf.mxu0  ;;  %v8367_v7 = vld [vmem:[#allocation3 + $0xd9] sm:$0xff] }
 0xab9   : > { %v8368_v56 = vld [vmem:[%s8585_s14 + $0xb0] sm:$0xff] }
 0xaba   : > { %v6818_v10 = vadd.f32 %v6728_v2, %v6516_v5 }
 0xabb   : > { %7200 = vmatmul.msk.f32.gmra.mxu2 %vm16937_vm8, %v8364_v60  ;;  %vm16949_vm8 = vmmov %vm16943_vm2 }
 0xabc   : > { %7168 = vmatmul.msk.f32.gmra.mxu3 %vm16936_vm6, %v8363_v38  ;;  %v6854_v41 = vadd.f32 %v14917_v23, %v6818_v10  ;;  %v14998_v10 = vpop.f32.mrf.mxu1  ;;  %v6302_v38 = vadd.f32 %v14878_v58, %v14603_v24  ;;  %vm16947_vm6 = vmmov %vm16941_vm0 }
 0xabe   : > { %6886 = vst.msk [vmem:[%s14928_s29 + $0x18] sm:$0xff] %vm16938_vm4, %v6854_v41  ;;  %v6731_v15 = vpop.f32.mrf.mxu2  ;;  %v8369_v41 = vld [vmem:[#allocation3 + $0xe1] sm:$0xff]  ;;  %vm16950_vm4 = vmmov %vm16941_vm0 }
 0xabf   : > { %v6518_v27 = vpop.f32.mrf.mxu3 }
 0xac0   : > { %v6519_v34 = vadd.f32 %v6518_v27, %v6406_v9  ;;  %v15000_v0 = vpop.f32.mrf.mxu0  ;;  %v5328_v9 = vsel %vm16775_vm5, %v8369_v41, 0.0  ;;  %v8370_v27 = vld [vmem:[%s8585_s14 + $0xb8] sm:$0xff]  ;;  %vm16948_vm5 = vmmov %vm16941_vm0 }
 0xac1   : > { %v6317_v12 = vadd.f32 %v15000_v0, %v14677_v29 }
 0xac2   : > { %v6819_v8 = vadd.f32 %v6731_v15, %v6519_v34  ;;  %v6415_v15 = vadd.f32 %v14934_v19, %v6302_v38 }
 0xac3   : > { %7201 = vmatmul.msk.f32.gmra.mxu2 %vm16940_vm13, %v8366_v39  ;;  %v8372_v39 = vld [vmem:[%s8585_s14 + $0xc0] sm:$0xff]  ;;  %vm16952_vm13 = vmmov %vm16943_vm2 }
 0xac4   : > { %7169 = vmatmul.msk.f32.gmra.mxu3 %vm16939_vm14, %v5326_v55  ;;  %v6855_v63 = vadd.f32 %v14917_v23, %v6819_v8  ;;  %v15013_v54 = vpop.f32.mrf.mxu1  ;;  %v8371_v55 = vld [vmem:[#allocation3 + $0xe9] sm:$0xff]  ;;  %vm16951_vm14 = vmmov %vm16941_vm0 }
 0xac6   : > { %6887 = vst.msk [vmem:[%s14928_s29 + $0x20] sm:$0xff] %vm16941_vm0, %v6855_v63  ;;  %v6734_v53 = vpop.f32.mrf.mxu2  ;;  %v6418_v63 = vadd.f32 %v14946_v26, %v6305_v32 }
 0xac7   : > { %v6521_v48 = vpop.f32.mrf.mxu3 }
 0xac8   : > { %v6522_v3 = vadd.f32 %v6521_v48, %v6409_v20  ;;  %v15017_v8 = vpop.f32.mrf.mxu0 }
 0xac9   : > { %v6320_v29 = vadd.f32 %v15017_v8, %v14692_v6 }
 0xaca   : > { %v6820_v18 = vadd.f32 %v6734_v53, %v6522_v3  ;;  %v8373_v3 = vld [vmem:[#allocation3 + $0xf1] sm:$0xff] }
 0xacb   : > { %7202 = vmatmul.msk.f32.gmra.mxu2 %vm16943_vm2, %v8368_v56  ;;  %v5330_v44 = vsel %vm16779_vm1, %v8373_v3, 0.0  ;;  %vm16953_vm1 = vmmov %vm16941_vm0 }
 0xacc   : > { %7170 = vmatmul.msk.f32.gmra.mxu3 %vm16942_vm12, %v8367_v7  ;;  %v6856_v2 = vadd.f32 %v14917_v23, %v6820_v18  ;;  %v8374_v18 = vld [vmem:[%s8585_s14 + $0xc8] sm:$0xff]  ;;  %v6432_v7 = vpop.f32.mrf.mxu1  ;;  %vm16954_vm12 = vmmov %vm16943_vm2 }
 0xacd   : > { %vm16955_vm2 = vmmov %vm16941_vm0 }
 0xace   : > { %6888 = vst.msk [vmem:[%s14928_s29 + $0x28] sm:$0xff] %vm16944_vm3, %v6856_v2  ;;  %v6737_v28 = vpop.f32.mrf.mxu2  ;;  %vm16956_vm3 = vmmov %vm16941_vm0 }
 0xacf   : > { %v6524_v5 = vpop.f32.mrf.mxu3 }
 0xad0   : > { %v6525_v1 = vadd.f32 %v6524_v5, %v6412_v16  ;;  %v15033_v56 = vpop.f32.mrf.mxu0  ;;  %v6311_v16 = vadd.f32 %v14968_v25, %v14648_v40 }
 0xad2   : > { %v6821_v60 = vadd.f32 %v6737_v28, %v6525_v1  ;;  %v8375_v28 = vld [vmem:[#allocation3 + $0xf9] sm:$0xff]  ;;  %v6424_v36 = vadd.f32 %v14982_v14, %v6311_v16  ;;  %v6323_v16 = vadd.f32 %v15033_v56, %v14712_v45 }
 0xad3   : > { %7203 = vmatmul.msk.f32.gmra.mxu2 %vm16946_vm10, %v8370_v27  ;;  %v8376_v1 = vld [vmem:[%s8585_s14 + $0xd0] sm:$0xff]  ;;  %v6314_v27 = vadd.f32 %v14984_v35, %v14661_v52  ;;  %vm16958_vm10 = vmmov %vm16941_vm0 }
 0xad4   : > { %7171 = vmatmul.msk.f32.gmra.mxu3 %vm16945_vm11, %v5328_v9  ;;  %v6857_v4 = vadd.f32 %v14917_v23, %v6821_v60  ;;  %v6435_v60 = vpop.f32.mrf.mxu1  ;;  %vm16957_vm11 = vmmov %vm16949_vm8 }
 0xad6   : > { %6889 = vst.msk [vmem:[%s14928_s29 + $0x30] sm:$0xff] %vm16947_vm6, %v6857_v4  ;;  %v6740_v24 = vpop.f32.mrf.mxu2  ;;  %vm16960_vm6 = vmmov %vm16949_vm8 }
 0xad7   : > { %v6527_v34 = vpop.f32.mrf.mxu3 }
 0xad8   : > { %v6528_v58 = vadd.f32 %v6527_v34, %v6415_v15  ;;  %v15045_v41 = vpop.f32.mrf.mxu0  ;;  %v8377_v15 = vld [vmem:[#allocation3 + $0x101] sm:$0xff] }
 0xad9   : > { %v5332_v34 = vsel %vm16783_vm15, %v8377_v15, 0.0  ;;  %vm16959_vm15 = vmmov %vm16941_vm0 }
 0xada   : > { %v6822_v13 = vadd.f32 %v6740_v24, %v6528_v58  ;;  %v8378_v24 = vld [vmem:[%s8585_s14 + $0xd8] sm:$0xff]  ;;  %v6427_v58 = vadd.f32 %v14998_v10, %v6314_v27  ;;  %v6430_v10 = vadd.f32 %v15013_v54, %v6317_v12 }
 0xadb   : > { %7204 = vmatmul.msk.f32.gmra.mxu2 %vm16949_vm8, %v8372_v39  ;;  %vm16963_vm8 = vmmov %vm16941_vm0 }
 0xadc   : > { %7172 = vmatmul.msk.f32.gmra.mxu3 %vm16948_vm5, %v8371_v55  ;;  %v6858_v19 = vadd.f32 %v14917_v23, %v6822_v13  ;;  %v6438_v35 = vpop.f32.mrf.mxu1  ;;  %vm16961_vm5 = vmmov %vm16941_vm0 }
 0xade   : > { %6890 = vst.msk [vmem:[%s14928_s29 + $0x38] sm:$0xff] %vm16950_vm4, %v6858_v19  ;;  %v6743_v48 = vpop.f32.mrf.mxu2  ;;  %v8379_v19 = vld [vmem:[#allocation3 + $0x109] sm:$0xff]  ;;  %vm16964_vm4 = vmmov %vm16960_vm6 }
 0xadf   : > { %v6530_v20 = vpop.f32.mrf.mxu3 }
 0xae0   : > { %v6531_v30 = vadd.f32 %v6530_v20, %v6418_v63  ;;  %v6328_v13 = vpop.f32.mrf.mxu0  ;;  %v8380_v63 = vld [vmem:[%s8585_s14 + $0xe0] sm:$0xff] }
 0xae2   : > { %v6823_v53 = vadd.f32 %v6743_v48, %v6531_v30 }
 0xae3   : > { %7205 = vmatmul.msk.f32.gmra.mxu2 %vm16952_vm13, %v8374_v18  ;;  %vm16967_vm13 = vmmov %vm16964_vm4 }
 0xae4   : > { %7173 = vmatmul.msk.f32.gmra.mxu3 %vm16951_vm14, %v5330_v44  ;;  %v6859_v26 = vadd.f32 %v14917_v23, %v6823_v53  ;;  %v6441_v53 = vpop.f32.mrf.mxu1  ;;  %v8381_v44 = vld [vmem:[#allocation3 + $0x111] sm:$0xff]  ;;  %vm16965_vm14 = vmmov %vm16941_vm0 }
 0xae6   : > { %6891 = vst.msk [vmem:[%s14928_s29 + $0x40] sm:$0xff] %vm16941_vm0, %v6859_v26  ;;  %v6746_v2 = vpop.f32.mrf.mxu2  ;;  %v5334_v26 = vsel %vm16789_vm9, %v8381_v44, 0.0  ;;  %vm16966_vm9 = vmmov %vm16941_vm0 }
 0xae7   : > { %v6533_v11 = vpop.f32.mrf.mxu3 }
 0xae8   : > { %v6534_v46 = vadd.f32 %v6533_v11, %v6421_v62  ;;  %v6331_v0 = vpop.f32.mrf.mxu0  ;;  %v8382_v62 = vld [vmem:[%s8585_s14 + $0xe8] sm:$0xff]  ;;  %v6433_v11 = vadd.f32 %v6432_v7, %v6320_v29  ;;  %v5304_v7 = vld [vmem:[#allocation3 + $0x121] sm:$0xff] }
 0xae9   : > { %v5336_v56 = vsel %vm16829_vm7, %v5304_v7, 0.0  ;;  %vm16972_vm7 = vmmov %vm16941_vm0 }
 0xaea   : > { %v6824_v5 = vadd.f32 %v6746_v2, %v6534_v46  ;;  %v5303_v46 = vld [vmem:[#allocation3 + $0x119] sm:$0xff] }
 0xaeb   : > { %7206 = vmatmul.msk.f32.gmra.mxu2 %vm16954_vm12, %v8376_v1  ;;  %vm16970_vm12 = vmmov %vm16964_vm4 }
 0xaec   : > { %7174 = vmatmul.msk.f32.gmra.mxu3 %vm16953_vm1, %v8375_v28  ;;  %v6860_v38 = vadd.f32 %v14917_v23, %v6824_v5  ;;  %v8383_v28 = vld [vmem:[%s8585_s14 + $0xf0] sm:$0xff]  ;;  %v6444_v1 = vpop.f32.mrf.mxu1  ;;  %vm16969_vm1 = vmmov %vm16941_vm0 }
 0xaee   : > { %6892 = vst.msk [vmem:[%s14928_s29 + $0x48] sm:$0xff] %vm16955_vm2, %v6860_v38  ;;  %v6749_v40 = vpop.f32.mrf.mxu2  ;;  %vm16971_vm2 = vmmov %vm16941_vm0 }
 0xaef   : > { %v6536_v9 = vpop.f32.mrf.mxu3 }
 0xaf0   : > { %v6537_v25 = vadd.f32 %v6536_v9, %v6424_v36  ;;  %v6334_v38 = vpop.f32.mrf.mxu0  ;;  %v6436_v9 = vadd.f32 %v6435_v60, %v6323_v16 }
 0xaf2   : > { %v6825_v4 = vadd.f32 %v6749_v40, %v6537_v25 }
 0xaf3   : > { %7207 = vmatmul.msk.f32.gmra.mxu2 %vm16957_vm11, %v8378_v24  ;;  %vm16974_vm11 = vmmov %vm16941_vm0 }
 0xaf4   : > { %7175 = vmatmul.msk.f32.gmra.mxu3 %vm16956_vm3, %v5332_v34  ;;  %v6861_v14 = vadd.f32 %v14917_v23, %v6825_v4  ;;  %v6326_v4 = vadd.f32 %v15045_v41, %v14731_v22  ;;  %v8384_v34 = vld [vmem:[%s8585_s14 + $0xf8] sm:$0xff]  ;;  %v6329_v22 = vadd.f32 %v6328_v13, %v14744_v37  ;;  %vm16973_vm3 = vmmov %vm16941_vm0  ;;  %s7218_s14 = sshll.u32 %s8537_s21, 8  ;;  %s6916_s21 = scalar_lea.sflag [#allocation5], %s377_s12 }
 0xaf5   : > { %s6927_s22 = scalar_lea.hbm %s15212_s11, %s7218_s14 }
 0xaf6   : > { %6893 = vst.msk [vmem:[%s14928_s29 + $0x50] sm:$0xff] %vm16958_vm10, %v6861_v14  ;;  %v6752_v52 = vpop.f32.mrf.mxu2  ;;  %v6447_v14 = vpop.f32.mrf.mxu1  ;;  %vm16975_vm10 = vmmov %vm16941_vm0  ;;  %s6930_s13 = sshll.u32 %s6927_s22, 4  ;;  %s6931_s13 = int_to_ptr.hbm [resolvable:$true] %s6930_s13 }
 0xaf7   : > { %v6539_v32 = vpop.f32.mrf.mxu3  ;;  %s8399_s15 = sshra.s32 %s6931_s13, 4  ;;  %s8400_s15 = int_to_ptr.hbm [resolvable:$true] %s8399_s15 }
 0xaf8   : > { %v6540_v55 = vadd.f32 %v6539_v32, %v6427_v58  ;;  %v6337_v60 = vpop.f32.mrf.mxu0  ;;  %v6439_v58 = vadd.f32 %v6438_v35, %v6326_v4  ;;  %v6332_v35 = vadd.f32 %v6331_v0, %v14754_v61  ;;  %s8401_s24 = scalar_lea.hbm %s8400_s15, 256  ;;  %p8406_p0 = scmp.lt.s32.totalorder %s8400_s15, %s15212_s11 }
 0xaf9   : > { %p8402_p11 = scmp.ne.s32.totalorder %s8400_s15, %s8401_s24  ;;  %p8407_p1 = scmp.lt.s32.totalorder %s8405_s16, %s8401_s24 }
 0xafa   : > { %v6826_v39 = vadd.f32 %v6752_v52, %v6540_v55  ;;  %v6445_v37 = vadd.f32 %v6444_v1, %v6332_v35 }
 0xafb   : > { %7208 = vmatmul.msk.f32.gmra.mxu2 %vm16960_vm6, %v8380_v63  ;;  %vm16977_vm6 = vmmov %vm16941_vm0  ;;  %p8403_p12 = pnand %p8402_p11, %p8554_p5  ;;  %p8408_p2 = por %p8407_p1, %p8406_p0 }
 0xafc   : > { %7176 = vmatmul.msk.f32.gmra.mxu3 %vm16959_vm15, %v8379_v19  ;;  %v6862_v20 = vadd.f32 %v14917_v23, %v6826_v39  ;;  %v6442_v39 = vadd.f32 %v6441_v53, %v6329_v22  ;;  %v6335_v53 = vadd.f32 %v6334_v38, %v14762_v59  ;;  %vm16976_vm15 = vmmov %vm16941_vm0 }
 0xafd   : > { %p8404_p13 = pneg %p8403_p12 }
 0xafe   : > { %6894 = vst.msk [vmem:[%s14928_s29 + $0x58] sm:$0xff] %vm16961_vm5, %v6862_v20  ;;  %v6755_v30 = vpop.f32.mrf.mxu2  ;;  %v6450_v20 = vpop.f32.mrf.mxu1  ;;  %v6448_v61 = vadd.f32 %v6447_v14, %v6335_v53  ;;  %vm16979_vm5 = vmmov %vm16941_vm0 }
 0xaff   : > { %v6542_v48 = vpop.f32.mrf.mxu3  ;;  %p8409_p3 = pnand %p8408_p2, %p8404_p13 }
 0xb00   : > { %v6543_v42 = vadd.f32 %v6542_v48, %v6430_v10  ;;  %v6340_v10 = vpop.f32.mrf.mxu0 }
 0xb01   : > { %v6341_v38 = vadd.f32 %v6340_v10, %v14779_v51 }
 0xb02   : > { %v6827_v3 = vadd.f32 %v6755_v30, %v6543_v42 }
 0xb03   : > { %7209 = vmatmul.msk.f32.gmra.mxu2 %vm16964_vm4, %v8382_v62  ;;  %vm16983_vm4 = vmmov %vm16941_vm0 }
 0xb04   : > { %7177 = vmatmul.msk.f32.gmra.mxu3 %vm16963_vm8, %v5334_v26  ;;  %v6863_v54 = vadd.f32 %v14917_v23, %v6827_v3  ;;  %vm16981_vm8 = vmmov %vm16941_vm0 }
 0xb06   : > { %6895 = vst.msk [vmem:[%s14928_s29 + $0x60] sm:$0xff] %vm16965_vm14, %v6863_v54  ;;  %v6758_v6 = vpop.f32.mrf.mxu2  ;;  %v6453_v44 = vpop.f32.mrf.mxu1  ;;  %vm16985_vm14 = vmmov %vm16941_vm0 }
 0xb07   : > { %v6545_v2 = vpop.f32.mrf.mxu3 }
 0xb08   : > { %v6546_v8 = vadd.f32 %v6545_v2, %v6433_v11  ;;  %v6343_v18 = vpop.f32.mrf.mxu0  ;;  %v6338_v2 = vadd.f32 %v6337_v60, %v14771_v57  ;;  %v6454_v57 = vadd.f32 %v6453_v44, %v6341_v38  ;;  %v16986_v38 = vld [vmem:[#allocation81_spill] sm:$0xff] }
 0xb0a   : > { %v6828_v5 = vadd.f32 %v6758_v6, %v6546_v8  ;;  %v6451_v59 = vadd.f32 %v6450_v20, %v6338_v2 }
 0xb0b   : > { %7210 = vmatmul.msk.f32.gmra.mxu2 %vm16967_vm13, %v8383_v28  ;;  %vm16988_vm13 = vmmov %vm16941_vm0 }
 0xb0c   : > { %7178 = vmatmul.msk.f32.gmra.mxu3 %vm16966_vm9, %v5303_v46  ;;  %v6864_v36 = vadd.f32 %v14917_v23, %v6828_v5  ;;  %vm16987_vm9 = vmmov %vm16941_vm0 }
 0xb0e   : > { %6896 = vst.msk [vmem:[%s14928_s29 + $0x68] sm:$0xff] %vm16941_vm0, %v6864_v36  ;;  %v6761_v25 = vpop.f32.mrf.mxu2  ;;  %v6456_v8 = vpop.f32.mrf.mxu1 }
 0xb0f   : > { %v6548_v40 = vpop.f32.mrf.mxu3 }
 0xb10   : > { %v6549_v27 = vadd.f32 %v6548_v40, %v6436_v9  ;;  %v6346_v46 = vpop.f32.mrf.mxu0 }
 0xb12   : > { %v6829_v15 = vadd.f32 %v6761_v25, %v6549_v27 }
 0xb13   : > { %7211 = vmatmul.msk.f32.gmra.mxu2 %vm16970_vm12, %v8384_v34  ;;  %vm16990_vm12 = vmmov %vm16941_vm0 }
 0xb14   : > { %7179 = vmatmul.msk.f32.gmra.mxu3 %vm16969_vm1, %v5336_v56  ;;  %v6865_v24 = vadd.f32 %v14917_v23, %v6829_v15  ;;  %v6344_v56 = vadd.f32 %v6343_v18, %v14791_v33  ;;  %vm16989_vm1 = vmmov %vm16941_vm0 }
 0xb16   : > { %6897 = vst.msk [vmem:[%s14928_s29 + $0x70] sm:$0xff] %vm16971_vm2, %v6865_v24  ;;  %v6764_v52 = vpop.f32.mrf.mxu2  ;;  %v6459_v9 = vpop.f32.mrf.mxu1  ;;  %v6457_v51 = vadd.f32 %v6456_v8, %v6344_v56  ;;  %vm16991_vm2 = vmmov %vm16941_vm0 }
 0xb17   : > { %v6551_v32 = vpop.f32.mrf.mxu3 }
 0xb18   : > { %v6552_v55 = vadd.f32 %v6551_v32, %v6439_v58  ;;  %v6349_v40 = vpop.f32.mrf.mxu0  ;;  %v16978_v32 = vld [vmem:[#allocation96_spill] sm:$0xff] }
 0xb1a   : > { %v6830_v41 = vadd.f32 %v6764_v52, %v6552_v55  ;;  %v6347_v52 = vadd.f32 %v6346_v46, %v16978_v32 }
 0xb1c   : > { %v6866_v12 = vadd.f32 %v14917_v23, %v6830_v41  ;;  %v6460_v33 = vadd.f32 %v6459_v9, %v6347_v52 }
 0xb1e   : > { %6898 = vst.msk [vmem:[%s14928_s29 + $0x78] sm:$0xff] %vm16972_vm7, %v6866_v12  ;;  %v6767_v63 = vpop.f32.mrf.mxu2  ;;  %v6462_v14 = vpop.f32.mrf.mxu1  ;;  %vm16992_vm7 = vmmov %vm16941_vm0 }
 0xb1f   : > { %v6554_v19 = vpop.f32.mrf.mxu3 }
 0xb20   : > { %v6555_v48 = vadd.f32 %v6554_v19, %v6442_v39  ;;  %v6352_v60 = vpop.f32.mrf.mxu0 }
 0xb22   : > { %v6831_v30 = vadd.f32 %v6767_v63, %v6555_v48  ;;  %v16980_v63 = vld [vmem:[#allocation74_spill] sm:$0xff] }
 0xb23   : > { %v6350_v20 = vadd.f32 %v6349_v40, %v16980_v63 }
 0xb24   : > { %v6867_v42 = vadd.f32 %v14917_v23, %v6831_v30 }
 0xb25   : > { %v6463_v30 = vadd.f32 %v6462_v14, %v6350_v20 }
 0xb26   : > { %6899 = vst.msk [vmem:[%s14928_s29 + $0x80] sm:$0xff] %vm16973_vm3, %v6867_v42  ;;  %v6770_v29 = vpop.f32.mrf.mxu2  ;;  %v6465_v19 = vpop.f32.mrf.mxu1 }
 0xb27   : > { %v6557_v13 = vpop.f32.mrf.mxu3 }
 0xb28   : > { %v6558_v3 = vadd.f32 %v6557_v13, %v6445_v37  ;;  %v6355_v10 = vpop.f32.mrf.mxu0 }
 0xb2a   : > { %v6832_v26 = vadd.f32 %v6770_v29, %v6558_v3  ;;  %v16982_v29 = vld [vmem:[#allocation97_spill] sm:$0xff] }
 0xb2b   : > { %v6353_v3 = vadd.f32 %v6352_v60, %v16982_v29 }
 0xb2c   : > { %v6868_v62 = vadd.f32 %v14917_v23, %v6832_v26 }
 0xb2e   : > { %6900 = vst.msk [vmem:[%s14928_s29 + $0x88] sm:$0xff] %vm16974_vm11, %v6868_v62  ;;  %v6773_v54 = vpop.f32.mrf.mxu2  ;;  %v6468_v53 = vpop.f32.mrf.mxu1  ;;  %v6466_v62 = vadd.f32 %v6465_v19, %v6353_v3 }
 0xb2f   : > { %v6560_v0 = vpop.f32.mrf.mxu3 }
 0xb30   : > { %v6561_v11 = vadd.f32 %v6560_v0, %v6448_v61  ;;  %v6358_v18 = vpop.f32.mrf.mxu0 }
 0xb32   : > { %v6833_v6 = vadd.f32 %v6773_v54, %v6561_v11  ;;  %v16984_v11 = vld [vmem:[#allocation17_spill] sm:$0xff] }
 0xb33   : > { %v6356_v2 = vadd.f32 %v6355_v10, %v16984_v11 }
 0xb34   : > { %v6869_v16 = vadd.f32 %v14917_v23, %v6833_v6 }
 0xb36   : > { %6901 = vst.msk [vmem:[%s14928_s29 + $0x90] sm:$0xff] %vm16975_vm10, %v6869_v16  ;;  %v6776_v28 = vpop.f32.mrf.mxu2  ;;  %v6471_v46 = vpop.f32.mrf.mxu1 }
 0xb37   : > { %v6563_v5 = vpop.f32.mrf.mxu3 }
 0xb38   : > { %v6564_v1 = vadd.f32 %v6563_v5, %v6451_v59  ;;  %v6361_v16 = vpop.f32.mrf.mxu0  ;;  %v6469_v59 = vadd.f32 %v6468_v53, %v6356_v2 }
 0xb3a   : > { %v6834_v36 = vadd.f32 %v6776_v28, %v6564_v1 }
 0xb3c   : > { %v6870_v7 = vadd.f32 %v14917_v23, %v6834_v36  ;;  %v6359_v36 = vadd.f32 %v6358_v18, %v16986_v38 }
 0xb3e   : > { %6902 = vst.msk [vmem:[%s14928_s29 + $0x98] sm:$0xff] %vm16976_vm15, %v6870_v7  ;;  %v6779_v27 = vpop.f32.mrf.mxu2  ;;  %v6472_v40 = vadd.f32 %v6471_v46, %v6359_v36  ;;  %v6474_v56 = vpop.f32.mrf.mxu1 }
 0xb3f   : > { %v6566_v25 = vpop.f32.mrf.mxu3 }
 0xb40   : > { %v6567_v45 = vadd.f32 %v6566_v25, %v6454_v57 }
 0xb42   : > { %v6835_v4 = vadd.f32 %v6779_v27, %v6567_v45  ;;  %v6364_v27 = vpop.f32.mrf.mxu0 }
 0xb44   : > { %v6871_v15 = vadd.f32 %v14917_v23, %v6835_v4  ;;  %v6362_v4 = vadd.f32 %v6361_v16, %v14853_v50 }
 0xb46   : > { %6903 = vst.msk [vmem:[%s14928_s29 + $0xa0] sm:$0xff] %vm16977_vm6, %v6871_v15  ;;  %v6782_v24 = vpop.f32.mrf.mxu2 }
 0xb47   : > { %v6569_v34 = vpop.f32.mrf.mxu3 }
 0xb48   : > { %v6570_v58 = vadd.f32 %v6569_v34, %v6457_v51  ;;  %v6475_v34 = vadd.f32 %v6474_v56, %v6362_v4 }
 0xb4a   : > { %v6836_v55 = vadd.f32 %v6782_v24, %v6570_v58  ;;  %v6365_v58 = vadd.f32 %v6364_v27, %v14863_v21  ;;  %v6367_v32 = vpop.f32.mrf.mxu0 }
 0xb4c   : > { %v6872_v22 = vadd.f32 %v14917_v23, %v6836_v55  ;;  %v6477_v55 = vpop.f32.mrf.mxu1 }
 0xb4d   : > { %v6478_v50 = vadd.f32 %v6477_v55, %v6365_v58 }
 0xb4e   : > { %6904 = vst.msk [vmem:[%s14928_s29 + $0xa8] sm:$0xff] %vm16979_vm5, %v6872_v22  ;;  %v6785_v12 = vpop.f32.mrf.mxu2 }
 0xb4f   : > { %v6572_v41 = vpop.f32.mrf.mxu3 }
 0xb50   : > { %v6573_v39 = vadd.f32 %v6572_v41, %v6460_v33 }
 0xb52   : > { %v6837_v48 = vadd.f32 %v6785_v12, %v6573_v39  ;;  %v6368_v39 = vadd.f32 %v6367_v32, %v14874_v47  ;;  %v6370_v63 = vpop.f32.mrf.mxu0 }
 0xb54   : > { %v6873_v35 = vadd.f32 %v14917_v23, %v6837_v48  ;;  %v6480_v10 = vpop.f32.mrf.mxu1 }
 0xb55   : > { %v6481_v21 = vadd.f32 %v6480_v10, %v6368_v39 }
 0xb56   : > { %6905 = vst.msk [vmem:[%s14928_s29 + $0xb0] sm:$0xff] %vm16981_vm8, %v6873_v35  ;;  %v6788_v37 = vpop.f32.mrf.mxu2 }
 0xb57   : > { %v6575_v42 = vpop.f32.mrf.mxu3 }
 0xb58   : > { %v6576_v13 = vadd.f32 %v6575_v42, %v6463_v30  ;;  %v6371_v42 = vadd.f32 %v6370_v63, %v14886_v31 }
 0xb5a   : > { %v6838_v44 = vadd.f32 %v6788_v37, %v6576_v13  ;;  %v6373_v29 = vpop.f32.mrf.mxu0  ;;  %v6484_v47 = vadd.f32 %v14884_v49, %v6371_v42 }
 0xb5b   : > { %v6374_v18 = vadd.f32 %v6373_v29, %v14896_v43 }
 0xb5c   : > { %v6874_v26 = vadd.f32 %v14917_v23, %v6838_v44 }
 0xb5e   : > { %6906 = vst.msk [vmem:[%s14928_s29 + $0xb8] sm:$0xff] %vm16983_vm4, %v6874_v26  ;;  %v6791_v0 = vpop.f32.mrf.mxu2 }
 0xb5f   : > { %v6578_v61 = vpop.f32.mrf.mxu3 }
 0xb60   : > { %v6579_v54 = vadd.f32 %v6578_v61, %v6466_v62  ;;  %v6487_v62 = vadd.f32 %v14898_v17, %v6374_v18 }
 0xb62   : > { %v6839_v6 = vadd.f32 %v6791_v0, %v6579_v54 }
 0xb64   : > { %v6875_v8 = vadd.f32 %v14917_v23, %v6839_v6 }
 0xb66   : > { %6907 = vst.msk [vmem:[%s14928_s29 + $0xc0] sm:$0xff] %vm16985_vm14, %v6875_v8  ;;  %v6794_v28 = vpop.f32.mrf.mxu2 }
 0xb67   : > { %v6581_v5 = vpop.f32.mrf.mxu3 }
 0xb68   : > { %v6582_v1 = vadd.f32 %v6581_v5, %v6469_v59 }
 0xb6a   : > { %v6840_v7 = vadd.f32 %v6794_v28, %v6582_v1 }
 0xb6c   : > { %v6876_v9 = vadd.f32 %v14917_v23, %v6840_v7 }
 0xb6e   : > { %6908 = vst.msk [vmem:[%s14928_s29 + $0xc8] sm:$0xff] %vm16987_vm9, %v6876_v9  ;;  %v6797_v25 = vpop.f32.mrf.mxu2 }
 0xb6f   : > { %v6584_v57 = vpop.f32.mrf.mxu3 }
 0xb70   : > { %v6585_v45 = vadd.f32 %v6584_v57, %v6472_v40 }
 0xb72   : > { %v6841_v15 = vadd.f32 %v6797_v25, %v6585_v45 }
 0xb74   : > { %v6877_v51 = vadd.f32 %v14917_v23, %v6841_v15 }
 0xb76   : > { %6909 = vst.msk [vmem:[%s14928_s29 + $0xd0] sm:$0xff] %vm16988_vm13, %v6877_v51  ;;  %v6800_v14 = vpop.f32.mrf.mxu2 }
 0xb77   : > { %v6587_v24 = vpop.f32.mrf.mxu3 }
 0xb78   : > { %v6588_v60 = vadd.f32 %v6587_v24, %v6475_v34 }
 0xb7a   : > { %v6842_v52 = vadd.f32 %v6800_v14, %v6588_v60 }
 0xb7c   : > { %v6878_v22 = vadd.f32 %v14917_v23, %v6842_v52 }
 0xb7e   : > { %6910 = vst.msk [vmem:[%s14928_s29 + $0xd8] sm:$0xff] %vm16941_vm0, %v6878_v22  ;;  %v6803_v41 = vpop.f32.mrf.mxu2 }
 0xb7f   : > { %v6590_v33 = vpop.f32.mrf.mxu3 }
 0xb80   : > { %v6591_v12 = vadd.f32 %v6590_v33, %v6478_v50 }
 0xb82   : > { %v6843_v19 = vadd.f32 %v6803_v41, %v6591_v12 }
 0xb84   : > { %v6879_v20 = vadd.f32 %v14917_v23, %v6843_v19 }
 0xb86   : > { %6911 = vst.msk [vmem:[%s14928_s29 + $0xe0] sm:$0xff] %vm16989_vm1, %v6879_v20  ;;  %v6806_v35 = vpop.f32.mrf.mxu2 }
 0xb87   : > { %v6593_v48 = vpop.f32.mrf.mxu3 }
 0xb88   : > { %v6594_v30 = vadd.f32 %v6593_v48, %v6481_v21 }
 0xb8a   : > { %v6844_v37 = vadd.f32 %v6806_v35, %v6594_v30 }
 0xb8c   : > { %v6880_v13 = vadd.f32 %v14917_v23, %v6844_v37 }
 0xb8e   : > { %6912 = vst.msk [vmem:[%s14928_s29 + $0xe8] sm:$0xff] %vm16990_vm12, %v6880_v13  ;;  %v6809_v44 = vpop.f32.mrf.mxu2 }
 0xb8f   : > { %v6596_v3 = vpop.f32.mrf.mxu3 }
 0xb90   : > { %v6597_v53 = vadd.f32 %v6596_v3, %v6484_v47 }
 0xb92   : > { %v6845_v26 = vadd.f32 %v6809_v44, %v6597_v53 }
 0xb94   : > { %v6881_v31 = vadd.f32 %v14917_v23, %v6845_v26 }
 0xb96   : > { %6913 = vst.msk [vmem:[%s14928_s29 + $0xf0] sm:$0xff] %vm16991_vm2, %v6881_v31  ;;  %v6812_v61 = vpop.f32.mrf.mxu2 }
 0xb97   : > { %v6599_v49 = vpop.f32.mrf.mxu3 }
 0xb98   : > { %v6600_v0 = vadd.f32 %v6599_v49, %v6487_v62 }
 0xb9a   : > { %v6846_v43 = vadd.f32 %v6812_v61, %v6600_v0 }
 0xb9c   : > { %v6882_v54 = vadd.f32 %v14917_v23, %v6846_v43 }
 0xb9e   : > { %6914 = vst.msk [vmem:[%s14928_s29 + $0xf8] sm:$0xff] %vm16992_vm7, %v6882_v54 }
 0xb9f   : > { %8412 = shalt.err (!%p8409_p3)
}
 0xba0   : > { %s8454_s12 = smov 128   ;;  %s8455_s29 = smov 8  }
 0xba1   : > { %7255 = dma.vmem_to_hbm [thread:$0]  (%p8554_p5), %s6929_s30, 4096, %s6931_s13, %s6916_s21, %s8454_s12, %s8454_s12, %s8455_s29  }
 0xba2 PF: > { %p7261_p4 = scmp.ge.s32.totalorder %s8447_s20, 2  ;;  %s6945_s14 = sand.u32 1, %s8435_s17  }
 0xba3   : > { %s6946_s0 = scalar_lea.sflag [#allocation5], %s6945_s14 }
 0xba4   : > { %p7258_p7 = pnand %p7261_p4, %p8558_p6 }
 0xba6   : > { %p7259_p8 = pneg %p7258_p7 }
 0xba8   : > { %8430 = dma.done.wait (%p7259_p8), %s6946_s0, 4096  }
 0xba9   : > { %8432 = vsyncadd (%p7259_p8), %s6946_s0, 4294963200  ;;  %p21_p9 = scmp.ge.s32.totalorder %s8541_s23, 4   ;;  %s16993_s17 = smov %s8439_s18 }
 0xbaa   : > { %s16994_s18 = smov %s8443_s19  ;;  %s16995_s19 = smov %s8552_s26 }
 0xbab   : > { %s16996_s20 = smov %s8541_s23  ;;  %23 = sbr.rel (!%p21_p9) target bundleno = 5 (0x5), region = 99 }
 0xbb0   :  { %6952 = vsyncpa [#allocation5], 1 }
 0xbb1   :  { %6954 = vsyncpa [#allocation5 + $0x1], 1 }

</bundles_post_ra>
